<compile_context>
chip_gen: v7x
topology: tpu7x:2x2x1
jax: 0.10.0
libtpu: 0.0.40
codegen_flags: <defaults>
</compile_context>

<pallas_src>
import numpy as np
import jax
import jax.numpy as jnp
from jax import lax
from jax.experimental import pallas as pl
from jax.experimental.pallas import tpu as pltpu

HIGH = jax.lax.Precision.HIGHEST
LANE = 128


def _round_up(n, m):
    return ((n + m - 1) // m) * m


def _mxu(a, b):
    """bf16 operands, f32 accumulation -> native MXU rate on v5e/v6e/v7x."""
    return jnp.dot(a.astype(jnp.bfloat16), b.astype(jnp.bfloat16),
                   preferred_element_type=jnp.float32)


def _device_kind():
    try:
        return jax.devices()[0].device_kind.lower()
    except Exception:
        return ""


# ----------------------------------------------------------------------------
# Pallas kernel: GRU message passing (depth steps) + node readout + pooling
# ----------------------------------------------------------------------------
def make_gfe_kernel(depth, hp, wide_gather):
    def kernel(x_ref, fnode_ref, bgraph_ref, agraph_ref, seg_ref, mm_ref, am_ref,
               Wf_ref, bf_ref, Wzh_ref, Ur_ref, Whh_ref, Wo_ref, bo_ref,
               hatom_ref, hmol_ref):
        Ep, nb = bgraph_ref.shape
        Ap = fnode_ref.shape[0]
        Mp = hmol_ref.shape[0]

        x = x_ref[...]                        # (Ep, inp)  bf16 message features
        mm = mm_ref[...]                      # (Ep, 1)    f32 message mask
        Wzh = Wzh_ref[...]                    # (hp, hp)   bf16
        Ur = Ur_ref[...]                      # (hp, hp)   bf16
        Whh = Whh_ref[...]                    # (hp, hp)   bf16

        # ---- fused loop-invariant input projections: [W_z | W_h | W_r] -------
        xW = _mxu(x, Wf_ref[...]) + bf_ref[...]             # (Ep, 3*hp) f32
        xWz = xW[:, 0:hp]
        xWh = xW[:, hp:2 * hp]
        xWr = xW[:, 2 * hp:3 * hp]                          # b_Ur folded in

        # ---- hoisted gather matrix: stacked per-slot one-hots, built once ----
        bg = bgraph_ref[...]                                # (Ep, nb) int32
        onehots = []
        for j in range(nb):
            iota_e = lax.broadcasted_iota(jnp.int32, (Ep, Ep), 1)
            onehots.append((iota_e == bg[:, j:j + 1]).astype(jnp.bfloat16))
        G = jnp.concatenate(onehots, axis=0)                # (nb*Ep, Ep) bf16

        def step(_, h):
            h16 = h.astype(jnp.bfloat16)
            # single U_r projection per step (instead of one per neighbor slot)
            hUr16 = _mxu(h16, Ur).astype(jnp.bfloat16)      # (Ep, hp)
            if wide_gather:
                # 256-wide RHS fills the 256-wide MXU on v6e/v7x
                HH = _mxu(G, jnp.concatenate([h16, hUr16], axis=1))
                Hh, HUr = HH[:, 0:hp], HH[:, hp:2 * hp]
            else:
                # v5e (128-wide MXU): two narrow gathers
                Hh = _mxu(G, h16)
                HUr = _mxu(G, hUr16)
            sum_h = jnp.zeros((Ep, hp), jnp.float32)
            sum_gated = jnp.zeros((Ep, hp), jnp.float32)
            for j in range(nb):
                h_nei_j = Hh[j * Ep:(j + 1) * Ep, :]
                r_j = jax.nn.sigmoid(xWr + HUr[j * Ep:(j + 1) * Ep, :])
                sum_h = sum_h + h_nei_j
                sum_gated = sum_gated + r_j * h_nei_j
            z = jax.nn.sigmoid(xWz + _mxu(sum_h, Wzh))
            pre_h = jnp.tanh(xWh + _mxu(sum_gated, Whh))
            new_h = (1.0 - z) * sum_h + z * pre_h
            # TODO(synk): nn.Dropout between GRU steps is identity (eval mode).
            return new_h * mm

        h = lax.fori_loop(0, depth, step, jnp.zeros((Ep, hp), jnp.float32),
                          unroll=True)
        h16 = h.astype(jnp.bfloat16)

        # ---- MPNEncoder readout: nei_msg = h[agraph].sum(1) (duplicate-aware)
        ag = agraph_ref[...]                                # (Ap, nb)
        counts = jnp.zeros((Ap, Ep), jnp.float32)
        for j in range(nb):
            iota_a = lax.broadcasted_iota(jnp.int32, (Ap, Ep), 1)
            counts = counts + (iota_a == ag[:, j:j + 1]).astype(jnp.float32)
        nei_msg = _mxu(counts, h16)                         # counts <= nb, exact

        # fused W_o readout: [fnode | nei_msg] @ [Won ; Woh] + bo, ReLU, mask
        node_in = jnp.concatenate(
            [fnode_ref[...], nei_msg.astype(jnp.bfloat16)], axis=1)
        node_h = _mxu(node_in, Wo_ref[...]) + bo_ref[...]
        hatom = jnp.maximum(node_h, 0.0) * am_ref[...]
        hatom_ref[...] = hatom

        # ---- atom_pool_type == 'sum': per-molecule segment sum (0/1 matmul) --
        iota_m = lax.broadcasted_iota(jnp.int32, (Mp, Ap), 0)
        P = (iota_m == seg_ref[...]).astype(jnp.bfloat16)   # (Mp, Ap)
        hmol_ref[...] = _mxu(P, hatom)

    return kernel


# ----------------------------------------------------------------------------
# Wrapper: pad to TPU-friendly shapes, ship int32 indices, invoke the kernel
# ----------------------------------------------------------------------------
def graph_feat_encoder_pallas(graph_tensors, atom_scope, params, depth=3):
    fnode, fmess, agraph, bgraph, _ = graph_tensors
    fnode = fnode.astype(jnp.float32)
    n_atoms = fnode.shape[0]
    E, nb = bgraph.shape
    node_fdim = params["Won"].shape[0]
    in_size = params["Wzx"].shape[0]
    h_size = params["Wzh"].shape[0]

    kind = _device_kind()
    is_v5 = "v5" in kind
    is_v7 = "v7" in kind
    wide_gather = not is_v5                      # 256-wide MXU only on v6e/v7x
    vmem_limit = (48 if is_v7 else 100) * 1024 * 1024

    # all lane dims / MXU K,N -> multiples of 128; row-only dims -> multiples of 8
    hp = _round_up(h_size, LANE)
    inp = _round_up(in_size, LANE)
    nfp = _round_up(node_fdim, LANE)
    Ep = _round_up(E, LANE)                      # E is a lane dim (one-hots, counts)
    Ap = _round_up(n_atoms, LANE)                # lane dim of the pooling matrix
    scope_pairs = [se for scope in atom_scope for se in scope]
    n_mols = len(scope_pairs)
    Mp = _round_up(max(n_mols, 1), 8)
    # TODO(synk): in production, bucket (Ep, Ap, Mp) to a fixed size ladder so
    # differently sized batches do not retrace/recompile the kernel.

    # glue: hmess = cat([fnode[fmess[:, 0]], fmess[:, 2:]])  (pure indexing)
    src = fmess[:, 0].astype(jnp.int32)
    hmess = jnp.concatenate([fnode[src], fmess[:, 2:]], axis=-1)

    def pad2(a, rows, cols, dtype):
        out = jnp.zeros((rows, cols), dtype)
        return out.at[:a.shape[0], :a.shape[1]].set(a.astype(dtype))

    x_p = pad2(hmess, Ep, inp, jnp.bfloat16)
    fnode_p = pad2(fnode, Ap, nfp, jnp.bfloat16)
    bgraph_p = pad2(bgraph.astype(jnp.int32), Ep, nb, jnp.int32)
    agraph_p = pad2(agraph.astype(jnp.int32), Ap, nb, jnp.int32)

    # molecule segment ids (-1 = not pooled); masks zero row 0 + padding rows
    seg_np = np.full((1, Ap), -1, np.int32)
    for m, (s, l) in enumerate(scope_pairs):
        seg_np[0, s:s + l] = m
    seg = jnp.asarray(seg_np)

    mm_np = np.ones((Ep, 1), np.float32); mm_np[0, 0] = 0.0; mm_np[E:] = 0.0
    am_np = np.ones((Ap, 1), np.float32); am_np[0, 0] = 0.0; am_np[n_atoms:] = 0.0
    mm = jnp.asarray(mm_np)
    am = jnp.asarray(am_np)

    # weights padded with zeros (padded lanes of h stay exactly 0); matmul
    # operands bf16, biases f32.  Fused weight blocks:
    #   Wfused = [Wzx | Whx | Wr]   (inp, 3*hp),   bfused = [bz | bh | bUr]
    #   Wo     = [Won ; Woh]        (nfp+hp, hp)
    wb = lambda a, r, c: pad2(a, r, c, jnp.bfloat16)
    fb = lambda a: pad2(a, 1, hp, jnp.float32)
    Wfused = jnp.concatenate([wb(params["Wzx"], inp, hp),
                              wb(params["Whx"], inp, hp),
                              wb(params["Wr"], inp, hp)], axis=1)
    bfused = jnp.concatenate([fb(params["bz"]), fb(params["bh"]),
                              fb(params["bUr"])], axis=1)
    Wo = jnp.concatenate([wb(params["Won"], nfp, hp),
                          wb(params["Woh"], hp, hp)], axis=0)
    weights = (Wfused, bfused,
               wb(params["Wzh"], hp, hp), wb(params["Ur"], hp, hp),
               wb(params["Whh"], hp, hp), Wo, fb(params["bo"]))

    inputs = (x_p, fnode_p, bgraph_p, agraph_p, seg, mm, am) + weights
    out_shapes = (jax.ShapeDtypeStruct((Ap, hp), jnp.float32),
                  jax.ShapeDtypeStruct((Mp, hp), jnp.float32))

    hatom_p, hmol_p = pl.pallas_call(
        make_gfe_kernel(depth, hp, wide_gather),
        out_shape=out_shapes,
        in_specs=[pl.BlockSpec(memory_space=pltpu.MemorySpace.VMEM)
                  for _ in inputs],
        out_specs=(pl.BlockSpec(memory_space=pltpu.MemorySpace.VMEM),
                   pl.BlockSpec(memory_space=pltpu.MemorySpace.VMEM)),
        compiler_params=pltpu.CompilerParams(vmem_limit_bytes=vmem_limit),
    )(*inputs)

    hatom = hatom_p[:n_atoms, :h_size]
    hmol_stacked = hmol_p[:n_mols, :h_size]
    hmol, i = [], 0
    for scope in atom_scope:
        hmol.append(hmol_stacked[i:i + len(scope)])
        i += len(scope)
    return hatom, hmol


# ----------------------------------------------------------------------------
# Pure-JAX reference (mirrors the PyTorch module, eval mode, f32/HIGHEST)
# ----------------------------------------------------------------------------
def graph_feat_encoder_ref(graph_tensors, atom_scope, params, depth=3):
    fnode, fmess, agraph, bgraph, _ = graph_tensors
    fnode = fnode.astype(jnp.float32)
    src = fmess[:, 0].astype(jnp.int32)
    x = jnp.concatenate([fnode[src], fmess[:, 2:]], axis=-1).astype(jnp.float32)
    E = x.shape[0]
    h_size = params["Wzh"].shape[0]
    dot = lambda a, b: jnp.dot(a, b, precision=HIGH)

    h = jnp.zeros((E, h_size), jnp.float32)
    mm = jnp.ones((E, 1), jnp.float32).at[0, 0].set(0.0)
    for _ in range(depth):
        h_nei = h[bgraph]                                   # (E, nb, h)
        sum_h = h_nei.sum(1)
        z = jax.nn.sigmoid(dot(x, params["Wzx"]) + dot(sum_h, params["Wzh"])
                           + params["bz"])
        r1 = dot(x, params["Wr"])[:, None, :]
        r2 = (dot(h_nei.reshape(-1, h_size), params["Ur"])
              + params["bUr"]).reshape(E, -1, h_size)
        r = jax.nn.sigmoid(r1 + r2)
        sum_g = (r * h_nei).sum(1)
        pre_h = jnp.tanh(dot(x, params["Whx"]) + dot(sum_g, params["Whh"])
                         + params["bh"])
        h = ((1.0 - z) * sum_h + z * pre_h) * mm

    nei_msg = h[agraph].sum(1)
    n_atoms = fnode.shape[0]
    am = jnp.ones((n_atoms, 1), jnp.float32).at[0, 0].set(0.0)
    hatom = jax.nn.relu(dot(fnode, params["Won"]) + dot(nei_msg, params["Woh"])
                        + params["bo"]) * am
    hmol = [jnp.stack([hatom[s:s + l].sum(0) for s, l in scope])
            for scope in atom_scope]
    return hatom, hmol


# ----------------------------------------------------------------------------
# Deterministic parameter init (shapes from GRU / MPNEncoder __init__)
# ----------------------------------------------------------------------------
def init_params(key, n_atom_feat, n_bond_feat, h_size):
    in_size = n_atom_feat + n_bond_feat
    ks = jax.random.split(key, 12)

    def lin(k, fan_in, shape):
        b = 1.0 / np.sqrt(fan_in)
        return jax.random.uniform(k, shape, jnp.float32, -b, b)

    return {
        # W_z : Linear(in+h, h)  (split into x / h parts, stored as (fan_in, h))
        "Wzx": lin(ks[0], in_size + h_size, (in_size, h_size)),
        "Wzh": lin(ks[1], in_size + h_size, (h_size, h_size)),
        "bz":  lin(ks[2], in_size + h_size, (1, h_size)),
        # W_r : Linear(in, h, bias=False)
        "Wr":  lin(ks[3], in_size, (in_size, h_size)),
        # U_r : Linear(h, h)
        "Ur":  lin(ks[4], h_size, (h_size, h_size)),
        "bUr": lin(ks[5], h_size, (1, h_size)),
        # W_h : Linear(in+h, h)
        "Whx": lin(ks[6], in_size + h_size, (in_size, h_size)),
        "Whh": lin(ks[7], in_size + h_size, (h_size, h_size)),
        "bh":  lin(ks[8], in_size + h_size, (1, h_size)),
        # W_o : Linear(node_fdim + h, h) + ReLU
        "Won": lin(ks[9], n_atom_feat + h_size, (n_atom_feat, h_size)),
        "Woh": lin(ks[10], n_atom_feat + h_size, (h_size, h_size)),
        "bo":  lin(ks[11], n_atom_feat + h_size, (1, h_size)),
    }


if __name__ == "__main__":
    key = jax.random.PRNGKey(0)
    n_atom_feat, n_bond_feat, h_size, depth = 16, 8, 32, 3
    n_atoms, E, max_nb = 16, 24, 4

    k1, k2, k3, k4, k5, kp = jax.random.split(key, 6)
    fnode = jax.random.normal(k1, (n_atoms, n_atom_feat), jnp.float32).at[0].set(0.0)
    src = jax.random.randint(k2, (E,), 1, n_atoms)
    dst = jax.random.randint(k3, (E,), 1, n_atoms)
    bond_feat = jax.random.normal(k4, (E, n_bond_feat), jnp.float32)
    fmess = jnp.concatenate(
        [src[:, None].astype(jnp.float32), dst[:, None].astype(jnp.float32), bond_feat],
        axis=1).at[0].set(0.0)
    kb, ka = jax.random.split(k5)
    bgraph = jax.random.randint(kb, (E, max_nb), 0, E).at[0].set(0)
    agraph = jax.random.randint(ka, (n_atoms, max_nb), 0, E).at[0].set(0)
    atom_scope = [[(1, 5), (6, 5)], [(11, 5)]]   # 2 "reactions", 3 molecules total

    graph_tensors = (fnode, fmess, agraph, bgraph, None)
    params = init_params(kp, n_atom_feat, n_bond_feat, h_size)

    hatom, hmol = graph_feat_encoder_pallas(graph_tensors, atom_scope, params, depth)
    hatom = jax.block_until_ready(hatom)
    hmol = [jax.block_until_ready(m) for m in hmol]

    hatom_ref, hmol_ref = graph_feat_encoder_ref(graph_tensors, atom_scope, params, depth)
    assert hatom.shape == (n_atoms, h_size)
    assert bool(jnp.all(jnp.isfinite(hatom)))
    # bf16 MXU operands with f32 accumulation (plus the pre-gathered h@Ur
    # rounding) vs. f32/HIGHEST reference.
    assert jnp.allclose(hatom, hatom_ref, atol=3e-2, rtol=3e-2)
    for m, mr in zip(hmol, hmol_ref):
        assert m.shape == mr.shape
        assert jnp.allclose(m, mr, atol=3e-2, rtol=3e-2)

    print("KERNEL_OK")
</pallas_src>

<mosaic_0001>
module attributes {stable_mosaic.version = 11 : i64} {
  func.func @kernel(%arg0: memref<128x128xbf16, #tpu.memory_space<vmem>>, %arg1: memref<128x128xbf16, #tpu.memory_space<vmem>>, %arg2: memref<128x4xi32, #tpu.memory_space<vmem>>, %arg3: memref<128x4xi32, #tpu.memory_space<vmem>>, %arg4: memref<1x128xi32, #tpu.memory_space<vmem>>, %arg5: memref<128x1xf32, #tpu.memory_space<vmem>>, %arg6: memref<128x1xf32, #tpu.memory_space<vmem>>, %arg7: memref<128x384xbf16, #tpu.memory_space<vmem>>, %arg8: memref<1x384xf32, #tpu.memory_space<vmem>>, %arg9: memref<128x128xbf16, #tpu.memory_space<vmem>>, %arg10: memref<128x128xbf16, #tpu.memory_space<vmem>>, %arg11: memref<128x128xbf16, #tpu.memory_space<vmem>>, %arg12: memref<256x128xbf16, #tpu.memory_space<vmem>>, %arg13: memref<1x128xf32, #tpu.memory_space<vmem>>, %arg14: memref<128x128xf32, #tpu.memory_space<vmem>>, %arg15: memref<8x128xf32, #tpu.memory_space<vmem>>) attributes {dimension_semantics = [], scalar_prefetch = 0 : i64, scratch_operands = 0 : i64, tpu.core_type = #tpu.core_type<tc>} {
    %c0 = arith.constant 0 : index
    %c0_0 = arith.constant 0 : index
    %0 = vector.load %arg0[%c0, %c0_0] : memref<128x128xbf16, #tpu.memory_space<vmem>>, vector<128x128xbf16>
    %c0_1 = arith.constant 0 : index
    %c0_2 = arith.constant 0 : index
    %1 = vector.load %arg5[%c0_1, %c0_2] : memref<128x1xf32, #tpu.memory_space<vmem>>, vector<128x1xf32>
    %c0_3 = arith.constant 0 : index
    %c0_4 = arith.constant 0 : index
    %2 = vector.load %arg9[%c0_3, %c0_4] : memref<128x128xbf16, #tpu.memory_space<vmem>>, vector<128x128xbf16>
    %c0_5 = arith.constant 0 : index
    %c0_6 = arith.constant 0 : index
    %3 = vector.load %arg10[%c0_5, %c0_6] : memref<128x128xbf16, #tpu.memory_space<vmem>>, vector<128x128xbf16>
    %c0_7 = arith.constant 0 : index
    %c0_8 = arith.constant 0 : index
    %4 = vector.load %arg11[%c0_7, %c0_8] : memref<128x128xbf16, #tpu.memory_space<vmem>>, vector<128x128xbf16>
    %c0_9 = arith.constant 0 : index
    %c0_10 = arith.constant 0 : index
    %5 = vector.load %arg7[%c0_9, %c0_10] : memref<128x384xbf16, #tpu.memory_space<vmem>>, vector<128x384xbf16>
    %cst = arith.constant dense<0.000000e+00> : vector<128x384xf32>
    %6 = tpu.matmul %0, %5, %cst {dimension_numbers = #tpu.dot_dimension_numbers<[1], [0], [0], [1], [0, 0, 1, 1], [], []>} : vector<128x128xbf16>, vector<128x384xbf16>, vector<128x384xf32> -> vector<128x384xf32>
    %c0_11 = arith.constant 0 : index
    %c0_12 = arith.constant 0 : index
    %7 = vector.load %arg8[%c0_11, %c0_12] : memref<1x384xf32, #tpu.memory_space<vmem>>, vector<1x384xf32>
    %8 = vector.broadcast %7 : vector<1x384xf32> to vector<128x384xf32>
    %9 = arith.addf %6, %8 : vector<128x384xf32>
    %10 = vector.extract_strided_slice %9 {offsets = [0, 0], sizes = [128, 128], strides = [1, 1]} : vector<128x384xf32> to vector<128x128xf32>
    %11 = vector.extract_strided_slice %9 {offsets = [0, 128], sizes = [128, 128], strides = [1, 1]} : vector<128x384xf32> to vector<128x128xf32>
    %12 = vector.extract_strided_slice %9 {offsets = [0, 256], sizes = [128, 128], strides = [1, 1]} : vector<128x384xf32> to vector<128x128xf32>
    %c0_13 = arith.constant 0 : index
    %c0_14 = arith.constant 0 : index
    %13 = vector.load %arg2[%c0_13, %c0_14] : memref<128x4xi32, #tpu.memory_space<vmem>>, vector<128x4xi32>
    %14 = tpu.iota {dimensions = array<i32: 1>} : vector<128x128xi32>
    %15 = vector.extract_strided_slice %13 {offsets = [0, 0], sizes = [128, 1], strides = [1, 1]} : vector<128x4xi32> to vector<128x1xi32>
    %16 = vector.broadcast %15 : vector<128x1xi32> to vector<128x128xi32>
    %17 = arith.cmpi eq, %14, %16 : vector<128x128xi32>
    %18 = arith.extui %17 : vector<128x128xi1> to vector<128x128xi32>
    %19 = arith.sitofp %18 : vector<128x128xi32> to vector<128x128xf32>
    %20 = arith.truncf %19 : vector<128x128xf32> to vector<128x128xbf16>
    %21 = tpu.iota {dimensions = array<i32: 1>} : vector<128x128xi32>
    %22 = vector.extract_strided_slice %13 {offsets = [0, 1], sizes = [128, 1], strides = [1, 1]} : vector<128x4xi32> to vector<128x1xi32>
    %23 = vector.broadcast %22 : vector<128x1xi32> to vector<128x128xi32>
    %24 = arith.cmpi eq, %21, %23 : vector<128x128xi32>
    %25 = arith.extui %24 : vector<128x128xi1> to vector<128x128xi32>
    %26 = arith.sitofp %25 : vector<128x128xi32> to vector<128x128xf32>
    %27 = arith.truncf %26 : vector<128x128xf32> to vector<128x128xbf16>
    %28 = tpu.iota {dimensions = array<i32: 1>} : vector<128x128xi32>
    %29 = vector.extract_strided_slice %13 {offsets = [0, 2], sizes = [128, 1], strides = [1, 1]} : vector<128x4xi32> to vector<128x1xi32>
    %30 = vector.broadcast %29 : vector<128x1xi32> to vector<128x128xi32>
    %31 = arith.cmpi eq, %28, %30 : vector<128x128xi32>
    %32 = arith.extui %31 : vector<128x128xi1> to vector<128x128xi32>
    %33 = arith.sitofp %32 : vector<128x128xi32> to vector<128x128xf32>
    %34 = arith.truncf %33 : vector<128x128xf32> to vector<128x128xbf16>
    %35 = tpu.iota {dimensions = array<i32: 1>} : vector<128x128xi32>
    %36 = vector.extract_strided_slice %13 {offsets = [0, 3], sizes = [128, 1], strides = [1, 1]} : vector<128x4xi32> to vector<128x1xi32>
    %37 = vector.broadcast %36 : vector<128x1xi32> to vector<128x128xi32>
    %38 = arith.cmpi eq, %35, %37 : vector<128x128xi32>
    %39 = arith.extui %38 : vector<128x128xi1> to vector<128x128xi32>
    %40 = arith.sitofp %39 : vector<128x128xi32> to vector<128x128xf32>
    %41 = arith.truncf %40 : vector<128x128xf32> to vector<128x128xbf16>
    %42 = tpu.concatenate %20, %27, %34, %41 in 0 : vector<128x128xbf16>, vector<128x128xbf16>, vector<128x128xbf16>, vector<128x128xbf16> -> vector<512x128xbf16>
    %cst_15 = arith.constant 0.000000e+00 : f32
    %43 = vector.broadcast %cst_15 : f32 to vector<128x128xf32>
    %c0_i32 = arith.constant 0 : i32
    %44 = arith.truncf %43 : vector<128x128xf32> to vector<128x128xbf16>
    %cst_16 = arith.constant dense<0.000000e+00> : vector<128x128xf32>
    %45 = tpu.matmul %44, %3, %cst_16 {dimension_numbers = #tpu.dot_dimension_numbers<[1], [0], [0], [1], [0, 0, 1, 1], [], []>} : vector<128x128xbf16>, vector<128x128xbf16>, vector<128x128xf32> -> vector<128x128xf32>
    %46 = arith.truncf %45 : vector<128x128xf32> to vector<128x128xbf16>
    %47 = tpu.concatenate %44, %46 in 1 : vector<128x128xbf16>, vector<128x128xbf16> -> vector<128x256xbf16>
    %cst_17 = arith.constant dense<0.000000e+00> : vector<512x256xf32>
    %48 = tpu.matmul %42, %47, %cst_17 {dimension_numbers = #tpu.dot_dimension_numbers<[1], [0], [0], [1], [0, 0, 1, 1], [], []>} : vector<512x128xbf16>, vector<128x256xbf16>, vector<512x256xf32> -> vector<512x256xf32>
    %49 = vector.extract_strided_slice %48 {offsets = [0, 0], sizes = [512, 128], strides = [1, 1]} : vector<512x256xf32> to vector<512x128xf32>
    %50 = vector.extract_strided_slice %48 {offsets = [0, 128], sizes = [512, 128], strides = [1, 1]} : vector<512x256xf32> to vector<512x128xf32>
    %cst_18 = arith.constant 0.000000e+00 : f32
    %51 = vector.broadcast %cst_18 : f32 to vector<128x128xf32>
    %cst_19 = arith.constant 0.000000e+00 : f32
    %52 = vector.broadcast %cst_19 : f32 to vector<128x128xf32>
    %53 = vector.extract_strided_slice %49 {offsets = [0, 0], sizes = [128, 128], strides = [1, 1]} : vector<512x128xf32> to vector<128x128xf32>
    %54 = vector.extract_strided_slice %50 {offsets = [0, 0], sizes = [128, 128], strides = [1, 1]} : vector<512x128xf32> to vector<128x128xf32>
    %55 = arith.addf %12, %54 : vector<128x128xf32>
    %56 = arith.negf %55 : vector<128x128xf32>
    %57 = math.exp %56 : vector<128x128xf32>
    %cst_20 = arith.constant 1.000000e+00 : f32
    %58 = vector.broadcast %cst_20 : f32 to vector<128x128xf32>
    %59 = arith.addf %58, %57 : vector<128x128xf32>
    %60 = arith.divf %58, %59 : vector<128x128xf32>
    %61 = arith.addf %51, %53 : vector<128x128xf32>
    %62 = arith.mulf %60, %53 : vector<128x128xf32>
    %63 = arith.addf %52, %62 : vector<128x128xf32>
    %64 = vector.extract_strided_slice %49 {offsets = [128, 0], sizes = [128, 128], strides = [1, 1]} : vector<512x128xf32> to vector<128x128xf32>
    %65 = vector.extract_strided_slice %50 {offsets = [128, 0], sizes = [128, 128], strides = [1, 1]} : vector<512x128xf32> to vector<128x128xf32>
    %66 = arith.addf %12, %65 : vector<128x128xf32>
    %67 = arith.negf %66 : vector<128x128xf32>
    %68 = math.exp %67 : vector<128x128xf32>
    %cst_21 = arith.constant 1.000000e+00 : f32
    %69 = vector.broadcast %cst_21 : f32 to vector<128x128xf32>
    %70 = arith.addf %69, %68 : vector<128x128xf32>
    %71 = arith.divf %69, %70 : vector<128x128xf32>
    %72 = arith.addf %61, %64 : vector<128x128xf32>
    %73 = arith.mulf %71, %64 : vector<128x128xf32>
    %74 = arith.addf %63, %73 : vector<128x128xf32>
    %75 = vector.extract_strided_slice %49 {offsets = [256, 0], sizes = [128, 128], strides = [1, 1]} : vector<512x128xf32> to vector<128x128xf32>
    %76 = vector.extract_strided_slice %50 {offsets = [256, 0], sizes = [128, 128], strides = [1, 1]} : vector<512x128xf32> to vector<128x128xf32>
    %77 = arith.addf %12, %76 : vector<128x128xf32>
    %78 = arith.negf %77 : vector<128x128xf32>
    %79 = math.exp %78 : vector<128x128xf32>
    %cst_22 = arith.constant 1.000000e+00 : f32
    %80 = vector.broadcast %cst_22 : f32 to vector<128x128xf32>
    %81 = arith.addf %80, %79 : vector<128x128xf32>
    %82 = arith.divf %80, %81 : vector<128x128xf32>
    %83 = arith.addf %72, %75 : vector<128x128xf32>
    %84 = arith.mulf %82, %75 : vector<128x128xf32>
    %85 = arith.addf %74, %84 : vector<128x128xf32>
    %86 = vector.extract_strided_slice %49 {offsets = [384, 0], sizes = [128, 128], strides = [1, 1]} : vector<512x128xf32> to vector<128x128xf32>
    %87 = vector.extract_strided_slice %50 {offsets = [384, 0], sizes = [128, 128], strides = [1, 1]} : vector<512x128xf32> to vector<128x128xf32>
    %88 = arith.addf %12, %87 : vector<128x128xf32>
    %89 = arith.negf %88 : vector<128x128xf32>
    %90 = math.exp %89 : vector<128x128xf32>
    %cst_23 = arith.constant 1.000000e+00 : f32
    %91 = vector.broadcast %cst_23 : f32 to vector<128x128xf32>
    %92 = arith.addf %91, %90 : vector<128x128xf32>
    %93 = arith.divf %91, %92 : vector<128x128xf32>
    %94 = arith.addf %83, %86 : vector<128x128xf32>
    %95 = arith.mulf %93, %86 : vector<128x128xf32>
    %96 = arith.addf %85, %95 : vector<128x128xf32>
    %97 = arith.truncf %94 : vector<128x128xf32> to vector<128x128xbf16>
    %cst_24 = arith.constant dense<0.000000e+00> : vector<128x128xf32>
    %98 = tpu.matmul %97, %2, %cst_24 {dimension_numbers = #tpu.dot_dimension_numbers<[1], [0], [0], [1], [0, 0, 1, 1], [], []>} : vector<128x128xbf16>, vector<128x128xbf16>, vector<128x128xf32> -> vector<128x128xf32>
    %99 = arith.addf %10, %98 : vector<128x128xf32>
    %100 = arith.negf %99 : vector<128x128xf32>
    %101 = math.exp %100 : vector<128x128xf32>
    %cst_25 = arith.constant 1.000000e+00 : f32
    %102 = vector.broadcast %cst_25 : f32 to vector<128x128xf32>
    %103 = arith.addf %102, %101 : vector<128x128xf32>
    %104 = arith.divf %102, %103 : vector<128x128xf32>
    %105 = arith.truncf %96 : vector<128x128xf32> to vector<128x128xbf16>
    %cst_26 = arith.constant dense<0.000000e+00> : vector<128x128xf32>
    %106 = tpu.matmul %105, %4, %cst_26 {dimension_numbers = #tpu.dot_dimension_numbers<[1], [0], [0], [1], [0, 0, 1, 1], [], []>} : vector<128x128xbf16>, vector<128x128xbf16>, vector<128x128xf32> -> vector<128x128xf32>
    %107 = arith.addf %11, %106 : vector<128x128xf32>
    %108 = math.tanh %107 : vector<128x128xf32>
    %cst_27 = arith.constant 1.000000e+00 : f32
    %109 = vector.broadcast %cst_27 : f32 to vector<128x128xf32>
    %110 = arith.subf %109, %104 : vector<128x128xf32>
    %111 = arith.mulf %110, %94 : vector<128x128xf32>
    %112 = arith.mulf %104, %108 : vector<128x128xf32>
    %113 = arith.addf %111, %112 : vector<128x128xf32>
    %114 = vector.broadcast %1 : vector<128x1xf32> to vector<128x128xf32>
    %115 = arith.mulf %113, %114 : vector<128x128xf32>
    %c1_i32 = arith.constant 1 : i32
    %116 = arith.truncf %115 : vector<128x128xf32> to vector<128x128xbf16>
    %cst_28 = arith.constant dense<0.000000e+00> : vector<128x128xf32>
    %117 = tpu.matmul %116, %3, %cst_28 {dimension_numbers = #tpu.dot_dimension_numbers<[1], [0], [0], [1], [0, 0, 1, 1], [], []>} : vector<128x128xbf16>, vector<128x128xbf16>, vector<128x128xf32> -> vector<128x128xf32>
    %118 = arith.truncf %117 : vector<128x128xf32> to vector<128x128xbf16>
    %119 = tpu.concatenate %116, %118 in 1 : vector<128x128xbf16>, vector<128x128xbf16> -> vector<128x256xbf16>
    %cst_29 = arith.constant dense<0.000000e+00> : vector<512x256xf32>
    %120 = tpu.matmul %42, %119, %cst_29 {dimension_numbers = #tpu.dot_dimension_numbers<[1], [0], [0], [1], [0, 0, 1, 1], [], []>} : vector<512x128xbf16>, vector<128x256xbf16>, vector<512x256xf32> -> vector<512x256xf32>
    %121 = vector.extract_strided_slice %120 {offsets = [0, 0], sizes = [512, 128], strides = [1, 1]} : vector<512x256xf32> to vector<512x128xf32>
    %122 = vector.extract_strided_slice %120 {offsets = [0, 128], sizes = [512, 128], strides = [1, 1]} : vector<512x256xf32> to vector<512x128xf32>
    %cst_30 = arith.constant 0.000000e+00 : f32
    %123 = vector.broadcast %cst_30 : f32 to vector<128x128xf32>
    %cst_31 = arith.constant 0.000000e+00 : f32
    %124 = vector.broadcast %cst_31 : f32 to vector<128x128xf32>
    %125 = vector.extract_strided_slice %121 {offsets = [0, 0], sizes = [128, 128], strides = [1, 1]} : vector<512x128xf32> to vector<128x128xf32>
    %126 = vector.extract_strided_slice %122 {offsets = [0, 0], sizes = [128, 128], strides = [1, 1]} : vector<512x128xf32> to vector<128x128xf32>
    %127 = arith.addf %12, %126 : vector<128x128xf32>
    %128 = arith.negf %127 : vector<128x128xf32>
    %129 = math.exp %128 : vector<128x128xf32>
    %cst_32 = arith.constant 1.000000e+00 : f32
    %130 = vector.broadcast %cst_32 : f32 to vector<128x128xf32>
    %131 = arith.addf %130, %129 : vector<128x128xf32>
    %132 = arith.divf %130, %131 : vector<128x128xf32>
    %133 = arith.addf %123, %125 : vector<128x128xf32>
    %134 = arith.mulf %132, %125 : vector<128x128xf32>
    %135 = arith.addf %124, %134 : vector<128x128xf32>
    %136 = vector.extract_strided_slice %121 {offsets = [128, 0], sizes = [128, 128], strides = [1, 1]} : vector<512x128xf32> to vector<128x128xf32>
    %137 = vector.extract_strided_slice %122 {offsets = [128, 0], sizes = [128, 128], strides = [1, 1]} : vector<512x128xf32> to vector<128x128xf32>
    %138 = arith.addf %12, %137 : vector<128x128xf32>
    %139 = arith.negf %138 : vector<128x128xf32>
    %140 = math.exp %139 : vector<128x128xf32>
    %cst_33 = arith.constant 1.000000e+00 : f32
    %141 = vector.broadcast %cst_33 : f32 to vector<128x128xf32>
    %142 = arith.addf %141, %140 : vector<128x128xf32>
    %143 = arith.divf %141, %142 : vector<128x128xf32>
    %144 = arith.addf %133, %136 : vector<128x128xf32>
    %145 = arith.mulf %143, %136 : vector<128x128xf32>
    %146 = arith.addf %135, %145 : vector<128x128xf32>
    %147 = vector.extract_strided_slice %121 {offsets = [256, 0], sizes = [128, 128], strides = [1, 1]} : vector<512x128xf32> to vector<128x128xf32>
    %148 = vector.extract_strided_slice %122 {offsets = [256, 0], sizes = [128, 128], strides = [1, 1]} : vector<512x128xf32> to vector<128x128xf32>
    %149 = arith.addf %12, %148 : vector<128x128xf32>
    %150 = arith.negf %149 : vector<128x128xf32>
    %151 = math.exp %150 : vector<128x128xf32>
    %cst_34 = arith.constant 1.000000e+00 : f32
    %152 = vector.broadcast %cst_34 : f32 to vector<128x128xf32>
    %153 = arith.addf %152, %151 : vector<128x128xf32>
    %154 = arith.divf %152, %153 : vector<128x128xf32>
    %155 = arith.addf %144, %147 : vector<128x128xf32>
    %156 = arith.mulf %154, %147 : vector<128x128xf32>
    %157 = arith.addf %146, %156 : vector<128x128xf32>
    %158 = vector.extract_strided_slice %121 {offsets = [384, 0], sizes = [128, 128], strides = [1, 1]} : vector<512x128xf32> to vector<128x128xf32>
    %159 = vector.extract_strided_slice %122 {offsets = [384, 0], sizes = [128, 128], strides = [1, 1]} : vector<512x128xf32> to vector<128x128xf32>
    %160 = arith.addf %12, %159 : vector<128x128xf32>
    %161 = arith.negf %160 : vector<128x128xf32>
    %162 = math.exp %161 : vector<128x128xf32>
    %cst_35 = arith.constant 1.000000e+00 : f32
    %163 = vector.broadcast %cst_35 : f32 to vector<128x128xf32>
    %164 = arith.addf %163, %162 : vector<128x128xf32>
    %165 = arith.divf %163, %164 : vector<128x128xf32>
    %166 = arith.addf %155, %158 : vector<128x128xf32>
    %167 = arith.mulf %165, %158 : vector<128x128xf32>
    %168 = arith.addf %157, %167 : vector<128x128xf32>
    %169 = arith.truncf %166 : vector<128x128xf32> to vector<128x128xbf16>
    %cst_36 = arith.constant dense<0.000000e+00> : vector<128x128xf32>
    %170 = tpu.matmul %169, %2, %cst_36 {dimension_numbers = #tpu.dot_dimension_numbers<[1], [0], [0], [1], [0, 0, 1, 1], [], []>} : vector<128x128xbf16>, vector<128x128xbf16>, vector<128x128xf32> -> vector<128x128xf32>
    %171 = arith.addf %10, %170 : vector<128x128xf32>
    %172 = arith.negf %171 : vector<128x128xf32>
    %173 = math.exp %172 : vector<128x128xf32>
    %cst_37 = arith.constant 1.000000e+00 : f32
    %174 = vector.broadcast %cst_37 : f32 to vector<128x128xf32>
    %175 = arith.addf %174, %173 : vector<128x128xf32>
    %176 = arith.divf %174, %175 : vector<128x128xf32>
    %177 = arith.truncf %168 : vector<128x128xf32> to vector<128x128xbf16>
    %cst_38 = arith.constant dense<0.000000e+00> : vector<128x128xf32>
    %178 = tpu.matmul %177, %4, %cst_38 {dimension_numbers = #tpu.dot_dimension_numbers<[1], [0], [0], [1], [0, 0, 1, 1], [], []>} : vector<128x128xbf16>, vector<128x128xbf16>, vector<128x128xf32> -> vector<128x128xf32>
    %179 = arith.addf %11, %178 : vector<128x128xf32>
    %180 = math.tanh %179 : vector<128x128xf32>
    %cst_39 = arith.constant 1.000000e+00 : f32
    %181 = vector.broadcast %cst_39 : f32 to vector<128x128xf32>
    %182 = arith.subf %181, %176 : vector<128x128xf32>
    %183 = arith.mulf %182, %166 : vector<128x128xf32>
    %184 = arith.mulf %176, %180 : vector<128x128xf32>
    %185 = arith.addf %183, %184 : vector<128x128xf32>
    %186 = vector.broadcast %1 : vector<128x1xf32> to vector<128x128xf32>
    %187 = arith.mulf %185, %186 : vector<128x128xf32>
    %c2_i32 = arith.constant 2 : i32
    %188 = arith.truncf %187 : vector<128x128xf32> to vector<128x128xbf16>
    %cst_40 = arith.constant dense<0.000000e+00> : vector<128x128xf32>
    %189 = tpu.matmul %188, %3, %cst_40 {dimension_numbers = #tpu.dot_dimension_numbers<[1], [0], [0], [1], [0, 0, 1, 1], [], []>} : vector<128x128xbf16>, vector<128x128xbf16>, vector<128x128xf32> -> vector<128x128xf32>
    %190 = arith.truncf %189 : vector<128x128xf32> to vector<128x128xbf16>
    %191 = tpu.concatenate %188, %190 in 1 : vector<128x128xbf16>, vector<128x128xbf16> -> vector<128x256xbf16>
    %cst_41 = arith.constant dense<0.000000e+00> : vector<512x256xf32>
    %192 = tpu.matmul %42, %191, %cst_41 {dimension_numbers = #tpu.dot_dimension_numbers<[1], [0], [0], [1], [0, 0, 1, 1], [], []>} : vector<512x128xbf16>, vector<128x256xbf16>, vector<512x256xf32> -> vector<512x256xf32>
    %193 = vector.extract_strided_slice %192 {offsets = [0, 0], sizes = [512, 128], strides = [1, 1]} : vector<512x256xf32> to vector<512x128xf32>
    %194 = vector.extract_strided_slice %192 {offsets = [0, 128], sizes = [512, 128], strides = [1, 1]} : vector<512x256xf32> to vector<512x128xf32>
    %cst_42 = arith.constant 0.000000e+00 : f32
    %195 = vector.broadcast %cst_42 : f32 to vector<128x128xf32>
    %cst_43 = arith.constant 0.000000e+00 : f32
    %196 = vector.broadcast %cst_43 : f32 to vector<128x128xf32>
    %197 = vector.extract_strided_slice %193 {offsets = [0, 0], sizes = [128, 128], strides = [1, 1]} : vector<512x128xf32> to vector<128x128xf32>
    %198 = vector.extract_strided_slice %194 {offsets = [0, 0], sizes = [128, 128], strides = [1, 1]} : vector<512x128xf32> to vector<128x128xf32>
    %199 = arith.addf %12, %198 : vector<128x128xf32>
    %200 = arith.negf %199 : vector<128x128xf32>
    %201 = math.exp %200 : vector<128x128xf32>
    %cst_44 = arith.constant 1.000000e+00 : f32
    %202 = vector.broadcast %cst_44 : f32 to vector<128x128xf32>
    %203 = arith.addf %202, %201 : vector<128x128xf32>
    %204 = arith.divf %202, %203 : vector<128x128xf32>
    %205 = arith.addf %195, %197 : vector<128x128xf32>
    %206 = arith.mulf %204, %197 : vector<128x128xf32>
    %207 = arith.addf %196, %206 : vector<128x128xf32>
    %208 = vector.extract_strided_slice %193 {offsets = [128, 0], sizes = [128, 128], strides = [1, 1]} : vector<512x128xf32> to vector<128x128xf32>
    %209 = vector.extract_strided_slice %194 {offsets = [128, 0], sizes = [128, 128], strides = [1, 1]} : vector<512x128xf32> to vector<128x128xf32>
    %210 = arith.addf %12, %209 : vector<128x128xf32>
    %211 = arith.negf %210 : vector<128x128xf32>
    %212 = math.exp %211 : vector<128x128xf32>
    %cst_45 = arith.constant 1.000000e+00 : f32
    %213 = vector.broadcast %cst_45 : f32 to vector<128x128xf32>
    %214 = arith.addf %213, %212 : vector<128x128xf32>
    %215 = arith.divf %213, %214 : vector<128x128xf32>
    %216 = arith.addf %205, %208 : vector<128x128xf32>
    %217 = arith.mulf %215, %208 : vector<128x128xf32>
    %218 = arith.addf %207, %217 : vector<128x128xf32>
    %219 = vector.extract_strided_slice %193 {offsets = [256, 0], sizes = [128, 128], strides = [1, 1]} : vector<512x128xf32> to vector<128x128xf32>
    %220 = vector.extract_strided_slice %194 {offsets = [256, 0], sizes = [128, 128], strides = [1, 1]} : vector<512x128xf32> to vector<128x128xf32>
    %221 = arith.addf %12, %220 : vector<128x128xf32>
    %222 = arith.negf %221 : vector<128x128xf32>
    %223 = math.exp %222 : vector<128x128xf32>
    %cst_46 = arith.constant 1.000000e+00 : f32
    %224 = vector.broadcast %cst_46 : f32 to vector<128x128xf32>
    %225 = arith.addf %224, %223 : vector<128x128xf32>
    %226 = arith.divf %224, %225 : vector<128x128xf32>
    %227 = arith.addf %216, %219 : vector<128x128xf32>
    %228 = arith.mulf %226, %219 : vector<128x128xf32>
    %229 = arith.addf %218, %228 : vector<128x128xf32>
    %230 = vector.extract_strided_slice %193 {offsets = [384, 0], sizes = [128, 128], strides = [1, 1]} : vector<512x128xf32> to vector<128x128xf32>
    %231 = vector.extract_strided_slice %194 {offsets = [384, 0], sizes = [128, 128], strides = [1, 1]} : vector<512x128xf32> to vector<128x128xf32>
    %232 = arith.addf %12, %231 : vector<128x128xf32>
    %233 = arith.negf %232 : vector<128x128xf32>
    %234 = math.exp %233 : vector<128x128xf32>
    %cst_47 = arith.constant 1.000000e+00 : f32
    %235 = vector.broadcast %cst_47 : f32 to vector<128x128xf32>
    %236 = arith.addf %235, %234 : vector<128x128xf32>
    %237 = arith.divf %235, %236 : vector<128x128xf32>
    %238 = arith.addf %227, %230 : vector<128x128xf32>
    %239 = arith.mulf %237, %230 : vector<128x128xf32>
    %240 = arith.addf %229, %239 : vector<128x128xf32>
    %241 = arith.truncf %238 : vector<128x128xf32> to vector<128x128xbf16>
    %cst_48 = arith.constant dense<0.000000e+00> : vector<128x128xf32>
    %242 = tpu.matmul %241, %2, %cst_48 {dimension_numbers = #tpu.dot_dimension_numbers<[1], [0], [0], [1], [0, 0, 1, 1], [], []>} : vector<128x128xbf16>, vector<128x128xbf16>, vector<128x128xf32> -> vector<128x128xf32>
    %243 = arith.addf %10, %242 : vector<128x128xf32>
    %244 = arith.negf %243 : vector<128x128xf32>
    %245 = math.exp %244 : vector<128x128xf32>
    %cst_49 = arith.constant 1.000000e+00 : f32
    %246 = vector.broadcast %cst_49 : f32 to vector<128x128xf32>
    %247 = arith.addf %246, %245 : vector<128x128xf32>
    %248 = arith.divf %246, %247 : vector<128x128xf32>
    %249 = arith.truncf %240 : vector<128x128xf32> to vector<128x128xbf16>
    %cst_50 = arith.constant dense<0.000000e+00> : vector<128x128xf32>
    %250 = tpu.matmul %249, %4, %cst_50 {dimension_numbers = #tpu.dot_dimension_numbers<[1], [0], [0], [1], [0, 0, 1, 1], [], []>} : vector<128x128xbf16>, vector<128x128xbf16>, vector<128x128xf32> -> vector<128x128xf32>
    %251 = arith.addf %11, %250 : vector<128x128xf32>
    %252 = math.tanh %251 : vector<128x128xf32>
    %cst_51 = arith.constant 1.000000e+00 : f32
    %253 = vector.broadcast %cst_51 : f32 to vector<128x128xf32>
    %254 = arith.subf %253, %248 : vector<128x128xf32>
    %255 = arith.mulf %254, %238 : vector<128x128xf32>
    %256 = arith.mulf %248, %252 : vector<128x128xf32>
    %257 = arith.addf %255, %256 : vector<128x128xf32>
    %258 = vector.broadcast %1 : vector<128x1xf32> to vector<128x128xf32>
    %259 = arith.mulf %257, %258 : vector<128x128xf32>
    %260 = arith.truncf %259 : vector<128x128xf32> to vector<128x128xbf16>
    %c0_52 = arith.constant 0 : index
    %c0_53 = arith.constant 0 : index
    %261 = vector.load %arg3[%c0_52, %c0_53] : memref<128x4xi32, #tpu.memory_space<vmem>>, vector<128x4xi32>
    %cst_54 = arith.constant 0.000000e+00 : f32
    %262 = vector.broadcast %cst_54 : f32 to vector<128x128xf32>
    %263 = tpu.iota {dimensions = array<i32: 1>} : vector<128x128xi32>
    %264 = vector.extract_strided_slice %261 {offsets = [0, 0], sizes = [128, 1], strides = [1, 1]} : vector<128x4xi32> to vector<128x1xi32>
    %265 = vector.broadcast %264 : vector<128x1xi32> to vector<128x128xi32>
    %266 = arith.cmpi eq, %263, %265 : vector<128x128xi32>
    %267 = arith.extui %266 : vector<128x128xi1> to vector<128x128xi32>
    %268 = arith.sitofp %267 : vector<128x128xi32> to vector<128x128xf32>
    %269 = arith.addf %262, %268 : vector<128x128xf32>
    %270 = tpu.iota {dimensions = array<i32: 1>} : vector<128x128xi32>
    %271 = vector.extract_strided_slice %261 {offsets = [0, 1], sizes = [128, 1], strides = [1, 1]} : vector<128x4xi32> to vector<128x1xi32>
    %272 = vector.broadcast %271 : vector<128x1xi32> to vector<128x128xi32>
    %273 = arith.cmpi eq, %270, %272 : vector<128x128xi32>
    %274 = arith.extui %273 : vector<128x128xi1> to vector<128x128xi32>
    %275 = arith.sitofp %274 : vector<128x128xi32> to vector<128x128xf32>
    %276 = arith.addf %269, %275 : vector<128x128xf32>
    %277 = tpu.iota {dimensions = array<i32: 1>} : vector<128x128xi32>
    %278 = vector.extract_strided_slice %261 {offsets = [0, 2], sizes = [128, 1], strides = [1, 1]} : vector<128x4xi32> to vector<128x1xi32>
    %279 = vector.broadcast %278 : vector<128x1xi32> to vector<128x128xi32>
    %280 = arith.cmpi eq, %277, %279 : vector<128x128xi32>
    %281 = arith.extui %280 : vector<128x128xi1> to vector<128x128xi32>
    %282 = arith.sitofp %281 : vector<128x128xi32> to vector<128x128xf32>
    %283 = arith.addf %276, %282 : vector<128x128xf32>
    %284 = tpu.iota {dimensions = array<i32: 1>} : vector<128x128xi32>
    %285 = vector.extract_strided_slice %261 {offsets = [0, 3], sizes = [128, 1], strides = [1, 1]} : vector<128x4xi32> to vector<128x1xi32>
    %286 = vector.broadcast %285 : vector<128x1xi32> to vector<128x128xi32>
    %287 = arith.cmpi eq, %284, %286 : vector<128x128xi32>
    %288 = arith.extui %287 : vector<128x128xi1> to vector<128x128xi32>
    %289 = arith.sitofp %288 : vector<128x128xi32> to vector<128x128xf32>
    %290 = arith.addf %283, %289 : vector<128x128xf32>
    %291 = arith.truncf %290 : vector<128x128xf32> to vector<128x128xbf16>
    %cst_55 = arith.constant dense<0.000000e+00> : vector<128x128xf32>
    %292 = tpu.matmul %291, %260, %cst_55 {dimension_numbers = #tpu.dot_dimension_numbers<[1], [0], [0], [1], [0, 0, 1, 1], [], []>} : vector<128x128xbf16>, vector<128x128xbf16>, vector<128x128xf32> -> vector<128x128xf32>
    %c0_56 = arith.constant 0 : index
    %c0_57 = arith.constant 0 : index
    %293 = vector.load %arg1[%c0_56, %c0_57] : memref<128x128xbf16, #tpu.memory_space<vmem>>, vector<128x128xbf16>
    %294 = arith.truncf %292 : vector<128x128xf32> to vector<128x128xbf16>
    %295 = tpu.concatenate %293, %294 in 1 : vector<128x128xbf16>, vector<128x128xbf16> -> vector<128x256xbf16>
    %c0_58 = arith.constant 0 : index
    %c0_59 = arith.constant 0 : index
    %296 = vector.load %arg12[%c0_58, %c0_59] : memref<256x128xbf16, #tpu.memory_space<vmem>>, vector<256x128xbf16>
    %cst_60 = arith.constant dense<0.000000e+00> : vector<128x128xf32>
    %297 = tpu.matmul %295, %296, %cst_60 {dimension_numbers = #tpu.dot_dimension_numbers<[1], [0], [0], [1], [0, 0, 1, 1], [], []>} : vector<128x256xbf16>, vector<256x128xbf16>, vector<128x128xf32> -> vector<128x128xf32>
    %c0_61 = arith.constant 0 : index
    %c0_62 = arith.constant 0 : index
    %298 = vector.load %arg13[%c0_61, %c0_62] : memref<1x128xf32, #tpu.memory_space<vmem>>, vector<1x128xf32>
    %299 = vector.broadcast %298 : vector<1x128xf32> to vector<128x128xf32>
    %300 = arith.addf %297, %299 : vector<128x128xf32>
    %cst_63 = arith.constant 0.000000e+00 : f32
    %301 = vector.broadcast %cst_63 : f32 to vector<128x128xf32>
    %302 = arith.maximumf %300, %301 : vector<128x128xf32>
    %c0_64 = arith.constant 0 : index
    %c0_65 = arith.constant 0 : index
    %303 = vector.load %arg6[%c0_64, %c0_65] : memref<128x1xf32, #tpu.memory_space<vmem>>, vector<128x1xf32>
    %304 = vector.broadcast %303 : vector<128x1xf32> to vector<128x128xf32>
    %305 = arith.mulf %302, %304 : vector<128x128xf32>
    %c0_66 = arith.constant 0 : index
    %c0_67 = arith.constant 0 : index
    %306 = vector.load %arg14[%c0_66, %c0_67] : memref<128x128xf32, #tpu.memory_space<vmem>>, vector<128x128xf32>
    tpu.vector_store %arg14[%c0_66, %c0_67], %305 {strides = array<i32>} : memref<128x128xf32, #tpu.memory_space<vmem>>, vector<128x128xf32>,
    %307 = tpu.iota {dimensions = array<i32: 0>} : vector<8x128xi32>
    %c0_68 = arith.constant 0 : index
    %c0_69 = arith.constant 0 : index
    %308 = vector.load %arg4[%c0_68, %c0_69] : memref<1x128xi32, #tpu.memory_space<vmem>>, vector<1x128xi32>
    %309 = vector.broadcast %308 : vector<1x128xi32> to vector<8x128xi32>
    %310 = arith.cmpi eq, %307, %309 : vector<8x128xi32>
    %311 = arith.extui %310 : vector<8x128xi1> to vector<8x128xi32>
    %312 = arith.sitofp %311 : vector<8x128xi32> to vector<8x128xf32>
    %313 = arith.truncf %312 : vector<8x128xf32> to vector<8x128xbf16>
    %314 = arith.truncf %305 : vector<128x128xf32> to vector<128x128xbf16>
    %cst_70 = arith.constant dense<0.000000e+00> : vector<8x128xf32>
    %315 = tpu.matmul %313, %314, %cst_70 {dimension_numbers = #tpu.dot_dimension_numbers<[1], [0], [0], [1], [0, 0, 1, 1], [], []>} : vector<8x128xbf16>, vector<128x128xbf16>, vector<8x128xf32> -> vector<8x128xf32>
    %c0_71 = arith.constant 0 : index
    %c0_72 = arith.constant 0 : index
    %316 = vector.load %arg15[%c0_71, %c0_72] : memref<8x128xf32, #tpu.memory_space<vmem>>, vector<8x128xf32>
    tpu.vector_store %arg15[%c0_71, %c0_72], %315 {strides = array<i32>} : memref<8x128xf32, #tpu.memory_space<vmem>>, vector<8x128xf32>,
    return
  }
}

</mosaic_0001>

<bundles_post_ra>
// kernel: tpu_custom_call.1
= control target key start
LH: loop header
LB: loop body
LE: loop exit
PB: predicated region body
PF: predicated region fallthrough
CT: control target
= control target key end

     0   :  { %s14381_s0 = inlined_call_operand.hbm [shape: bf16[128,128], index: 0, kind: input, shape index: {}]   ;;  %s14382_s1 = inlined_call_operand.hbm [shape: bf16[128,128], index: 1, kind: input, shape index: {}]   ;;  %s14383_s2 = inlined_call_operand.hbm [shape: s32[128,4], index: 2, kind: input, shape index: {}]   ;;  %s14384_s3 = inlined_call_operand.hbm [shape: s32[128,4], index: 3, kind: input, shape index: {}]   ;;  %s14385_s4 = inlined_call_operand.hbm [shape: s32[1,128], index: 4, kind: input, shape index: {}]   ;;  %s14386_s5 = inlined_call_operand.hbm [shape: f32[128,1], index: 5, kind: input, shape index: {}]   ;;  %s14387_s6 = inlined_call_operand.hbm [shape: f32[128,1], index: 6, kind: input, shape index: {}]   ;;  %s14388_s7 = inlined_call_operand.hbm [shape: bf16[128,384], index: 7, kind: input, shape index: {}]   ;;  %s14389_s8 = inlined_call_operand.hbm [shape: f32[1,384], index: 8, kind: input, shape index: {}]   ;;  %s14390_s9 = inlined_call_operand.hbm [shape: bf16[128,128], index: 9, kind: input, shape index: {}]   ;;  %s14391_s10 = inlined_call_operand.hbm [shape: bf16[128,128], index: 10, kind: input, shape index: {}]   ;;  %s14392_s11 = inlined_call_operand.hbm [shape: bf16[128,128], index: 11, kind: input, shape index: {}]   ;;  %s14393_s12 = inlined_call_operand.hbm [shape: bf16[256,128], index: 12, kind: input, shape index: {}]   ;;  %s14394_s13 = inlined_call_operand.hbm [shape: f32[1,128], index: 13, kind: input, shape index: {}]   ;;  %s14395_s14 = inlined_call_operand.hbm [shape: f32[128,128], index: 14, kind: output, shape index: {0}]   ;;  %s14396_s15 = inlined_call_operand.hbm [shape: f32[8,128], index: 15, kind: output, shape index: {1}]  }
   0x1   :  { %14693 = sst [smem:[#allocation149_spill]] %s14396_s15 }
   0x2   :  { %21 = vsyncpa [#allocation3], 0 }
   0x3   :  { %22 = vsyncpa [#allocation6], 0 }
   0x4   :  { %23 = vsyncpa [#allocation9], 0 }
   0x5   :  { %24 = vsyncpa [#allocation12], 0 }
   0x6   :  { %25 = vsyncpa [#allocation15], 0 }
   0x7   :  { %26 = vsyncpa [#allocation18], 0 }
   0x8   :  { %27 = vsyncpa [#allocation21], 0 }
   0x9   :  { %28 = vsyncpa [#allocation24], 0 }
   0xa   :  { %29 = vsyncpa [#allocation4], 0 }
   0xb   :  { %30 = vsyncpa [#allocation27], 0  ;;  %s10061_s18 = smov [#allocation5]   ;;  %s9689_s22 = scalar_lea.hbm %s14382_s1, 1024 }
   0xc   :  { %s48_s19 = sshll.u32 %s10061_s18, 4  ;;  %p9690_p0 = scmp.ne.s32.totalorder %s14382_s1, %s9689_s22  ;;  %s49_s19 = int_to_ptr.vmem [resolvable:$true] %s48_s19 }
   0xd   :  { %p9693_p1 = scmp.lt.u32.totalorder %s9689_s22, %s14382_s1 }
   0xf   :  { %p9695_p2 = pnand %p9693_p1, %p9690_p0 }
  0x11   :  { %9698 = shalt.err (!%p9695_p2)
}
  0x12   :  { %s9699_s27 = scalar_lea.vmem %s49_s19, 1024  ;;  %p9704_p4 = scmp.lt.s32.totalorder %s49_s19, %s49_s19 }
  0x13   :  { %p9700_p3 = scmp.ne.s32.totalorder %s49_s19, %s9699_s27  ;;  %p9705_p5 = scmp.lt.s32.totalorder %s9699_s27, %s9699_s27 }
  0x15   :  { %p9706_p6 = por %p9705_p5, %p9704_p4 }
  0x17   :  { %p9707_p7 = pnand %p9706_p6, %p9700_p3 }
  0x19   :  { %9710 = shalt.err (!%p9707_p7)
}
  0x1a   :  { %s10062_s28 = smov 64   ;;  %s10063_s29 = smov 4  }
  0x1b   :  { %54 = dma.hbm_to_vmem [thread:$0]  %s14382_s1, 1024, %s49_s19, [#allocation6], %s10062_s28, %s10062_s28, %s10063_s29  }
  0x1c   :  { %s10064_s17 = smov [#allocation8]   ;;  %s10065_s20 = smov [#allocation11]  }
  0x1d   :  { %s72_s18 = sshll.u32 %s10064_s17, 4  ;;  %s94_s21 = sshll.u32 %s10065_s20, 4  ;;  %s73_s18 = int_to_ptr.vmem [resolvable:$true] %s72_s18  ;;  %s95_s21 = int_to_ptr.vmem [resolvable:$true] %s94_s21 }
  0x1e   :  { %s9711_s24 = scalar_lea.hbm %s14384_s3, 2048 }
  0x1f   :  { %p9712_p8 = scmp.ne.s32.totalorder %s14384_s3, %s9711_s24  ;;  %p9715_p9 = scmp.lt.u32.totalorder %s9711_s24, %s14384_s3 }
  0x21   :  { %p9717_p10 = pnand %p9715_p9, %p9712_p8 }
  0x23   :  { %9720 = shalt.err (!%p9717_p10)
}
  0x24   :  { %s9721_s1 = scalar_lea.vmem %s73_s18, 2048  ;;  %p9726_p12 = scmp.lt.s32.totalorder %s73_s18, %s73_s18 }
  0x25   :  { %p9722_p11 = scmp.ne.s32.totalorder %s73_s18, %s9721_s1  ;;  %p9727_p13 = scmp.lt.s32.totalorder %s9721_s1, %s9721_s1 }
  0x27   :  { %p9728_p0 = por %p9727_p13, %p9726_p12 }
  0x29   :  { %p9729_p1 = pnand %p9728_p0, %p9722_p11 }
  0x2b   :  { %9732 = shalt.err (!%p9729_p1)
}
  0x2c   :  { %s14398_s19 = smov 128   ;;  %s10067_s30 = smov 8  }
  0x2d   :  { %78 = dma.hbm_to_vmem [thread:$0]  %s14384_s3, 2048, %s73_s18, [#allocation9], %s14398_s19, %s14398_s19, %s10067_s30  }
  0x2e   :  { %s9733_s22 = scalar_lea.hbm %s14386_s5, 2048 }
  0x2f   :  { %p9734_p2 = scmp.ne.s32.totalorder %s14386_s5, %s9733_s22  ;;  %p9737_p3 = scmp.lt.u32.totalorder %s9733_s22, %s14386_s5 }
  0x31   :  { %p9739_p4 = pnand %p9737_p3, %p9734_p2 }
  0x33   :  { %9742 = shalt.err (!%p9739_p4)
}
  0x34   :  { %s9743_s27 = scalar_lea.vmem %s95_s21, 2048  ;;  %p9748_p6 = scmp.lt.s32.totalorder %s95_s21, %s95_s21 }
  0x35   :  { %p9744_p5 = scmp.ne.s32.totalorder %s95_s21, %s9743_s27  ;;  %p9749_p7 = scmp.lt.s32.totalorder %s9743_s27, %s9743_s27 }
  0x37   :  { %p9750_p8 = por %p9749_p7, %p9748_p6 }
  0x39   :  { %p9751_p9 = pnand %p9750_p8, %p9744_p5 }
  0x3b   :  { %9754 = shalt.err (!%p9751_p9)
}
  0x3c   :  { %100 = dma.hbm_to_vmem [thread:$0]  %s14386_s5, 2048, %s95_s21, [#allocation12], %s14398_s19, %s14398_s19, %s10067_s30  }
  0x3d   :  { %s10068_s1 = smov [#allocation14]   ;;  %s9755_s20 = scalar_lea.hbm %s14388_s7, 3072 }
  0x3e   :  { %s118_s16 = sshll.u32 %s10068_s1, 4  ;;  %p9756_p10 = scmp.ne.s32.totalorder %s14388_s7, %s9755_s20  ;;  %s119_s16 = int_to_ptr.vmem [resolvable:$true] %s118_s16 }
  0x3f   :  { %p9759_p11 = scmp.lt.u32.totalorder %s9755_s20, %s14388_s7 }
  0x41   :  { %p9761_p12 = pnand %p9759_p11, %p9756_p10 }
  0x43   :  { %9764 = shalt.err (!%p9761_p12)
}
  0x44   :  { %s9765_s26 = scalar_lea.vmem %s119_s16, 3072  ;;  %p9770_p0 = scmp.lt.s32.totalorder %s119_s16, %s119_s16 }
  0x45   :  { %p9766_p13 = scmp.ne.s32.totalorder %s119_s16, %s9765_s26  ;;  %p9771_p1 = scmp.lt.s32.totalorder %s9765_s26, %s9765_s26 }
  0x47   :  { %p9772_p2 = por %p9771_p1, %p9770_p0 }
  0x49   :  { %p9773_p3 = pnand %p9772_p2, %p9766_p13 }
  0x4b   :  { %9776 = shalt.err (!%p9773_p3)
}
  0x4c   :  { %s10069_s5 = smov 192   ;;  %s10070_s21 = smov 12  }
  0x4d   :  { %124 = dma.hbm_to_vmem [thread:$0]  %s14388_s7, 3072, %s119_s16, [#allocation15], %s10069_s5, %s10069_s5, %s10070_s21  }
  0x4e   :  { %s10071_s18 = smov [#allocation17]   ;;  %s10072_s17 = smov [#allocation20]  }
  0x4f   :  { %s140_s1 = sshll.u32 %s10071_s18, 4  ;;  %s164_s15 = sshll.u32 %s10072_s17, 4  ;;  %s141_s1 = int_to_ptr.vmem [resolvable:$true] %s140_s1  ;;  %s10227_s15 = int_to_ptr.vmem [resolvable:$true] %s164_s15 }
  0x50   :  { %s9777_s23 = scalar_lea.hbm %s14390_s9, 1024 }
  0x51   :  { %p9778_p4 = scmp.ne.s32.totalorder %s14390_s9, %s9777_s23  ;;  %p9781_p5 = scmp.lt.u32.totalorder %s9777_s23, %s14390_s9 }
  0x53   :  { %p9783_p6 = pnand %p9781_p5, %p9778_p4 }
  0x55   :  { %9786 = shalt.err (!%p9783_p6)
}
  0x56   :  { %s9787_s7 = scalar_lea.vmem %s141_s1, 1024  ;;  %p9792_p8 = scmp.lt.s32.totalorder %s141_s1, %s141_s1 }
  0x57   :  { %p9788_p7 = scmp.ne.s32.totalorder %s141_s1, %s9787_s7  ;;  %p9793_p9 = scmp.lt.s32.totalorder %s9787_s7, %s9787_s7 }
  0x59   :  { %p9794_p10 = por %p9793_p9, %p9792_p8 }
  0x5b   :  { %p9795_p11 = pnand %p9794_p10, %p9788_p7 }
  0x5d   :  { %9798 = shalt.err (!%p9795_p11)
}
  0x5e   :  { %146 = dma.hbm_to_vmem [thread:$0]  %s14390_s9, 1024, %s141_s1, [#allocation18], %s10062_s28, %s10062_s28, %s10063_s29  }
  0x5f   :  { %s9799_s19 = scalar_lea.hbm %s14392_s11, 1024 }
  0x60   :  { %p9800_p12 = scmp.ne.s32.totalorder %s14392_s11, %s9799_s19  ;;  %p9803_p13 = scmp.lt.u32.totalorder %s9799_s19, %s14392_s11 }
  0x62   :  { %p9805_p0 = pnand %p9803_p13, %p9800_p12 }
  0x64   :  { %9808 = shalt.err (!%p9805_p0)
}
  0x65   :  { %s9809_s22 = scalar_lea.vmem %s10227_s15, 1024  ;;  %p9814_p2 = scmp.lt.s32.totalorder %s10227_s15, %s10227_s15 }
  0x66   :  { %p9810_p1 = scmp.ne.s32.totalorder %s10227_s15, %s9809_s22  ;;  %p9815_p3 = scmp.lt.s32.totalorder %s9809_s22, %s9809_s22 }
  0x68   :  { %p9816_p4 = por %p9815_p3, %p9814_p2 }
  0x6a   :  { %p9817_p5 = pnand %p9816_p4, %p9810_p1 }
  0x6c   :  { %9820 = shalt.err (!%p9817_p5)
}
  0x6d   :  { %170 = dma.hbm_to_vmem [thread:$0]  %s14392_s11, 1024, %s10227_s15, [#allocation21], %s10062_s28, %s10062_s28, %s10063_s29  }
  0x6e   :  { %s10073_s23 = smov [#allocation2]   ;;  %s10074_s25 = smov [#allocation7]  }
  0x6f   :  { %s36_s24 = sshll.u32 %s10073_s23, 4  ;;  %s60_s26 = sshll.u32 %s10074_s25, 4  ;;  %s37_s24 = int_to_ptr.vmem [resolvable:$true] %s36_s24  ;;  %s10264_s26 = int_to_ptr.vmem [resolvable:$true] %s60_s26 }
  0x70   :  { %s9821_s5 = scalar_lea.hbm %s14381_s0, 1024 }
  0x71   :  { %p9822_p6 = scmp.ne.s32.totalorder %s14381_s0, %s9821_s5  ;;  %p9825_p7 = scmp.lt.u32.totalorder %s9821_s5, %s14381_s0 }
  0x73   :  { %p9827_p8 = pnand %p9825_p7, %p9822_p6 }
  0x75   :  { %9830 = shalt.err (!%p9827_p8)
}
  0x76   :  { %s9831_s11 = scalar_lea.vmem %s37_s24, 1024  ;;  %p9836_p10 = scmp.lt.s32.totalorder %s37_s24, %s37_s24 }
  0x77   :  { %p9832_p9 = scmp.ne.s32.totalorder %s37_s24, %s9831_s11  ;;  %p9837_p11 = scmp.lt.s32.totalorder %s9831_s11, %s9831_s11 }
  0x79   :  { %p9838_p12 = por %p9837_p11, %p9836_p10 }
  0x7b   :  { %p9839_p13 = pnand %p9838_p12, %p9832_p9 }
  0x7d   :  { %9842 = shalt.err (!%p9839_p13)
}
  0x7e   :  { %42 = dma.hbm_to_vmem [thread:$0]  %s14381_s0, 1024, %s37_s24, [#allocation3], %s10062_s28, %s10062_s28, %s10063_s29  }
  0x7f   :  { %s9843_s22 = scalar_lea.hbm %s14383_s2, 2048 }
  0x80   :  { %p9844_p0 = scmp.ne.s32.totalorder %s14383_s2, %s9843_s22  ;;  %p9847_p1 = scmp.lt.u32.totalorder %s9843_s22, %s14383_s2 }
  0x82   :  { %p9849_p2 = pnand %p9847_p1, %p9844_p0 }
  0x84   :  { %9852 = shalt.err (!%p9849_p2)
}
  0x85   :  { %s9853_s7 = scalar_lea.vmem %s10264_s26, 2048  ;;  %p9858_p4 = scmp.lt.s32.totalorder %s10264_s26, %s10264_s26 }
  0x86   :  { %p9854_p3 = scmp.ne.s32.totalorder %s10264_s26, %s9853_s7  ;;  %p9859_p5 = scmp.lt.s32.totalorder %s9853_s7, %s9853_s7 }
  0x88   :  { %p9860_p6 = por %p9859_p5, %p9858_p4 }
  0x8a   :  { %p9861_p7 = pnand %p9860_p6, %p9854_p3 }
  0x8c   :  { %9864 = shalt.err (!%p9861_p7)
}
  0x8d   :  { %s14694_s0 = smov 128   ;;  %s10075_s5 = smov [#allocation10]  }
  0x8e   :  { %66 = dma.hbm_to_vmem [thread:$0]  %s14383_s2, 2048, %s10264_s26, [#allocation6], %s14694_s0, %s14694_s0, %s10067_s30  }
  0x8f   :  { %s85_s21 = sshll.u32 %s10075_s5, 4  ;;  %s10076_s27 = smov [#allocation13]   ;;  %s86_s21 = int_to_ptr.vmem [resolvable:$true] %s85_s21 }
  0x90   :  { %s106_s19 = sshll.u32 %s10076_s27, 4  ;;  %s9865_s15 = scalar_lea.hbm %s14385_s4, 16  ;;  %s10301_s19 = int_to_ptr.vmem [resolvable:$true] %s106_s19 }
  0x91   :  { %p9866_p8 = scmp.ne.s32.totalorder %s14385_s4, %s9865_s15  ;;  %p9869_p9 = scmp.lt.u32.totalorder %s9865_s15, %s14385_s4 }
  0x93   :  { %p9871_p10 = pnand %p9869_p9, %p9866_p8 }
  0x95   :  { %9874 = shalt.err (!%p9871_p10)
}
  0x96   :  { %s9875_s2 = scalar_lea.vmem %s86_s21, 16  ;;  %s9879_s26 = scalar_lea.vmem %s86_s21, 32 }
  0x97   :  { %p9876_p11 = scmp.ne.s32.totalorder %s86_s21, %s9875_s2  ;;  %p9880_p12 = scmp.lt.s32.totalorder %s86_s21, %s86_s21 }
  0x98   :  { %p9881_p13 = scmp.lt.s32.totalorder %s9879_s26, %s9875_s2 }
  0x9a   :  { %p9882_p0 = por %p9881_p13, %p9880_p12 }
  0x9c   :  { %p9883_p1 = pnand %p9882_p0, %p9876_p11 }
  0x9e   :  { %9886 = shalt.err (!%p9883_p1)
}
  0x9f   :  { %88 = dma.hbm_to_vmem [thread:$0]  %s14385_s4, 16, %s86_s21, [#allocation9]  }
  0xa0   :  { %s9887_s7 = scalar_lea.hbm %s14387_s6, 2048 }
  0xa1   :  { %p9888_p2 = scmp.ne.s32.totalorder %s14387_s6, %s9887_s7  ;;  %p9891_p3 = scmp.lt.u32.totalorder %s9887_s7, %s14387_s6 }
  0xa3   :  { %p9893_p4 = pnand %p9891_p3, %p9888_p2 }
  0xa5   :  { %9896 = shalt.err (!%p9893_p4)
}
  0xa6   :  { %s9897_s3 = scalar_lea.vmem %s10301_s19, 2048  ;;  %p9902_p6 = scmp.lt.s32.totalorder %s10301_s19, %s10301_s19 }
  0xa7   :  { %p9898_p5 = scmp.ne.s32.totalorder %s10301_s19, %s9897_s3  ;;  %p9903_p7 = scmp.lt.s32.totalorder %s9897_s3, %s9897_s3 }
  0xa9   :  { %p9904_p8 = por %p9903_p7, %p9902_p6 }
  0xab   :  { %p9905_p9 = pnand %p9904_p8, %p9898_p5 }
  0xad   :  { %9908 = shalt.err (!%p9905_p9)
}
  0xae   :  { %112 = dma.hbm_to_vmem [thread:$0]  %s14387_s6, 2048, %s10301_s19, [#allocation12], %s14694_s0, %s14694_s0, %s10067_s30  }
  0xaf   :  { %s10077_s11 = smov [#allocation16]   ;;  %s10078_s18 = smov [#allocation19]  }
  0xb0   :  { %s131_s15 = sshll.u32 %s10077_s11, 4  ;;  %s152_s17 = sshll.u32 %s10078_s18, 4  ;;  %s132_s15 = int_to_ptr.vmem [resolvable:$true] %s131_s15  ;;  %s10335_s17 = int_to_ptr.vmem [resolvable:$true] %s152_s17 }
  0xb1   :  { %s9909_s2 = scalar_lea.hbm %s14389_s8, 48 }
  0xb2   :  { %p9910_p10 = scmp.ne.s32.totalorder %s14389_s8, %s9909_s2  ;;  %p9913_p11 = scmp.lt.u32.totalorder %s9909_s2, %s14389_s8 }
  0xb4   :  { %p9915_p12 = pnand %p9913_p11, %p9910_p10 }
  0xb6   :  { %9918 = shalt.err (!%p9915_p12)
}
  0xb7   :  { %s9919_s6 = scalar_lea.vmem %s132_s15, 48  ;;  %s9923_s19 = scalar_lea.vmem %s132_s15, 64 }
  0xb8   :  { %p9920_p13 = scmp.ne.s32.totalorder %s132_s15, %s9919_s6  ;;  %p9924_p0 = scmp.lt.s32.totalorder %s132_s15, %s132_s15 }
  0xb9   :  { %p9925_p1 = scmp.lt.s32.totalorder %s9923_s19, %s9919_s6 }
  0xbb   :  { %p9926_p2 = por %p9925_p1, %p9924_p0 }
  0xbd   :  { %p9927_p3 = pnand %p9926_p2, %p9920_p13 }
  0xbf   :  { %9930 = shalt.err (!%p9927_p3)
}
  0xc0   :  { %134 = dma.hbm_to_vmem [thread:$0]  %s14389_s8, 48, %s132_s15, [#allocation15]  }
  0xc1   :  { %s9931_s5 = scalar_lea.hbm %s14391_s10, 1024 }
  0xc2   :  { %p9932_p4 = scmp.ne.s32.totalorder %s14391_s10, %s9931_s5  ;;  %p9935_p5 = scmp.lt.u32.totalorder %s9931_s5, %s14391_s10 }
  0xc4   :  { %p9937_p6 = pnand %p9935_p5, %p9932_p4 }
  0xc6   :  { %9940 = shalt.err (!%p9937_p6)
}
  0xc7   :  { %s9941_s11 = scalar_lea.vmem %s10335_s17, 1024  ;;  %p9946_p8 = scmp.lt.s32.totalorder %s10335_s17, %s10335_s17 }
  0xc8   :  { %p9942_p7 = scmp.ne.s32.totalorder %s10335_s17, %s9941_s11  ;;  %p9947_p9 = scmp.lt.s32.totalorder %s9941_s11, %s9941_s11 }
  0xca   :  { %p9948_p10 = por %p9947_p9, %p9946_p8 }
  0xcc   :  { %p9949_p11 = pnand %p9948_p10, %p9942_p7 }
  0xce   :  { %9952 = shalt.err (!%p9949_p11)
}
  0xcf   :  { %158 = dma.hbm_to_vmem [thread:$0]  %s14391_s10, 1024, %s10335_s17, [#allocation18], %s10062_s28, %s10062_s28, %s10063_s29  }
  0xd0   :  { %s10079_s18 = smov [#allocation22]   ;;  %s10080_s22 = smov [#allocation23]  }
  0xd1   :  { %s176_s20 = sshll.u32 %s10079_s18, 4  ;;  %s189_s2 = sshll.u32 %s10080_s22, 4  ;;  %s177_s20 = int_to_ptr.vmem [resolvable:$true] %s176_s20  ;;  %s190_s2 = int_to_ptr.vmem [resolvable:$true] %s189_s2 }
  0xd2   :  { %s9953_s1 = scalar_lea.hbm %s14393_s12, 2048 }
  0xd3   :  { %p9954_p12 = scmp.ne.s32.totalorder %s14393_s12, %s9953_s1  ;;  %p9957_p13 = scmp.lt.u32.totalorder %s9953_s1, %s14393_s12 }
  0xd5   :  { %p9959_p0 = pnand %p9957_p13, %p9954_p12 }
  0xd7   :  { %9962 = shalt.err (!%p9959_p0)
}
  0xd8   :  { %s9963_s10 = scalar_lea.vmem %s177_s20, 2048  ;;  %p9968_p2 = scmp.lt.s32.totalorder %s177_s20, %s177_s20 }
  0xd9   :  { %p9964_p1 = scmp.ne.s32.totalorder %s177_s20, %s9963_s10  ;;  %p9969_p3 = scmp.lt.s32.totalorder %s9963_s10, %s9963_s10 }
  0xdb   :  { %p9970_p4 = por %p9969_p3, %p9968_p2 }
  0xdd   :  { %p9971_p5 = pnand %p9970_p4, %p9964_p1 }
  0xdf   :  { %9974 = shalt.err (!%p9971_p5)
}
  0xe0   :  { %182 = dma.hbm_to_vmem [thread:$0]  %s14393_s12, 2048, %s177_s20, [#allocation21], %s10062_s28, %s10062_s28, %s10063_s29  }
  0xe1   :  { %s9975_s5 = scalar_lea.hbm %s14394_s13, 16 }
  0xe2   :  { %p9976_p6 = scmp.ne.s32.totalorder %s14394_s13, %s9975_s5  ;;  %p9979_p7 = scmp.lt.u32.totalorder %s9975_s5, %s14394_s13 }
  0xe4   :  { %p9981_p8 = pnand %p9979_p7, %p9976_p6 }
  0xe6   :  { %9984 = shalt.err (!%p9981_p8)
}
  0xe7   :  { %s9985_s11 = scalar_lea.vmem %s190_s2, 16  ;;  %s9989_s8 = scalar_lea.vmem %s190_s2, 32 }
  0xe8   :  { %p9986_p9 = scmp.ne.s32.totalorder %s190_s2, %s9985_s11  ;;  %p9990_p10 = scmp.lt.s32.totalorder %s190_s2, %s190_s2 }
  0xe9   :  { %p9991_p11 = scmp.lt.s32.totalorder %s9989_s8, %s9985_s11 }
  0xeb   :  { %p9992_p12 = por %p9991_p11, %p9990_p10 }
  0xed   :  { %p9993_p13 = pnand %p9992_p12, %p9986_p9 }
  0xef   :  { %9996 = shalt.err (!%p9993_p13)
}
  0xf0   :  { %192 = dma.hbm_to_vmem [thread:$0]  %s14394_s13, 16, %s190_s2, [#allocation24]  }
  0xf1   :  { %10041 = dma.done.wait [#allocation3], 1024  }
  0xf2   :  { %10042 = vsyncadd [#allocation3], 4294966272 }
  0xf3   :  { %10043 = dma.done.wait [#allocation6], 3072  }
  0xf4   :  { %10044 = vsyncadd [#allocation6], 4294964224 }
  0xf5   :  { %10045 = dma.done.wait [#allocation9], 2064  }
  0xf6   :  { %10046 = vsyncadd [#allocation9], 4294965232 }
  0xf7   :  { %10047 = dma.done.wait [#allocation12], 4096  }
  0xf8   :  { %10048 = vsyncadd [#allocation12], 4294963200 }
  0xf9   :  { %10049 = dma.done.wait [#allocation15], 3120  }
  0xfa   :  { %10050 = vsyncadd [#allocation15], 4294964176 }
  0xfb   :  { %10051 = dma.done.wait [#allocation18], 2048  }
  0xfc   :  { %10052 = vsyncadd [#allocation18], 4294965248 }
  0xfd   :  { %10053 = dma.done.wait [#allocation21], 3072  }
  0xfe   :  { %10054 = vsyncadd [#allocation21], 4294964224 }
  0xff   :  { %10055 = dma.done.wait [#allocation24], 16  }
 0x100   :  { %10056 = vsyncadd [#allocation24], 4294967280  ;;  %v14406_v0 = vmov 0   ;;  %v8497_v1 = vld [vmem:[#allocation14 + $0x8] ss:$12 sps:$4 sm:$0xff]   ;;  %v10399_v5 = vld [vmem:[#allocation2] sm:$0xff]  }
 0x101   :  { %8456 = vset.pattern.permute.xlu1 %v14406_v0  ;;  %8455 = vset.pattern.permute.xlu0 %v14406_v0  ;;  %v8498_v2 = vld [vmem:[#allocation14 + $0x20] ss:$12 sps:$4 sm:$0xff]   ;;  %v8499_v3 = vld [vmem:[#allocation14 + $0x38] ss:$12 sps:$4 sm:$0xff]   ;;  %v8500_v4 = vld [vmem:[#allocation14 + $0x50] ss:$12 sps:$4 sm:$0xff]  }
 0x102   :  { %573 = vmatprep.mubr.bf16.mxu0 %v14406_v0  ;;  %8038 = vmatprep.subr.bf16.mxu1 %v8497_v1  ;;  %v8501_v6 = vld [vmem:[#allocation14 + $0x68] ss:$12 sps:$4 sm:$0xff]   ;;  %v8502_v7 = vld [vmem:[#allocation14 + $0x80] ss:$12 sps:$4 sm:$0xff]   ;;  %v8503_v8 = vld [vmem:[#allocation14 + $0x98] ss:$12 sps:$4 sm:$0xff]  }
 0x103   :  { %8039 = vmatpush3.bf16.msra.mxu1 %v8497_v1  ;;  %8054 = vmatprep.mubr.bf16.mxu1 %v10399_v5  ;;  %v8504_v9 = vld [vmem:[#allocation14 + $0xb0] ss:$12 sps:$4 sm:$0xff]   ;;  %v10410_v13 = vld [vmem:[#allocation7 + $0x8] sm:$0xff]  ;;  %v8511_v23 = vld [vmem:[#allocation19 + $0x10] sm:$0xff]   ;;  %v14404_v52 = vmov 1   ;;  %v14402_v56 = vmov 2  }
 0x104   :  { %8040 = vmatprep.subr.bf16.mxu1 %v8498_v2  ;;  %v10402_v10 = vld [vmem:[#allocation7 + $0x10] sm:$0xff]  ;;  %v10405_v11 = vld [vmem:[#allocation7] sm:$0xff]  ;;  %v10407_v12 = vld [vmem:[#allocation7 + $0x18] sm:$0xff]  ;;  %v14400_v59 = vmov 3   ;;  %s10088_s13 = smov [#allocation25]  }
 0x105   :  { %776 = vperm.xlu1 %8456, %v10402_v10   ;;  %770 = vperm.xlu0 %8455, %v10405_v11   ;;  %v10412_v14 = vld [vmem:[#allocation2 + $0x8] sm:$0xff]   ;;  %v10416_v17 = vld [vmem:[#allocation2 + $0x10] sm:$0xff]   ;;  %v10419_v18 = vld [vmem:[#allocation7 + $0x20] sm:$0xff]  ;;  %s7111_s29 = sshll.u32 %s10088_s13, 4  ;;  %s7112_s29 = int_to_ptr.vmem [resolvable:$true] %s7111_s29 }
 0x106   :  { %v8507_v15 = vld [vmem:[#allocation19] sm:$0xff]   ;;  %v8508_v19 = vld [vmem:[#allocation19 + $0x8] sm:$0xff]   ;;  %v10422_v20 = vld [vmem:[#allocation7 + $0x38] sm:$0xff]  ;;  %s9997_s15 = scalar_lea.vmem %s7112_s29, 2048  ;;  %p10002_p1 = scmp.lt.s32.totalorder %s7112_s29, %s7112_s29 }
 0x107   :  { %8041 = vmatpush3.bf16.msra.mxu1 %v8498_v2  ;;  %v10414_v16 = vld [vmem:[#allocation7 + $0x28] sm:$0xff]  ;;  %v10425_v21 = vld [vmem:[#allocation7 + $0x30] sm:$0xff]  ;;  %v10430_v24 = vld [vmem:[#allocation2 + $0x18] sm:$0xff]   ;;  %p9998_p0 = scmp.ne.s32.totalorder %s7112_s29, %s9997_s15  ;;  %p10003_p2 = scmp.lt.s32.totalorder %s9997_s15, %s9997_s15 }
 0x108   :  { %8042 = vmatprep.subr.bf16.mxu1 %v8499_v3  ;;  %v8521_v22 = vld [vmem:[#allocation14 + $0x4] ss:$12 sps:$4 sm:$0xff]   ;;  %v8523_v28 = vld [vmem:[#allocation14] ss:$12 sps:$4 sm:$0xff]   ;;  %v8524_v29 = vld [vmem:[#allocation14 + $0x1c] ss:$12 sps:$4 sm:$0xff]  }
 0x109   :  { %779 = vperm.xlu1 %8456, %v10407_v12   ;;  %773 = vperm.xlu0 %8455, %v10410_v13   ;;  %v10432_v25 = vld [vmem:[#allocation7 + $0x48] sm:$0xff]  ;;  %v10434_v26 = vld [vmem:[#allocation2 + $0x20] sm:$0xff]   ;;  %v10440_v31 = vld [vmem:[#allocation7 + $0x58] sm:$0xff]  ;;  %p10004_p3 = por %p10003_p2, %p10002_p1 }
 0x10a   :  { %541 = vmatprep.subr.bf16.mxu0 %v8521_v22  ;;  %v10437_v27 = vld [vmem:[#allocation7 + $0x40] sm:$0xff]  ;;  %v10443_v32 = vld [vmem:[#allocation7 + $0x50] sm:$0xff]  ;;  %v10448_v36 = vld [vmem:[#allocation2 + $0x28] sm:$0xff]  }
 0x10b   :  { %8043 = vmatpush3.bf16.msra.mxu1 %v8499_v3  ;;  %v8512_v30 = vld [vmem:[#allocation19 + $0x18] sm:$0xff]   ;;  %542 = vmatpush1.bf16.msra.mxu0 %v8523_v28  ;;  %v8526_v33 = vld [vmem:[#allocation14 + $0x18] ss:$12 sps:$4 sm:$0xff]   ;;  %v10452_v38 = vld [vmem:[#allocation2 + $0x30] sm:$0xff]   ;;  %p10005_p4 = pnand %p10004_p3, %p9998_p0 }
 0x10c   :  { %8044 = vmatprep.subr.bf16.mxu1 %v8500_v4  ;;  %543 = vmatprep.subr.bf16.mxu0 %v8524_v29  ;;  %v8527_v34 = vld [vmem:[#allocation14 + $0x34] ss:$12 sps:$4 sm:$0xff]   ;;  %v8515_v35 = vld [vmem:[#allocation19 + $0x20] sm:$0xff]   ;;  %v8529_v40 = vld [vmem:[#allocation14 + $0x30] ss:$12 sps:$4 sm:$0xff]  }
 0x10d   :  { %785 = vperm.xlu1 %8456, %v10414_v16   ;;  %782 = vperm.xlu0 %8455, %v10419_v18   ;;  %v10450_v37 = vld [vmem:[#allocation7 + $0x68] sm:$0xff]  ;;  %v10455_v39 = vld [vmem:[#allocation7 + $0x60] sm:$0xff]  ;;  %v10458_v43 = vld [vmem:[#allocation7 + $0x78] sm:$0xff] }
 0x10e   :  { %v8530_v41 = vld [vmem:[#allocation14 + $0x4c] ss:$12 sps:$4 sm:$0xff]   ;;  %v8532_v45 = vld [vmem:[#allocation14 + $0x48] ss:$12 sps:$4 sm:$0xff]   ;;  %v8533_v46 = vld [vmem:[#allocation14 + $0x64] ss:$12 sps:$4 sm:$0xff]  }
 0x10f   :  { %8045 = vmatpush3.bf16.msra.mxu1 %v8500_v4  ;;  %544 = vmatpush1.bf16.msra.mxu0 %v8526_v33  ;;  %v8516_v42 = vld [vmem:[#allocation19 + $0x28] sm:$0xff]   ;;  %v8519_v47 = vld [vmem:[#allocation19 + $0x30] sm:$0xff]   ;;  %v8536_v50 = vld [vmem:[#allocation14 + $0x7c] ss:$12 sps:$4 sm:$0xff]  }
 0x110   :  { %8046 = vmatprep.subr.bf16.mxu1 %v8501_v6  ;;  %545 = vmatprep.subr.bf16.mxu0 %v8527_v34  ;;  %v10461_v44 = vld [vmem:[#allocation7 + $0x70] sm:$0xff]  ;;  %v10466_v48 = vld [vmem:[#allocation2 + $0x38] sm:$0xff]  }
 0x111   :  { %791 = vperm.xlu1 %8456, %v10422_v20   ;;  %788 = vperm.xlu0 %8455, %v10425_v21   ;;  %v8535_v49 = vld [vmem:[#allocation14 + $0x60] ss:$12 sps:$4 sm:$0xff]   ;;  %v8538_v53 = vld [vmem:[#allocation14 + $0x78] ss:$12 sps:$4 sm:$0xff]   ;;  %v8541_v55 = vld [vmem:[#allocation14 + $0x90] ss:$12 sps:$4 sm:$0xff]  }
 0x112   :  { %v8520_v51 = vld [vmem:[#allocation19 + $0x38] sm:$0xff]   ;;  %v8542_v57 = vld [vmem:[#allocation14 + $0xac] ss:$12 sps:$4 sm:$0xff]   ;;  %v8544_v58 = vld [vmem:[#allocation14 + $0xa8] ss:$12 sps:$4 sm:$0xff]  }
 0x113   :  { %8047 = vmatpush3.bf16.msra.mxu1 %v8501_v6  ;;  %546 = vmatpush1.bf16.msra.mxu0 %v8529_v40  ;;  %v8539_v54 = vld [vmem:[#allocation14 + $0x94] ss:$12 sps:$4 sm:$0xff]  }
 0x114   :  { %8048 = vmatprep.subr.bf16.mxu1 %v8502_v7  ;;  %547 = vmatprep.subr.bf16.mxu0 %v8530_v41 }
 0x115   :  { %797 = vperm.xlu1 %8456, %v10432_v25   ;;  %794 = vperm.xlu0 %8455, %v10437_v27  }
 0x117   :  { %8049 = vmatpush3.bf16.msra.mxu1 %v8502_v7  ;;  %548 = vmatpush1.bf16.msra.mxu0 %v8532_v45 }
 0x118   :  { %8050 = vmatprep.subr.bf16.mxu1 %v8503_v8  ;;  %549 = vmatprep.subr.bf16.mxu0 %v8533_v46 }
 0x119   :  { %803 = vperm.xlu1 %8456, %v10440_v31   ;;  %800 = vperm.xlu0 %8455, %v10443_v32  }
 0x11b   :  { %8051 = vmatpush3.bf16.msra.mxu1 %v8503_v8  ;;  %550 = vmatpush1.bf16.msra.mxu0 %v8535_v49 }
 0x11c   :  { %8052 = vmatprep.subr.bf16.mxu1 %v8504_v9  ;;  %551 = vmatprep.subr.bf16.mxu0 %v8536_v50 }
 0x11d   :  { %809 = vperm.xlu1 %8456, %v10450_v37   ;;  %806 = vperm.xlu0 %8455, %v10455_v39  }
 0x11f   :  { %8053 = vmatpush3.bf16.msra.mxu1 %v8504_v9  ;;  %552 = vmatpush1.bf16.msra.mxu0 %v8538_v53 }
 0x120   :  { %8070 = vmatprep.subr.bf16.mxu1 %v8507_v15  ;;  %553 = vmatprep.subr.bf16.mxu0 %v8539_v54 }
 0x121   :  { %815 = vperm.xlu1 %8456, %v10458_v43   ;;  %812 = vperm.xlu0 %8455, %v10461_v44  }
 0x122   :  { %8055 = vmatmul.mubr.bf16.vlgmr.msra.gmra.mrb[0].mxu1 %v10412_v14 }
 0x123   :  { %8071 = vmatpush3.bf16.msra.mxu1 %v8507_v15  ;;  %8058 = vmatprep.mubr.bf16.mxu1 %v10416_v17 }
 0x124   :  { %8072 = vmatprep.subr.bf16.mxu1 %v8508_v19  ;;  %554 = vmatpush1.bf16.msra.mxu0 %v8541_v55 }
 0x125   :  { %8458 = vset.pattern.permute.xlu1 %v14404_v52  ;;  %8457 = vset.pattern.permute.xlu0 %v14404_v52 }
 0x126   :  { %877 = vperm.xlu1 %8458, %v10410_v13   ;;  %874 = vperm.xlu0 %8457, %v10405_v11  }
 0x127   :  { %8073 = vmatpush3.bf16.msra.mxu1 %v8508_v19  ;;  %555 = vmatprep.subr.bf16.mxu0 %v8542_v57 }
 0x128   :  { %8074 = vmatprep.subr.bf16.mxu1 %v8511_v23  ;;  %556 = vmatpush1.bf16.msra.mxu0 %v8544_v58 }
 0x12a   :  { %8059 = vmatmul.mubr.bf16.gmra.mrb[4].mxu1 %v10430_v24  ;;  %880 = vperm.xlu1 %8458, %v10402_v10  }
 0x12b   :  { %8075 = vmatpush3.bf16.msra.mxu1 %v8511_v23  ;;  %8062 = vmatprep.mubr.bf16.mxu1 %v10434_v26 }
 0x12c   :  { %8076 = vmatprep.subr.bf16.mxu1 %v8512_v30  ;;  %883 = vperm.xlu0 %8457, %v10407_v12  }
 0x12d   :  { %574 = vmatmul.mubr.bf16.vlgmr.msra.gmra.mrb[0].mxu0 %v10399_v5 }
 0x12e   :  { %886 = vperm.xlu1 %8458, %v10419_v18   ;;  %583 = vmatprep.mubr.bf16.mxu0 %v14406_v0 }
 0x12f   :  { %8077 = vmatpush3.bf16.msra.mxu1 %v8512_v30 }
 0x130   :  { %8078 = vmatprep.subr.bf16.mxu1 %v8515_v35  ;;  %889 = vperm.xlu0 %8457, %v10414_v16  }
 0x132   :  { %8063 = vmatmul.mubr.bf16.gmra.mrb[8].mxu1 %v10448_v36  ;;  %892 = vperm.xlu1 %8458, %v10425_v21  }
 0x133   :  { %8079 = vmatpush3.bf16.msra.mxu1 %v8515_v35  ;;  %8066 = vmatprep.mubr.bf16.mxu1 %v10452_v38 }
 0x134   :  { %8080 = vmatprep.subr.bf16.mxu1 %v8516_v42  ;;  %895 = vperm.xlu0 %8457, %v10422_v20  }
 0x135   :  { %584 = vmatmul.mubr.bf16.gmra.mrb[4].mxu0 %v10412_v14 }
 0x136   :  { %898 = vperm.xlu1 %8458, %v10437_v27   ;;  %593 = vmatprep.mubr.bf16.mxu0 %v14406_v0 }
 0x137   :  { %8081 = vmatpush3.bf16.msra.mxu1 %v8516_v42 }
 0x138   :  { %8082 = vmatprep.subr.bf16.mxu1 %v8519_v47  ;;  %901 = vperm.xlu0 %8457, %v10432_v25  }
 0x13a   :  { %8067 = vmatmul.mubr.bf16.gmra.mrb[12].mxu1 %v10466_v48  ;;  %904 = vperm.xlu1 %8458, %v10443_v32  }
 0x13b   :  { %8083 = vmatpush3.bf16.msra.mxu1 %v8519_v47  ;;  %8086 = vmatprep.mubr.bf16.mxu1 %v14406_v0 }
 0x13c   :  { %8084 = vmatprep.subr.bf16.mxu1 %v8520_v51  ;;  %907 = vperm.xlu0 %8457, %v10440_v31  }
 0x13d   :  { %594 = vmatmul.mubr.bf16.gmra.mrb[8].mxu0 %v10416_v17 }
 0x13e   :  { %910 = vperm.xlu1 %8458, %v10455_v39   ;;  %603 = vmatprep.mubr.bf16.mxu0 %v14406_v0 }
 0x13f   :  { %8085 = vmatpush3.bf16.msra.mxu1 %v8520_v51 }
 0x140   :  { %913 = vperm.xlu0 %8457, %v10450_v37  }
 0x142   :  { %8087 = vmatmul.mubr.bf16.vlgmr.msra.gmra.mrb[16].mxu1 %v14406_v0  ;;  %916 = vperm.xlu1 %8458, %v10461_v44  }
 0x143   :  { %8090 = vmatprep.mubr.bf16.mxu1 %v14406_v0 }
 0x144   :  { %919 = vperm.xlu0 %8457, %v10458_v43  }
 0x145   :  { %604 = vmatmul.mubr.bf16.gmra.mrb[12].mxu0 %v10430_v24 }
 0x146   :  { %8459 = vset.pattern.permute.xlu1 %v14402_v56  ;;  %613 = vmatprep.mubr.bf16.mxu0 %v14406_v0 }
 0x147   :  { %978 = vperm.xlu1 %8459, %v10405_v11  }
 0x148   :  { %8460 = vset.pattern.permute.xlu0 %v14402_v56 }
 0x149   :  { %981 = vperm.xlu0 %8460, %v10410_v13  }
 0x14a   :  { %8091 = vmatmul.mubr.bf16.gmra.mrb[20].mxu1 %v14406_v0 }
 0x14b   :  { %8094 = vmatprep.mubr.bf16.mxu1 %v14406_v0  ;;  %984 = vperm.xlu1 %8459, %v10402_v10  }
 0x14d   :  { %990 = vperm.xlu0 %8460, %v10419_v18   ;;  %614 = vmatmul.mubr.bf16.gmra.mrb[16].mxu0 %v10434_v26 }
 0x14e   :  { %623 = vmatprep.mubr.bf16.mxu0 %v14406_v0 }
 0x14f   :  { %987 = vperm.xlu1 %8459, %v10407_v12  }
 0x151   :  { %996 = vperm.xlu0 %8460, %v10425_v21  }
 0x152   :  { %8095 = vmatmul.mubr.bf16.gmra.mrb[24].mxu1 %v14406_v0 }
 0x153   :  { %8098 = vmatprep.mubr.bf16.mxu1 %v14406_v0  ;;  %993 = vperm.xlu1 %8459, %v10414_v16  }
 0x155   :  { %1002 = vperm.xlu0 %8460, %v10437_v27   ;;  %624 = vmatmul.mubr.bf16.gmra.mrb[20].mxu0 %v10448_v36 }
 0x156   :  { %633 = vmatprep.mubr.bf16.mxu0 %v14406_v0 }
 0x157   :  { %999 = vperm.xlu1 %8459, %v10422_v20  }
 0x159   :  { %1008 = vperm.xlu0 %8460, %v10443_v32  }
 0x15a   :  { %8099 = vmatmul.mubr.bf16.gmra.mrb[28].mxu1 %v14406_v0 }
 0x15b   :  { %1640 = vmatprep.mubr.bf16.mxu1 %v14406_v0  ;;  %1005 = vperm.xlu1 %8459, %v10432_v25  }
 0x15d   :  { %1014 = vperm.xlu0 %8460, %v10455_v39   ;;  %634 = vmatmul.mubr.bf16.gmra.mrb[24].mxu0 %v10452_v38 }
 0x15e   :  { %643 = vmatprep.mubr.bf16.mxu0 %v14406_v0 }
 0x15f   :  { %1011 = vperm.xlu1 %8459, %v10440_v31  }
 0x161   :  { %1020 = vperm.xlu0 %8460, %v10461_v44  }
 0x163   :  { %1017 = vperm.xlu1 %8459, %v10450_v37  }
 0x165   :  { %8461 = vset.pattern.permute.xlu0 %v14400_v59  ;;  %644 = vmatmul.mubr.bf16.gmra.mrb[28].mxu0 %v10466_v48 }
 0x166   :  { %1082 = vperm.xlu0 %8461, %v10405_v11   ;;  %1370 = vmatprep.mubr.bf16.mxu0 %v14406_v0 }
 0x167   :  { %1023 = vperm.xlu1 %8459, %v10458_v43  }
 0x16a   :  { %1103 = vperm.xlu0 %8461, %v10422_v20  }
 0x16b   :  { %8462 = vset.pattern.permute.xlu1 %v14400_v59 }
 0x16c   :  { %1085 = vperm.xlu1 %8462, %v10410_v13  }
 0x16e   :  { %1091 = vperm.xlu0 %8461, %v10407_v12  }
 0x170   :  { %1100 = vperm.xlu1 %8462, %v10425_v21  }
 0x172   :  { %1109 = vperm.xlu0 %8461, %v10432_v25  }
 0x174   :  { %1088 = vperm.xlu1 %8462, %v10402_v10  }
 0x176   :  { %1097 = vperm.xlu0 %8461, %v10414_v16  }
 0x178   :  { %1106 = vperm.xlu1 %8462, %v10437_v27  }
 0x17a   :  { %1115 = vperm.xlu0 %8461, %v10440_v31  }
 0x17c   :  { %1094 = vperm.xlu1 %8462, %v10419_v18  }
 0x17e   :  { %1121 = vperm.xlu0 %8461, %v10450_v37  }
 0x180   :  { %1112 = vperm.xlu1 %8462, %v10443_v32  }
 0x182   :  { %1127 = vperm.xlu0 %8461, %v10458_v43  }
 0x184   :  { %v10540_v60 = vpop.permute.xlu1 %776  ;;  %1118 = vperm.xlu1 %8462, %v10455_v39   ;;  %v10544_v61 = vpop.permute.xlu0 %770 }
 0x186   :  { %8464 = vset.pattern.permute.xlu0 %v14406_v0 }
 0x188   :  { %v10548_v62 = vpop.permute.xlu1 %779  ;;  %1124 = vperm.xlu1 %8462, %v10461_v44   ;;  %v10551_v63 = vpop.permute.xlu0 %773 }
 0x18c   :  { %v10553_v1 = vpop.permute.xlu1 %785  ;;  %8463 = vset.pattern.permute.xlu1 %v14406_v0  ;;  %v10560_v3 = vpop.permute.xlu0 %782 }
 0x190   :  { %v10558_v2 = vpop.permute.xlu1 %791  ;;  %v10566_v5 = vpop.permute.xlu0 %788 }
 0x194   :  { %v10562_v4 = vpop.permute.xlu1 %797  ;;  %v10571_v7 = vpop.permute.xlu0 %794 }
 0x198   :  { %v10568_v6 = vpop.permute.xlu1 %803  ;;  %v10576_v9 = vpop.permute.xlu0 %800 }
 0x19c   :  { %v10574_v8 = vpop.permute.xlu1 %809  ;;  %v10580_v11 = vpop.permute.xlu0 %806 }
 0x1a0   :  { %v10578_v10 = vpop.permute.xlu1 %815  ;;  %v10584_v13 = vpop.permute.xlu0 %812 }
 0x1a5   :  { %v10582_v12 = vpop.permute.xlu1 %877  ;;  %v10588_v15 = vpop.permute.xlu0 %874 }
 0x1a9   :  { %v10586_v14 = vpop.permute.xlu1 %880 }
 0x1ab   :  { %v10592_v17 = vpop.permute.xlu0 %883 }
 0x1ad   :  { %v10590_v16 = vpop.permute.xlu1 %886 }
 0x1af   :  { %v10596_v19 = vpop.permute.xlu0 %889 }
 0x1b1   :  { %v10594_v18 = vpop.permute.xlu1 %892 }
 0x1b3   :  { %v10600_v21 = vpop.permute.xlu0 %895 }
 0x1b5   :  { %v10598_v20 = vpop.permute.xlu1 %898 }
 0x1b7   :  { %v10604_v23 = vpop.permute.xlu0 %901 }
 0x1b9   :  { %v10602_v22 = vpop.permute.xlu1 %904 }
 0x1bb   :  { %v10608_v25 = vpop.permute.xlu0 %907 }
 0x1bd   :  { %v10606_v24 = vpop.permute.xlu1 %910 }
 0x1bf   :  { %v10612_v27 = vpop.permute.xlu0 %913 }
 0x1c1   :  { %v10610_v26 = vpop.permute.xlu1 %916 }
 0x1c3   :  { %v10616_v29 = vpop.permute.xlu0 %919 }
 0x1c6   :  { %v10614_v28 = vpop.permute.xlu1 %978 }
 0x1c8   :  { %v10628_v35 = vpop.permute.xlu0 %981 }
 0x1ca   :  { %v10618_v30 = vpop.permute.xlu1 %984 }
 0x1cc   :  { %v10638_v40 = vpop.permute.xlu0 %990 }
 0x1ce   :  { %v10630_v36 = vpop.permute.xlu1 %987 }
 0x1d0   :  { %v10646_v44 = vpop.permute.xlu0 %996 }
 0x1d2   :  { %v10642_v42 = vpop.permute.xlu1 %993 }
 0x1d4   :  { %v10656_v49 = vpop.permute.xlu0 %1002 }
 0x1d6   :  { %v10650_v46 = vpop.permute.xlu1 %999 }
 0x1d8   :  { %v10668_v57 = vpop.permute.xlu0 %1008 }
 0x1da   :  { %v10658_v50 = vpop.permute.xlu1 %1005 }
 0x1dc   :  { %v10672_v0 = vpop.permute.xlu0 %1014 }
 0x1de   :  { %v10670_v58 = vpop.permute.xlu1 %1011 }
 0x1f5   :  { %v10620_v31 = vpop.f32.mrb[0].mxu1 }
 0x1f6   :  { %14695 = vst [vmem:[#allocation38_spill] sm:$0xff] %v10620_v31  ;;  %v10622_v32 = vpop.f32.mrb[1].mxu1 }
 0x1f7   :  { %14696 = vst [vmem:[#allocation39_spill] sm:$0xff] %v10622_v32  ;;  %v10624_v33 = vpop.f32.mrb[2].mxu1 }
 0x1f8   :  { %14697 = vst [vmem:[#allocation40_spill] sm:$0xff] %v10624_v33  ;;  %v10626_v34 = vpop.f32.mrb[3].mxu1 }
 0x1f9   :  { %14698 = vst [vmem:[#allocation41_spill] sm:$0xff] %v10626_v34 }
 0x1fd   :  { %v10632_v37 = vpop.f32.mrb[4].mxu1 }
 0x1fe   :  { %14699 = vst [vmem:[#allocation42_spill] sm:$0xff] %v10632_v37  ;;  %v10634_v38 = vpop.f32.mrb[5].mxu1 }
 0x1ff   :  { %14700 = vst [vmem:[#allocation43_spill] sm:$0xff] %v10634_v38  ;;  %v10636_v39 = vpop.f32.mrb[6].mxu1 }
 0x200   :  { %14701 = vst [vmem:[#allocation44_spill] sm:$0xff] %v10636_v39  ;;  %v10640_v41 = vpop.f32.mrb[7].mxu1 }
 0x201   :  { %14702 = vst [vmem:[#allocation45_spill] sm:$0xff] %v10640_v41 }
 0x205   :  { %v10644_v43 = vpop.f32.mrb[8].mxu1 }
 0x206   :  { %14703 = vst [vmem:[#allocation46_spill] sm:$0xff] %v10644_v43  ;;  %v10648_v45 = vpop.f32.mrb[9].mxu1  ;;  %v10674_v43 = vpop.permute.xlu1 %1017 }
 0x207   :  { %14704 = vst [vmem:[#allocation47_spill] sm:$0xff] %v10648_v45  ;;  %v10652_v47 = vpop.f32.mrb[10].mxu1 }
 0x208   :  { %14705 = vst [vmem:[#allocation48_spill] sm:$0xff] %v10652_v47  ;;  %v10654_v48 = vpop.f32.mrb[11].mxu1 }
 0x209   :  { %14706 = vst [vmem:[#allocation49_spill] sm:$0xff] %v10654_v48 }
 0x20a   :  { %v10680_v48 = vpop.permute.xlu1 %1023 }
 0x20d   :  { %v10660_v51 = vpop.f32.mrb[12].mxu1 }
 0x20e   :  { %14707 = vst [vmem:[#allocation50_spill] sm:$0xff] %v10660_v51  ;;  %v10662_v53 = vpop.f32.mrb[13].mxu1 }
 0x20f   :  { %14708 = vst [vmem:[#allocation51_spill] sm:$0xff] %v10662_v53  ;;  %v10664_v54 = vpop.f32.mrb[14].mxu1  ;;  %v14711_v53 = vmov 0  }
 0x210   :  { %14709 = vst [vmem:[#allocation52_spill] sm:$0xff] %v10664_v54  ;;  %v10666_v55 = vpop.f32.mrb[15].mxu1 }
 0x211   :  { %14710 = vst [vmem:[#allocation53_spill] sm:$0xff] %v10666_v55  ;;  %v10678_v55 = vpop.permute.xlu0 %1020 }
 0x215   :  { %v8088_v59 = vpop.f32.mrb[16].mxu1 }
 0x216   :  { %v1267_v56 = vpop.f32.mrb[17].mxu1 }
 0x217   :  { %v8089_v52 = vpop.f32.mrb[18].mxu1 }
 0x218   :  { %v1331_v47 = vpack.c.bf16 %v8089_v52, %v8088_v59  ;;  %v1270_v41 = vpop.f32.mrb[19].mxu1 }
 0x219   :  { %v1330_v51 = vpack.c.bf16 %v1270_v41, %v1267_v56  ;;  %v10684_v41 = vpop.permute.xlu0 %1082 }
 0x21b   :  { %1338 = vmatprep.subr.bf16.mxu0 %v1330_v51  ;;  %8410 = vmatprep.subr.bf16.mxu1 %v1330_v51 }
 0x21c   :  { %1339 = vmatpush1.bf16.msra.mxu0 %v14711_v53  ;;  %8418 = vmatpush1.bf16.msra.mxu1 %v14711_v53 }
 0x21d   :  { %v8092_v54 = vpop.f32.mrb[20].mxu1  ;;  %1340 = vmatprep.subr.bf16.mxu0 %v1331_v47  ;;  %8411 = vmatprep.subr.bf16.mxu1 %v1331_v47  ;;  %v10688_v47 = vpop.permute.xlu1 %1085 }
 0x21e   :  { %v1283_v38 = vpop.f32.mrb[21].mxu1 }
 0x21f   :  { %v8093_v33 = vpop.f32.mrb[22].mxu1 }
 0x220   :  { %v1333_v52 = vpack.c.bf16 %v8093_v33, %v8092_v54  ;;  %v1286_v59 = vpop.f32.mrb[23].mxu1  ;;  %1341 = vmatpush1.bf16.msra.mxu0 %v14711_v53  ;;  %8419 = vmatpush1.bf16.msra.mxu1 %v14711_v53 }
 0x221   :  { %v1332_v56 = vpack.c.bf16 %v1286_v59, %v1283_v38  ;;  %v1104_v59 = vpop.permute.xlu0 %1103 }
 0x223   :  { %1342 = vmatprep.subr.bf16.mxu0 %v1332_v56  ;;  %8412 = vmatprep.subr.bf16.mxu1 %v1332_v56  ;;  %v1101_v56 = vpop.permute.xlu1 %1100 }
 0x224   :  { %1343 = vmatpush1.bf16.msra.mxu0 %v14711_v53  ;;  %8420 = vmatpush1.bf16.msra.mxu1 %v14711_v53 }
 0x225   :  { %v8096_v51 = vpop.f32.mrb[24].mxu1  ;;  %1344 = vmatprep.subr.bf16.mxu0 %v1333_v52  ;;  %8413 = vmatprep.subr.bf16.mxu1 %v1333_v52 }
 0x226   :  { %v1299_v33 = vpop.f32.mrb[25].mxu1 }
 0x227   :  { %v8097_v54 = vpop.f32.mrb[26].mxu1 }
 0x228   :  { %v1335_v45 = vpack.c.bf16 %v8097_v54, %v8096_v51  ;;  %v1302_v31 = vpop.f32.mrb[27].mxu1  ;;  %1345 = vmatpush1.bf16.msra.mxu0 %v14711_v53  ;;  %8421 = vmatpush1.bf16.msra.mxu1 %v14711_v53  ;;  %v10694_v51 = vpop.permute.xlu0 %1091 }
 0x229   :  { %v1334_v38 = vpack.c.bf16 %v1302_v31, %v1299_v33  ;;  %v10698_v31 = vpop.permute.xlu1 %1088  ;;  %v14408_v33 = vlaneseq }
 0x22b   :  { %1346 = vmatprep.subr.bf16.mxu0 %v1334_v38  ;;  %8414 = vmatprep.subr.bf16.mxu1 %v1334_v38  ;;  %v10701_v32 = vand.u32 127, %v14408_v33  ;;  %v14735_v33 = vmov 0 }
 0x22c   :  { %1347 = vmatpush1.bf16.msra.mxu0 %v14711_v53  ;;  %8422 = vmatpush1.bf16.msra.mxu1 %v14711_v53 }
 0x22d   :  { %v8100_v39 = vpop.f32.mrb[28].mxu1  ;;  %1348 = vmatprep.subr.bf16.mxu0 %v1335_v45  ;;  %8415 = vmatprep.subr.bf16.mxu1 %v1335_v45  ;;  %14712 = vst [vmem:[#allocation54_spill] sm:$0xff] %v10701_v32  ;;  %vm1135_vm0 = vcmp.eq.s32.totalorder %v10701_v32, %v1101_v56  ;;  %vm1136_vm1 = vcmp.eq.s32.totalorder %v10701_v32, %v1104_v59  ;;  %v14716_v45 = vmov 0  ;;  %v14409_v59 = vmov 1.0|1.0  }
 0x22e   :  { %v1315_v52 = vpop.f32.mrb[29].mxu1  ;;  %vm817_vm2 = vcmp.eq.s32.totalorder %v10701_v32, %v10544_v61  ;;  %vm818_vm3 = vcmp.eq.s32.totalorder %v10701_v32, %v10551_v63  ;;  %vm10711_vm4 = vmpackc.low %vm1136_vm1, %vm1135_vm0  ;;  %vm819_vm8 = vcmp.eq.s32.totalorder %v10701_v32, %v10540_v60  ;;  %vm820_vm9 = vcmp.eq.s32.totalorder %v10701_v32, %v10548_v62 }
 0x22f   :  { %v8101_v34 = vpop.f32.mrb[30].mxu1  ;;  %vm10717_vm5 = vmpackc.low %vm818_vm3, %vm817_vm2  ;;  %v14719_v56 = vmov 0  ;;  %vm822_vm14 = vcmp.eq.s32.totalorder %v10701_v32, %v10553_v1  ;;  %vm821_vm15 = vcmp.eq.s32.totalorder %v10701_v32, %v10560_v3  ;;  %v14725_v60 = vmov 0  ;;  %v10775_v1 = vpop.f32.mrb[0].mxu0 }
 0x230   :  { %v1337_v54 = vpack.c.bf16 %v8101_v34, %v8100_v39  ;;  %v1318_v37 = vpop.f32.mrb[31].mxu1  ;;  %1349 = vmatpush1.bf16.msra.mxu0 %v14711_v53  ;;  %8423 = vmatpush1.bf16.msra.mxu1 %v14711_v53  ;;  %v1107_v34 = vpop.permute.xlu1 %1106  ;;  %v14717_v45 = vsel %vm10717_vm5, 4294967295, %v14716_v45  ;;  %vm10743_vm11 = vmpackc.low %vm820_vm9, %vm819_vm8  ;;  %v14728_v62 = vmov 0  ;;  %14731 = vst [vmem:[#allocation61_spill] sm:$0xff] %v10775_v1 }
 0x231   :  { %v1336_v38 = vpack.c.bf16 %v1318_v37, %v1315_v52  ;;  %v1110_v39 = vpop.permute.xlu0 %1109  ;;  %v14713_v37 = vmov 0  ;;  %14718 = vst [vmem:[#allocation56_spill] sm:$0xff] %v14717_v45  ;;  %vm1137_vm6 = vcmp.eq.s32.totalorder %v10701_v32, %v1107_v34  ;;  %v14722_v52 = vmov 0  ;;  %vm10765_vm1 = vmpackc.low %vm822_vm14, %vm821_vm15  ;;  %v10779_v3 = vpop.f32.mrb[1].mxu0 }
 0x232   :  { %v14714_v37 = vsel %vm10711_vm4, 4294967295, %v14713_v37  ;;  %vm1138_vm7 = vcmp.eq.s32.totalorder %v10701_v32, %v1110_v39  ;;  %v14723_v52 = vsel %vm10743_vm11, 4294967295, %v14722_v52  ;;  %v14729_v62 = vsel %vm10765_vm1, 4294967295, %v14728_v62  ;;  %14732 = vst [vmem:[#allocation62_spill] sm:$0xff] %v10779_v3 }
 0x233   :  { %1350 = vmatprep.subr.bf16.mxu0 %v1336_v38  ;;  %8416 = vmatprep.subr.bf16.mxu1 %v1336_v38  ;;  %14715 = vst [vmem:[#allocation55_spill] sm:$0xff] %v14714_v37  ;;  %vm10739_vm10 = vmpackc.low %vm1138_vm7, %vm1137_vm6  ;;  %vm824_vm6 = vcmp.eq.s32.totalorder %v10701_v32, %v10558_v2  ;;  %vm823_vm7 = vcmp.eq.s32.totalorder %v10701_v32, %v10566_v5 }
 0x234   :  { %1351 = vmatpush1.bf16.msra.mxu0 %v14711_v53  ;;  %8424 = vmatpush1.bf16.msra.mxu1 %v14711_v53  ;;  %v10729_v61 = vpop.permute.xlu1 %1094  ;;  %v14720_v56 = vsel %vm10739_vm10, 4294967295, %v14719_v56  ;;  %14724 = vst [vmem:[#allocation58_spill] sm:$0xff] %v14723_v52  ;;  %14730 = vst [vmem:[#allocation60_spill] sm:$0xff] %v14729_v62  ;;  %vm826_vm14 = vcmp.eq.s32.totalorder %v10701_v32, %v10562_v4  ;;  %vm825_vm15 = vcmp.eq.s32.totalorder %v10701_v32, %v10571_v7 }
 0x235   :  { %1352 = vmatprep.subr.bf16.mxu0 %v1337_v54  ;;  %8417 = vmatprep.subr.bf16.mxu1 %v1337_v54  ;;  %v10731_v63 = vpop.permute.xlu0 %1097  ;;  %14721 = vst [vmem:[#allocation57_spill] sm:$0xff] %v14720_v56  ;;  %vm10795_vm9 = vmpackc.low %vm824_vm6, %vm823_vm7  ;;  %vm828_vm6 = vcmp.eq.s32.totalorder %v10701_v32, %v10568_v6  ;;  %vm827_vm7 = vcmp.eq.s32.totalorder %v10701_v32, %v10576_v9  ;;  %v14763_v9 = vmov 0 }
 0x238   :  { %1353 = vmatpush1.bf16.msra.mxu0 %v14711_v53  ;;  %8425 = vmatpush1.bf16.msra.mxu1 %v14711_v53  ;;  %v1113_v54 = vpop.permute.xlu1 %1112 }
 0x239   :  { %v1116_v38 = vpop.permute.xlu0 %1115  ;;  %vm1139_vm12 = vcmp.eq.s32.totalorder %v10701_v32, %v1113_v54  ;;  %v10783_v54 = vpop.f32.mrb[2].mxu0 }
 0x23a   :  { %vm1140_vm13 = vcmp.eq.s32.totalorder %v10701_v32, %v1116_v38  ;;  %14733 = vst [vmem:[#allocation63_spill] sm:$0xff] %v10783_v54  ;;  %v10785_v38 = vpop.f32.mrb[3].mxu0 }
 0x23b   :  { %7249 = vmatmul.mubr.msk.bf16.vlgmr.msra.gmra.mrb[32].mxu0 %vm10717_vm5, %v14409_v59  ;;  %7303 = vmatmul.mubr.msk.bf16.vlgmr.msra.gmra.mrb[32].mxu1 %vm10711_vm4, %v14409_v59  ;;  %vm10761_vm0 = vmpackc.low %vm1140_vm13, %vm1139_vm12  ;;  %14734 = vst [vmem:[#allocation64_spill] sm:$0xff] %v10785_v38  ;;  %v10805_v2 = vpop.f32.mrb[4].mxu0 }
 0x23c   :  { %1380 = vmatprep.mubr.bf16.mxu0 %v14711_v53  ;;  %1650 = vmatprep.mubr.bf16.mxu1 %v14711_v53  ;;  %v14726_v60 = vsel %vm10761_vm0, 4294967295, %v14725_v60  ;;  %v1119_v34 = vpop.permute.xlu1 %1118  ;;  %14742 = vst [vmem:[#allocation67_spill] sm:$0xff] %v10805_v2  ;;  %v10809_v5 = vpop.f32.mrb[5].mxu0 }
 0x23d   :  { %14727 = vst [vmem:[#allocation59_spill] sm:$0xff] %v14726_v60  ;;  %v1122_v39 = vpop.permute.xlu0 %1121  ;;  %vm1141_vm2 = vcmp.eq.s32.totalorder %v10701_v32, %v1119_v34  ;;  %v14741_v60 = vmov 1.0|1.0   ;;  %14743 = vst [vmem:[#allocation68_spill] sm:$0xff] %v10809_v5  ;;  %v10813_v56 = vpop.f32.mrb[6].mxu0 }
 0x23e   :  { %vm1142_vm3 = vcmp.eq.s32.totalorder %v10701_v32, %v1122_v39  ;;  %14744 = vst [vmem:[#allocation69_spill] sm:$0xff] %v10813_v56  ;;  %v10815_v37 = vpop.f32.mrb[7].mxu0 }
 0x23f   :  { %vm10791_vm8 = vmpackc.low %vm1142_vm3, %vm1141_vm2  ;;  %14745 = vst [vmem:[#allocation70_spill] sm:$0xff] %v10815_v37  ;;  %v10835_v4 = vpop.f32.mrb[8].mxu0 }
 0x240   :  { %v14736_v33 = vsel %vm10791_vm8, 4294967295, %v14735_v33  ;;  %v1125_v34 = vpop.permute.xlu1 %1124  ;;  %vm10825_vm3 = vmpackc.low %vm826_vm14, %vm825_vm15  ;;  %14752 = vst [vmem:[#allocation73_spill] sm:$0xff] %v10835_v4  ;;  %v10838_v7 = vpop.f32.mrb[9].mxu0  ;;  %vm829_vm14 = vcmp.eq.s32.totalorder %v10701_v32, %v10580_v11  ;;  %v14770_v11 = vmov 0 }
 0x241   :  { %14737 = vst [vmem:[#allocation65_spill] sm:$0xff] %v14736_v33  ;;  %v1128_v39 = vpop.permute.xlu0 %1127  ;;  %vm1143_vm12 = vcmp.eq.s32.totalorder %v10701_v32, %v1125_v34  ;;  %v14746_v33 = vmov 0  ;;  %14753 = vst [vmem:[#allocation74_spill] sm:$0xff] %v10838_v7  ;;  %v10840_v34 = vpop.f32.mrb[10].mxu0 }
 0x242   :  { %vm1144_vm13 = vcmp.eq.s32.totalorder %v10701_v32, %v1128_v39  ;;  %14754 = vst [vmem:[#allocation75_spill] sm:$0xff] %v10840_v34  ;;  %v10842_v39 = vpop.f32.mrb[11].mxu0 }
 0x243   :  { %7251 = vmatmul.mubr.msk.bf16.gmra.mrb[36].mxu0 %vm10743_vm11, %v14409_v59  ;;  %7305 = vmatmul.mubr.msk.bf16.gmra.mrb[36].mxu1 %vm10739_vm10, %v14409_v59  ;;  %vm10821_vm2 = vmpackc.low %vm1144_vm13, %vm1143_vm12  ;;  %14755 = vst [vmem:[#allocation76_spill] sm:$0xff] %v10842_v39  ;;  %vm830_vm13 = vcmp.eq.s32.totalorder %v10701_v32, %v10574_v8  ;;  %vm928_vm10 = vcmp.eq.s32.totalorder %v10701_v32, %v10600_v21  ;;  %v14806_v21 = vmov 0 }
 0x244   :  { %1390 = vmatprep.mubr.bf16.mxu0 %v14711_v53  ;;  %1660 = vmatprep.mubr.bf16.mxu1 %v14711_v53  ;;  %v14747_v33 = vsel %vm10821_vm2, 4294967295, %v14746_v33  ;;  %vm10848_vm12 = vmpackc.low %vm828_vm6, %vm827_vm7  ;;  %vm832_vm6 = vcmp.eq.s32.totalorder %v10701_v32, %v10578_v10  ;;  %vm831_vm7 = vcmp.eq.s32.totalorder %v10701_v32, %v10584_v13 }
 0x245   :  { %14748 = vst [vmem:[#allocation71_spill] sm:$0xff] %v14747_v33  ;;  %v10855_v33 = vpop.f32.mrb[12].mxu0  ;;  %vm10868_vm15 = vmpackc.low %vm830_vm13, %vm829_vm14  ;;  %vm922_vm14 = vcmp.eq.s32.totalorder %v10701_v32, %v10582_v12 }
 0x246   :  { %14759 = vst [vmem:[#allocation78_spill] sm:$0xff] %v10855_v33  ;;  %v10858_v62 = vpop.f32.mrb[13].mxu0  ;;  %v14764_v9 = vsel %vm10868_vm15, 4294967295, %v14763_v9  ;;  %vm10888_vm13 = vmpackc.low %vm832_vm6, %vm831_vm7  ;;  %vm924_vm7 = vcmp.eq.s32.totalorder %v10701_v32, %v10592_v17  ;;  %v14791_v17 = vmov 0 }
 0x247   :  { %14760 = vst [vmem:[#allocation79_spill] sm:$0xff] %v10858_v62  ;;  %v10860_v52 = vpop.f32.mrb[14].mxu0  ;;  %14765 = vst [vmem:[#allocation82_spill] sm:$0xff] %v14764_v9  ;;  %v14771_v11 = vsel %vm10888_vm13, 4294967295, %v14770_v11 }
 0x248   :  { %14761 = vst [vmem:[#allocation80_spill] sm:$0xff] %v10860_v52  ;;  %v10862_v6 = vpop.f32.mrb[15].mxu0  ;;  %14772 = vst [vmem:[#allocation87_spill] sm:$0xff] %v14771_v11 }
 0x249   :  { %14762 = vst [vmem:[#allocation81_spill] sm:$0xff] %v10862_v6 }
 0x24b   :  { %7253 = vmatmul.mubr.msk.bf16.gmra.mrb[40].mxu0 %vm10765_vm1, %v14409_v59  ;;  %7307 = vmatmul.mubr.msk.bf16.gmra.mrb[40].mxu1 %vm10761_vm0, %v14409_v59  ;;  %v14738_v59 = vmov 0  ;;  %vm927_vm0 = vcmp.eq.s32.totalorder %v10701_v32, %v10594_v18  ;;  %v14797_v18 = vmov 0 }
 0x24c   :  { %1400 = vmatprep.mubr.bf16.mxu0 %v14711_v53  ;;  %1670 = vmatprep.mubr.bf16.mxu1 %v14711_v53  ;;  %v14739_v59 = vsel %vm10795_vm9, 4294967295, %v14738_v59  ;;  %vm10960_vm4 = vmpackc.low %vm928_vm10, %vm927_vm0  ;;  %vm931_vm10 = vcmp.eq.s32.totalorder %v10701_v32, %v10602_v22  ;;  %vm932_vm0 = vcmp.eq.s32.totalorder %v10701_v32, %v10608_v25  ;;  %v14809_v22 = vmov 0 }
 0x24d   :  { %14740 = vst [vmem:[#allocation66_spill] sm:$0xff] %v14739_v59  ;;  %v14749_v59 = vmov 0  ;;  %v14818_v25 = vmov 0 }
 0x24e   :  { %v14750_v59 = vsel %vm10825_vm3, 4294967295, %v14749_v59 }
 0x24f   :  { %14751 = vst [vmem:[#allocation72_spill] sm:$0xff] %v14750_v59  ;;  %v14756_v59 = vmov 0 }
 0x250   :  { %v14757_v59 = vsel %vm10848_vm12, 4294967295, %v14756_v59 }
 0x251   :  { %14758 = vst [vmem:[#allocation77_spill] sm:$0xff] %v14757_v59  ;;  %v10875_v59 = vpop.f32.mrb[16].mxu0 }
 0x252   :  { %14766 = vst [vmem:[#allocation83_spill] sm:$0xff] %v10875_v59  ;;  %v10878_v45 = vpop.f32.mrb[17].mxu0  ;;  %v14886_v59 = vld [vmem:[#allocation52_spill] sm:$0xff] }
 0x253   :  { %7255 = vmatmul.mubr.msk.bf16.gmra.mrb[44].mxu0 %vm10795_vm9, %v14741_v60  ;;  %7309 = vmatmul.mubr.msk.bf16.gmra.mrb[44].mxu1 %vm10791_vm8, %v14741_v60  ;;  %14767 = vst [vmem:[#allocation84_spill] sm:$0xff] %v10878_v45  ;;  %v10880_v6 = vpop.f32.mrb[18].mxu0 }
 0x254   :  { %1410 = vmatprep.mubr.bf16.mxu0 %v14711_v53  ;;  %1680 = vmatprep.mubr.bf16.mxu1 %v14711_v53  ;;  %14768 = vst [vmem:[#allocation85_spill] sm:$0xff] %v10880_v6  ;;  %v10882_v8 = vpop.f32.mrb[19].mxu0 }
 0x255   :  { %14769 = vst [vmem:[#allocation86_spill] sm:$0xff] %v10882_v8  ;;  %v10895_v9 = vpop.f32.mrb[20].mxu0  ;;  %v14777_v8 = vmov 0 }
 0x256   :  { %14773 = vst [vmem:[#allocation88_spill] sm:$0xff] %v10895_v9  ;;  %v10898_v45 = vpop.f32.mrb[21].mxu0 }
 0x257   :  { %14774 = vst [vmem:[#allocation89_spill] sm:$0xff] %v10898_v45  ;;  %v10904_v10 = vpop.f32.mrb[22].mxu0 }
 0x258   :  { %14775 = vst [vmem:[#allocation90_spill] sm:$0xff] %v10904_v10  ;;  %v10906_v13 = vpop.f32.mrb[23].mxu0 }
 0x259   :  { %14776 = vst [vmem:[#allocation91_spill] sm:$0xff] %v10906_v13  ;;  %v10915_v11 = vpop.f32.mrb[24].mxu0  ;;  %v14784_v13 = vmov 0 }
 0x25a   :  { %14780 = vst [vmem:[#allocation93_spill] sm:$0xff] %v10915_v11  ;;  %v10918_v12 = vpop.f32.mrb[25].mxu0 }
 0x25b   :  { %7257 = vmatmul.mubr.msk.bf16.gmra.mrb[48].mxu0 %vm10825_vm3, %v14741_v60  ;;  %7311 = vmatmul.mubr.msk.bf16.gmra.mrb[48].mxu1 %vm10821_vm2, %v14741_v60  ;;  %vm921_vm2 = vcmp.eq.s32.totalorder %v10701_v32, %v10588_v15  ;;  %14781 = vst [vmem:[#allocation94_spill] sm:$0xff] %v10918_v12  ;;  %v10920_v45 = vpop.f32.mrb[26].mxu0 }
 0x25c   :  { %1420 = vmatprep.mubr.bf16.mxu0 %v14711_v53  ;;  %vm10908_vm6 = vmpackc.low %vm922_vm14, %vm921_vm2  ;;  %14782 = vst [vmem:[#allocation95_spill] sm:$0xff] %v10920_v45  ;;  %v10922_v15 = vpop.f32.mrb[27].mxu0  ;;  %vm923_vm2 = vcmp.eq.s32.totalorder %v10701_v32, %v10586_v14 }
 0x25d   :  { %v14778_v8 = vsel %vm10908_vm6, 4294967295, %v14777_v8  ;;  %14783 = vst [vmem:[#allocation96_spill] sm:$0xff] %v10922_v15  ;;  %vm10928_vm14 = vmpackc.low %vm924_vm7, %vm923_vm2  ;;  %vm925_vm2 = vcmp.eq.s32.totalorder %v10701_v32, %v10590_v16  ;;  %vm926_vm7 = vcmp.eq.s32.totalorder %v10701_v32, %v10596_v19  ;;  %v14794_v16 = vmov 0 }
 0x25e   :  { %14779 = vst [vmem:[#allocation92_spill] sm:$0xff] %v14778_v8  ;;  %v14785_v13 = vsel %vm10928_vm14, 4294967295, %v14784_v13  ;;  %v10935_v8 = vpop.f32.mrb[28].mxu0  ;;  %vm10948_vm8 = vmpackc.low %vm926_vm7, %vm925_vm2  ;;  %v14795_v16 = vsel %vm10960_vm4, 4294967295, %v14794_v16  ;;  %vm929_vm2 = vcmp.eq.s32.totalorder %v10701_v32, %v10598_v20  ;;  %vm930_vm7 = vcmp.eq.s32.totalorder %v10701_v32, %v10604_v23 }
 0x25f   :  { %14786 = vst [vmem:[#allocation97_spill] sm:$0xff] %v14785_v13  ;;  %14787 = vst [vmem:[#allocation98_spill] sm:$0xff] %v10935_v8  ;;  %v10938_v12 = vpop.f32.mrb[29].mxu0  ;;  %v14792_v17 = vsel %vm10948_vm8, 4294967295, %v14791_v17  ;;  %v14800_v19 = vmov 0  ;;  %v14803_v20 = vmov 0 }
 0x260   :  { %14788 = vst [vmem:[#allocation99_spill] sm:$0xff] %v10938_v12  ;;  %v10940_v15 = vpop.f32.mrb[30].mxu0  ;;  %14793 = vst [vmem:[#allocation102_spill] sm:$0xff] %v14792_v17  ;;  %v14812_v23 = vmov 0  ;;  %v14870_v13 = vld [vmem:[#allocation45_spill] sm:$0xff] }
 0x261   :  { %14789 = vst [vmem:[#allocation100_spill] sm:$0xff] %v10940_v15  ;;  %v10942_v14 = vpop.f32.mrb[31].mxu0  ;;  %14796 = vst [vmem:[#allocation103_spill] sm:$0xff] %v14795_v16 }
 0x262   :  { %14790 = vst [vmem:[#allocation101_spill] sm:$0xff] %v10942_v14 }
 0x263   :  { %7259 = vmatmul.mubr.msk.bf16.gmra.mrb[52].mxu0 %vm10848_vm12, %v14741_v60 }
 0x264   :  { %1430 = vmatprep.mubr.bf16.mxu0 %v14711_v53 }
 0x26b   :  { %7261 = vmatmul.mubr.msk.bf16.gmra.mrb[56].mxu0 %vm10868_vm15, %v14741_v60 }
 0x26c   :  { %1440 = vmatprep.mubr.bf16.mxu0 %v14711_v53 }
 0x273   :  { %7263 = vmatmul.mubr.msk.bf16.gmra.mrb[60].mxu0 %vm10888_vm13, %v14741_v60 }
 0x274   :  { %1450 = vmatprep.mubr.bf16.mxu0 %v14711_v53 }
 0x27b   :  { %7265 = vmatmul.mubr.msk.bf16.gmra.mrb[64].mxu0 %vm10908_vm6, %v14741_v60 }
 0x27c   :  { %1460 = vmatprep.mubr.bf16.mxu0 %v14711_v53 }
 0x283   :  { %7267 = vmatmul.mubr.msk.bf16.gmra.mrb[68].mxu0 %vm10928_vm14, %v14741_v60 }
 0x284   :  { %1470 = vmatprep.mubr.bf16.mxu0 %v14711_v53 }
 0x28b   :  { %7269 = vmatmul.mubr.msk.bf16.gmra.mrb[72].mxu0 %vm10948_vm8, %v14741_v60  ;;  %vm10972_vm8 = vmpackc.low %vm930_vm7, %vm929_vm2  ;;  %vm933_vm2 = vcmp.eq.s32.totalorder %v10701_v32, %v10606_v24  ;;  %vm934_vm7 = vcmp.eq.s32.totalorder %v10701_v32, %v10612_v27  ;;  %v14815_v24 = vmov 0  ;;  %v14824_v27 = vmov 0 }
 0x28c   :  { %1480 = vmatprep.mubr.bf16.mxu0 %v14711_v53  ;;  %v14798_v18 = vsel %vm10972_vm8, 4294967295, %v14797_v18 }
 0x28d   :  { %14799 = vst [vmem:[#allocation104_spill] sm:$0xff] %v14798_v18 }
 0x293   :  { %7271 = vmatmul.mubr.msk.bf16.gmra.mrb[76].mxu0 %vm10960_vm4, %v14741_v60  ;;  %vm10984_vm4 = vmpackc.low %vm932_vm0, %vm931_vm10  ;;  %vm935_vm10 = vcmp.eq.s32.totalorder %v10701_v32, %v10610_v26  ;;  %vm936_vm0 = vcmp.eq.s32.totalorder %v10701_v32, %v10616_v29  ;;  %v14821_v26 = vmov 0  ;;  %v14830_v29 = vmov 0 }
 0x294   :  { %1490 = vmatprep.mubr.bf16.mxu0 %v14711_v53  ;;  %v14801_v19 = vsel %vm10984_vm4, 4294967295, %v14800_v19 }
 0x295   :  { %14802 = vst [vmem:[#allocation105_spill] sm:$0xff] %v14801_v19  ;;  %v14866_v19 = vld [vmem:[#allocation46_spill] sm:$0xff] }
 0x29b   :  { %7273 = vmatmul.mubr.msk.bf16.gmra.mrb[80].mxu0 %vm10972_vm8, %v14741_v60  ;;  %vm10996_vm8 = vmpackc.low %vm934_vm7, %vm933_vm2  ;;  %vm1025_vm2 = vcmp.eq.s32.totalorder %v10701_v32, %v10614_v28  ;;  %vm1026_vm7 = vcmp.eq.s32.totalorder %v10701_v32, %v10628_v35  ;;  %v14827_v28 = vmov 0 }
 0x29c   :  { %1500 = vmatprep.mubr.bf16.mxu0 %v14711_v53  ;;  %v14804_v20 = vsel %vm10996_vm8, 4294967295, %v14803_v20 }
 0x29d   :  { %14805 = vst [vmem:[#allocation106_spill] sm:$0xff] %v14804_v20 }
 0x2a3   :  { %7275 = vmatmul.mubr.msk.bf16.gmra.mrb[84].mxu0 %vm10984_vm4, %v14741_v60  ;;  %vm11008_vm4 = vmpackc.low %vm936_vm0, %vm935_vm10  ;;  %vm1027_vm10 = vcmp.eq.s32.totalorder %v10701_v32, %v10618_v30  ;;  %vm1028_vm0 = vcmp.eq.s32.totalorder %v10701_v32, %v10630_v36  ;;  %v14836_v30 = vlaneseq  ;;  %v14838_v36 = vmov 0 }
 0x2a4   :  { %1510 = vmatprep.mubr.bf16.mxu0 %v14711_v53  ;;  %v14807_v21 = vsel %vm11008_vm4, 4294967295, %v14806_v21 }
 0x2a5   :  { %14808 = vst [vmem:[#allocation107_spill] sm:$0xff] %v14807_v21  ;;  %v11129_v35 = vshrl.u32 %v14836_v30, 7 }
 0x2a7   :  { %14837 = vst [vmem:[#allocation117_spill] sm:$0xff] %v11129_v35 }
 0x2ab   :  { %7277 = vmatmul.mubr.msk.bf16.gmra.mrb[88].mxu0 %vm10996_vm8, %v14741_v60  ;;  %vm11020_vm8 = vmpackc.low %vm1026_vm7, %vm1025_vm2  ;;  %vm1030_vm2 = vcmp.eq.s32.totalorder %v10701_v32, %v10642_v42  ;;  %vm1029_vm7 = vcmp.eq.s32.totalorder %v10701_v32, %v10638_v40  ;;  %v360_v40 = vsub.s32 2, %v11129_v35  ;;  %v348_v42 = vld [vmem:[#allocation16] sm:$0x7] }
 0x2ac   :  { %1520 = vmatprep.mubr.bf16.mxu0 %v14711_v53  ;;  %v14810_v22 = vsel %vm11020_vm8, 4294967295, %v14809_v22 }
 0x2ad   :  { %14811 = vst [vmem:[#allocation108_spill] sm:$0xff] %v14810_v22 }
 0x2b3   :  { %7279 = vmatmul.mubr.msk.bf16.gmra.mrb[92].mxu0 %vm11008_vm4, %v14741_v60  ;;  %vm11032_vm4 = vmpackc.low %vm1028_vm0, %vm1027_vm10  ;;  %vm1032_vm10 = vcmp.eq.s32.totalorder %v10701_v32, %v10650_v46  ;;  %vm1031_vm0 = vcmp.eq.s32.totalorder %v10701_v32, %v10646_v44  ;;  %v14841_v44 = vmov 0  ;;  %v14844_v46 = vld [vmem:[#allocation39_spill] sm:$0xff] }
 0x2b4   :  { %1530 = vmatprep.mubr.bf16.mxu0 %v14711_v53  ;;  %v14813_v23 = vsel %vm11032_vm4, 4294967295, %v14812_v23 }
 0x2b5   :  { %14814 = vst [vmem:[#allocation109_spill] sm:$0xff] %v14813_v23 }
 0x2bb   :  { %7281 = vmatmul.mubr.msk.bf16.gmra.mrb[96].mxu0 %vm11020_vm8, %v14741_v60  ;;  %vm11044_vm8 = vmpackc.low %vm1030_vm2, %vm1029_vm7  ;;  %vm1034_vm2 = vcmp.eq.s32.totalorder %v10701_v32, %v10658_v50  ;;  %vm1033_vm7 = vcmp.eq.s32.totalorder %v10701_v32, %v10656_v49  ;;  %v14846_v49 = vld [vmem:[#allocation42_spill] sm:$0xff] }
 0x2bc   :  { %1540 = vmatprep.mubr.bf16.mxu0 %v14711_v53  ;;  %v14816_v24 = vsel %vm11044_vm8, 4294967295, %v14815_v24 }
 0x2bd   :  { %14817 = vst [vmem:[#allocation110_spill] sm:$0xff] %v14816_v24 }
 0x2c3   :  { %7283 = vmatmul.mubr.msk.bf16.gmra.mrb[100].mxu0 %vm11032_vm4, %v14741_v60  ;;  %vm11056_vm4 = vmpackc.low %vm1032_vm10, %vm1031_vm0  ;;  %vm1036_vm10 = vcmp.eq.s32.totalorder %v10701_v32, %v10670_v58  ;;  %vm1035_vm0 = vcmp.eq.s32.totalorder %v10701_v32, %v10668_v57 }
 0x2c4   :  { %1550 = vmatprep.mubr.bf16.mxu0 %v14711_v53  ;;  %v14819_v25 = vsel %vm11056_vm4, 4294967295, %v14818_v25 }
 0x2c5   :  { %14820 = vst [vmem:[#allocation111_spill] sm:$0xff] %v14819_v25 }
 0x2cb   :  { %7285 = vmatmul.mubr.msk.bf16.gmra.mrb[104].mxu0 %vm11044_vm8, %v14741_v60  ;;  %vm11068_vm8 = vmpackc.low %vm1034_vm2, %vm1033_vm7  ;;  %vm1038_vm2 = vcmp.eq.s32.totalorder %v10701_v32, %v10674_v43  ;;  %vm1037_vm7 = vcmp.eq.s32.totalorder %v10701_v32, %v10672_v0  ;;  %v14833_v0 = vmov 0  ;;  %v11144_v43 = vrot.slane %v348_v42, %v360_v40 }
 0x2cc   :  { %1560 = vmatprep.mubr.bf16.mxu0 %v14711_v53  ;;  %v14822_v26 = vsel %vm11068_vm8, 4294967295, %v14821_v26 }
 0x2cd   :  { %14823 = vst [vmem:[#allocation112_spill] sm:$0xff] %v14822_v26  ;;  %v11159_v50 = vadd.f32 %v14846_v49, %v11144_v43  ;;  %v11215_v18 = vadd.f32 %v14866_v19, %v11144_v43 }
 0x2cf   :  { %14847 = vst [vmem:[#allocation42_spill] sm:$0xff] %v11159_v50  ;;  %14867 = vst [vmem:[#allocation46_spill] sm:$0xff] %v11215_v18 }
 0x2d3   :  { %7287 = vmatmul.mubr.msk.bf16.gmra.mrb[108].mxu0 %vm11056_vm4, %v14741_v60  ;;  %vm11080_vm4 = vmpackc.low %vm1036_vm10, %vm1035_vm0  ;;  %vm1040_vm10 = vcmp.eq.s32.totalorder %v10701_v32, %v10680_v48  ;;  %vm1039_vm0 = vcmp.eq.s32.totalorder %v10701_v32, %v10678_v55  ;;  %v11155_v48 = vadd.f32 %v14844_v46, %v11144_v43 }
 0x2d4   :  { %1570 = vmatprep.mubr.bf16.mxu0 %v14711_v53  ;;  %v14825_v27 = vsel %vm11080_vm4, 4294967295, %v14824_v27 }
 0x2d5   :  { %14826 = vst [vmem:[#allocation113_spill] sm:$0xff] %v14825_v27  ;;  %14845 = vst [vmem:[#allocation39_spill] sm:$0xff] %v11155_v48 }
 0x2db   :  { %7289 = vmatmul.mubr.msk.bf16.gmra.mrb[112].mxu0 %vm11068_vm8, %v14741_v60  ;;  %vm11092_vm8 = vmpackc.low %vm1038_vm2, %vm1037_vm7  ;;  %vm1130_vm2 = vcmp.eq.s32.totalorder %v10701_v32, %v10688_v47  ;;  %vm1129_vm7 = vcmp.eq.s32.totalorder %v10701_v32, %v10684_v41  ;;  %v14849_v47 = vld [vmem:[#allocation41_spill] sm:$0xff] }
 0x2dc   :  { %1580 = vmatprep.mubr.bf16.mxu0 %v14711_v53  ;;  %v14828_v28 = vsel %vm11092_vm8, 4294967295, %v14827_v28 }
 0x2dd   :  { %14829 = vst [vmem:[#allocation114_spill] sm:$0xff] %v14828_v28 }
 0x2e3   :  { %7291 = vmatmul.mubr.msk.bf16.gmra.mrb[116].mxu0 %vm11080_vm4, %v14741_v60  ;;  %vm11104_vm4 = vmpackc.low %vm1040_vm10, %vm1039_vm0  ;;  %vm1131_vm10 = vcmp.eq.s32.totalorder %v10701_v32, %v10698_v31  ;;  %vm1132_vm0 = vcmp.eq.s32.totalorder %v10701_v32, %v10694_v51  ;;  %v11167_v51 = vadd.f32 %v14849_v47, %v11144_v43  ;;  %v14851_v31 = vld [vmem:[#allocation44_spill] sm:$0xff] }
 0x2e4   :  { %1590 = vmatprep.mubr.bf16.mxu0 %v14711_v53  ;;  %v14831_v29 = vsel %vm11104_vm4, 4294967295, %v14830_v29 }
 0x2e5   :  { %14832 = vst [vmem:[#allocation115_spill] sm:$0xff] %v14831_v29  ;;  %14850 = vst [vmem:[#allocation41_spill] sm:$0xff] %v11167_v51 }
 0x2eb   :  { %7293 = vmatmul.mubr.msk.bf16.gmra.mrb[120].mxu0 %vm11092_vm8, %v14741_v60  ;;  %vm11116_vm8 = vmpackc.low %vm1130_vm2, %vm1129_vm7  ;;  %vm1133_vm2 = vcmp.eq.s32.totalorder %v10701_v32, %v10729_v61  ;;  %vm1134_vm7 = vcmp.eq.s32.totalorder %v10701_v32, %v10731_v63  ;;  %v11171_v61 = vadd.f32 %v14851_v31, %v11144_v43 }
 0x2ec   :  { %1600 = vmatprep.mubr.bf16.mxu0 %v14711_v53  ;;  %v14834_v0 = vsel %vm11116_vm8, 4294967295, %v14833_v0 }
 0x2ed   :  { %14835 = vst [vmem:[#allocation116_spill] sm:$0xff] %v14834_v0  ;;  %14852 = vst [vmem:[#allocation44_spill] sm:$0xff] %v11171_v61 }
 0x2f3   :  { %7295 = vmatmul.mubr.msk.bf16.gmra.mrb[124].mxu0 %vm11104_vm4, %v14741_v60  ;;  %vm11131_vm4 = vmpackc.low %vm1132_vm0, %vm1131_vm10 }
 0x2f4   :  { %1610 = vmatprep.mubr.bf16.mxu0 %v14711_v53  ;;  %v14839_v36 = vsel %vm11131_vm4, 4294967295, %v14838_v36  ;;  %vm11146_vm10 = vmpackc.low %vm1134_vm7, %vm1133_vm2 }
 0x2f5   :  { %14840 = vst [vmem:[#allocation118_spill] sm:$0xff] %v14839_v36  ;;  %v14842_v44 = vsel %vm11146_vm10, 4294967295, %v14841_v44 }
 0x2f6   :  { %14843 = vst [vmem:[#allocation119_spill] sm:$0xff] %v14842_v44 }
 0x2fb   :  { %7297 = vmatmul.mubr.msk.bf16.gmra.mrb[128].mxu0 %vm11116_vm8, %v14741_v60 }
 0x2fc   :  { %1620 = vmatprep.mubr.bf16.mxu0 %v14711_v53 }
 0x303   :  { %7299 = vmatmul.mubr.msk.bf16.gmra.mrb[132].mxu0 %vm11131_vm4, %v14741_v60 }
 0x304   :  { %1630 = vmatprep.mubr.bf16.mxu0 %v14711_v53  ;;  %v8548_v53 = vld [vmem:[#allocation17 + $0x18] sm:$0xff]  }
 0x30b   :  { %7301 = vmatmul.mubr.msk.bf16.gmra.mrb[136].mxu0 %vm11146_vm10, %v14741_v60  ;;  %v11229_v60 = vadd.f32 %v14870_v13, %v11144_v43 }
 0x30d   :  { %14871 = vst [vmem:[#allocation45_spill] sm:$0xff] %v11229_v60 }
 0x30e   :  { %v11161_v55 = vpop.f32.mrb[32].mxu0  ;;  %v11163_v57 = vpop.f32.mrb[32].mxu1 }
 0x30f   :  { %14848 = vst [vmem:[#allocation120_spill] sm:$0xff] %v11163_v57  ;;  %v1374_v58 = vpop.f32.mrb[33].mxu0  ;;  %v1644_v41 = vpop.f32.mrb[33].mxu1 }
 0x310   :  { %v1691_v63 = vadd.f32 %v1374_v58, %v11155_v48  ;;  %v2177_v30 = vadd.f32 %v1644_v41, %v11159_v50  ;;  %v11175_v40 = vpop.f32.mrb[34].mxu0  ;;  %v11177_v42 = vpop.f32.mrb[34].mxu1  ;;  %v14854_v58 = vld [vmem:[#allocation38_spill] sm:$0xff]  ;;  %v14856_v41 = vld [vmem:[#allocation47_spill] sm:$0xff] }
 0x311   :  { %14853 = vst [vmem:[#allocation121_spill] sm:$0xff] %v11177_v42  ;;  %v1378_v46 = vpop.f32.mrb[35].mxu0  ;;  %v1648_v49 = vpop.f32.mrb[35].mxu1  ;;  %v11183_v28 = vadd.f32 %v14854_v58, %v11144_v43  ;;  %v11187_v27 = vadd.f32 %v14856_v41, %v11144_v43 }
 0x312   :  { %v7312_v44 = vmul.f32 -1.442695, %v1691_v63  ;;  %v7366_v36 = vmul.f32 -1.442695, %v2177_v30  ;;  %v1692_v0 = vadd.f32 %v1378_v46, %v11167_v51  ;;  %v2178_v47 = vadd.f32 %v1648_v49, %v11171_v61 }
 0x313   :  { %14855 = vst [vmem:[#allocation38_spill] sm:$0xff] %v11183_v28  ;;  %14857 = vst [vmem:[#allocation47_spill] sm:$0xff] %v11187_v27 }
 0x314   :  { %8585 = vpow2.f32 %v7312_v44  ;;  %v7313_v29 = vmul.f32 -1.442695, %v1692_v0  ;;  %v7367_v31 = vmul.f32 -1.442695, %v2178_v47  ;;  %v14859_v0 = vld [vmem:[#allocation40_spill] sm:$0xff] }
 0x315   :  { %8587 = vpow2.f32 %v7366_v36  ;;  %v11195_v44 = vadd.f32 %v14859_v0, %v11144_v43  ;;  %v14861_v36 = vld [vmem:[#allocation49_spill] sm:$0xff] }
 0x316   :  { %8589 = vpow2.f32 %v7313_v29  ;;  %v11189_v26 = vpop.f32.mrb[36].mxu0  ;;  %v11191_v63 = vpop.f32.mrb[36].mxu1  ;;  %v11199_v49 = vadd.f32 %v14861_v36, %v11144_v43 }
 0x317   :  { %14858 = vst [vmem:[#allocation122_spill] sm:$0xff] %v11191_v63  ;;  %8591 = vpow2.f32 %v7367_v31  ;;  %v1384_v30 = vpop.f32.mrb[37].mxu0  ;;  %v1654_v46 = vpop.f32.mrb[37].mxu1  ;;  %14860 = vst [vmem:[#allocation40_spill] sm:$0xff] %v11195_v44 }
 0x318   :  { %14862 = vst [vmem:[#allocation49_spill] sm:$0xff] %v11199_v49  ;;  %v1693_v47 = vadd.f32 %v1384_v30, %v11183_v28  ;;  %v2179_v58 = vadd.f32 %v1654_v46, %v11187_v27  ;;  %v11203_v29 = vpop.f32.mrb[38].mxu0  ;;  %v11205_v41 = vpop.f32.mrb[38].mxu1  ;;  %v14864_v30 = vld [vmem:[#allocation43_spill] sm:$0xff] }
 0x319   :  { %14863 = vst [vmem:[#allocation123_spill] sm:$0xff] %v11205_v41  ;;  %v1388_v25 = vpop.f32.mrb[39].mxu0  ;;  %v1658_v31 = vpop.f32.mrb[39].mxu1  ;;  %v11211_v46 = vadd.f32 %v14864_v30, %v11144_v43 }
 0x31a   :  { %v7314_v24 = vmul.f32 -1.442695, %v1693_v47  ;;  %v7368_v23 = vmul.f32 -1.442695, %v2179_v58  ;;  %v1694_v22 = vadd.f32 %v1388_v25, %v11195_v44  ;;  %v2180_v0 = vadd.f32 %v1658_v31, %v11199_v49 }
 0x31b   :  { %14865 = vst [vmem:[#allocation43_spill] sm:$0xff] %v11211_v46 }
 0x31c   :  { %8593 = vpow2.f32 %v7314_v24  ;;  %v7315_v21 = vmul.f32 -1.442695, %v1694_v22  ;;  %v7369_v36 = vmul.f32 -1.442695, %v2180_v0 }
 0x31d   :  { %8595 = vpow2.f32 %v7368_v23 }
 0x31e   :  { %v8586_v20 = vpop.eup %8585  ;;  %8597 = vpow2.f32 %v7315_v21  ;;  %v11217_v47 = vpop.f32.mrb[40].mxu0 }
 0x31f   :  { %v11219_v58 = vpop.f32.mrb[40].mxu1  ;;  %v8588_v25 = vpop.eup %8587  ;;  %v1755_v31 = vadd.f32 1.0, %v8586_v20  ;;  %8599 = vpow2.f32 %v7369_v36  ;;  %v14872_v20 = vld [vmem:[#allocation48_spill] sm:$0xff] }
 0x320   :  { %14868 = vst [vmem:[#allocation124_spill] sm:$0xff] %v11219_v58  ;;  %v1394_v22 = vpop.f32.mrb[41].mxu0  ;;  %v1664_v24 = vpop.f32.mrb[41].mxu1  ;;  %v2241_v0 = vadd.f32 1.0, %v8588_v25  ;;  %v11233_v36 = vadd.f32 %v14872_v20, %v11144_v43  ;;  %v14874_v20 = vld [vmem:[#allocation51_spill] sm:$0xff] }
 0x321   :  { %v8590_v23 = vpop.eup %8589  ;;  %v1695_v16 = vadd.f32 %v1394_v22, %v11211_v46  ;;  %v2181_v30 = vadd.f32 %v1664_v24, %v11215_v18  ;;  %v11223_v17 = vpop.f32.mrb[42].mxu0  ;;  %8601 = vrcp.f32 %v1755_v31  ;;  %v11239_v31 = vadd.f32 %v14874_v20, %v11144_v43  ;;  %v14878_v20 = vld [vmem:[#allocation53_spill] sm:$0xff] }
 0x322   :  { %v11225_v19 = vpop.f32.mrb[42].mxu1  ;;  %v8592_v21 = vpop.eup %8591  ;;  %14873 = vst [vmem:[#allocation48_spill] sm:$0xff] %v11233_v36  ;;  %v1756_v14 = vadd.f32 1.0, %v8590_v23  ;;  %8603 = vrcp.f32 %v2241_v0  ;;  %v11253_v3 = vadd.f32 %v14878_v20, %v11144_v43 }
 0x323   :  { %14869 = vst [vmem:[#allocation125_spill] sm:$0xff] %v11225_v19  ;;  %v1398_v25 = vpop.f32.mrb[43].mxu0  ;;  %v1668_v12 = vpop.f32.mrb[43].mxu1  ;;  %v2242_v22 = vadd.f32 1.0, %v8592_v21  ;;  %v7316_v24 = vmul.f32 -1.442695, %v1695_v16 }
 0x324   :  { %v7370_v62 = vmul.f32 -1.442695, %v2181_v30  ;;  %8605 = vrcp.f32 %v1756_v14  ;;  %v1696_v39 = vadd.f32 %v1398_v25, %v11229_v60  ;;  %v2182_v7 = vadd.f32 %v1668_v12, %v11233_v36  ;;  %14875 = vst [vmem:[#allocation51_spill] sm:$0xff] %v11239_v31  ;;  %14879 = vst [vmem:[#allocation53_spill] sm:$0xff] %v11253_v3 }
 0x325   :  { %8607 = vrcp.f32 %v2242_v22 }
 0x326   :  { %8609 = vpow2.f32 %v7316_v24  ;;  %v7317_v13 = vmul.f32 -1.442695, %v1696_v39  ;;  %v7371_v38 = vmul.f32 -1.442695, %v2182_v7  ;;  %v8594_v37 = vpop.eup %8593  ;;  %v11241_v23 = vpop.f32.mrb[44].mxu0 }
 0x327   :  { %8611 = vpow2.f32 %v7370_v62  ;;  %v11243_v0 = vpop.f32.mrb[44].mxu1  ;;  %v8596_v16 = vpop.eup %8595  ;;  %v1757_v14 = vadd.f32 1.0, %v8594_v37 }
 0x328   :  { %14876 = vst [vmem:[#allocation126_spill] sm:$0xff] %v11243_v0  ;;  %8613 = vpow2.f32 %v7317_v13  ;;  %v1404_v30 = vpop.f32.mrb[45].mxu0  ;;  %v1674_v21 = vpop.f32.mrb[45].mxu1  ;;  %v2243_v25 = vadd.f32 1.0, %v8596_v16 }
 0x329   :  { %v8598_v12 = vpop.eup %8597  ;;  %8615 = vpow2.f32 %v7371_v38  ;;  %v1697_v7 = vadd.f32 %v1404_v30, %v11159_v50  ;;  %v2183_v39 = vadd.f32 %v1674_v21, %v11239_v31  ;;  %v11247_v22 = vpop.f32.mrb[46].mxu0 }
 0x32a   :  { %v11249_v24 = vpop.f32.mrb[46].mxu1  ;;  %v8600_v62 = vpop.eup %8599  ;;  %8617 = vrcp.f32 %v1757_v14  ;;  %v1758_v37 = vadd.f32 1.0, %v8598_v12 }
 0x32b   :  { %14877 = vst [vmem:[#allocation127_spill] sm:$0xff] %v11249_v24  ;;  %v1408_v13 = vpop.f32.mrb[47].mxu0  ;;  %v1678_v5 = vpop.f32.mrb[47].mxu1  ;;  %8619 = vrcp.f32 %v2243_v25  ;;  %v2244_v16 = vadd.f32 1.0, %v8600_v62  ;;  %v7318_v38 = vmul.f32 -1.442695, %v1697_v7 }
 0x32c   :  { %v7372_v45 = vmul.f32 -1.442695, %v2183_v39  ;;  %v8602_v30 = vpop.eup %8601  ;;  %8621 = vrcp.f32 %v1758_v37  ;;  %v1698_v21 = vadd.f32 %v1408_v13, %v11171_v61  ;;  %v2184_v15 = vadd.f32 %v1678_v5, %v11253_v3  ;;  %v14881_v39 = vld [vmem:[#allocation50_spill] sm:$0xff] }
 0x32d   :  { %v8604_v11 = vpop.eup %8603  ;;  %8623 = vrcp.f32 %v2244_v16  ;;  %v11258_v8 = vmul.f32 %v8602_v30, %v11161_v55  ;;  %v11265_v62 = vadd.f32 %v14881_v39, %v11144_v43 }
 0x32e   :  { %v8606_v20 = vpop.eup %8605  ;;  %8625 = vpow2.f32 %v7318_v38  ;;  %v7319_v14 = vmul.f32 -1.442695, %v1698_v21  ;;  %v7373_v12 = vmul.f32 -1.442695, %v2184_v15  ;;  %v11261_v25 = vmul.f32 %v8604_v11, %v11163_v57  ;;  %v11267_v37 = vpop.f32.mrb[48].mxu0 }
 0x32f   :  { %v8608_v7 = vpop.eup %8607  ;;  %14882 = vst [vmem:[#allocation50_spill] sm:$0xff] %v11265_v62  ;;  %8627 = vpow2.f32 %v7372_v45  ;;  %v11269_v5 = vpop.f32.mrb[48].mxu1  ;;  %v11272_v13 = vmul.f32 %v8606_v20, %v11175_v40 }
 0x330   :  { %14880 = vst [vmem:[#allocation128_spill] sm:$0xff] %v11261_v25  ;;  %14883 = vst [vmem:[#allocation129_spill] sm:$0xff] %v11269_v5  ;;  %v8610_v16 = vpop.eup %8609  ;;  %8629 = vpow2.f32 %v7319_v14  ;;  %v1414_v38 = vpop.f32.mrb[49].mxu0  ;;  %v11275_v11 = vmul.f32 %v8608_v7, %v11177_v42  ;;  %v11285_v14 = vadd.f32 %v14886_v59, %v11144_v43 }
 0x331   :  { %v1684_v15 = vpop.f32.mrb[49].mxu1  ;;  %v8612_v30 = vpop.eup %8611  ;;  %v1759_v21 = vadd.f32 1.0, %v8610_v16  ;;  %8631 = vpow2.f32 %v7373_v12  ;;  %v1699_v39 = vadd.f32 %v1414_v38, %v11187_v27 }
 0x332   :  { %14884 = vst [vmem:[#allocation130_spill] sm:$0xff] %v11275_v11  ;;  %v2185_v45 = vadd.f32 %v1684_v15, %v11265_v62  ;;  %v11279_v6 = vpop.f32.mrb[50].mxu0  ;;  %v11281_v10 = vpop.f32.mrb[50].mxu1  ;;  %14887 = vst [vmem:[#allocation52_spill] sm:$0xff] %v11285_v14  ;;  %v2245_v9 = vadd.f32 1.0, %v8612_v30 }
 0x333   :  { %14885 = vst [vmem:[#allocation131_spill] sm:$0xff] %v11281_v10  ;;  %v8614_v20 = vpop.eup %8613  ;;  %v1418_v34 = vpop.f32.mrb[51].mxu0  ;;  %8633 = vrcp.f32 %v1759_v21  ;;  %v7320_v12 = vmul.f32 -1.442695, %v1699_v39 }
 0x334   :  { %v1688_v7 = vpop.f32.mrb[51].mxu1  ;;  %v8616_v52 = vpop.eup %8615  ;;  %v1760_v16 = vadd.f32 1.0, %v8614_v20  ;;  %v7374_v4 = vmul.f32 -1.442695, %v2185_v45  ;;  %8635 = vrcp.f32 %v2245_v9  ;;  %v1700_v33 = vadd.f32 %v1418_v34, %v11199_v49 }
 0x335   :  { %v8618_v38 = vpop.eup %8617  ;;  %v2246_v15 = vadd.f32 1.0, %v8616_v52  ;;  %v2186_v54 = vadd.f32 %v1688_v7, %v11285_v14 }
 0x336   :  { %v8620_v56 = vpop.eup %8619  ;;  %v11290_v1 = vmul.f32 %v8618_v38, %v11189_v26  ;;  %8637 = vrcp.f32 %v1760_v16  ;;  %v7321_v43 = vmul.f32 -1.442695, %v1700_v33  ;;  %v11298_v52 = vpop.f32.mrb[52].mxu0 }
 0x337   :  { %v8622_v59 = vpop.eup %8621  ;;  %8639 = vrcp.f32 %v2246_v15  ;;  %v7375_v30 = vmul.f32 -1.442695, %v2186_v54  ;;  %v11293_v21 = vmul.f32 %v8620_v56, %v11191_v63  ;;  %v1424_v45 = vpop.f32.mrb[53].mxu0 }
 0x338   :  { %v8624_v39 = vpop.eup %8623  ;;  %v11296_v9 = vmul.f32 %v8622_v59, %v11203_v29  ;;  %8641 = vpow2.f32 %v7320_v12  ;;  %v1701_v33 = vadd.f32 %v1424_v45, %v11215_v18  ;;  %v11304_v56 = vpop.f32.mrb[54].mxu0 }
 0x339   :  { %14888 = vst [vmem:[#allocation132_spill] sm:$0xff] %v11293_v21  ;;  %v8626_v34 = vpop.eup %8625  ;;  %8643 = vpow2.f32 %v7374_v4  ;;  %v11301_v20 = vmul.f32 %v8624_v39, %v11205_v41  ;;  %v1428_v15 = vpop.f32.mrb[55].mxu0 }
 0x33a   :  { %v8628_v7 = vpop.eup %8627  ;;  %v1761_v16 = vadd.f32 1.0, %v8626_v34  ;;  %8645 = vpow2.f32 %v7321_v43  ;;  %v7322_v2 = vmul.f32 -1.442695, %v1701_v33  ;;  %v1702_v4 = vadd.f32 %v1428_v15, %v11233_v36 }
 0x33b   :  { %14889 = vst [vmem:[#allocation133_spill] sm:$0xff] %v11301_v20  ;;  %v8630_v54 = vpop.eup %8629  ;;  %v2247_v38 = vadd.f32 1.0, %v8628_v7  ;;  %8647 = vpow2.f32 %v7375_v30  ;;  %v8545_v7 = vld [vmem:[#allocation17] sm:$0xff]  }
 0x33c   :  { %v8632_v12 = vpop.eup %8631  ;;  %8649 = vrcp.f32 %v1761_v16  ;;  %v1762_v59 = vadd.f32 1.0, %v8630_v54  ;;  %v7323_v34 = vmul.f32 -1.442695, %v1702_v4  ;;  %8102 = vmatprep.subr.bf16.mxu1 %v8545_v7  ;;  %8198 = vmatprep.subr.bf16.mxu0 %v8545_v7 }
 0x33d   :  { %8651 = vrcp.f32 %v2247_v38  ;;  %v2248_v39 = vadd.f32 1.0, %v8632_v12  ;;  %v8634_v35 = vpop.eup %8633  ;;  %8103 = vmatpush3.bf16.msra.mxu1 %v8545_v7  ;;  %8199 = vmatpush3.bf16.msra.mxu0 %v8545_v7 }
 0x33e   :  { %8653 = vrcp.f32 %v1762_v59  ;;  %v8636_v43 = vpop.eup %8635  ;;  %v11308_v45 = vmul.f32 %v8634_v35, %v11217_v47  ;;  %v11310_v30 = vpop.f32.mrb[56].mxu0 }
 0x33f   :  { %8655 = vrcp.f32 %v2248_v39  ;;  %v11313_v16 = vmul.f32 %v8636_v43, %v11219_v58  ;;  %v1434_v54 = vpop.f32.mrb[57].mxu0 }
 0x340   :  { %v8638_v32 = vpop.eup %8637  ;;  %8657 = vpow2.f32 %v7322_v2  ;;  %v1703_v12 = vadd.f32 %v1434_v54, %v11239_v31  ;;  %v11319_v59 = vpop.f32.mrb[58].mxu0 }
 0x341   :  { %14890 = vst [vmem:[#allocation134_spill] sm:$0xff] %v11313_v16  ;;  %v8640_v33 = vpop.eup %8639  ;;  %8659 = vpow2.f32 %v7323_v34  ;;  %v11316_v38 = vmul.f32 %v8638_v32, %v11223_v17  ;;  %v1438_v39 = vpop.f32.mrb[59].mxu0  ;;  %v8546_v16 = vld [vmem:[#allocation17 + $0x8] sm:$0xff]  }
 0x342   :  { %v8642_v15 = vpop.eup %8641  ;;  %v11322_v2 = vmul.f32 %v8640_v33, %v11225_v19  ;;  %v1704_v32 = vadd.f32 %v1438_v39, %v11253_v3  ;;  %v7324_v21 = vmul.f32 -1.442695, %v1703_v12  ;;  %8104 = vmatprep.subr.bf16.mxu1 %v8546_v16  ;;  %8200 = vmatprep.subr.bf16.mxu0 %v8546_v16 }
 0x343   :  { %v8644_v35 = vpop.eup %8643  ;;  %v1763_v4 = vadd.f32 1.0, %v8642_v15  ;;  %8105 = vmatpush3.bf16.msra.mxu1 %v8546_v16  ;;  %8201 = vmatpush3.bf16.msra.mxu0 %v8546_v16 }
 0x344   :  { %14891 = vst [vmem:[#allocation135_spill] sm:$0xff] %v11322_v2  ;;  %v8646_v34 = vpop.eup %8645  ;;  %v2249_v43 = vadd.f32 1.0, %v8644_v35  ;;  %v7325_v33 = vmul.f32 -1.442695, %v1704_v32 }
 0x345   :  { %v8648_v20 = vpop.eup %8647  ;;  %8661 = vrcp.f32 %v1763_v4  ;;  %v1764_v54 = vadd.f32 1.0, %v8646_v34  ;;  %v8547_v4 = vld [vmem:[#allocation17 + $0x10] sm:$0xff]  }
 0x346   :  { %v8650_v11 = vpop.eup %8649  ;;  %8663 = vrcp.f32 %v2249_v43  ;;  %v2250_v25 = vadd.f32 1.0, %v8648_v20  ;;  %v11328_v35 = vpop.f32.mrb[60].mxu0  ;;  %8106 = vmatprep.subr.bf16.mxu1 %v8547_v4  ;;  %8202 = vmatprep.subr.bf16.mxu0 %v8547_v4 }
 0x347   :  { %v8652_v2 = vpop.eup %8651  ;;  %8665 = vrcp.f32 %v1764_v54  ;;  %v11326_v7 = vmul.f32 %v8650_v11, %v11241_v23  ;;  %v1444_v20 = vpop.f32.mrb[61].mxu0  ;;  %8107 = vmatpush3.bf16.msra.mxu1 %v8547_v4  ;;  %8203 = vmatpush3.bf16.msra.mxu0 %v8547_v4 }
 0x348   :  { %v8654_v15 = vpop.eup %8653  ;;  %8667 = vrcp.f32 %v2250_v25  ;;  %v11331_v12 = vmul.f32 %v8652_v2, %v11243_v0  ;;  %v1705_v11 = vadd.f32 %v1444_v20, %v11265_v62  ;;  %v11337_v32 = vpop.f32.mrb[62].mxu0  ;;  %8108 = vmatprep.subr.bf16.mxu1 %v8548_v53  ;;  %8204 = vmatprep.subr.bf16.mxu0 %v8548_v53  ;;  %v8550_v0 = vld [vmem:[#allocation17 + $0x28] sm:$0xff]  }
 0x349   :  { %v8656_v39 = vpop.eup %8655  ;;  %8669 = vpow2.f32 %v7324_v21  ;;  %v11334_v34 = vmul.f32 %v8654_v15, %v11247_v22  ;;  %v1448_v54 = vpop.f32.mrb[63].mxu0 }
 0x34a   :  { %14892 = vst [vmem:[#allocation136_spill] sm:$0xff] %v11331_v12  ;;  %v8658_v43 = vpop.eup %8657  ;;  %8671 = vpow2.f32 %v7325_v33  ;;  %v11340_v25 = vmul.f32 %v8656_v39, %v11249_v24  ;;  %v7326_v12 = vmul.f32 -1.442695, %v1705_v11  ;;  %v1706_v15 = vadd.f32 %v1448_v54, %v11285_v14 }
 0x34b   :  { %v8660_v16 = vpop.eup %8659  ;;  %v1765_v2 = vadd.f32 1.0, %v8658_v43  ;;  %8109 = vmatpush3.bf16.msra.mxu1 %v8548_v53  ;;  %8205 = vmatpush3.bf16.msra.mxu0 %v8548_v53 }
 0x34c   :  { %14893 = vst [vmem:[#allocation137_spill] sm:$0xff] %v11340_v25  ;;  %v1766_v21 = vadd.f32 1.0, %v8660_v16  ;;  %v7327_v33 = vmul.f32 -1.442695, %v1706_v15  ;;  %v8549_v25 = vld [vmem:[#allocation17 + $0x20] sm:$0xff]  }
 0x34d   :  { %8673 = vrcp.f32 %v1765_v2  ;;  %8110 = vmatprep.subr.bf16.mxu1 %v8549_v25  ;;  %8206 = vmatprep.subr.bf16.mxu0 %v8549_v25 }
 0x34e   :  { %8675 = vrcp.f32 %v1766_v21  ;;  %v11343_v43 = vpop.f32.mrb[64].mxu0 }
 0x34f   :  { %v8662_v20 = vpop.eup %8661  ;;  %8677 = vpow2.f32 %v7326_v12  ;;  %v11350_v16 = vadd.f32 %v11343_v43, %v11161_v55  ;;  %v1454_v2 = vpop.f32.mrb[65].mxu0  ;;  %8111 = vmatpush3.bf16.msra.mxu1 %v8549_v25  ;;  %8207 = vmatpush3.bf16.msra.mxu0 %v8549_v25  ;;  %v8551_v25 = vld [vmem:[#allocation17 + $0x30] sm:$0xff]  }
 0x350   :  { %v8664_v39 = vpop.eup %8663  ;;  %8679 = vpow2.f32 %v7327_v33  ;;  %v11346_v4 = vmul.f32 %v8662_v20, %v11267_v37  ;;  %v1851_v53 = vadd.f32 %v1454_v2, %v11155_v48  ;;  %v11356_v21 = vpop.f32.mrb[66].mxu0  ;;  %8112 = vmatprep.subr.bf16.mxu1 %v8550_v0  ;;  %8208 = vmatprep.subr.bf16.mxu0 %v8550_v0 }
 0x351   :  { %v8666_v11 = vpop.eup %8665  ;;  %v11353_v54 = vmul.f32 %v8664_v39, %v11269_v5  ;;  %v11363_v20 = vadd.f32 %v11356_v21, %v11175_v40  ;;  %v1458_v55 = vpop.f32.mrb[67].mxu0 }
 0x352   :  { %v8668_v12 = vpop.eup %8667  ;;  %v11359_v15 = vmul.f32 %v8666_v11, %v11279_v6  ;;  %v7328_v5 = vmul.f32 -1.442695, %v1851_v53  ;;  %v1852_v24 = vadd.f32 %v1458_v55, %v11167_v51 }
 0x353   :  { %14894 = vst [vmem:[#allocation138_spill] sm:$0xff] %v11353_v54  ;;  %v8670_v33 = vpop.eup %8669  ;;  %v11366_v39 = vmul.f32 %v8668_v12, %v11281_v10  ;;  %8113 = vmatpush3.bf16.msra.mxu1 %v8550_v0  ;;  %8209 = vmatpush3.bf16.msra.mxu0 %v8550_v0  ;;  %v8552_v10 = vld [vmem:[#allocation17 + $0x38] sm:$0xff]  }
 0x354   :  { %v8672_v54 = vpop.eup %8671  ;;  %v1767_v2 = vadd.f32 1.0, %v8670_v33  ;;  %v7329_v19 = vmul.f32 -1.442695, %v1852_v24  ;;  %8114 = vmatprep.subr.bf16.mxu1 %v8551_v25  ;;  %8210 = vmatprep.subr.bf16.mxu0 %v8551_v25 }
 0x355   :  { %14895 = vst [vmem:[#allocation139_spill] sm:$0xff] %v11366_v39  ;;  %v1768_v11 = vadd.f32 1.0, %v8672_v54 }
 0x356   :  { %8681 = vrcp.f32 %v1767_v2  ;;  %v11369_v12 = vpop.f32.mrb[68].mxu0 }
 0x357   :  { %v8674_v58 = vpop.eup %8673  ;;  %8683 = vrcp.f32 %v1768_v11  ;;  %v11376_v54 = vadd.f32 %v11369_v12, %v11189_v26  ;;  %v1464_v24 = vpop.f32.mrb[69].mxu0  ;;  %8115 = vmatpush3.bf16.msra.mxu1 %v8551_v25  ;;  %8211 = vmatpush3.bf16.msra.mxu0 %v8551_v25 }
 0x358   :  { %v8676_v40 = vpop.eup %8675  ;;  %8685 = vpow2.f32 %v7328_v5  ;;  %v11372_v33 = vmul.f32 %v8674_v58, %v11298_v52  ;;  %v1853_v5 = vadd.f32 %v1464_v24, %v11183_v28  ;;  %v11382_v11 = vpop.f32.mrb[70].mxu0  ;;  %8116 = vmatprep.subr.bf16.mxu1 %v8552_v10  ;;  %8212 = vmatprep.subr.bf16.mxu0 %v8552_v10 }
 0x359   :  { %v8678_v53 = vpop.eup %8677  ;;  %8687 = vpow2.f32 %v7329_v19  ;;  %v11379_v55 = vmul.f32 %v8676_v40, %v11304_v56  ;;  %v11386_v19 = vadd.f32 %v11382_v11, %v11203_v29  ;;  %v1468_v39 = vpop.f32.mrb[71].mxu0 }
 0x35a   :  { %v8680_v2 = vpop.eup %8679  ;;  %v1769_v0 = vadd.f32 1.0, %v8678_v53  ;;  %v7330_v26 = vmul.f32 -1.442695, %v1853_v5  ;;  %v1854_v40 = vadd.f32 %v1468_v39, %v11195_v44  ;;  %v11395_v5 = vld [vmem:[#allocation20] sm:$0xff]  }
 0x35b   :  { %v1770_v58 = vadd.f32 1.0, %v8680_v2  ;;  %8117 = vmatpush3.bf16.msra.mxu1 %v8552_v10  ;;  %8213 = vmatpush3.bf16.msra.mxu0 %v8552_v10  ;;  %14896 = vst [vmem:[#allocation140_spill] sm:$0xff] %v11395_v5 }
 0x35c   :  { %8689 = vrcp.f32 %v1769_v0  ;;  %v7331_v53 = vmul.f32 -1.442695, %v1854_v40  ;;  %8134 = vmatprep.subr.bf16.mxu1 %v11395_v5  ;;  %8230 = vmatprep.subr.bf16.mxu0 %v11395_v5 }
 0x35d   :  { %8691 = vrcp.f32 %v1770_v58 }
 0x35e   :  { %8693 = vpow2.f32 %v7330_v26  ;;  %v11389_v2 = vpop.f32.mrb[72].mxu0 }
 0x35f   :  { %8695 = vpow2.f32 %v7331_v53  ;;  %v11393_v25 = vadd.f32 %v11389_v2, %v11217_v47  ;;  %v1474_v0 = vpop.f32.mrb[73].mxu0 }
 0x360   :  { %v8682_v24 = vpop.eup %8681  ;;  %v1855_v26 = vadd.f32 %v1474_v0, %v11211_v46  ;;  %v11401_v40 = vpop.f32.mrb[74].mxu0 }
 0x361   :  { %v8684_v29 = vpop.eup %8683  ;;  %v11398_v39 = vmul.f32 %v8682_v24, %v11310_v30  ;;  %v11408_v47 = vadd.f32 %v11401_v40, %v11223_v17  ;;  %v1478_v63 = vpop.f32.mrb[75].mxu0 }
 0x362   :  { %v8686_v58 = vpop.eup %8685  ;;  %v11404_v10 = vmul.f32 %v8684_v29, %v11319_v59  ;;  %v7332_v42 = vmul.f32 -1.442695, %v1855_v26  ;;  %v1856_v0 = vadd.f32 %v1478_v63, %v11229_v60 }
 0x363   :  { %v8688_v53 = vpop.eup %8687  ;;  %v1915_v41 = vadd.f32 1.0, %v8686_v58  ;;  %14898 = vst [vmem:[#allocation142_spill] sm:$0xff] %v11408_v47 }
 0x364   :  { %14897 = vst [vmem:[#allocation141_spill] sm:$0xff] %v11404_v10  ;;  %v1916_v24 = vadd.f32 1.0, %v8688_v53  ;;  %v7333_v29 = vmul.f32 -1.442695, %v1856_v0 }
 0x365   :  { %8697 = vrcp.f32 %v1915_v41 }
 0x366   :  { %v8690_v57 = vpop.eup %8689  ;;  %8699 = vrcp.f32 %v1916_v24  ;;  %v11416_v47 = vpop.f32.mrb[76].mxu0 }
 0x367   :  { %v8692_v10 = vpop.eup %8691  ;;  %8701 = vpow2.f32 %v7332_v42  ;;  %v11414_v58 = vmul.f32 %v8690_v57, %v11328_v35  ;;  %v11423_v63 = vadd.f32 %v11416_v47, %v11241_v23  ;;  %v1484_v41 = vpop.f32.mrb[77].mxu0 }
 0x368   :  { %v8694_v17 = vpop.eup %8693  ;;  %8703 = vpow2.f32 %v7333_v29  ;;  %v11419_v46 = vmul.f32 %v8692_v10, %v11337_v32  ;;  %v1857_v24 = vadd.f32 %v1484_v41, %v11159_v50  ;;  %v11426_v42 = vpop.f32.mrb[78].mxu0 }
 0x369   :  { %v1917_v53 = vadd.f32 1.0, %v8694_v17  ;;  %14900 = vst [vmem:[#allocation144_spill] sm:$0xff] %v11423_v63  ;;  %v8696_v26 = vpop.eup %8695  ;;  %v11430_v0 = vadd.f32 %v11426_v42, %v11247_v22  ;;  %v1488_v29 = vpop.f32.mrb[79].mxu0 }
 0x36a   :  { %14899 = vst [vmem:[#allocation143_spill] sm:$0xff] %v11419_v46  ;;  %v1918_v57 = vadd.f32 1.0, %v8696_v26  ;;  %v7334_v10 = vmul.f32 -1.442695, %v1857_v24  ;;  %v1858_v17 = vadd.f32 %v1488_v29, %v11171_v61 }
 0x36b   :  { %8705 = vrcp.f32 %v1917_v53  ;;  %14901 = vst [vmem:[#allocation145_spill] sm:$0xff] %v11430_v0 }
 0x36c   :  { %8707 = vrcp.f32 %v1918_v57  ;;  %v7335_v23 = vmul.f32 -1.442695, %v1858_v17 }
 0x36d   :  { %8709 = vpow2.f32 %v7334_v10 }
 0x36e   :  { %8711 = vpow2.f32 %v7335_v23  ;;  %v11433_v63 = vpop.f32.mrb[80].mxu0 }
 0x36f   :  { %v8698_v5 = vpop.eup %8697  ;;  %v11438_v26 = vadd.f32 %v11433_v63, %v11267_v37  ;;  %v1494_v22 = vpop.f32.mrb[81].mxu0 }
 0x370   :  { %v8700_v46 = vpop.eup %8699  ;;  %v1979_v41 = vmul.f32 %v8698_v5, %v11343_v43  ;;  %v1859_v57 = vadd.f32 %v1494_v22, %v11187_v27  ;;  %v11442_v10 = vpop.f32.mrb[82].mxu0 }
 0x371   :  { %v8702_v53 = vpop.eup %8701  ;;  %v1980_v24 = vmul.f32 %v8700_v46, %v11356_v21  ;;  %v11449_v43 = vadd.f32 %v11442_v10, %v11279_v6  ;;  %v1498_v5 = vpop.f32.mrb[83].mxu0 }
 0x372   :  { %v8704_v0 = vpop.eup %8703  ;;  %v1919_v29 = vadd.f32 1.0, %v8702_v53  ;;  %v11445_v17 = vadd.f32 %v1979_v41, %v11258_v8  ;;  %v7336_v46 = vmul.f32 -1.442695, %v1859_v57  ;;  %v1860_v21 = vadd.f32 %v1498_v5, %v11199_v49 }
 0x373   :  { %v1920_v23 = vadd.f32 1.0, %v8704_v0  ;;  %v11452_v37 = vadd.f32 %v1980_v24, %v11272_v13 }
 0x374   :  { %8713 = vrcp.f32 %v1919_v29  ;;  %v7337_v8 = vmul.f32 -1.442695, %v1860_v21 }
 0x375   :  { %v8706_v53 = vpop.eup %8705  ;;  %8715 = vrcp.f32 %v1920_v23 }
 0x376   :  { %v1981_v22 = vmul.f32 %v8706_v53, %v11369_v12  ;;  %8717 = vpow2.f32 %v7336_v46  ;;  %v8708_v41 = vpop.eup %8707  ;;  %v11460_v13 = vpop.f32.mrb[84].mxu0 }
 0x377   :  { %v8710_v0 = vpop.eup %8709  ;;  %v1982_v6 = vmul.f32 %v8708_v41, %v11382_v11  ;;  %8719 = vpow2.f32 %v7337_v8  ;;  %v11464_v29 = vadd.f32 %v11460_v13, %v11298_v52  ;;  %v1504_v57 = vpop.f32.mrb[85].mxu0 }
 0x378   :  { %v11457_v27 = vadd.f32 %v1981_v22, %v11290_v1  ;;  %v1921_v24 = vadd.f32 1.0, %v8710_v0  ;;  %v8712_v23 = vpop.eup %8711  ;;  %v1861_v5 = vadd.f32 %v1504_v57, %v11215_v18  ;;  %v11470_v46 = vpop.f32.mrb[86].mxu0 }
 0x379   :  { %v11467_v12 = vadd.f32 %v1982_v6, %v11296_v9  ;;  %v1922_v1 = vadd.f32 1.0, %v8712_v23  ;;  %v11474_v11 = vadd.f32 %v11470_v46, %v11304_v56  ;;  %v1508_v21 = vpop.f32.mrb[87].mxu0 }
 0x37a   :  { %8721 = vrcp.f32 %v1921_v24  ;;  %v7338_v53 = vmul.f32 -1.442695, %v1861_v5  ;;  %v1862_v52 = vadd.f32 %v1508_v21, %v11233_v36 }
 0x37b   :  { %8723 = vrcp.f32 %v1922_v1 }
 0x37c   :  { %8725 = vpow2.f32 %v7338_v53  ;;  %v7339_v8 = vmul.f32 -1.442695, %v1862_v52 }
 0x37e   :  { %v8714_v22 = vpop.eup %8713  ;;  %8727 = vpow2.f32 %v7339_v8  ;;  %v11478_v6 = vpop.f32.mrb[88].mxu0 }
 0x37f   :  { %v8716_v9 = vpop.eup %8715  ;;  %v1983_v41 = vmul.f32 %v8714_v22, %v11389_v2  ;;  %v11483_v56 = vadd.f32 %v11478_v6, %v11310_v30  ;;  %v1514_v23 = vpop.f32.mrb[89].mxu0 }
 0x380   :  { %v8718_v0 = vpop.eup %8717  ;;  %v1984_v24 = vmul.f32 %v8716_v9, %v11401_v40  ;;  %v1863_v21 = vadd.f32 %v1514_v23, %v11239_v31  ;;  %v11489_v53 = vpop.f32.mrb[90].mxu0 }
 0x381   :  { %v1923_v57 = vadd.f32 1.0, %v8718_v0  ;;  %v11486_v5 = vadd.f32 %v1983_v41, %v11308_v45  ;;  %v8720_v1 = vpop.eup %8719  ;;  %v11496_v40 = vadd.f32 %v11489_v53, %v11319_v59  ;;  %v1518_v30 = vpop.f32.mrb[91].mxu0 }
 0x382   :  { %v11492_v2 = vadd.f32 %v1984_v24, %v11316_v38  ;;  %v1924_v52 = vadd.f32 1.0, %v8720_v1  ;;  %v7340_v22 = vmul.f32 -1.442695, %v1863_v21  ;;  %v1864_v8 = vadd.f32 %v1518_v30, %v11253_v3 }
 0x383   :  { %8729 = vrcp.f32 %v1923_v57 }
 0x384   :  { %v8722_v45 = vpop.eup %8721  ;;  %8731 = vrcp.f32 %v1924_v52  ;;  %v7341_v9 = vmul.f32 -1.442695, %v1864_v8 }
 0x385   :  { %8733 = vpow2.f32 %v7340_v22  ;;  %v1985_v41 = vmul.f32 %v8722_v45, %v11416_v47  ;;  %v8724_v0 = vpop.eup %8723 }
 0x386   :  { %v8726_v23 = vpop.eup %8725  ;;  %8735 = vpow2.f32 %v7341_v9  ;;  %v11500_v38 = vpop.f32.mrb[92].mxu0  ;;  %v1986_v24 = vmul.f32 %v8724_v0, %v11426_v42 }
 0x387   :  { %v11504_v59 = vadd.f32 %v1985_v41, %v11326_v7  ;;  %v1925_v57 = vadd.f32 1.0, %v8726_v23  ;;  %v11508_v1 = vadd.f32 %v11500_v38, %v11328_v35  ;;  %v1524_v21 = vpop.f32.mrb[93].mxu0 }
 0x388   :  { %v8728_v52 = vpop.eup %8727  ;;  %v1865_v30 = vadd.f32 %v1524_v21, %v11265_v62  ;;  %v11511_v47 = vpop.f32.mrb[94].mxu0  ;;  %v11514_v22 = vadd.f32 %v1986_v24, %v11334_v34 }
 0x389   :  { %8737 = vrcp.f32 %v1925_v57  ;;  %v1926_v8 = vadd.f32 1.0, %v8728_v52  ;;  %v11518_v7 = vadd.f32 %v11511_v47, %v11337_v32  ;;  %v1528_v42 = vpop.f32.mrb[95].mxu0 }
 0x38a   :  { %v7342_v45 = vmul.f32 -1.442695, %v1865_v30  ;;  %v1866_v35 = vadd.f32 %v1528_v42, %v11285_v14 }
 0x38b   :  { %8739 = vrcp.f32 %v1926_v8 }
 0x38c   :  { %8741 = vpow2.f32 %v7342_v45  ;;  %v7343_v41 = vmul.f32 -1.442695, %v1866_v35 }
 0x38d   :  { %v8730_v9 = vpop.eup %8729 }
 0x38e   :  { %v1987_v0 = vmul.f32 %v8730_v9, %v11433_v63  ;;  %v8732_v23 = vpop.eup %8731  ;;  %8743 = vpow2.f32 %v7343_v41  ;;  %v11522_v34 = vpop.f32.mrb[96].mxu0 }
 0x38f   :  { %v8734_v21 = vpop.eup %8733  ;;  %v1988_v24 = vmul.f32 %v8732_v23, %v11442_v10  ;;  %v11530_v52 = vadd.f32 %v11350_v16, %v11522_v34  ;;  %v1534_v30 = vpop.f32.mrb[97].mxu0 }
 0x390   :  { %v11526_v32 = vadd.f32 %v1987_v0, %v11346_v4  ;;  %v1927_v57 = vadd.f32 1.0, %v8734_v21  ;;  %v8736_v8 = vpop.eup %8735  ;;  %v2011_v42 = vadd.f32 %v1534_v30, %v11155_v48  ;;  %v11533_v63 = vpop.f32.mrb[98].mxu0 }
 0x391   :  { %v11536_v45 = vadd.f32 %v1988_v24, %v11359_v15  ;;  %v1928_v35 = vadd.f32 1.0, %v8736_v8  ;;  %v11540_v4 = vadd.f32 %v11363_v20, %v11533_v63  ;;  %v1538_v10 = vpop.f32.mrb[99].mxu0  ;;  %v252_v8 = vld [vmem:[#allocation11] sm:$0xff] }
 0x392   :  { %8745 = vrcp.f32 %v1927_v57  ;;  %v7344_v9 = vmul.f32 -1.442695, %v2011_v42  ;;  %v2012_v16 = vadd.f32 %v1538_v10, %v11167_v51  ;;  %v253_v57 = vld [vmem:[#allocation11 + $0x8] sm:$0xff]  ;;  %2847 = vperm.xlu1 %8463, %v252_v8  }
 0x393   :  { %v8738_v41 = vpop.eup %8737  ;;  %8747 = vrcp.f32 %v1928_v35  ;;  %2852 = vperm.xlu0 %8464, %v253_v57  }
 0x394   :  { %8749 = vpow2.f32 %v7344_v9  ;;  %v7345_v0 = vmul.f32 -1.442695, %v2012_v16  ;;  %v1989_v23 = vmul.f32 %v8738_v41, %v11460_v13  ;;  %v254_v41 = vld [vmem:[#allocation11 + $0x10] sm:$0xff] }
 0x395   :  { %v8740_v21 = vpop.eup %8739 }
 0x396   :  { %v8742_v30 = vpop.eup %8741  ;;  %8751 = vpow2.f32 %v7345_v0  ;;  %v11544_v15 = vpop.f32.mrb[100].mxu0  ;;  %v1990_v24 = vmul.f32 %v8740_v21, %v11470_v46  ;;  %v11548_v20 = vadd.f32 %v1989_v23, %v11372_v33  ;;  %v256_v33 = vld [vmem:[#allocation11 + $0x20] sm:$0xff]  ;;  %2857 = vperm.xlu1 %8463, %v254_v41  }
 0x397   :  { %v1929_v42 = vadd.f32 1.0, %v8742_v30  ;;  %v11552_v35 = vadd.f32 %v11376_v54, %v11544_v15  ;;  %v1544_v10 = vpop.f32.mrb[101].mxu0  ;;  %2867 = vperm.xlu0 %8464, %v256_v33  }
 0x398   :  { %v8744_v13 = vpop.eup %8743  ;;  %v2013_v9 = vadd.f32 %v1544_v10, %v11183_v28  ;;  %v11555_v16 = vpop.f32.mrb[102].mxu0  ;;  %v11558_v46 = vadd.f32 %v1990_v24, %v11379_v55  ;;  %v258_v24 = vld [vmem:[#allocation11 + $0x30] sm:$0xff]  ;;  %v255_v10 = vld [vmem:[#allocation11 + $0x18] sm:$0xff] }
 0x399   :  { %8753 = vrcp.f32 %v1929_v42  ;;  %v1930_v0 = vadd.f32 1.0, %v8744_v13  ;;  %v11562_v23 = vadd.f32 %v11386_v19, %v11555_v16  ;;  %v1548_v54 = vpop.f32.mrb[103].mxu0 }
 0x39a   :  { %14902 = vst [vmem:[#allocation146_spill] sm:$0xff] %v11558_v46  ;;  %v7346_v21 = vmul.f32 -1.442695, %v2013_v9  ;;  %v2014_v30 = vadd.f32 %v1548_v54, %v11195_v44  ;;  %2862 = vperm.xlu1 %8463, %v255_v10  }
 0x39b   :  { %8755 = vrcp.f32 %v1930_v0  ;;  %2877 = vperm.xlu0 %8464, %v258_v24   ;;  %v14904_v0 = vld [vmem:[#allocation43_spill] sm:$0xff] }
 0x39c   :  { %v8746_v57 = vpop.eup %8745  ;;  %8757 = vpow2.f32 %v7346_v21  ;;  %v7347_v8 = vmul.f32 -1.442695, %v2014_v30 }
 0x39d   :  { %v1991_v55 = vmul.f32 %v8746_v57, %v11478_v6  ;;  %v8748_v42 = vpop.eup %8747  ;;  %v14905_v57 = vld [vmem:[#allocation141_spill] sm:$0xff] }
 0x39e   :  { %v8750_v13 = vpop.eup %8749  ;;  %8759 = vpow2.f32 %v7347_v8  ;;  %v11566_v46 = vpop.f32.mrb[104].mxu0  ;;  %v1992_v19 = vmul.f32 %v8748_v42, %v11489_v53  ;;  %v260_v53 = vld [vmem:[#allocation11 + $0x40] sm:$0xff]  ;;  %v257_v42 = vld [vmem:[#allocation11 + $0x28] sm:$0xff] }
 0x39f   :  { %v11570_v9 = vadd.f32 %v1991_v55, %v11398_v39  ;;  %v2075_v54 = vadd.f32 1.0, %v8750_v13  ;;  %v11574_v33 = vadd.f32 %v11393_v25, %v11566_v46  ;;  %v1554_v41 = vpop.f32.mrb[105].mxu0  ;;  %v14907_v55 = vld [vmem:[#allocation142_spill] sm:$0xff]  ;;  %2887 = vperm.xlu0 %8464, %v260_v53   ;;  %2872 = vperm.xlu1 %8463, %v257_v42   ;;  %v14910_v53 = vld [vmem:[#allocation144_spill] sm:$0xff] }
 0x3a0   :  { %v8752_v6 = vpop.eup %8751  ;;  %v2015_v21 = vadd.f32 %v1554_v41, %v14904_v0  ;;  %v11577_v30 = vpop.f32.mrb[106].mxu0  ;;  %v11580_v8 = vadd.f32 %v1992_v19, %v14905_v57  ;;  %v262_v57 = vld [vmem:[#allocation11 + $0x50] sm:$0xff] }
 0x3a1   :  { %14903 = vst [vmem:[#allocation147_spill] sm:$0xff] %v11574_v33  ;;  %8761 = vrcp.f32 %v2075_v54  ;;  %v2076_v39 = vadd.f32 1.0, %v8752_v6  ;;  %v11584_v13 = vadd.f32 %v14907_v55, %v11577_v30  ;;  %v1558_v25 = vpop.f32.mrb[107].mxu0 }
 0x3a2   :  { %14906 = vst [vmem:[#allocation141_spill] sm:$0xff] %v11580_v8  ;;  %v7348_v33 = vmul.f32 -1.442695, %v2015_v21  ;;  %v2016_v24 = vadd.f32 %v1558_v25, %v11229_v60  ;;  %v259_v8 = vld [vmem:[#allocation11 + $0x38] sm:$0xff]  ;;  %v264_v60 = vld [vmem:[#allocation11 + $0x60] sm:$0xff] }
 0x3a3   :  { %14908 = vst [vmem:[#allocation142_spill] sm:$0xff] %v11584_v13  ;;  %v8754_v10 = vpop.eup %8753  ;;  %8763 = vrcp.f32 %v2076_v39  ;;  %2897 = vperm.xlu0 %8464, %v262_v57   ;;  %2882 = vperm.xlu1 %8463, %v259_v8  }
 0x3a4   :  { %8765 = vpow2.f32 %v7348_v33  ;;  %v7349_v41 = vmul.f32 -1.442695, %v2016_v24  ;;  %v1993_v19 = vmul.f32 %v8754_v10, %v11500_v38  ;;  %v14911_v10 = vld [vmem:[#allocation143_spill] sm:$0xff] }
 0x3a5   :  { %v8756_v54 = vpop.eup %8755 }
 0x3a6   :  { %v8758_v6 = vpop.eup %8757  ;;  %8767 = vpow2.f32 %v7349_v41  ;;  %v11588_v0 = vpop.f32.mrb[108].mxu0  ;;  %v1994_v55 = vmul.f32 %v8756_v54, %v11511_v47  ;;  %v11592_v21 = vadd.f32 %v1993_v19, %v11414_v58  ;;  %v261_v47 = vld [vmem:[#allocation11 + $0x48] sm:$0xff]  ;;  %v14912_v19 = vld [vmem:[#allocation120_spill] sm:$0xff] }
 0x3a7   :  { %v2077_v25 = vadd.f32 1.0, %v8758_v6  ;;  %v2129_v42 = vadd.f32 %v14910_v53, %v11588_v0  ;;  %v1564_v33 = vpop.f32.mrb[109].mxu0  ;;  %v14913_v6 = vld [vmem:[#allocation145_spill] sm:$0xff]  ;;  %2907 = vperm.xlu0 %8464, %v264_v60   ;;  %2892 = vperm.xlu1 %8463, %v261_v47  }
 0x3a8   :  { %14909 = vst [vmem:[#allocation148_spill] sm:$0xff] %v11592_v21  ;;  %v8760_v38 = vpop.eup %8759  ;;  %v2017_v39 = vadd.f32 %v1564_v33, %v11159_v50  ;;  %v11597_v24 = vpop.f32.mrb[110].mxu0  ;;  %v11600_v41 = vadd.f32 %v1994_v55, %v14911_v10  ;;  %v14914_v50 = vld [vmem:[#allocation121_spill] sm:$0xff] }
 0x3a9   :  { %8769 = vrcp.f32 %v2077_v25  ;;  %v2078_v58 = vadd.f32 1.0, %v8760_v38  ;;  %v11603_v54 = vadd.f32 %v2129_v42, %v14912_v19  ;;  %v2130_v53 = vadd.f32 %v14913_v6, %v11597_v24  ;;  %v1568_v57 = vpop.f32.mrb[111].mxu0  ;;  %v266_v42 = vld [vmem:[#allocation11 + $0x70] sm:$0xff]  ;;  %v263_v38 = vld [vmem:[#allocation11 + $0x58] sm:$0xff] }
 0x3aa   :  { %v7350_v8 = vmul.f32 -1.442695, %v2017_v39  ;;  %v2018_v21 = vadd.f32 %v1568_v57, %v11171_v61 }
 0x3ab   :  { %v8762_v33 = vpop.eup %8761  ;;  %8771 = vrcp.f32 %v2078_v58  ;;  %v11609_v13 = vadd.f32 %v2130_v53, %v14914_v50  ;;  %2917 = vperm.xlu0 %8464, %v266_v42   ;;  %2902 = vperm.xlu1 %8463, %v263_v38   ;;  %v11631_v42 = vld [vmem:[#allocation8] sm:$0xff] }
 0x3ac   :  { %8773 = vpow2.f32 %v7350_v8  ;;  %v7351_v55 = vmul.f32 -1.442695, %v2018_v21  ;;  %v2139_v25 = vmul.f32 %v8762_v33, %v11522_v34  ;;  %v14915_v21 = vld [vmem:[#allocation47_spill] sm:$0xff]  ;;  %v265_v33 = vld [vmem:[#allocation11 + $0x68] sm:$0xff] }
 0x3ad   :  { %v8764_v10 = vpop.eup %8763 }
 0x3ae   :  { %v8766_v19 = vpop.eup %8765  ;;  %8775 = vpow2.f32 %v7351_v55  ;;  %v11612_v6 = vpop.f32.mrb[112].mxu0  ;;  %v2140_v39 = vmul.f32 %v8764_v10, %v11533_v63  ;;  %v11616_v58 = vadd.f32 %v2139_v25, %v11445_v17  ;;  %v14916_v17 = vld [vmem:[#allocation122_spill] sm:$0xff] }
 0x3af   :  { %v2079_v50 = vadd.f32 1.0, %v8766_v19  ;;  %v2131_v60 = vadd.f32 %v11438_v26, %v11612_v6  ;;  %v1574_v47 = vpop.f32.mrb[113].mxu0  ;;  %2912 = vperm.xlu1 %8463, %v265_v33  }
 0x3b0   :  { %v8768_v34 = vpop.eup %8767  ;;  %v2019_v53 = vadd.f32 %v1574_v47, %v14915_v21  ;;  %v11621_v57 = vpop.f32.mrb[114].mxu0  ;;  %v11624_v8 = vadd.f32 %v2140_v39, %v11452_v37  ;;  %v14917_v47 = vld [vmem:[#allocation123_spill] sm:$0xff]  ;;  %v14918_v39 = vmov 1   ;;  %v14925_v21 = vld [vmem:[#allocation128_spill] sm:$0xff] }
 0x3b1   :  { %8777 = vrcp.f32 %v2079_v50  ;;  %v2080_v63 = vadd.f32 1.0, %v8768_v34  ;;  %v11627_v55 = vadd.f32 %v2131_v60, %v14916_v17  ;;  %v2132_v26 = vadd.f32 %v11449_v43, %v11621_v57  ;;  %v1578_v25 = vpop.f32.mrb[115].mxu0  ;;  %8465 = vset.pattern.permute.xlu0 %v14918_v39  ;;  %v267_v43 = vld [vmem:[#allocation11 + $0x78] sm:$0xff] }
 0x3b2   :  { %v7352_v38 = vmul.f32 -1.442695, %v2019_v53  ;;  %v2020_v10 = vadd.f32 %v1578_v25, %v11199_v49  ;;  %6158 = vperm.xlu0 %8465, %v11631_v42  }
 0x3b3   :  { %v8770_v19 = vpop.eup %8769  ;;  %8779 = vrcp.f32 %v2080_v63  ;;  %v11635_v37 = vadd.f32 %v2132_v26, %v14917_v47  ;;  %2922 = vperm.xlu1 %8463, %v267_v43  }
 0x3b4   :  { %v2141_v50 = vmul.f32 %v8770_v19, %v11544_v15  ;;  %8781 = vpow2.f32 %v7352_v38  ;;  %v7353_v60 = vmul.f32 -1.442695, %v2020_v10 }
 0x3b5   :  { %v8772_v34 = vpop.eup %8771 }
 0x3b6   :  { %v8774_v17 = vpop.eup %8773  ;;  %v2142_v53 = vmul.f32 %v8772_v34, %v11555_v16  ;;  %8783 = vpow2.f32 %v7353_v60  ;;  %v11641_v25 = vpop.f32.mrb[116].mxu0  ;;  %v11644_v63 = vadd.f32 %v2141_v50, %v11457_v27  ;;  %v14919_v16 = vmov 2   ;;  %v11655_v60 = vld [vmem:[#allocation8 + $0x8] sm:$0xff]  ;;  %v14920_v50 = vld [vmem:[#allocation124_spill] sm:$0xff] }
 0x3b7   :  { %v2081_v26 = vadd.f32 1.0, %v8774_v17  ;;  %v2133_v33 = vadd.f32 %v11464_v29, %v11641_v25  ;;  %v1584_v15 = vpop.f32.mrb[117].mxu0  ;;  %8469 = vset.pattern.permute.xlu0 %v14919_v16  ;;  %6049 = vperm.xlu1 %8463, %v11655_v60  }
 0x3b8   :  { %v8776_v38 = vpop.eup %8775  ;;  %v2021_v10 = vadd.f32 %v1584_v15, %v11215_v18  ;;  %v11649_v19 = vpop.f32.mrb[118].mxu0  ;;  %v11652_v47 = vadd.f32 %v2142_v53, %v11467_v12  ;;  %6270 = vperm.xlu0 %8469, %v11631_v42   ;;  %v11664_v12 = vld [vmem:[#allocation8 + $0x18] sm:$0xff]  ;;  %v14921_v18 = vld [vmem:[#allocation125_spill] sm:$0xff] }
 0x3b9   :  { %8785 = vrcp.f32 %v2081_v26  ;;  %v2082_v27 = vadd.f32 1.0, %v8776_v38  ;;  %v11658_v34 = vadd.f32 %v2133_v33, %v14920_v50  ;;  %v2134_v29 = vadd.f32 %v11474_v11, %v11649_v19  ;;  %v1588_v43 = vpop.f32.mrb[119].mxu0 }
 0x3ba   :  { %v7354_v17 = vmul.f32 -1.442695, %v2021_v10  ;;  %v2022_v15 = vadd.f32 %v1588_v43, %v11233_v36  ;;  %v11697_v36 = vld [vmem:[#allocation8 + $0x10] sm:$0xff] }
 0x3bb   :  { %v8778_v53 = vpop.eup %8777  ;;  %8787 = vrcp.f32 %v2082_v27  ;;  %v11667_v49 = vadd.f32 %v2134_v29, %v14921_v18  ;;  %v11678_v18 = vld [vmem:[#allocation8 + $0x20] sm:$0xff]  ;;  %8466 = vset.pattern.permute.xlu1 %v14918_v39 }
 0x3bc   :  { %8789 = vpow2.f32 %v7354_v17  ;;  %v7355_v26 = vmul.f32 -1.442695, %v2022_v15  ;;  %v2143_v33 = vmul.f32 %v8778_v53, %v11566_v46  ;;  %6279 = vperm.xlu0 %8469, %v11664_v12   ;;  %6161 = vperm.xlu1 %8466, %v11655_v60  }
 0x3bd   :  { %v8780_v11 = vpop.eup %8779 }
 0x3be   :  { %v8782_v38 = vpop.eup %8781  ;;  %8791 = vpow2.f32 %v7355_v26  ;;  %v11672_v10 = vpop.f32.mrb[120].mxu0  ;;  %v2144_v50 = vmul.f32 %v8780_v11, %v11577_v30  ;;  %v11676_v27 = vadd.f32 %v2143_v33, %v11486_v5  ;;  %v14922_v30 = vld [vmem:[#allocation126_spill] sm:$0xff] }
 0x3bf   :  { %v2083_v29 = vadd.f32 1.0, %v8782_v38  ;;  %v2135_v43 = vadd.f32 %v11483_v56, %v11672_v10  ;;  %v1594_v17 = vpop.f32.mrb[121].mxu0 }
 0x3c0   :  { %v8784_v46 = vpop.eup %8783  ;;  %v2023_v15 = vadd.f32 %v1594_v17, %v11239_v31  ;;  %v11684_v53 = vpop.f32.mrb[122].mxu0  ;;  %v11687_v26 = vadd.f32 %v2144_v50, %v11492_v2  ;;  %6282 = vperm.xlu0 %8469, %v11678_v18   ;;  %v6036_v31 = vld [vmem:[#allocation8 + $0x38] sm:$0xff] }
 0x3c1   :  { %8793 = vrcp.f32 %v2083_v29  ;;  %v2084_v5 = vadd.f32 1.0, %v8784_v46  ;;  %v11691_v33 = vadd.f32 %v2135_v43, %v14922_v30  ;;  %v2136_v56 = vadd.f32 %v11496_v40, %v11684_v53  ;;  %v1598_v11 = vpop.f32.mrb[123].mxu0  ;;  %v14923_v50 = vld [vmem:[#allocation127_spill] sm:$0xff] }
 0x3c2   :  { %v7356_v38 = vmul.f32 -1.442695, %v2023_v15  ;;  %v2024_v17 = vadd.f32 %v1598_v11, %v11253_v3  ;;  %v14924_v30 = vmov 0  }
 0x3c3   :  { %v8786_v2 = vpop.eup %8785  ;;  %8795 = vrcp.f32 %v2084_v5  ;;  %v11700_v29 = vadd.f32 %v2136_v56, %v14923_v50  ;;  %8467 = vset.pattern.permute.xlu1 %v14924_v30  ;;  %v11709_v56 = vld [vmem:[#allocation8 + $0x40] sm:$0xff] }
 0x3c4   :  { %8797 = vpow2.f32 %v7356_v38  ;;  %v7357_v43 = vmul.f32 -1.442695, %v2024_v17  ;;  %v2145_v46 = vmul.f32 %v8786_v2, %v11588_v0  ;;  %6291 = vperm.xlu0 %8469, %v6036_v31   ;;  %6052 = vperm.xlu1 %8467, %v11697_v36  }
 0x3c5   :  { %v8788_v40 = vpop.eup %8787 }
 0x3c6   :  { %v8790_v15 = vpop.eup %8789  ;;  %8799 = vpow2.f32 %v7357_v43  ;;  %v11705_v11 = vpop.f32.mrb[124].mxu0  ;;  %v2146_v3 = vmul.f32 %v8788_v40, %v11597_v24  ;;  %v2161_v5 = vadd.f32 %v2145_v46, %v11504_v59  ;;  %v14926_v59 = vld [vmem:[#allocation129_spill] sm:$0xff] }
 0x3c7   :  { %v2085_v38 = vadd.f32 1.0, %v8790_v15  ;;  %v2137_v0 = vadd.f32 %v11508_v1, %v11705_v11  ;;  %v1604_v17 = vpop.f32.mrb[125].mxu0 }
 0x3c8   :  { %v8792_v2 = vpop.eup %8791  ;;  %v2025_v31 = vadd.f32 %v1604_v17, %v11265_v62  ;;  %v11714_v50 = vpop.f32.mrb[126].mxu0  ;;  %v2162_v43 = vadd.f32 %v2146_v3, %v11514_v22  ;;  %v11718_v61 = vadd.f32 %v14925_v21, %v2161_v5  ;;  %6294 = vperm.xlu0 %8469, %v11709_v56   ;;  %8468 = vset.pattern.permute.xlu1 %v14918_v39  ;;  %v14927_v3 = vld [vmem:[#allocation130_spill] sm:$0xff]  ;;  %v6040_v21 = vld [vmem:[#allocation8 + $0x58] sm:$0xff] }
 0x3c9   :  { %8801 = vrcp.f32 %v2085_v38  ;;  %v2086_v24 = vadd.f32 1.0, %v8792_v2  ;;  %v11721_v46 = vadd.f32 %v2137_v0, %v14926_v59  ;;  %v2138_v40 = vadd.f32 %v11518_v7, %v11714_v50  ;;  %v1608_v1 = vpop.f32.mrb[127].mxu0  ;;  %6164 = vperm.xlu1 %8468, %v11697_v36   ;;  %v14928_v38 = vld [vmem:[#allocation131_spill] sm:$0xff] }
 0x3ca   :  { %v7358_v15 = vmul.f32 -1.442695, %v2025_v31  ;;  %v2026_v17 = vadd.f32 %v1608_v1, %v11285_v14  ;;  %v11729_v22 = vadd.f32 %v14927_v3, %v2162_v43  ;;  %v14934_v62 = vld [vmem:[#allocation135_spill] sm:$0xff] }
 0x3cb   :  { %v8794_v5 = vpop.eup %8793  ;;  %8803 = vrcp.f32 %v2086_v24  ;;  %v11733_v0 = vadd.f32 %v2138_v40, %v14928_v38 }
 0x3cc   :  { %8805 = vpow2.f32 %v7358_v15  ;;  %v7359_v7 = vmul.f32 -1.442695, %v2026_v17  ;;  %v2147_v31 = vmul.f32 %v8794_v5, %v11612_v6  ;;  %6303 = vperm.xlu0 %8469, %v6040_v21  }
 0x3cd   :  { %v8796_v59 = vpop.eup %8795  ;;  %6167 = vperm.xlu1 %8468, %v11664_v12  }
 0x3ce   :  { %v8798_v1 = vpop.eup %8797  ;;  %8807 = vpow2.f32 %v7359_v7  ;;  %v11738_v43 = vpop.f32.mrb[128].mxu0  ;;  %v2148_v3 = vmul.f32 %v8796_v59, %v11621_v57  ;;  %v2163_v24 = vadd.f32 %v2147_v31, %v11526_v32  ;;  %v14929_v7 = vld [vmem:[#allocation132_spill] sm:$0xff] }
 0x3cf   :  { %v2087_v40 = vadd.f32 1.0, %v8798_v1  ;;  %v11745_v15 = vadd.f32 %v11530_v52, %v11738_v43  ;;  %v1614_v17 = vpop.f32.mrb[129].mxu0  ;;  %v14930_v52 = vmov 3  }
 0x3d0   :  { %v8800_v38 = vpop.eup %8799  ;;  %v2171_v6 = vadd.f32 %v1614_v17, %v11155_v48  ;;  %v11748_v21 = vpop.f32.mrb[130].mxu0  ;;  %v2164_v5 = vadd.f32 %v2148_v3, %v11536_v45  ;;  %v11752_v2 = vadd.f32 %v14929_v7, %v2163_v24  ;;  %8483 = vset.pattern.permute.xlu0 %v14930_v52  ;;  %v14931_v17 = vld [vmem:[#allocation133_spill] sm:$0xff] }
 0x3d1   :  { %8809 = vrcp.f32 %v2087_v40  ;;  %v2088_v32 = vadd.f32 1.0, %v8800_v38  ;;  %v11756_v57 = vadd.f32 %v11540_v4, %v11748_v21  ;;  %v1618_v31 = vpop.f32.mrb[131].mxu0  ;;  %6385 = vperm.xlu0 %8483, %v11655_v60   ;;  %8470 = vset.pattern.permute.xlu1 %v14919_v16  ;;  %v11767_v4 = vld [vmem:[#allocation8 + $0x28] sm:$0xff] }
 0x3d2   :  { %v7360_v59 = vmul.f32 -1.442695, %v2171_v6  ;;  %v2172_v1 = vadd.f32 %v1618_v31, %v11167_v51  ;;  %v11761_v14 = vadd.f32 %v14931_v17, %v2164_v5  ;;  %6273 = vperm.xlu1 %8470, %v11655_v60   ;;  %v6038_v17 = vld [vmem:[#allocation8 + $0x48] sm:$0xff] }
 0x3d3   :  { %v8802_v45 = vpop.eup %8801  ;;  %8811 = vrcp.f32 %v2088_v32  ;;  %v2331_v3 = vpack.c.bf16 %v11756_v57, %v11745_v15 }
 0x3d4   :  { %8813 = vpow2.f32 %v7360_v59  ;;  %v7361_v24 = vmul.f32 -1.442695, %v2172_v1  ;;  %v2149_v38 = vmul.f32 %v8802_v45, %v11641_v25 }
 0x3d5   :  { %v8804_v6 = vpop.eup %8803  ;;  %8118 = vmatprep.mubr.bf16.mxu1 %v2331_v3  ;;  %6397 = vperm.xlu0 %8483, %v11767_v4  }
 0x3d6   :  { %v8806_v5 = vpop.eup %8805  ;;  %8815 = vpow2.f32 %v7361_v24  ;;  %v11773_v7 = vpop.f32.mrb[132].mxu0  ;;  %v2150_v32 = vmul.f32 %v8804_v6, %v11649_v19  ;;  %v2165_v31 = vadd.f32 %v2149_v38, %v11548_v20  ;;  %6276 = vperm.xlu1 %8470, %v11697_v36   ;;  %v14932_v24 = vld [vmem:[#allocation146_spill] sm:$0xff] }
 0x3d7   :  { %v2089_v60 = vadd.f32 1.0, %v8806_v5  ;;  %v11780_v59 = vadd.f32 %v11552_v35, %v11773_v7  ;;  %v1624_v1 = vpop.f32.mrb[133].mxu0  ;;  %v14933_v6 = vld [vmem:[#allocation134_spill] sm:$0xff] }
 0x3d8   :  { %v8808_v25 = vpop.eup %8807  ;;  %v2173_v45 = vadd.f32 %v1624_v1, %v11183_v28  ;;  %v11784_v3 = vpop.f32.mrb[134].mxu0  ;;  %v2166_v19 = vadd.f32 %v2150_v32, %v14932_v24  ;;  %v11788_v20 = vadd.f32 %v14933_v6, %v2165_v31  ;;  %v8554_v31 = vld [vmem:[#allocation20 + $0x8] sm:$0xff]   ;;  %v14935_v24 = vld [vmem:[#allocation140_spill] sm:$0xff]  ;;  %v14936_v6 = vld [vmem:[#allocation147_spill] sm:$0xff] }
 0x3d9   :  { %8817 = vrcp.f32 %v2089_v60  ;;  %v2090_v38 = vadd.f32 1.0, %v8808_v25  ;;  %v11792_v35 = vadd.f32 %v11562_v23, %v11784_v3  ;;  %v1628_v5 = vpop.f32.mrb[135].mxu0  ;;  %6409 = vperm.xlu0 %8483, %v6038_v17  }
 0x3da   :  { %v7362_v40 = vmul.f32 -1.442695, %v2173_v45  ;;  %v2174_v16 = vadd.f32 %v1628_v5, %v11195_v44  ;;  %v11796_v51 = vadd.f32 %v14934_v62, %v2166_v19  ;;  %8471 = vset.pattern.permute.xlu1 %v14930_v52  ;;  %v8555_v5 = vld [vmem:[#allocation20 + $0x10] sm:$0xff]   ;;  %v14941_v44 = vld [vmem:[#allocation45_spill] sm:$0xff] }
 0x3db   :  { %v8810_v1 = vpop.eup %8809  ;;  %8819 = vrcp.f32 %v2090_v38  ;;  %v2332_v32 = vpack.c.bf16 %v11792_v35, %v11780_v59  ;;  %6382 = vperm.xlu1 %8471, %v11631_v42  }
 0x3dc   :  { %8821 = vpow2.f32 %v7362_v40  ;;  %v7363_v60 = vmul.f32 -1.442695, %v2174_v16  ;;  %v2151_v25 = vmul.f32 %v8810_v1, %v11672_v10 }
 0x3dd   :  { %v8812_v62 = vpop.eup %8811  ;;  %8119 = vmatmul.mubr.bf16.vlgmr.msra.gmra.mrb[52].mxu1 %v2332_v32  ;;  %8485 = vset.pattern.permute.xlu0 %v14924_v30  ;;  %v14937_v32 = vld [vmem:[#allocation43_spill] sm:$0xff] }
 0x3de   :  { %v8814_v17 = vpop.eup %8813  ;;  %8823 = vpow2.f32 %v7363_v60  ;;  %v11805_v45 = vpop.f32.mrb[136].mxu0  ;;  %8135 = vmatpush3.bf16.msra.mxu1 %v14935_v24  ;;  %v2152_v19 = vmul.f32 %v8812_v62, %v11684_v53  ;;  %v2167_v40 = vadd.f32 %v2151_v25, %v11570_v9  ;;  %6046 = vperm.xlu0 %8485, %v11631_v42   ;;  %v14938_v53 = vld [vmem:[#allocation141_spill] sm:$0xff]  ;;  %v14939_v9 = vld [vmem:[#allocation136_spill] sm:$0xff] }
 0x3df   :  { %v2235_v16 = vadd.f32 1.0, %v8814_v17  ;;  %v11813_v10 = vadd.f32 %v14936_v6, %v11805_v45  ;;  %v1634_v38 = vpop.f32.mrb[137].mxu0  ;;  %8136 = vmatprep.subr.bf16.mxu1 %v8554_v31  ;;  %6388 = vperm.xlu1 %8471, %v11697_v36   ;;  %v14940_v6 = vld [vmem:[#allocation142_spill] sm:$0xff]  ;;  %v2334_v36 = vpack.c.bf16 %v11609_v13, %v11603_v54 }
 0x3e0   :  { %v8816_v1 = vpop.eup %8815  ;;  %v2175_v60 = vadd.f32 %v1634_v38, %v14937_v32  ;;  %v11817_v24 = vpop.f32.mrb[138].mxu0  ;;  %v2168_v62 = vadd.f32 %v2152_v19, %v14938_v53  ;;  %v11821_v25 = vadd.f32 %v14939_v9, %v2167_v40  ;;  %v14942_v38 = vld [vmem:[#allocation137_spill] sm:$0xff]  ;;  %v2335_v53 = vpack.c.bf16 %v11635_v37, %v11627_v55 }
 0x3e1   :  { %8825 = vrcp.f32 %v2235_v16  ;;  %v2236_v17 = vadd.f32 1.0, %v8816_v1  ;;  %v11826_v23 = vadd.f32 %v14940_v6, %v11817_v24  ;;  %v1638_v52 = vpop.f32.mrb[139].mxu0  ;;  %v8556_v1 = vld [vmem:[#allocation20 + $0x18] sm:$0xff]  }
 0x3e2   :  { %v7364_v42 = vmul.f32 -1.442695, %v2175_v60  ;;  %v2176_v28 = vadd.f32 %v1638_v52, %v14941_v44  ;;  %8137 = vmatpush3.bf16.msra.mxu1 %v8554_v31  ;;  %v11830_v32 = vadd.f32 %v14942_v38, %v2168_v62  ;;  %6055 = vperm.xlu0 %8485, %v11664_v12   ;;  %v14944_v38 = vld [vmem:[#allocation138_spill] sm:$0xff] }
 0x3e3   :  { %v8818_v19 = vpop.eup %8817  ;;  %8827 = vrcp.f32 %v2236_v17  ;;  %v2333_v40 = vpack.c.bf16 %v11826_v23, %v11813_v10  ;;  %8138 = vmatprep.subr.bf16.mxu1 %v8555_v5  ;;  %6391 = vperm.xlu1 %8471, %v11664_v12   ;;  %v14943_v17 = vld [vmem:[#allocation148_spill] sm:$0xff] }
 0x3e4   :  { %8829 = vpow2.f32 %v7364_v42  ;;  %v7365_v16 = vmul.f32 -1.442695, %v2176_v28  ;;  %v2602_v52 = vpack.c.bf16 %v11830_v32, %v11821_v25  ;;  %v2153_v31 = vmul.f32 %v8818_v19, %v11705_v11  ;;  %v8557_v11 = vld [vmem:[#allocation20 + $0x20] sm:$0xff]  }
 0x3e5   :  { %v8820_v60 = vpop.eup %8819  ;;  %8122 = vmatprep.mubr.bf16.mxu1 %v2333_v40 }
 0x3e6   :  { %v8822_v62 = vpop.eup %8821  ;;  %8831 = vpow2.f32 %v7365_v16  ;;  %8123 = vmatmul.mubr.bf16.gmra.mrb[56].mxu1 %v2334_v36  ;;  %v2154_v9 = vmul.f32 %v8820_v60, %v11714_v50  ;;  %v2169_v28 = vadd.f32 %v2153_v31, %v14943_v17  ;;  %6058 = vperm.xlu0 %8485, %v11678_v18   ;;  %v14945_v50 = vld [vmem:[#allocation139_spill] sm:$0xff]  ;;  %v8558_v16 = vld [vmem:[#allocation20 + $0x28] sm:$0xff]  }
 0x3e7   :  { %v2237_v6 = vadd.f32 1.0, %v8822_v62  ;;  %8126 = vmatprep.mubr.bf16.mxu1 %v2335_v53  ;;  %8139 = vmatpush3.bf16.msra.mxu1 %v8555_v5 }
 0x3e8   :  { %v8824_v42 = vpop.eup %8823  ;;  %8140 = vmatprep.subr.bf16.mxu1 %v8556_v1  ;;  %v2170_v12 = vadd.f32 %v2154_v9, %v11600_v41  ;;  %v11847_v19 = vadd.f32 %v14944_v38, %v2169_v28  ;;  %8472 = vset.pattern.permute.xlu1 %v14924_v30  ;;  %v2336_v41 = vpack.c.bf16 %v11667_v49, %v11658_v34  ;;  %v8559_v28 = vld [vmem:[#allocation20 + $0x30] sm:$0xff]  }
 0x3e9   :  { %8833 = vrcp.f32 %v2237_v6  ;;  %v2238_v40 = vadd.f32 1.0, %v8824_v42  ;;  %6061 = vperm.xlu1 %8472, %v11767_v4   ;;  %v2337_v4 = vpack.c.bf16 %v11700_v29, %v11691_v33 }
 0x3ea   :  { %v11853_v36 = vadd.f32 %v14945_v50, %v2170_v12  ;;  %6070 = vperm.xlu0 %8485, %v11709_v56  }
 0x3eb   :  { %v8826_v5 = vpop.eup %8825  ;;  %8835 = vrcp.f32 %v2238_v40  ;;  %8141 = vmatpush3.bf16.msra.mxu1 %v8556_v1 }
 0x3ec   :  { %8142 = vmatprep.subr.bf16.mxu1 %v8557_v11  ;;  %v2299_v31 = vmul.f32 %v8826_v5, %v11738_v43  ;;  %v2603_v60 = vpack.c.bf16 %v11853_v36, %v11847_v19 }
 0x3ed   :  { %v8828_v53 = vpop.eup %8827  ;;  %8473 = vset.pattern.permute.xlu1 %v14918_v39 }
 0x3ee   :  { %v8830_v62 = vpop.eup %8829  ;;  %8127 = vmatmul.mubr.bf16.gmra.mrb[60].mxu1 %v2336_v41  ;;  %v2300_v1 = vmul.f32 %v8828_v53, %v11748_v21  ;;  %v2315_v9 = vadd.f32 %v2299_v31, %v11616_v58  ;;  %6170 = vperm.xlu1 %8473, %v11678_v18   ;;  %v2338_v18 = vpack.c.bf16 %v11733_v0, %v11721_v46  ;;  %v8560_v21 = vld [vmem:[#allocation20 + $0x38] sm:$0xff]   ;;  %v9641_v41 = vld [vmem:[#allocation19] sm:$0xff]   ;;  %v9642_v53 = vld [vmem:[#allocation19 + $0x8] sm:$0xff]  }
 0x3ef   :  { %v2239_v43 = vadd.f32 1.0, %v8830_v62  ;;  %8130 = vmatprep.mubr.bf16.mxu1 %v2337_v4  ;;  %8143 = vmatpush3.bf16.msra.mxu1 %v8557_v11  ;;  %v14947_v62 = vpack.c.bf16 %v11761_v14, %v11752_v2  ;;  %v9647_v14 = vld [vmem:[#allocation19 + $0x30] sm:$0xff]  }
 0x3f0   :  { %v8832_v17 = vpop.eup %8831  ;;  %8144 = vmatprep.subr.bf16.mxu1 %v8558_v16  ;;  %v2316_v6 = vadd.f32 %v2300_v1, %v11624_v8 }
 0x3f1   :  { %8837 = vrcp.f32 %v2239_v43  ;;  %v2240_v42 = vadd.f32 1.0, %v8832_v17 }
 0x3f2   :  { %v2596_v12 = vpack.c.bf16 %v2316_v6, %v2315_v9  ;;  %8474 = vset.pattern.permute.xlu1 %v14924_v30  ;;  %v14961_v6 = vld [vmem:[#allocation54_spill] sm:$0xff] }
 0x3f3   :  { %v8834_v56 = vpop.eup %8833  ;;  %8839 = vrcp.f32 %v2240_v42  ;;  %8145 = vmatpush3.bf16.msra.mxu1 %v8558_v16  ;;  %v14562_v42 = vmov 0.0  }
 0x3f4   :  { %v2301_v58 = vmul.f32 %v8834_v56, %v11773_v7  ;;  %8146 = vmatprep.subr.bf16.mxu1 %v8559_v28 }
 0x3f5   :  { %v8836_v11 = vpop.eup %8835 }
 0x3f6   :  { %v2302_v38 = vmul.f32 %v8836_v11, %v11784_v3  ;;  %8131 = vmatmul.mubr.bf16.gmra.mrb[64].mxu1 %v2338_v18  ;;  %v2317_v8 = vadd.f32 %v2301_v58, %v11644_v63 }
 0x3f7   :  { %8147 = vmatpush3.bf16.msra.mxu1 %v8559_v28  ;;  %8150 = vmatprep.mubr.bf16.mxu1 %v2596_v12 }
 0x3f8   :  { %8148 = vmatprep.subr.bf16.mxu1 %v8560_v21  ;;  %v2318_v40 = vadd.f32 %v2302_v38, %v11652_v47  ;;  %v9643_v47 = vld [vmem:[#allocation19 + $0x10] sm:$0xff]  }
 0x3fa   :  { %v2597_v50 = vpack.c.bf16 %v2318_v40, %v2317_v8  ;;  %v14964_v8 = vld [vmem:[#allocation117_spill] sm:$0xff] }
 0x3fb   :  { %v8838_v5 = vpop.eup %8837  ;;  %8149 = vmatpush3.bf16.msra.mxu1 %v8560_v21  ;;  %v352_v40 = vsub.s32 0, %v14964_v8 }
 0x3fc   :  { %v2303_v7 = vmul.f32 %v8838_v5, %v11805_v45  ;;  %8166 = vmatprep.subr.bf16.mxu1 %v9641_v41  ;;  %v14946_v45 = vpack.c.bf16 %v11729_v22, %v11718_v61  ;;  %v9646_v61 = vld [vmem:[#allocation19 + $0x28] sm:$0xff]   ;;  %v9648_v22 = vld [vmem:[#allocation19 + $0x38] sm:$0xff]  }
 0x3fd   :  { %v8840_v16 = vpop.eup %8839 }
 0x3fe   :  { %8151 = vmatmul.mubr.bf16.vlgmr.msra.gmra.mrb[68].mxu1 %v2597_v50  ;;  %v2304_v31 = vmul.f32 %v8840_v16, %v11817_v24  ;;  %v2319_v3 = vadd.f32 %v2303_v7, %v11676_v27  ;;  %v9644_v27 = vld [vmem:[#allocation19 + $0x18] sm:$0xff]   ;;  %v14948_v24 = vpack.c.bf16 %v11796_v51, %v11788_v20  ;;  %v14967_v16 = vld [vmem:[#allocation61_spill] sm:$0xff] }
 0x3ff   :  { %8167 = vmatpush3.bf16.msra.mxu1 %v9641_v41  ;;  %v11929_v50 = vld [vmem:[#allocation16] sm:$0x7]  ;;  %v14965_v7 = vld [vmem:[#allocation67_spill] sm:$0xff] }
 0x400   :  { %v2320_v63 = vadd.f32 %v2304_v31, %v11687_v26  ;;  %8168 = vmatprep.subr.bf16.mxu1 %v9642_v53  ;;  %v9645_v26 = vld [vmem:[#allocation19 + $0x20] sm:$0xff]   ;;  %v11932_v5 = vrot.slane %v11929_v50, %v352_v40 }
 0x402   :  { %v2598_v4 = vpack.c.bf16 %v2320_v63, %v2319_v3  ;;  %v11936_v41 = vadd.f32 %v14965_v7, %v11932_v5  ;;  %v11940_v31 = vadd.f32 %v14967_v16, %v11932_v5  ;;  %v14969_v63 = vld [vmem:[#allocation69_spill] sm:$0xff]  ;;  %v14977_v7 = vld [vmem:[#allocation80_spill] sm:$0xff] }
 0x403   :  { %8169 = vmatpush3.bf16.msra.mxu1 %v9642_v53  ;;  %v11944_v53 = vadd.f32 %v14969_v63, %v11932_v5  ;;  %v11964_v16 = vadd.f32 %v14977_v7, %v11932_v5 }
 0x404   :  { %8154 = vmatprep.mubr.bf16.mxu1 %v2598_v4  ;;  %8170 = vmatprep.subr.bf16.mxu1 %v9643_v47  ;;  %14966 = vst [vmem:[#allocation131_spill] sm:$0xff] %v11936_v41  ;;  %14968 = vst [vmem:[#allocation132_spill] sm:$0xff] %v11940_v31 }
 0x405   :  { %14970 = vst [vmem:[#allocation133_spill] sm:$0xff] %v11944_v53  ;;  %14978 = vst [vmem:[#allocation140_spill] sm:$0xff] %v11964_v16 }
 0x406   :  { %8155 = vmatmul.mubr.bf16.gmra.mrb[72].mxu1 %v14946_v45  ;;  %v14971_v45 = vld [vmem:[#allocation63_spill] sm:$0xff] }
 0x407   :  { %8158 = vmatprep.mubr.bf16.mxu1 %v14947_v62  ;;  %8171 = vmatpush3.bf16.msra.mxu1 %v9643_v47  ;;  %v11949_v62 = vadd.f32 %v14971_v45, %v11932_v5 }
 0x408   :  { %8172 = vmatprep.subr.bf16.mxu1 %v9644_v27 }
 0x409   :  { %14972 = vst [vmem:[#allocation146_spill] sm:$0xff] %v11949_v62 }
 0x40b   :  { %8173 = vmatpush3.bf16.msra.mxu1 %v9644_v27 }
 0x40c   :  { %8174 = vmatprep.subr.bf16.mxu1 %v9645_v26 }
 0x40e   :  { %8159 = vmatmul.mubr.bf16.gmra.mrb[76].mxu1 %v14948_v24 }
 0x40f   :  { %8162 = vmatprep.mubr.bf16.mxu1 %v2602_v52  ;;  %8175 = vmatpush3.bf16.msra.mxu1 %v9645_v26 }
 0x410   :  { %8176 = vmatprep.subr.bf16.mxu1 %v9646_v61 }
 0x411   :  { %v11894_v51 = vpop.permute.xlu1 %2847 }
 0x412   :  { %14949 = vst [vmem:[#allocation144_spill] sm:$0xff] %v11894_v51 }
 0x413   :  { %8177 = vmatpush3.bf16.msra.mxu1 %v9646_v61 }
 0x414   :  { %8178 = vmatprep.subr.bf16.mxu1 %v9647_v14 }
 0x415   :  { %v11896_v2 = vpop.permute.xlu1 %2857 }
 0x416   :  { %8163 = vmatmul.mubr.bf16.gmra.mrb[80].mxu1 %v2603_v60  ;;  %14950 = vst [vmem:[#allocation143_spill] sm:$0xff] %v11896_v2 }
 0x417   :  { %8179 = vmatpush3.bf16.msra.mxu1 %v9647_v14 }
 0x418   :  { %8180 = vmatprep.subr.bf16.mxu1 %v9648_v22 }
 0x419   :  { %v11898_v20 = vpop.permute.xlu1 %2862 }
 0x41a   :  { %14951 = vst [vmem:[#allocation120_spill] sm:$0xff] %v11898_v20 }
 0x41b   :  { %8181 = vmatpush3.bf16.msra.mxu1 %v9648_v22 }
 0x41e   :  { %v11900_v32 = vpop.permute.xlu1 %2872 }
 0x41f   :  { %14952 = vst [vmem:[#allocation145_spill] sm:$0xff] %v11900_v32 }
 0x422   :  { %v11902_v25 = vpop.permute.xlu1 %2882 }
 0x423   :  { %14953 = vst [vmem:[#allocation121_spill] sm:$0xff] %v11902_v25 }
 0x426   :  { %v11904_v52 = vpop.permute.xlu1 %2892 }
 0x427   :  { %14954 = vst [vmem:[#allocation122_spill] sm:$0xff] %v11904_v52 }
 0x42a   :  { %v11906_v1 = vpop.permute.xlu1 %2902 }
 0x42b   :  { %14955 = vst [vmem:[#allocation123_spill] sm:$0xff] %v11906_v1 }
 0x42e   :  { %v11908_v19 = vpop.permute.xlu1 %2912 }
 0x42f   :  { %14956 = vst [vmem:[#allocation124_spill] sm:$0xff] %v11908_v19 }
 0x432   :  { %v11910_v36 = vpop.permute.xlu1 %2922 }
 0x433   :  { %14957 = vst [vmem:[#allocation125_spill] sm:$0xff] %v11910_v36 }
 0x436   :  { %v11912_v60 = vpop.permute.xlu1 %6049 }
 0x437   :  { %14958 = vst [vmem:[#allocation126_spill] sm:$0xff] %v11912_v60 }
 0x43b   :  { %v11914_v9 = vpop.permute.xlu1 %6161 }
 0x43c   :  { %14959 = vst [vmem:[#allocation127_spill] sm:$0xff] %v11914_v9 }
 0x443   :  { %v6053_v43 = vpop.permute.xlu1 %6052 }
 0x444   :  { %vm6095_vm0 = vcmp.eq.s32.totalorder %v14961_v6, %v6053_v43 }
 0x445   :  { %v7698_v12 = vsel %vm6095_vm0, 1.0, %v14562_v42 }
 0x448   :  { %v6165_v17 = vpop.permute.xlu1 %6164 }
 0x449   :  { %vm6207_vm2 = vcmp.eq.s32.totalorder %v14961_v6, %v6165_v17 }
 0x44a   :  { %v7714_v56 = vsel %vm6207_vm2, 1.0, %v14562_v42 }
 0x44b   :  { %v6255_v18 = vadd.f32 %v7714_v56, %v7698_v12  ;;  %v14973_v12 = vld [vmem:[#allocation78_spill] sm:$0xff] }
 0x44c   :  { %v11916_v28 = vpop.permute.xlu1 %6167  ;;  %v11956_v56 = vadd.f32 %v14973_v12, %v11932_v5 }
 0x44d   :  { %14960 = vst [vmem:[#allocation128_spill] sm:$0xff] %v11916_v28 }
 0x44e   :  { %14974 = vst [vmem:[#allocation134_spill] sm:$0xff] %v11956_v56 }
 0x451   :  { %v11922_v58 = vpop.permute.xlu1 %6273 }
 0x452   :  { %14962 = vst [vmem:[#allocation129_spill] sm:$0xff] %v11922_v58 }
 0x455   :  { %v6277_v21 = vpop.permute.xlu1 %6276 }
 0x456   :  { %vm6319_vm7 = vcmp.eq.s32.totalorder %v14961_v6, %v6277_v21  ;;  %v14975_v21 = vld [vmem:[#allocation73_spill] sm:$0xff] }
 0x457   :  { %v7730_v11 = vsel %vm6319_vm7, 1.0, %v14562_v42 }
 0x458   :  { %v11926_v38 = vadd.f32 %v7730_v11, %v6255_v18  ;;  %v11960_v11 = vadd.f32 %v14975_v21, %v11932_v5  ;;  %v14981_v21 = vld [vmem:[#allocation88_spill] sm:$0xff] }
 0x45a   :  { %14963 = vst [vmem:[#allocation130_spill] sm:$0xff] %v11926_v38  ;;  %14976 = vst [vmem:[#allocation135_spill] sm:$0xff] %v11960_v11 }
 0x4b0   :  { %v8120_v3 = vpop.f32.mrb[52].mxu1 }
 0x4b1   :  { %v2486_v4 = vadd.f32 %v8120_v3, %v11936_v41  ;;  %v2421_v47 = vpop.f32.mrb[53].mxu1 }
 0x4b2   :  { %v2484_v27 = vadd.f32 %v2421_v47, %v11940_v31  ;;  %v8121_v26 = vpop.f32.mrb[54].mxu1  ;;  %v15022_v31 = vld [vmem:[#allocation94_spill] sm:$0xff] }
 0x4b3   :  { %v7386_v24 = vmul.f32 -1.442695, %v2486_v4  ;;  %v2487_v61 = vadd.f32 %v8121_v26, %v11944_v53  ;;  %v2424_v14 = vpop.f32.mrb[55].mxu1  ;;  %v14979_v4 = vld [vmem:[#allocation75_spill] sm:$0xff] }
 0x4b4   :  { %v7384_v22 = vmul.f32 -1.442695, %v2484_v27  ;;  %v2485_v43 = vadd.f32 %v2424_v14, %v11949_v62  ;;  %v11969_v47 = vadd.f32 %v14979_v4, %v11932_v5 }
 0x4b5   :  { %v7387_v17 = vmul.f32 -1.442695, %v2487_v61  ;;  %8841 = vpow2.f32 %v7386_v24 }
 0x4b6   :  { %8843 = vpow2.f32 %v7384_v22  ;;  %v7385_v18 = vmul.f32 -1.442695, %v2485_v43  ;;  %14980 = vst [vmem:[#allocation147_spill] sm:$0xff] %v11969_v47 }
 0x4b7   :  { %8845 = vpow2.f32 %v7387_v17 }
 0x4b8   :  { %8847 = vpow2.f32 %v7385_v18 }
 0x4b9   :  { %v8124_v40 = vpop.f32.mrb[56].mxu1 }
 0x4ba   :  { %v2490_v3 = vadd.f32 %v8124_v40, %v11956_v56  ;;  %v2437_v63 = vpop.f32.mrb[57].mxu1  ;;  %v11976_v40 = vadd.f32 %v14981_v21, %v11932_v5  ;;  %v15020_v56 = vld [vmem:[#allocation91_spill] sm:$0xff] }
 0x4bb   :  { %v2488_v45 = vadd.f32 %v2437_v63, %v11960_v11  ;;  %v8125_v27 = vpop.f32.mrb[58].mxu1  ;;  %v14983_v63 = vld [vmem:[#allocation83_spill] sm:$0xff] }
 0x4bc   :  { %v7390_v26 = vmul.f32 -1.442695, %v2490_v3  ;;  %v2491_v24 = vadd.f32 %v8125_v27, %v11964_v16  ;;  %v2440_v61 = vpop.f32.mrb[59].mxu1  ;;  %14982 = vst [vmem:[#allocation141_spill] sm:$0xff] %v11976_v40  ;;  %v11980_v18 = vadd.f32 %v14983_v63, %v11932_v5 }
 0x4bd   :  { %v7388_v14 = vmul.f32 -1.442695, %v2488_v45  ;;  %v2489_v22 = vadd.f32 %v2440_v61, %v11969_v47  ;;  %v14985_v45 = vld [vmem:[#allocation90_spill] sm:$0xff]  ;;  %v14987_v61 = vld [vmem:[#allocation85_spill] sm:$0xff] }
 0x4be   :  { %8849 = vpow2.f32 %v7390_v26  ;;  %v7391_v43 = vmul.f32 -1.442695, %v2491_v24  ;;  %14984 = vst [vmem:[#allocation136_spill] sm:$0xff] %v11980_v18  ;;  %v11984_v27 = vadd.f32 %v14985_v45, %v11932_v5 }
 0x4bf   :  { %v7389_v17 = vmul.f32 -1.442695, %v2489_v22  ;;  %v8842_v12 = vpop.eup %8841  ;;  %8851 = vpow2.f32 %v7388_v14  ;;  %v11989_v22 = vadd.f32 %v14987_v61, %v11932_v5  ;;  %v14989_v61 = vld [vmem:[#allocation98_spill] sm:$0xff] }
 0x4c0   :  { %v8844_v7 = vpop.eup %8843  ;;  %8853 = vpow2.f32 %v7391_v43  ;;  %14986 = vst [vmem:[#allocation142_spill] sm:$0xff] %v11984_v27  ;;  %v2550_v14 = vadd.f32 1.0, %v8842_v12  ;;  %v11996_v12 = vadd.f32 %v14989_v61, %v11932_v5 }
 0x4c1   :  { %v8128_v3 = vpop.f32.mrb[60].mxu1  ;;  %v8846_v4 = vpop.eup %8845  ;;  %8855 = vpow2.f32 %v7389_v17  ;;  %14988 = vst [vmem:[#allocation137_spill] sm:$0xff] %v11989_v22  ;;  %v2548_v42 = vadd.f32 1.0, %v8844_v7  ;;  %v356_v7 = vsub.s32 1, %v14964_v8  ;;  %v14995_v8 = vld [vmem:[#allocation95_spill] sm:$0xff] }
 0x4c2   :  { %v2494_v26 = vadd.f32 %v8128_v3, %v11976_v40  ;;  %v2453_v24 = vpop.f32.mrb[61].mxu1  ;;  %v2551_v28 = vadd.f32 1.0, %v8846_v4  ;;  %v8848_v17 = vpop.eup %8847  ;;  %14990 = vst [vmem:[#allocation148_spill] sm:$0xff] %v11996_v12  ;;  %v12010_v6 = vadd.f32 %v14995_v8, %v11932_v5 }
 0x4c3   :  { %v2492_v21 = vadd.f32 %v2453_v24, %v11980_v18  ;;  %v8129_v63 = vpop.f32.mrb[62].mxu1 }
 0x4c4   :  { %v7394_v43 = vmul.f32 -1.442695, %v2494_v26  ;;  %v2495_v38 = vadd.f32 %v8129_v63, %v11984_v27  ;;  %v2456_v58 = vpop.f32.mrb[63].mxu1  ;;  %v14991_v26 = vld [vmem:[#allocation93_spill] sm:$0xff]  ;;  %14996 = vst [vmem:[#allocation67_spill] sm:$0xff] %v12010_v6 }
 0x4c5   :  { %v2493_v45 = vadd.f32 %v2456_v58, %v11989_v22  ;;  %v7392_v3 = vmul.f32 -1.442695, %v2492_v21  ;;  %v12001_v63 = vadd.f32 %v14991_v26, %v11932_v5  ;;  %v2549_v58 = vadd.f32 1.0, %v8848_v17 }
 0x4c6   :  { %8857 = vpow2.f32 %v7394_v43  ;;  %v7395_v9 = vmul.f32 -1.442695, %v2495_v38 }
 0x4c7   :  { %8859 = vrcp.f32 %v2550_v14  ;;  %v7393_v24 = vmul.f32 -1.442695, %v2493_v45  ;;  %14992 = vst [vmem:[#allocation138_spill] sm:$0xff] %v12001_v63  ;;  %v14993_v14 = vld [vmem:[#allocation100_spill] sm:$0xff] }
 0x4c8   :  { %v8850_v60 = vpop.eup %8849  ;;  %8861 = vrcp.f32 %v2548_v42  ;;  %v12005_v38 = vadd.f32 %v14993_v14, %v11932_v5 }
 0x4c9   :  { %8863 = vrcp.f32 %v2551_v28  ;;  %v8132_v4 = vpop.f32.mrb[64].mxu1  ;;  %v8852_v43 = vpop.eup %8851  ;;  %v2554_v21 = vadd.f32 1.0, %v8850_v60 }
 0x4ca   :  { %14994 = vst [vmem:[#allocation139_spill] sm:$0xff] %v12005_v38  ;;  %8865 = vpow2.f32 %v7392_v3  ;;  %v2498_v61 = vadd.f32 %v8132_v4, %v11996_v12  ;;  %v2469_v42 = vpop.f32.mrb[65].mxu1  ;;  %v8854_v45 = vpop.eup %8853  ;;  %v2552_v60 = vadd.f32 1.0, %v8852_v43  ;;  %v12016_v12 = vrot.slane %v11929_v50, %v356_v7  ;;  %v14999_v50 = vld [vmem:[#allocation62_spill] sm:$0xff] }
 0x4cb   :  { %8867 = vpow2.f32 %v7395_v9  ;;  %v2496_v28 = vadd.f32 %v2469_v42, %v12001_v63  ;;  %v8133_v17 = vpop.f32.mrb[66].mxu1  ;;  %v8856_v26 = vpop.eup %8855  ;;  %v2555_v8 = vadd.f32 1.0, %v8854_v45 }
 0x4cc   :  { %8869 = vpow2.f32 %v7393_v24  ;;  %v7398_v39 = vmul.f32 -1.442695, %v2498_v61  ;;  %v2499_v14 = vadd.f32 %v8133_v17, %v12005_v38  ;;  %v2472_v22 = vpop.f32.mrb[67].mxu1  ;;  %v2553_v9 = vadd.f32 1.0, %v8856_v26  ;;  %v14997_v61 = vld [vmem:[#allocation68_spill] sm:$0xff] }
 0x4cd   :  { %8871 = vrcp.f32 %v2549_v58  ;;  %v7396_v3 = vmul.f32 -1.442695, %v2496_v28  ;;  %v2497_v4 = vadd.f32 %v2472_v22, %v12010_v6  ;;  %v12022_v17 = vadd.f32 %v14997_v61, %v12016_v12  ;;  %v15001_v28 = vld [vmem:[#allocation70_spill] sm:$0xff] }
 0x4ce   :  { %8873 = vrcp.f32 %v2554_v21  ;;  %v7399_v42 = vmul.f32 -1.442695, %v2499_v14  ;;  %v12028_v7 = vadd.f32 %v14999_v50, %v12016_v12  ;;  %v12034_v26 = vadd.f32 %v15001_v28, %v12016_v12 }
 0x4cf   :  { %8875 = vpow2.f32 %v7398_v39  ;;  %14998 = vst [vmem:[#allocation61_spill] sm:$0xff] %v12022_v17  ;;  %v7397_v58 = vmul.f32 -1.442695, %v2497_v4  ;;  %v15003_v4 = vld [vmem:[#allocation64_spill] sm:$0xff]  ;;  %v12091_v62 = vadd.f32 %v15020_v56, %v12016_v12 }
 0x4d0   :  { %v8858_v5 = vpop.eup %8857  ;;  %8877 = vpow2.f32 %v7396_v3  ;;  %15000 = vst [vmem:[#allocation69_spill] sm:$0xff] %v12028_v7  ;;  %15002 = vst [vmem:[#allocation63_spill] sm:$0xff] %v12034_v26  ;;  %v12039_v61 = vadd.f32 %v15003_v4, %v12016_v12  ;;  %v15005_v4 = vld [vmem:[#allocation74_spill] sm:$0xff] }
 0x4d1   :  { %v12018_v24 = vpop.eup %8859  ;;  %8879 = vrcp.f32 %v2552_v60  ;;  %v8152_v43 = vpop.f32.mrb[68].mxu1  ;;  %v2558_v39 = vadd.f32 1.0, %v8858_v5  ;;  %15021 = vst [vmem:[#allocation93_spill] sm:$0xff] %v12091_v62 }
 0x4d2   :  { %v12024_v22 = vpop.eup %8861  ;;  %8881 = vrcp.f32 %v2555_v8  ;;  %v2686_v21 = vpop.f32.mrb[69].mxu1  ;;  %v2751_v14 = vadd.f32 %v8152_v43, %v12022_v17  ;;  %15004 = vst [vmem:[#allocation78_spill] sm:$0xff] %v12039_v61 }
 0x4d3   :  { %v12030_v45 = vpop.eup %8863  ;;  %8883 = vrcp.f32 %v2553_v9  ;;  %v8153_v60 = vpop.f32.mrb[70].mxu1  ;;  %v2749_v8 = vadd.f32 %v2686_v21, %v12028_v7  ;;  %v15007_v21 = vld [vmem:[#allocation76_spill] sm:$0xff]  ;;  %v2781_v47 = vsub.f32 1.0, %v12024_v22 }
 0x4d4   :  { %v8866_v3 = vpop.eup %8865  ;;  %8885 = vpow2.f32 %v7399_v42  ;;  %v2689_v5 = vpop.f32.mrb[71].mxu1  ;;  %v2752_v6 = vadd.f32 %v8153_v60, %v12034_v26  ;;  %v12050_v42 = vadd.f32 %v15005_v4, %v12016_v12  ;;  %v12054_v7 = vadd.f32 %v15007_v21, %v12016_v12  ;;  %v15014_v21 = vld [vmem:[#allocation84_spill] sm:$0xff] }
 0x4d5   :  { %v8868_v50 = vpop.eup %8867  ;;  %8887 = vpow2.f32 %v7397_v58  ;;  %v2750_v9 = vadd.f32 %v2689_v5, %v12039_v61  ;;  %v2556_v43 = vadd.f32 1.0, %v8866_v3  ;;  %v12056_v58 = vpop.permute.xlu0 %2852  ;;  %v15010_v5 = vld [vmem:[#allocation79_spill] sm:$0xff]  ;;  %v12068_v27 = vadd.f32 %v15014_v21, %v12016_v12 }
 0x4d6   :  { %v8870_v38 = vpop.eup %8869  ;;  %8889 = vrcp.f32 %v2558_v39  ;;  %15006 = vst [vmem:[#allocation73_spill] sm:$0xff] %v12050_v42  ;;  %15008 = vst [vmem:[#allocation80_spill] sm:$0xff] %v12054_v7  ;;  %v2559_v60 = vadd.f32 1.0, %v8868_v50  ;;  %v12060_v61 = vadd.f32 %v15010_v5, %v12016_v12  ;;  %v15016_v50 = vld [vmem:[#allocation86_spill] sm:$0xff]  ;;  %v2784_v21 = vsub.f32 1.0, %v12030_v45 }
 0x4d7   :  { %v12044_v28 = vpop.eup %8871  ;;  %8891 = vtanh.f32 %v2751_v14  ;;  %15009 = vst [vmem:[#allocation75_spill] sm:$0xff] %v12056_v58  ;;  %v15012_v14 = vld [vmem:[#allocation81_spill] sm:$0xff]  ;;  %v2557_v26 = vadd.f32 1.0, %v8870_v38  ;;  %15015 = vst [vmem:[#allocation90_spill] sm:$0xff] %v12068_v27  ;;  %v2783_v38 = vsub.f32 1.0, %v12018_v24 }
 0x4d8   :  { %v12046_v17 = vpop.eup %8873  ;;  %8893 = vtanh.f32 %v2749_v8  ;;  %15011 = vst [vmem:[#allocation88_spill] sm:$0xff] %v12060_v61  ;;  %v12064_v3 = vadd.f32 %v15012_v14, %v12016_v12  ;;  %v12072_v8 = vadd.f32 %v15016_v50, %v12016_v12 }
 0x4d9   :  { %v8876_v39 = vpop.eup %8875  ;;  %8895 = vtanh.f32 %v2752_v6  ;;  %v8156_v4 = vpop.f32.mrb[72].mxu1  ;;  %v2799_v56 = vmul.f32 %v2783_v38, %v11780_v59  ;;  %v2787_v30 = vsub.f32 1.0, %v12046_v17 }
 0x4da   :  { %15013 = vst [vmem:[#allocation83_spill] sm:$0xff] %v12064_v3  ;;  %v8878_v63 = vpop.eup %8877  ;;  %15017 = vst [vmem:[#allocation85_spill] sm:$0xff] %v12072_v8  ;;  %v2562_v18 = vadd.f32 1.0, %v8876_v39  ;;  %8897 = vtanh.f32 %v2750_v9  ;;  %v2702_v5 = vpop.f32.mrb[73].mxu1  ;;  %v2755_v50 = vadd.f32 %v8156_v4, %v12060_v61  ;;  %v2782_v9 = vsub.f32 1.0, %v12044_v28  ;;  %v15024_v61 = vld [vmem:[#allocation96_spill] sm:$0xff] }
 0x4db   :  { %v12074_v40 = vpop.eup %8879  ;;  %8899 = vrcp.f32 %v2556_v43  ;;  %v2560_v14 = vadd.f32 1.0, %v8878_v63  ;;  %v8157_v6 = vpop.f32.mrb[74].mxu1  ;;  %v15018_v43 = vld [vmem:[#allocation89_spill] sm:$0xff]  ;;  %v12096_v4 = vadd.f32 %v15022_v31, %v12016_v12  ;;  %v12100_v41 = vadd.f32 %v15024_v61, %v12016_v12 }
 0x4dc   :  { %v12078_v16 = vpop.eup %8881  ;;  %8901 = vrcp.f32 %v2559_v60  ;;  %v2705_v11 = vpop.f32.mrb[75].mxu1  ;;  %v12087_v63 = vadd.f32 %v15018_v43, %v12016_v12  ;;  %v2753_v60 = vadd.f32 %v2702_v5, %v12050_v42  ;;  %v2756_v43 = vadd.f32 %v8157_v6, %v12064_v3 }
 0x4dd   :  { %v12083_v39 = vpop.eup %8883  ;;  %8903 = vrcp.f32 %v2557_v26  ;;  %15023 = vst [vmem:[#allocation100_spill] sm:$0xff] %v12096_v4  ;;  %15025 = vst [vmem:[#allocation95_spill] sm:$0xff] %v12100_v41  ;;  %v12102_v44 = vpop.permute.xlu0 %2867  ;;  %v2754_v26 = vadd.f32 %v2705_v11, %v12054_v7  ;;  %v2797_v5 = vmul.f32 %v2781_v47, %v11745_v15  ;;  %v2800_v31 = vmul.f32 %v2784_v21, %v11792_v35 }
 0x4de   :  { %15019 = vst [vmem:[#allocation98_spill] sm:$0xff] %v12087_v63  ;;  %v8886_v53 = vpop.eup %8885  ;;  %15026 = vst [vmem:[#allocation68_spill] sm:$0xff] %v12102_v44  ;;  %8905 = vrcp.f32 %v2562_v18  ;;  %v2798_v61 = vmul.f32 %v2782_v9, %v11756_v57  ;;  %v2786_v59 = vsub.f32 1.0, %v12083_v39  ;;  %v2788_v11 = vsub.f32 1.0, %v12078_v16 }
 0x4df   :  { %v8888_v48 = vpop.eup %8887  ;;  %8907 = vrcp.f32 %v2560_v14  ;;  %v2785_v14 = vsub.f32 1.0, %v12074_v40  ;;  %v2563_v15 = vadd.f32 1.0, %v8886_v53 }
 0x4e0   :  { %v12108_v42 = vpop.eup %8889  ;;  %8909 = vtanh.f32 %v2755_v50  ;;  %v2561_v50 = vadd.f32 1.0, %v8888_v48 }
 0x4e1   :  { %v8892_v18 = vpop.eup %8891  ;;  %8911 = vtanh.f32 %v2753_v60  ;;  %v8160_v6 = vpop.f32.mrb[76].mxu1 }
 0x4e2   :  { %v8894_v38 = vpop.eup %8893  ;;  %v2815_v47 = vmul.f32 %v8892_v18, %v12018_v24  ;;  %8913 = vtanh.f32 %v2756_v43  ;;  %v2759_v35 = vadd.f32 %v8160_v6, %v12087_v63  ;;  %v2718_v21 = vpop.f32.mrb[77].mxu1 }
 0x4e3   :  { %v8896_v57 = vpop.eup %8895  ;;  %8915 = vtanh.f32 %v2754_v26  ;;  %v2757_v9 = vadd.f32 %v2718_v21, %v12068_v27  ;;  %v8161_v60 = vpop.f32.mrb[78].mxu1  ;;  %v2813_v7 = vmul.f32 %v8894_v38, %v12024_v22  ;;  %v15028_v22 = vld [vmem:[#allocation99_spill] sm:$0xff] }
 0x4e4   :  { %v8898_v3 = vpop.eup %8897  ;;  %v12120_v19 = vpop.permute.xlu0 %2877  ;;  %v2831_v36 = vadd.f32 %v2815_v47, %v2799_v56  ;;  %v2816_v53 = vmul.f32 %v8896_v57, %v12030_v45  ;;  %8917 = vtanh.f32 %v2759_v35  ;;  %v2760_v24 = vadd.f32 %v8161_v60, %v12091_v62  ;;  %v15030_v45 = vld [vmem:[#allocation101_spill] sm:$0xff] }
 0x4e5   :  { %15027 = vst [vmem:[#allocation62_spill] sm:$0xff] %v12120_v19  ;;  %v2721_v43 = vpop.f32.mrb[79].mxu1  ;;  %v12124_v18 = vpop.eup %8899  ;;  %8919 = vtanh.f32 %v2757_v9  ;;  %v2814_v26 = vmul.f32 %v8898_v3, %v12044_v28  ;;  %v2829_v6 = vadd.f32 %v2813_v7, %v2797_v5  ;;  %v12132_v38 = vadd.f32 %v15028_v22, %v12016_v12 }
 0x4e6   :  { %v2758_v48 = vadd.f32 %v2721_v43, %v12072_v8  ;;  %v12128_v21 = vpop.eup %8901  ;;  %v12136_v56 = vadd.f32 %v15030_v45, %v12016_v12  ;;  %v2832_v47 = vadd.f32 %v2816_v53, %v2800_v31  ;;  %8921 = vtanh.f32 %v2760_v24 }
 0x4e7   :  { %15029 = vst [vmem:[#allocation70_spill] sm:$0xff] %v12132_v38  ;;  %v12138_v35 = vpop.eup %8903  ;;  %v2830_v57 = vadd.f32 %v2814_v26, %v2798_v61  ;;  %v2801_v9 = vmul.f32 %v2785_v14, %v11813_v10  ;;  %v2803_v7 = vmul.f32 %v2787_v30, %v11603_v54  ;;  %v2927_v3 = vmul.f32 %v11896_v2, %v2831_v36 }
 0x4e8   :  { %15031 = vst [vmem:[#allocation64_spill] sm:$0xff] %v12136_v56  ;;  %8923 = vtanh.f32 %v2758_v48  ;;  %v12142_v28 = vpop.eup %8905  ;;  %v2928_v5 = vmul.f32 %v11898_v20, %v2832_v47  ;;  %v2804_v12 = vmul.f32 %v2788_v11, %v11609_v13  ;;  %v2925_v53 = vmul.f32 %v11894_v51, %v2829_v6  ;;  %v12152_v30 = vpop.permute.xlu0 %2887 }
 0x4e9   :  { %8925 = vrcp.f32 %v2563_v15  ;;  %v12147_v60 = vpop.eup %8907  ;;  %v8164_v31 = vpop.f32.mrb[80].mxu1  ;;  %v2926_v61 = vmul.f32 %v12056_v58, %v2830_v57  ;;  %v2802_v10 = vmul.f32 %v2786_v59, %v11826_v23  ;;  %15032 = vst [vmem:[#allocation74_spill] sm:$0xff] %v12152_v30  ;;  %v2789_v13 = vsub.f32 1.0, %v12124_v18 }
 0x4ea   :  { %8927 = vrcp.f32 %v2561_v50  ;;  %v8910_v54 = vpop.eup %8909  ;;  %v2763_v14 = vadd.f32 %v8164_v31, %v12132_v38  ;;  %v2734_v36 = vpop.f32.mrb[81].mxu1  ;;  %v12155_v15 = vpack.c.bf16 %v2928_v5, %v2927_v3  ;;  %v2791_v11 = vsub.f32 1.0, %v12108_v42 }
 0x4eb   :  { %v8912_v50 = vpop.eup %8911  ;;  %v2761_v24 = vadd.f32 %v2734_v36, %v12096_v4  ;;  %v12160_v43 = vpack.c.bf16 %v2926_v61, %v2925_v53  ;;  %v8165_v48 = vpop.f32.mrb[82].mxu1  ;;  %v2819_v23 = vmul.f32 %v8910_v54, %v12046_v17  ;;  %v2792_v59 = vsub.f32 1.0, %v12128_v21 }
 0x4ec   :  { %v8914_v26 = vpop.eup %8913  ;;  %8929 = vtanh.f32 %v2763_v14  ;;  %v2764_v6 = vadd.f32 %v8165_v48, %v12136_v56  ;;  %v2737_v22 = vpop.f32.mrb[83].mxu1  ;;  %v2817_v45 = vmul.f32 %v8912_v50, %v12074_v40  ;;  %v2790_v47 = vsub.f32 1.0, %v12138_v35 }
 0x4ed   :  { %v8916_v57 = vpop.eup %8915  ;;  %8931 = vtanh.f32 %v2761_v24  ;;  %8182 = vmatprep.mubr.bf16.mxu1 %v12160_v43  ;;  %v2762_v3 = vadd.f32 %v2737_v22, %v12100_v41  ;;  %v2820_v5 = vmul.f32 %v8914_v26, %v12078_v16  ;;  %v2835_v17 = vadd.f32 %v2819_v23, %v2803_v7  ;;  %v12175_v48 = vpop.permute.xlu0 %2897 }
 0x4ee   :  { %v8918_v31 = vpop.eup %8917  ;;  %8933 = vtanh.f32 %v2764_v6  ;;  %8183 = vmatmul.mubr.bf16.vlgmr.msra.gmra.mrb[84].mxu1 %v12155_v15  ;;  %v2818_v53 = vmul.f32 %v8916_v57, %v12083_v39  ;;  %v2833_v61 = vadd.f32 %v2817_v45, %v2801_v9  ;;  %v2807_v40 = vmul.f32 %v2791_v11, %v11658_v34  ;;  %15033 = vst [vmem:[#allocation76_spill] sm:$0xff] %v12175_v48 }
 0x4ef   :  { %v8920_v54 = vpop.eup %8919  ;;  %8935 = vtanh.f32 %v2762_v3  ;;  %v2836_v14 = vadd.f32 %v2820_v5, %v2804_v12  ;;  %v2805_v36 = vmul.f32 %v2789_v13, %v11627_v55  ;;  %v2823_v50 = vmul.f32 %v8918_v31, %v12108_v42 }
 0x4f0   :  { %v8922_v24 = vpop.eup %8921  ;;  %v2834_v16 = vadd.f32 %v2818_v53, %v2802_v10  ;;  %v2806_v7 = vmul.f32 %v2790_v47, %v11635_v37  ;;  %v2821_v23 = vmul.f32 %v8920_v54, %v12124_v18  ;;  %v2808_v39 = vmul.f32 %v2792_v59, %v11667_v49 }
 0x4f1   :  { %v2931_v34 = vmul.f32 %v12120_v19, %v2835_v17  ;;  %v2932_v11 = vmul.f32 %v11902_v25, %v2836_v14  ;;  %v2824_v12 = vmul.f32 %v8922_v24, %v12128_v21  ;;  %v2839_v55 = vadd.f32 %v2823_v50, %v2807_v40  ;;  %v12192_v17 = vpop.permute.xlu0 %2907 }
 0x4f2   :  { %v8924_v9 = vpop.eup %8923  ;;  %v2929_v42 = vmul.f32 %v12102_v44, %v2833_v61  ;;  %v2930_v26 = vmul.f32 %v11900_v32, %v2834_v16  ;;  %v2837_v37 = vadd.f32 %v2821_v23, %v2805_v36  ;;  %v2795_v59 = vsub.f32 1.0, %v12142_v28  ;;  %15034 = vst [vmem:[#allocation79_spill] sm:$0xff] %v12192_v17  ;;  %v15105_v32 = vld [vmem:[#allocation50_spill] sm:$0xff] }
 0x4f3   :  { %v8926_v13 = vpop.eup %8925  ;;  %v2822_v10 = vmul.f32 %v8924_v9, %v12138_v35  ;;  %v12186_v18 = vpack.c.bf16 %v2932_v11, %v2931_v34  ;;  %v2840_v49 = vadd.f32 %v2824_v12, %v2808_v39  ;;  %v2793_v47 = vsub.f32 1.0, %v12147_v60 }
 0x4f4   :  { %v8928_v6 = vpop.eup %8927  ;;  %v2943_v22 = vpack.c.bf16 %v2930_v26, %v2929_v42  ;;  %v2935_v21 = vmul.f32 %v12175_v48, %v2839_v55  ;;  %v2796_v3 = vsub.f32 1.0, %v8926_v13  ;;  %v2933_v35 = vmul.f32 %v12152_v30, %v2837_v37  ;;  %v15036_v26 = vld [vmem:[#allocation125_spill] sm:$0xff] }
 0x4f5   :  { %v2838_v45 = vadd.f32 %v2822_v10, %v2806_v7  ;;  %v2936_v57 = vmul.f32 %v11906_v1, %v2840_v49  ;;  %v2794_v53 = vsub.f32 1.0, %v8928_v6  ;;  %v2811_v54 = vmul.f32 %v2795_v59, %v11721_v46  ;;  %v12203_v46 = vpop.permute.xlu0 %2917  ;;  %v15037_v10 = vld [vmem:[#allocation124_spill] sm:$0xff] }
 0x4f6   :  { %v8930_v5 = vpop.eup %8929  ;;  %8186 = vmatprep.mubr.bf16.mxu1 %v2943_v22  ;;  %v2809_v24 = vmul.f32 %v2793_v47, %v11691_v33  ;;  %v2812_v23 = vmul.f32 %v2796_v3, %v11733_v0  ;;  %15035 = vst [vmem:[#allocation81_spill] sm:$0xff] %v12203_v46 }
 0x4f7   :  { %v2934_v31 = vmul.f32 %v11904_v52, %v2838_v45  ;;  %v8932_v61 = vpop.eup %8931  ;;  %8187 = vmatmul.mubr.bf16.gmra.mrb[88].mxu1 %v12186_v18  ;;  %v2946_v40 = vpack.c.bf16 %v2936_v57, %v2935_v21  ;;  %v2827_v14 = vmul.f32 %v8930_v5, %v12142_v28  ;;  %v2810_v34 = vmul.f32 %v2794_v53, %v11700_v29 }
 0x4f8   :  { %v8934_v36 = vpop.eup %8933  ;;  %v2825_v16 = vmul.f32 %v8932_v61, %v12147_v60  ;;  %v15038_v29 = vmov 0  }
 0x4f9   :  { %v2945_v50 = vpack.c.bf16 %v2934_v31, %v2933_v35  ;;  %v8936_v7 = vpop.eup %8935  ;;  %v2828_v39 = vmul.f32 %v8934_v36, %v8926_v13  ;;  %v2843_v9 = vadd.f32 %v2827_v14, %v2811_v54 }
 0x4fa   :  { %v2826_v11 = vmul.f32 %v8936_v7, %v8928_v6  ;;  %v2841_v12 = vadd.f32 %v2825_v16, %v2809_v24 }
 0x4fb   :  { %8190 = vmatprep.mubr.bf16.mxu1 %v2945_v50  ;;  %v2844_v55 = vadd.f32 %v2828_v39, %v2812_v23  ;;  %v2939_v42 = vmul.f32 %v12203_v46, %v2843_v9 }
 0x4fc   :  { %v2842_v28 = vadd.f32 %v2826_v11, %v2810_v34  ;;  %v2937_v60 = vmul.f32 %v12192_v17, %v2841_v12  ;;  %v15039_v34 = vmov 1.0|1.0   ;;  %v9653_v12 = vld [vmem:[#allocation17 + $0x18] sm:$0xff]  }
 0x4fd   :  { %v2940_v33 = vmul.f32 %v15036_v26, %v2844_v55  ;;  %v9654_v55 = vld [vmem:[#allocation17 + $0x20] sm:$0xff]   ;;  %v15103_v26 = vld [vmem:[#allocation51_spill] sm:$0xff] }
 0x4fe   :  { %v2938_v37 = vmul.f32 %v15037_v10, %v2842_v28  ;;  %v15101_v28 = vld [vmem:[#allocation46_spill] sm:$0xff] }
 0x4ff   :  { %8191 = vmatmul.mubr.bf16.gmra.mrb[92].mxu1 %v2946_v40  ;;  %v2948_v0 = vpack.c.bf16 %v2940_v33, %v2939_v42  ;;  %v9655_v42 = vld [vmem:[#allocation17 + $0x28] sm:$0xff]   ;;  %v9656_v33 = vld [vmem:[#allocation17 + $0x30] sm:$0xff]  }
 0x500   :  { %v2947_v13 = vpack.c.bf16 %v2938_v37, %v2937_v60  ;;  %v9657_v37 = vld [vmem:[#allocation17 + $0x38] sm:$0xff]  }
 0x502   :  { %8194 = vmatprep.mubr.bf16.mxu1 %v2947_v13 }
 0x507   :  { %8195 = vmatmul.mubr.bf16.gmra.mrb[96].mxu1 %v2948_v0 }
 0x508   :  { %3086 = vmatprep.mubr.bf16.mxu1 %v15038_v29 }
 0x5c1   :  { %v8184_v6 = vpop.f32.mrb[84].mxu1 }
 0x5c2   :  { %v2983_v49 = vpop.f32.mrb[85].mxu1 }
 0x5c3   :  { %v8185_v59 = vpop.f32.mrb[86].mxu1 }
 0x5c4   :  { %v3047_v45 = vpack.c.bf16 %v8185_v59, %v8184_v6  ;;  %v2986_v47 = vpop.f32.mrb[87].mxu1 }
 0x5c5   :  { %v3046_v21 = vpack.c.bf16 %v2986_v47, %v2983_v49  ;;  %v15098_v49 = vld [vmem:[#allocation49_spill] sm:$0xff] }
 0x5c7   :  { %3054 = vmatprep.subr.bf16.mxu1 %v3046_v21  ;;  %v15050_v21 = vld [vmem:[#allocation102_spill] sm:$0xff] }
 0x5c8   :  { %3055 = vmatpush1.bf16.msra.mxu1 %v12160_v43  ;;  %vm15051_vm0 = vnez %v15050_v21  ;;  %v15095_v21 = vld [vmem:[#allocation65_spill] sm:$0xff] }
 0x5c9   :  { %3056 = vmatprep.subr.bf16.mxu1 %v3047_v45 }
 0x5ca   :  { %v8188_v57 = vpop.f32.mrb[88].mxu1 }
 0x5cb   :  { %v2999_v3 = vpop.f32.mrb[89].mxu1 }
 0x5cc   :  { %v8189_v5 = vpop.f32.mrb[90].mxu1  ;;  %3057 = vmatpush1.bf16.msra.mxu1 %v12155_v15 }
 0x5cd   :  { %v3049_v35 = vpack.c.bf16 %v8189_v5, %v8188_v57  ;;  %v3002_v31 = vpop.f32.mrb[91].mxu1  ;;  %v15052_v57 = vld [vmem:[#allocation103_spill] sm:$0xff]  ;;  %v15056_v5 = vld [vmem:[#allocation105_spill] sm:$0xff] }
 0x5ce   :  { %v3048_v53 = vpack.c.bf16 %v3002_v31, %v2999_v3  ;;  %vm15053_vm2 = vnez %v15052_v57  ;;  %v15054_v3 = vld [vmem:[#allocation104_spill] sm:$0xff]  ;;  %v15060_v31 = vld [vmem:[#allocation107_spill] sm:$0xff] }
 0x5cf   :  { %vm15055_vm7 = vnez %v15054_v3  ;;  %v15094_v57 = vld [vmem:[#allocation44_spill] sm:$0xff] }
 0x5d0   :  { %3058 = vmatprep.subr.bf16.mxu1 %v3048_v53  ;;  %v15062_v53 = vld [vmem:[#allocation108_spill] sm:$0xff] }
 0x5d1   :  { %3059 = vmatpush1.bf16.msra.mxu1 %v2943_v22  ;;  %v9650_v22 = vld [vmem:[#allocation17] sm:$0xff]  }
 0x5d2   :  { %v8192_v61 = vpop.f32.mrb[92].mxu1  ;;  %3060 = vmatprep.subr.bf16.mxu1 %v3049_v35  ;;  %v15058_v35 = vld [vmem:[#allocation106_spill] sm:$0xff] }
 0x5d3   :  { %v3015_v54 = vpop.f32.mrb[93].mxu1 }
 0x5d4   :  { %v8193_v14 = vpop.f32.mrb[94].mxu1 }
 0x5d5   :  { %v3051_v36 = vpack.c.bf16 %v8193_v14, %v8192_v61  ;;  %v3018_v24 = vpop.f32.mrb[95].mxu1  ;;  %3061 = vmatpush1.bf16.msra.mxu1 %v12186_v18  ;;  %v9651_v18 = vld [vmem:[#allocation17 + $0x8] sm:$0xff]   ;;  %v15068_v14 = vld [vmem:[#allocation111_spill] sm:$0xff] }
 0x5d6   :  { %v3050_v43 = vpack.c.bf16 %v3018_v24, %v3015_v54  ;;  %v15064_v61 = vld [vmem:[#allocation109_spill] sm:$0xff]  ;;  %v15066_v54 = vld [vmem:[#allocation110_spill] sm:$0xff] }
 0x5d7   :  { %v15072_v24 = vld [vmem:[#allocation113_spill] sm:$0xff] }
 0x5d8   :  { %3062 = vmatprep.subr.bf16.mxu1 %v3050_v43  ;;  %v15074_v43 = vld [vmem:[#allocation114_spill] sm:$0xff] }
 0x5d9   :  { %3063 = vmatpush1.bf16.msra.mxu1 %v2945_v50  ;;  %v9652_v50 = vld [vmem:[#allocation17 + $0x10] sm:$0xff]  }
 0x5da   :  { %v8196_v16 = vpop.f32.mrb[96].mxu1  ;;  %3064 = vmatprep.subr.bf16.mxu1 %v3051_v36  ;;  %v15070_v36 = vld [vmem:[#allocation112_spill] sm:$0xff] }
 0x5db   :  { %v3031_v7 = vpop.f32.mrb[97].mxu1 }
 0x5dc   :  { %v8197_v15 = vpop.f32.mrb[98].mxu1 }
 0x5dd   :  { %v3053_v23 = vpack.c.bf16 %v8197_v15, %v8196_v16  ;;  %v3034_v39 = vpop.f32.mrb[99].mxu1  ;;  %3065 = vmatpush1.bf16.msra.mxu1 %v2946_v40  ;;  %v15076_v16 = vld [vmem:[#allocation115_spill] sm:$0xff] }
 0x5de   :  { %v3052_v9 = vpack.c.bf16 %v3034_v39, %v3031_v7  ;;  %v15085_v7 = vld [vmem:[#allocation38_spill] sm:$0xff] }
 0x5e0   :  { %3066 = vmatprep.subr.bf16.mxu1 %v3052_v9 }
 0x5e1   :  { %3067 = vmatpush1.bf16.msra.mxu1 %v2947_v13 }
 0x5e2   :  { %3068 = vmatprep.subr.bf16.mxu1 %v3053_v23 }
 0x5e5   :  { %3069 = vmatpush1.bf16.msra.mxu1 %v2948_v0  ;;  %v9658_v0 = vld [vmem:[#allocation20] sm:$0xff]  }
 0x5e6   :  { %8294 = vmatprep.subr.bf16.mxu1 %v9650_v22 }
 0x5e8   :  { %7409 = vmatmul.mubr.msk.bf16.vlgmr.msra.gmra.mrb[100].mxu1 %vm10717_vm5, %v15039_v34 }
 0x5e9   :  { %3096 = vmatprep.mubr.bf16.mxu1 %v15038_v29  ;;  %8295 = vmatpush3.bf16.msra.mxu1 %v9650_v22  ;;  %v15081_v22 = vld [vmem:[#allocation39_spill] sm:$0xff] }
 0x5ea   :  { %8296 = vmatprep.subr.bf16.mxu1 %v9651_v18 }
 0x5ed   :  { %8297 = vmatpush3.bf16.msra.mxu1 %v9651_v18 }
 0x5ee   :  { %8298 = vmatprep.subr.bf16.mxu1 %v9652_v50 }
 0x5f0   :  { %7411 = vmatmul.mubr.msk.bf16.gmra.mrb[104].mxu1 %vm10743_vm11, %v15039_v34 }
 0x5f1   :  { %3106 = vmatprep.mubr.bf16.mxu1 %v15038_v29  ;;  %8299 = vmatpush3.bf16.msra.mxu1 %v9652_v50 }
 0x5f2   :  { %8300 = vmatprep.subr.bf16.mxu1 %v9653_v12 }
 0x5f5   :  { %8301 = vmatpush3.bf16.msra.mxu1 %v9653_v12 }
 0x5f6   :  { %8302 = vmatprep.subr.bf16.mxu1 %v9654_v55 }
 0x5f8   :  { %7413 = vmatmul.mubr.msk.bf16.gmra.mrb[108].mxu1 %vm10765_vm1, %v15039_v34 }
 0x5f9   :  { %3116 = vmatprep.mubr.bf16.mxu1 %v15038_v29  ;;  %8303 = vmatpush3.bf16.msra.mxu1 %v9654_v55 }
 0x5fa   :  { %8304 = vmatprep.subr.bf16.mxu1 %v9655_v42 }
 0x5fd   :  { %8305 = vmatpush3.bf16.msra.mxu1 %v9655_v42  ;;  %v15082_v42 = vld [vmem:[#allocation41_spill] sm:$0xff] }
 0x5fe   :  { %8306 = vmatprep.subr.bf16.mxu1 %v9656_v33 }
 0x600   :  { %7415 = vmatmul.mubr.msk.bf16.gmra.mrb[112].mxu1 %vm10795_vm9, %v15039_v34 }
 0x601   :  { %3126 = vmatprep.mubr.bf16.mxu1 %v15038_v29  ;;  %8307 = vmatpush3.bf16.msra.mxu1 %v9656_v33 }
 0x602   :  { %8308 = vmatprep.subr.bf16.mxu1 %v9657_v37 }
 0x605   :  { %8309 = vmatpush3.bf16.msra.mxu1 %v9657_v37  ;;  %v15083_v37 = vld [vmem:[#allocation55_spill] sm:$0xff] }
 0x606   :  { %8326 = vmatprep.subr.bf16.mxu1 %v9658_v0 }
 0x608   :  { %7417 = vmatmul.mubr.msk.bf16.gmra.mrb[116].mxu1 %vm10825_vm3, %v15039_v34 }
 0x609   :  { %3136 = vmatprep.mubr.bf16.mxu1 %v15038_v29 }
 0x610   :  { %7419 = vmatmul.mubr.msk.bf16.gmra.mrb[120].mxu1 %vm10848_vm12, %v15039_v34 }
 0x611   :  { %3146 = vmatprep.mubr.bf16.mxu1 %v15038_v29 }
 0x618   :  { %7421 = vmatmul.mubr.msk.bf16.gmra.mrb[124].mxu1 %vm10868_vm15, %v15039_v34 }
 0x619   :  { %3156 = vmatprep.mubr.bf16.mxu1 %v15038_v29 }
 0x620   :  { %7423 = vmatmul.mubr.msk.bf16.gmra.mrb[128].mxu1 %vm10888_vm13, %v15039_v34 }
 0x621   :  { %3166 = vmatprep.mubr.bf16.mxu1 %v15038_v29 }
 0x628   :  { %7425 = vmatmul.mubr.msk.bf16.gmra.mrb[132].mxu1 %vm10908_vm6, %v15039_v34 }
 0x629   :  { %3176 = vmatprep.mubr.bf16.mxu1 %v15038_v29 }
 0x630   :  { %7427 = vmatmul.mubr.msk.bf16.gmra.mrb[136].mxu1 %vm10928_vm14, %v15039_v34  ;;  %vm15057_vm14 = vnez %v15056_v5  ;;  %v15093_v5 = vld [vmem:[#allocation42_spill] sm:$0xff] }
 0x631   :  { %3186 = vmatprep.mubr.bf16.mxu1 %v15038_v29 }
 0x638   :  { %7429 = vmatmul.mubr.msk.bf16.gmra.mrb[140].mxu1 %vm15051_vm0, %v15039_v34  ;;  %vm15059_vm0 = vnez %v15058_v35 }
 0x639   :  { %3196 = vmatprep.mubr.bf16.mxu1 %v15038_v29 }
 0x640   :  { %7431 = vmatmul.mubr.msk.bf16.gmra.mrb[144].mxu1 %vm15053_vm2, %v15039_v34  ;;  %vm15061_vm2 = vnez %v15060_v31  ;;  %v15090_v31 = vld [vmem:[#allocation45_spill] sm:$0xff] }
 0x641   :  { %3206 = vmatprep.mubr.bf16.mxu1 %v15038_v29 }
 0x648   :  { %7433 = vmatmul.mubr.msk.bf16.gmra.mrb[148].mxu1 %vm15055_vm7, %v15039_v34  ;;  %vm15063_vm7 = vnez %v15062_v53 }
 0x649   :  { %3216 = vmatprep.mubr.bf16.mxu1 %v15038_v29 }
 0x650   :  { %7435 = vmatmul.mubr.msk.bf16.gmra.mrb[152].mxu1 %vm15057_vm14, %v15039_v34  ;;  %vm15065_vm14 = vnez %v15064_v61 }
 0x651   :  { %3226 = vmatprep.mubr.bf16.mxu1 %v15038_v29 }
 0x658   :  { %7437 = vmatmul.mubr.msk.bf16.gmra.mrb[156].mxu1 %vm15059_vm0, %v15039_v34  ;;  %vm15067_vm0 = vnez %v15066_v54  ;;  %v15089_v54 = vld [vmem:[#allocation43_spill] sm:$0xff] }
 0x659   :  { %3236 = vmatprep.mubr.bf16.mxu1 %v15038_v29 }
 0x660   :  { %7439 = vmatmul.mubr.msk.bf16.gmra.mrb[160].mxu1 %vm15061_vm2, %v15039_v34  ;;  %vm15069_vm2 = vnez %v15068_v14 }
 0x661   :  { %3246 = vmatprep.mubr.bf16.mxu1 %v15038_v29 }
 0x668   :  { %7441 = vmatmul.mubr.msk.bf16.gmra.mrb[164].mxu1 %vm15063_vm7, %v15039_v34  ;;  %vm15071_vm7 = vnez %v15070_v36  ;;  %v15087_v36 = vld [vmem:[#allocation57_spill] sm:$0xff] }
 0x669   :  { %3256 = vmatprep.mubr.bf16.mxu1 %v15038_v29 }
 0x670   :  { %7443 = vmatmul.mubr.msk.bf16.gmra.mrb[168].mxu1 %vm15065_vm14, %v15039_v34  ;;  %vm15073_vm14 = vnez %v15072_v24  ;;  %v15086_v24 = vld [vmem:[#allocation40_spill] sm:$0xff] }
 0x671   :  { %3266 = vmatprep.mubr.bf16.mxu1 %v15038_v29 }
 0x678   :  { %7445 = vmatmul.mubr.msk.bf16.gmra.mrb[172].mxu1 %vm15067_vm0, %v15039_v34  ;;  %vm15075_vm0 = vnez %v15074_v43 }
 0x679   :  { %3276 = vmatprep.mubr.bf16.mxu1 %v15038_v29 }
 0x680   :  { %7447 = vmatmul.mubr.msk.bf16.gmra.mrb[176].mxu1 %vm15069_vm2, %v15039_v34  ;;  %vm15077_vm2 = vnez %v15076_v16 }
 0x681   :  { %3286 = vmatprep.mubr.bf16.mxu1 %v15038_v29 }
 0x688   :  { %7449 = vmatmul.mubr.msk.bf16.gmra.mrb[180].mxu1 %vm15071_vm7, %v15039_v34 }
 0x689   :  { %3296 = vmatprep.mubr.bf16.mxu1 %v15038_v29 }
 0x690   :  { %7451 = vmatmul.mubr.msk.bf16.gmra.mrb[184].mxu1 %vm15073_vm14, %v15039_v34 }
 0x691   :  { %3306 = vmatprep.mubr.bf16.mxu1 %v15038_v29 }
 0x698   :  { %7453 = vmatmul.mubr.msk.bf16.gmra.mrb[188].mxu1 %vm15075_vm0, %v15039_v34 }
 0x699   :  { %3316 = vmatprep.mubr.bf16.mxu1 %v15038_v29 }
 0x6a0   :  { %7455 = vmatmul.mubr.msk.bf16.gmra.mrb[192].mxu1 %vm15077_vm2, %v15039_v34 }
 0x6a1   :  { %3326 = vmatprep.mubr.bf16.mxu1 %v15038_v29 }
 0x6a8   :  { %7457 = vmatmul.mubr.msk.bf16.gmra.mrb[196].mxu1 %vm11116_vm8, %v15039_v34 }
 0x6a9   :  { %3336 = vmatprep.mubr.bf16.mxu1 %v15038_v29 }
 0x6b0   :  { %7459 = vmatmul.mubr.msk.bf16.gmra.mrb[200].mxu1 %vm11131_vm4, %v15039_v34  ;;  %vm15084_vm4 = vnez %v15083_v37 }
 0x6b1   :  { %3346 = vmatprep.mubr.bf16.mxu1 %v15038_v29 }
 0x6b8   :  { %7461 = vmatmul.mubr.msk.bf16.gmra.mrb[204].mxu1 %vm11146_vm10, %v15039_v34  ;;  %vm15088_vm10 = vnez %v15087_v36 }
 0x6b9   :  { %3356 = vmatprep.mubr.bf16.mxu1 %v15038_v29 }
 0x6bb   :  { %v12321_v39 = vpop.f32.mrb[100].mxu1 }
 0x6bc   :  { %v3090_v9 = vpop.f32.mrb[101].mxu1 }
 0x6bd   :  { %v3407_v18 = vadd.f32 %v3090_v9, %v15081_v22  ;;  %v12324_v50 = vpop.f32.mrb[102].mxu1 }
 0x6be   :  { %v3094_v12 = vpop.f32.mrb[103].mxu1 }
 0x6bf   :  { %v7472_v55 = vmul.f32 -1.442695, %v3407_v18  ;;  %v3408_v33 = vadd.f32 %v3094_v12, %v15082_v42 }
 0x6c0   :  { %7463 = vmatmul.mubr.msk.bf16.gmra.mrb[208].mxu1 %vm15084_vm4, %v15039_v34 }
 0x6c1   :  { %8937 = vpow2.f32 %v7472_v55  ;;  %v7473_v0 = vmul.f32 -1.442695, %v3408_v33  ;;  %3366 = vmatprep.mubr.bf16.mxu1 %v15038_v29 }
 0x6c3   :  { %8939 = vpow2.f32 %v7473_v0  ;;  %v12331_v23 = vpop.f32.mrb[104].mxu1 }
 0x6c4   :  { %v3100_v15 = vpop.f32.mrb[105].mxu1 }
 0x6c5   :  { %v3409_v9 = vadd.f32 %v3100_v15, %v15085_v7  ;;  %v12334_v16 = vpop.f32.mrb[106].mxu1 }
 0x6c6   :  { %v3104_v43 = vpop.f32.mrb[107].mxu1 }
 0x6c7   :  { %v7474_v18 = vmul.f32 -1.442695, %v3409_v9  ;;  %v3410_v12 = vadd.f32 %v3104_v43, %v15086_v24 }
 0x6c8   :  { %7465 = vmatmul.mubr.msk.bf16.gmra.mrb[212].mxu1 %vm15088_vm10, %v15039_v34 }
 0x6c9   :  { %8941 = vpow2.f32 %v7474_v18  ;;  %v7475_v55 = vmul.f32 -1.442695, %v3410_v12  ;;  %3376 = vmatprep.mubr.bf16.mxu1 %v15038_v29  ;;  %v15091_v12 = vld [vmem:[#allocation59_spill] sm:$0xff] }
 0x6ca   :  { %vm15092_vm10 = vnez %v15091_v12 }
 0x6cb   :  { %v8938_v33 = vpop.eup %8937  ;;  %8943 = vpow2.f32 %v7475_v55  ;;  %v12341_v0 = vpop.f32.mrb[108].mxu1 }
 0x6cc   :  { %v3471_v37 = vadd.f32 1.0, %v8938_v33  ;;  %v3110_v15 = vpop.f32.mrb[109].mxu1 }
 0x6cd   :  { %v8940_v14 = vpop.eup %8939  ;;  %v3411_v61 = vadd.f32 %v3110_v15, %v15089_v54  ;;  %v12344_v9 = vpop.f32.mrb[110].mxu1 }
 0x6ce   :  { %8945 = vrcp.f32 %v3471_v37  ;;  %v3472_v43 = vadd.f32 1.0, %v8940_v14  ;;  %v3114_v53 = vpop.f32.mrb[111].mxu1 }
 0x6cf   :  { %v7476_v36 = vmul.f32 -1.442695, %v3411_v61  ;;  %v3412_v18 = vadd.f32 %v3114_v53, %v15090_v31 }
 0x6d0   :  { %8947 = vrcp.f32 %v3472_v43  ;;  %7467 = vmatmul.mubr.msk.bf16.gmra.mrb[216].mxu1 %vm15092_vm10, %v15039_v34  ;;  %vm15096_vm10 = vnez %v15095_v21  ;;  %v15097_v21 = vld [vmem:[#allocation47_spill] sm:$0xff] }
 0x6d1   :  { %8949 = vpow2.f32 %v7476_v36  ;;  %v7477_v55 = vmul.f32 -1.442695, %v3412_v18  ;;  %3386 = vmatprep.mubr.bf16.mxu1 %v15038_v29 }
 0x6d3   :  { %v8942_v33 = vpop.eup %8941  ;;  %8951 = vpow2.f32 %v7477_v55  ;;  %v12351_v15 = vpop.f32.mrb[112].mxu1 }
 0x6d4   :  { %v3473_v35 = vadd.f32 1.0, %v8942_v33  ;;  %v3120_v37 = vpop.f32.mrb[113].mxu1 }
 0x6d5   :  { %v8944_v14 = vpop.eup %8943  ;;  %v3413_v61 = vadd.f32 %v3120_v37, %v15093_v5  ;;  %v12354_v3 = vpop.f32.mrb[114].mxu1 }
 0x6d6   :  { %8953 = vrcp.f32 %v3473_v35  ;;  %v3474_v53 = vadd.f32 1.0, %v8944_v14  ;;  %v3124_v43 = vpop.f32.mrb[115].mxu1 }
 0x6d7   :  { %v7478_v12 = vmul.f32 -1.442695, %v3413_v61  ;;  %v3414_v36 = vadd.f32 %v3124_v43, %v15094_v57 }
 0x6d8   :  { %v8946_v18 = vpop.eup %8945  ;;  %8955 = vrcp.f32 %v3474_v53  ;;  %7469 = vmatmul.mubr.msk.bf16.gmra.mrb[220].mxu1 %vm15096_vm10, %v15039_v34 }
 0x6d9   :  { %8957 = vpow2.f32 %v7478_v12  ;;  %v7479_v55 = vmul.f32 -1.442695, %v3414_v36  ;;  %3396 = vmatprep.mubr.bf16.mxu1 %v15038_v29  ;;  %v12362_v33 = vmul.f32 %v8946_v18, %v12321_v39 }
 0x6da   :  { %v8948_v37 = vpop.eup %8947 }
 0x6db   :  { %v8950_v35 = vpop.eup %8949  ;;  %8959 = vpow2.f32 %v7479_v55  ;;  %v12364_v14 = vpop.f32.mrb[116].mxu1  ;;  %v12367_v61 = vmul.f32 %v8948_v37, %v12324_v50  ;;  %v15099_v55 = vld [vmem:[#allocation71_spill] sm:$0xff] }
 0x6dc   :  { %v3475_v53 = vadd.f32 1.0, %v8950_v35  ;;  %v3130_v43 = vpop.f32.mrb[117].mxu1  ;;  %vm15100_vm10 = vnez %v15099_v55 }
 0x6dd   :  { %v8952_v47 = vpop.eup %8951  ;;  %v3415_v45 = vadd.f32 %v3130_v43, %v15097_v21  ;;  %v12370_v12 = vpop.f32.mrb[118].mxu1 }
 0x6de   :  { %8961 = vrcp.f32 %v3475_v53  ;;  %v3476_v36 = vadd.f32 1.0, %v8952_v47  ;;  %v3134_v59 = vpop.f32.mrb[119].mxu1 }
 0x6df   :  { %v7480_v18 = vmul.f32 -1.442695, %v3415_v45  ;;  %v3416_v6 = vadd.f32 %v3134_v59, %v15098_v49 }
 0x6e0   :  { %v8954_v13 = vpop.eup %8953  ;;  %8963 = vrcp.f32 %v3476_v36  ;;  %7471 = vmatmul.mubr.msk.bf16.gmra.mrb[224].mxu1 %vm15100_vm10, %v15039_v34 }
 0x6e1   :  { %v12377_v37 = vmul.f32 %v8954_v13, %v12331_v23  ;;  %8965 = vpow2.f32 %v7480_v18  ;;  %v7481_v35 = vmul.f32 -1.442695, %v3416_v6  ;;  %v15102_v6 = vld [vmem:[#allocation48_spill] sm:$0xff] }
 0x6e2   :  { %v8956_v43 = vpop.eup %8955 }
 0x6e3   :  { %v8958_v60 = vpop.eup %8957  ;;  %v12380_v53 = vmul.f32 %v8956_v43, %v12334_v16  ;;  %8967 = vpow2.f32 %v7481_v35  ;;  %v12382_v45 = vpop.f32.mrb[120].mxu1 }
 0x6e4   :  { %v3477_v59 = vadd.f32 1.0, %v8958_v60  ;;  %v3140_v47 = vpop.f32.mrb[121].mxu1 }
 0x6e5   :  { %v8960_v36 = vpop.eup %8959  ;;  %v3417_v40 = vadd.f32 %v3140_v47, %v15101_v28  ;;  %v12385_v55 = vpop.f32.mrb[122].mxu1 }
 0x6e6   :  { %8969 = vrcp.f32 %v3477_v59  ;;  %v3478_v13 = vadd.f32 1.0, %v8960_v36  ;;  %v3144_v11 = vpop.f32.mrb[123].mxu1 }
 0x6e7   :  { %v7482_v18 = vmul.f32 -1.442695, %v3417_v40  ;;  %v3418_v34 = vadd.f32 %v3144_v11, %v15102_v6 }
 0x6e8   :  { %v8962_v29 = vpop.eup %8961  ;;  %8971 = vrcp.f32 %v3478_v13 }
 0x6e9   :  { %8973 = vpow2.f32 %v7482_v18  ;;  %v7483_v43 = vmul.f32 -1.442695, %v3418_v34  ;;  %v12389_v35 = vmul.f32 %v8962_v29, %v12341_v0  ;;  %v15104_v18 = vld [vmem:[#allocation53_spill] sm:$0xff] }
 0x6ea   :  { %v8964_v60 = vpop.eup %8963 }
 0x6eb   :  { %v8966_v10 = vpop.eup %8965  ;;  %8975 = vpow2.f32 %v7483_v43  ;;  %v12391_v17 = vpop.f32.mrb[124].mxu1  ;;  %v12394_v47 = vmul.f32 %v8964_v60, %v12344_v9 }
 0x6ec   :  { %v3479_v59 = vadd.f32 1.0, %v8966_v10  ;;  %v3150_v36 = vpop.f32.mrb[125].mxu1 }
 0x6ed   :  { %v8968_v40 = vpop.eup %8967  ;;  %v3419_v11 = vadd.f32 %v3150_v36, %v15103_v26  ;;  %v12397_v46 = vpop.f32.mrb[126].mxu1 }
 0x6ee   :  { %8977 = vrcp.f32 %v3479_v59  ;;  %v3480_v34 = vadd.f32 1.0, %v8968_v40  ;;  %v3154_v13 = vpop.f32.mrb[127].mxu1 }
 0x6ef   :  { %v7484_v29 = vmul.f32 -1.442695, %v3419_v11  ;;  %v3420_v52 = vadd.f32 %v3154_v13, %v15104_v18 }
 0x6f0   :  { %v8970_v30 = vpop.eup %8969  ;;  %8979 = vrcp.f32 %v3480_v34 }
 0x6f1   :  { %8981 = vpow2.f32 %v7484_v29  ;;  %v7485_v43 = vmul.f32 -1.442695, %v3420_v52  ;;  %v12401_v60 = vmul.f32 %v8970_v30, %v12351_v15  ;;  %v15106_v29 = vld [vmem:[#allocation52_spill] sm:$0xff] }
 0x6f2   :  { %v8972_v10 = vpop.eup %8971 }
 0x6f3   :  { %v8974_v1 = vpop.eup %8973  ;;  %8983 = vpow2.f32 %v7485_v43  ;;  %v12403_v48 = vpop.f32.mrb[128].mxu1  ;;  %v12406_v36 = vmul.f32 %v8972_v10, %v12354_v3 }
 0x6f4   :  { %v3481_v59 = vadd.f32 1.0, %v8974_v1  ;;  %v3160_v40 = vpop.f32.mrb[129].mxu1 }
 0x6f5   :  { %v8976_v11 = vpop.eup %8975  ;;  %v3421_v13 = vadd.f32 %v3160_v40, %v15105_v32  ;;  %v12409_v44 = vpop.f32.mrb[130].mxu1 }
 0x6f6   :  { %8985 = vrcp.f32 %v3481_v59  ;;  %v3482_v52 = vadd.f32 1.0, %v8976_v11  ;;  %v3164_v34 = vpop.f32.mrb[131].mxu1 }
 0x6f7   :  { %v7486_v30 = vmul.f32 -1.442695, %v3421_v13  ;;  %v3422_v25 = vadd.f32 %v3164_v34, %v15106_v29 }
 0x6f8   :  { %v8978_v19 = vpop.eup %8977  ;;  %8987 = vrcp.f32 %v3482_v52 }
 0x6f9   :  { %8989 = vpow2.f32 %v7486_v30  ;;  %v7487_v43 = vmul.f32 -1.442695, %v3422_v25  ;;  %v12413_v10 = vmul.f32 %v8978_v19, %v12364_v14 }
 0x6fa   :  { %v8980_v1 = vpop.eup %8979 }
 0x6fb   :  { %v8982_v41 = vpop.eup %8981  ;;  %8991 = vpow2.f32 %v7487_v43  ;;  %v12415_v56 = vpop.f32.mrb[132].mxu1  ;;  %v12418_v40 = vmul.f32 %v8980_v1, %v12370_v12 }
 0x6fc   :  { %v3483_v59 = vadd.f32 1.0, %v8982_v41  ;;  %v12422_v11 = vadd.f32 %v12415_v56, %v12321_v39  ;;  %v3170_v13 = vpop.f32.mrb[133].mxu1 }
 0x6fd   :  { %v8984_v52 = vpop.eup %8983  ;;  %v3567_v25 = vadd.f32 %v3170_v13, %v15081_v22  ;;  %v12425_v34 = vpop.f32.mrb[134].mxu1 }
 0x6fe   :  { %8993 = vrcp.f32 %v3483_v59  ;;  %v3484_v19 = vadd.f32 1.0, %v8984_v52  ;;  %v12429_v30 = vadd.f32 %v12425_v34, %v12324_v50  ;;  %v3174_v43 = vpop.f32.mrb[135].mxu1 }
 0x6ff   :  { %v7488_v1 = vmul.f32 -1.442695, %v3567_v25  ;;  %v3568_v41 = vadd.f32 %v3174_v43, %v15082_v42 }
 0x700   :  { %v8986_v4 = vpop.eup %8985  ;;  %8995 = vrcp.f32 %v3484_v19 }
 0x701   :  { %8997 = vpow2.f32 %v7488_v1  ;;  %v7489_v39 = vmul.f32 -1.442695, %v3568_v41  ;;  %v12433_v38 = vmul.f32 %v8986_v4, %v12382_v45 }
 0x702   :  { %v8988_v13 = vpop.eup %8987 }
 0x703   :  { %v8990_v58 = vpop.eup %8989  ;;  %8999 = vpow2.f32 %v7489_v39  ;;  %v12435_v59 = vpop.f32.mrb[136].mxu1  ;;  %v12438_v52 = vmul.f32 %v8988_v13, %v12385_v55 }
 0x704   :  { %v3485_v50 = vadd.f32 1.0, %v8990_v58  ;;  %v12442_v25 = vadd.f32 %v12435_v59, %v12331_v23  ;;  %v3180_v43 = vpop.f32.mrb[137].mxu1 }
 0x705   :  { %v8992_v19 = vpop.eup %8991  ;;  %v3569_v1 = vadd.f32 %v3180_v43, %v15085_v7  ;;  %v12445_v41 = vpop.f32.mrb[138].mxu1 }
 0x706   :  { %9001 = vrcp.f32 %v3485_v50  ;;  %v3486_v4 = vadd.f32 1.0, %v8992_v19  ;;  %v12449_v39 = vadd.f32 %v12445_v41, %v12334_v16  ;;  %v3184_v51 = vpop.f32.mrb[139].mxu1 }
 0x707   :  { %v7490_v13 = vmul.f32 -1.442695, %v3569_v1  ;;  %v3570_v58 = vadd.f32 %v3184_v51, %v15086_v24 }
 0x708   :  { %v8994_v20 = vpop.eup %8993  ;;  %9003 = vrcp.f32 %v3486_v4 }
 0x709   :  { %9005 = vpow2.f32 %v7490_v13  ;;  %v7491_v23 = vmul.f32 -1.442695, %v3570_v58  ;;  %v12453_v2 = vmul.f32 %v8994_v20, %v12391_v17 }
 0x70a   :  { %v8996_v43 = vpop.eup %8995 }
 0x70b   :  { %v8998_v8 = vpop.eup %8997  ;;  %9007 = vpow2.f32 %v7491_v23  ;;  %v12455_v50 = vpop.f32.mrb[140].mxu1  ;;  %v12458_v19 = vmul.f32 %v8996_v43, %v12397_v46 }
 0x70c   :  { %v3631_v16 = vadd.f32 1.0, %v8998_v8  ;;  %v12462_v1 = vadd.f32 %v12455_v50, %v12341_v0  ;;  %v3190_v51 = vpop.f32.mrb[141].mxu1 }
 0x70d   :  { %15107 = vst [vmem:[#allocation84_spill] sm:$0xff] %v12458_v19  ;;  %v9000_v4 = vpop.eup %8999  ;;  %v3571_v13 = vadd.f32 %v3190_v51, %v15089_v54  ;;  %v12465_v58 = vpop.f32.mrb[142].mxu1 }
 0x70e   :  { %9009 = vrcp.f32 %v3631_v16  ;;  %v3632_v20 = vadd.f32 1.0, %v9000_v4  ;;  %v12469_v23 = vadd.f32 %v12465_v58, %v12344_v9  ;;  %v3194_v62 = vpop.f32.mrb[143].mxu1 }
 0x70f   :  { %v7492_v43 = vmul.f32 -1.442695, %v3571_v13  ;;  %v3572_v8 = vadd.f32 %v3194_v62, %v15090_v31 }
 0x710   :  { %v9002_v27 = vpop.eup %9001  ;;  %9011 = vrcp.f32 %v3632_v20 }
 0x711   :  { %9013 = vpow2.f32 %v7492_v43  ;;  %v7493_v0 = vmul.f32 -1.442695, %v3572_v8  ;;  %v12473_v63 = vmul.f32 %v9002_v27, %v12403_v48 }
 0x712   :  { %v9004_v51 = vpop.eup %9003 }
 0x713   :  { %15108 = vst [vmem:[#allocation86_spill] sm:$0xff] %v12473_v63  ;;  %v9006_v19 = vpop.eup %9005  ;;  %9015 = vpow2.f32 %v7493_v0  ;;  %v12475_v16 = vpop.f32.mrb[144].mxu1  ;;  %v12478_v4 = vmul.f32 %v9004_v51, %v12409_v44 }
 0x714   :  { %v3633_v9 = vadd.f32 1.0, %v9006_v19  ;;  %v12482_v13 = vadd.f32 %v12475_v16, %v12351_v15  ;;  %v3200_v62 = vpop.f32.mrb[145].mxu1 }
 0x715   :  { %15109 = vst [vmem:[#allocation89_spill] sm:$0xff] %v12478_v4  ;;  %v9008_v20 = vpop.eup %9007  ;;  %v3573_v43 = vadd.f32 %v3200_v62, %v15093_v5  ;;  %v12485_v8 = vpop.f32.mrb[146].mxu1 }
 0x716   :  { %15110 = vst [vmem:[#allocation91_spill] sm:$0xff] %v12482_v13  ;;  %9017 = vrcp.f32 %v3633_v9  ;;  %v3634_v27 = vadd.f32 1.0, %v9008_v20  ;;  %v12489_v0 = vadd.f32 %v12485_v8, %v12354_v3  ;;  %v3204_v63 = vpop.f32.mrb[147].mxu1 }
 0x717   :  { %v7494_v51 = vmul.f32 -1.442695, %v3573_v43  ;;  %v3574_v19 = vadd.f32 %v3204_v63, %v15094_v57 }
 0x718   :  { %v9010_v4 = vpop.eup %9009  ;;  %9019 = vrcp.f32 %v3634_v27 }
 0x719   :  { %9021 = vpow2.f32 %v7494_v51  ;;  %v7495_v15 = vmul.f32 -1.442695, %v3574_v19  ;;  %v3695_v13 = vmul.f32 %v9010_v4, %v12415_v56 }
 0x71a   :  { %v9012_v31 = vpop.eup %9011 }
 0x71b   :  { %v9014_v62 = vpop.eup %9013  ;;  %9023 = vpow2.f32 %v7495_v15  ;;  %v12493_v5 = vpop.f32.mrb[148].mxu1  ;;  %v3696_v9 = vmul.f32 %v9012_v31, %v12425_v34  ;;  %v12497_v3 = vadd.f32 %v3695_v13, %v12362_v33 }
 0x71c   :  { %v3635_v20 = vadd.f32 1.0, %v9014_v62  ;;  %v12501_v63 = vadd.f32 %v12493_v5, %v12364_v14  ;;  %v3210_v43 = vpop.f32.mrb[149].mxu1 }
 0x71d   :  { %v9016_v27 = vpop.eup %9015  ;;  %v3575_v51 = vadd.f32 %v3210_v43, %v15097_v21  ;;  %v12504_v56 = vpop.f32.mrb[150].mxu1  ;;  %v12507_v4 = vadd.f32 %v3696_v9, %v12367_v61 }
 0x71e   :  { %9025 = vrcp.f32 %v3635_v20  ;;  %v3636_v19 = vadd.f32 1.0, %v9016_v27  ;;  %v12511_v31 = vadd.f32 %v12504_v56, %v12370_v12  ;;  %v3214_v33 = vpop.f32.mrb[151].mxu1 }
 0x71f   :  { %v7496_v34 = vmul.f32 -1.442695, %v3575_v51  ;;  %v3576_v14 = vadd.f32 %v3214_v33, %v15098_v49 }
 0x720   :  { %v9018_v13 = vpop.eup %9017  ;;  %9027 = vrcp.f32 %v3636_v19 }
 0x721   :  { %v3697_v15 = vmul.f32 %v9018_v13, %v12435_v59  ;;  %9029 = vpow2.f32 %v7496_v34  ;;  %v7497_v62 = vmul.f32 -1.442695, %v3576_v14 }
 0x722   :  { %v9020_v43 = vpop.eup %9019 }
 0x723   :  { %v9022_v21 = vpop.eup %9021  ;;  %v12516_v61 = vadd.f32 %v3697_v15, %v12377_v37  ;;  %v3698_v9 = vmul.f32 %v9020_v43, %v12445_v41  ;;  %9031 = vpow2.f32 %v7497_v62  ;;  %v12519_v12 = vpop.f32.mrb[152].mxu1 }
 0x724   :  { %v3637_v20 = vadd.f32 1.0, %v9022_v21  ;;  %v12523_v27 = vadd.f32 %v12519_v12, %v12382_v45  ;;  %v3220_v51 = vpop.f32.mrb[153].mxu1 }
 0x725   :  { %v9024_v19 = vpop.eup %9023  ;;  %v12526_v59 = vadd.f32 %v3698_v9, %v12380_v53  ;;  %v3577_v33 = vadd.f32 %v3220_v51, %v15101_v28  ;;  %v12529_v34 = vpop.f32.mrb[154].mxu1 }
 0x726   :  { %9033 = vrcp.f32 %v3637_v20  ;;  %v3638_v37 = vadd.f32 1.0, %v9024_v19  ;;  %v12533_v41 = vadd.f32 %v12529_v34, %v12385_v55  ;;  %v3224_v21 = vpop.f32.mrb[155].mxu1 }
 0x727   :  { %v7498_v14 = vmul.f32 -1.442695, %v3577_v33  ;;  %v3578_v45 = vadd.f32 %v3224_v21, %v15102_v6 }
 0x728   :  { %v9026_v13 = vpop.eup %9025  ;;  %9035 = vrcp.f32 %v3638_v37 }
 0x729   :  { %9037 = vpow2.f32 %v7498_v14  ;;  %v7499_v15 = vmul.f32 -1.442695, %v3578_v45  ;;  %v3699_v53 = vmul.f32 %v9026_v13, %v12455_v50 }
 0x72a   :  { %v9028_v62 = vpop.eup %9027 }
 0x72b   :  { %v9030_v43 = vpop.eup %9029  ;;  %9039 = vpow2.f32 %v7499_v15  ;;  %v12537_v9 = vpop.f32.mrb[156].mxu1  ;;  %v3700_v20 = vmul.f32 %v9028_v62, %v12465_v58  ;;  %v12541_v55 = vadd.f32 %v3699_v53, %v12389_v35 }
 0x72c   :  { %v3639_v51 = vadd.f32 1.0, %v9030_v43  ;;  %v12545_v19 = vadd.f32 %v12537_v9, %v12391_v17  ;;  %v3230_v33 = vpop.f32.mrb[157].mxu1 }
 0x72d   :  { %v9032_v37 = vpop.eup %9031  ;;  %v3579_v21 = vadd.f32 %v3230_v33, %v15103_v26  ;;  %v12548_v50 = vpop.f32.mrb[158].mxu1  ;;  %v12551_v14 = vadd.f32 %v3700_v20, %v12394_v47 }
 0x72e   :  { %9041 = vrcp.f32 %v3639_v51  ;;  %v3640_v45 = vadd.f32 1.0, %v9032_v37  ;;  %v12555_v35 = vadd.f32 %v12548_v50, %v12397_v46  ;;  %v3234_v58 = vpop.f32.mrb[159].mxu1 }
 0x72f   :  { %v7500_v13 = vmul.f32 -1.442695, %v3579_v21  ;;  %v3580_v17 = vadd.f32 %v3234_v58, %v15104_v18 }
 0x730   :  { %v9034_v15 = vpop.eup %9033  ;;  %9043 = vrcp.f32 %v3640_v45 }
 0x731   :  { %9045 = vpow2.f32 %v7500_v13  ;;  %v7501_v53 = vmul.f32 -1.442695, %v3580_v17  ;;  %v3701_v62 = vmul.f32 %v9034_v15, %v12475_v16 }
 0x732   :  { %v9036_v43 = vpop.eup %9035 }
 0x733   :  { %v9038_v33 = vpop.eup %9037  ;;  %9047 = vpow2.f32 %v7501_v53  ;;  %v12559_v47 = vpop.f32.mrb[160].mxu1  ;;  %v3702_v20 = vmul.f32 %v9036_v43, %v12485_v8  ;;  %v12563_v46 = vadd.f32 %v3701_v62, %v12401_v60 }
 0x734   :  { %v3641_v51 = vadd.f32 1.0, %v9038_v33  ;;  %v12567_v37 = vadd.f32 %v12559_v47, %v12403_v48  ;;  %v3240_v21 = vpop.f32.mrb[161].mxu1 }
 0x735   :  { %v9040_v45 = vpop.eup %9039  ;;  %v3581_v58 = vadd.f32 %v3240_v21, %v15105_v32  ;;  %v12570_v16 = vpop.f32.mrb[162].mxu1  ;;  %v12573_v13 = vadd.f32 %v3702_v20, %v12406_v36 }
 0x736   :  { %9049 = vrcp.f32 %v3641_v51  ;;  %v3642_v17 = vadd.f32 1.0, %v9040_v45  ;;  %v12577_v60 = vadd.f32 %v12570_v16, %v12409_v44  ;;  %v3244_v8 = vpop.f32.mrb[163].mxu1 }
 0x737   :  { %v7502_v15 = vmul.f32 -1.442695, %v3581_v58  ;;  %v3582_v48 = vadd.f32 %v3244_v8, %v15106_v29 }
 0x738   :  { %v9042_v53 = vpop.eup %9041  ;;  %9051 = vrcp.f32 %v3642_v17 }
 0x739   :  { %9053 = vpow2.f32 %v7502_v15  ;;  %v7503_v62 = vmul.f32 -1.442695, %v3582_v48  ;;  %v3703_v43 = vmul.f32 %v9042_v53, %v12493_v5 }
 0x73a   :  { %v9044_v33 = vpop.eup %9043 }
 0x73b   :  { %v9046_v21 = vpop.eup %9045  ;;  %9055 = vpow2.f32 %v7503_v62  ;;  %v12581_v36 = vpop.f32.mrb[164].mxu1  ;;  %v3704_v20 = vmul.f32 %v9044_v33, %v12504_v56  ;;  %v12585_v44 = vadd.f32 %v3703_v43, %v12413_v10 }
 0x73c   :  { %v3643_v51 = vadd.f32 1.0, %v9046_v21  ;;  %v12589_v45 = vadd.f32 %v12422_v11, %v12581_v36  ;;  %v3250_v58 = vpop.f32.mrb[165].mxu1 }
 0x73d   :  { %v9048_v17 = vpop.eup %9047  ;;  %v3727_v8 = vadd.f32 %v3250_v58, %v15081_v22  ;;  %v12592_v5 = vpop.f32.mrb[166].mxu1  ;;  %v12595_v15 = vadd.f32 %v3704_v20, %v12418_v40 }
 0x73e   :  { %9057 = vrcp.f32 %v3643_v51  ;;  %v3644_v48 = vadd.f32 1.0, %v9048_v17  ;;  %v12599_v10 = vadd.f32 %v12429_v30, %v12592_v5  ;;  %v3254_v56 = vpop.f32.mrb[167].mxu1 }
 0x73f   :  { %v7504_v53 = vmul.f32 -1.442695, %v3727_v8  ;;  %v3728_v11 = vadd.f32 %v3254_v56, %v15082_v42 }
 0x740   :  { %v9050_v62 = vpop.eup %9049  ;;  %9059 = vrcp.f32 %v3644_v48 }
 0x741   :  { %9061 = vpow2.f32 %v7504_v53  ;;  %v7505_v43 = vmul.f32 -1.442695, %v3728_v11  ;;  %v3705_v33 = vmul.f32 %v9050_v62, %v12519_v12 }
 0x742   :  { %v9052_v21 = vpop.eup %9051 }
 0x743   :  { %v9054_v58 = vpop.eup %9053  ;;  %9063 = vpow2.f32 %v7505_v43  ;;  %v12603_v40 = vpop.f32.mrb[168].mxu1  ;;  %v3706_v20 = vmul.f32 %v9052_v21, %v12529_v34  ;;  %v12607_v30 = vadd.f32 %v3705_v33, %v12433_v38 }
 0x744   :  { %v3645_v51 = vadd.f32 1.0, %v9054_v58  ;;  %v12611_v17 = vadd.f32 %v12442_v25, %v12603_v40  ;;  %v3260_v8 = vpop.f32.mrb[169].mxu1 }
 0x745   :  { %v9056_v48 = vpop.eup %9055  ;;  %v3729_v56 = vadd.f32 %v3260_v8, %v15085_v7  ;;  %v12614_v12 = vpop.f32.mrb[170].mxu1  ;;  %v12617_v53 = vadd.f32 %v3706_v20, %v12438_v52 }
 0x746   :  { %9065 = vrcp.f32 %v3645_v51  ;;  %v3646_v11 = vadd.f32 1.0, %v9056_v48  ;;  %v12621_v38 = vadd.f32 %v12449_v39, %v12614_v12  ;;  %v3264_v34 = vpop.f32.mrb[171].mxu1 }
 0x747   :  { %v7506_v62 = vmul.f32 -1.442695, %v3729_v56  ;;  %v3730_v25 = vadd.f32 %v3264_v34, %v15086_v24 }
 0x748   :  { %v9058_v43 = vpop.eup %9057  ;;  %9067 = vrcp.f32 %v3646_v11 }
 0x749   :  { %9069 = vpow2.f32 %v7506_v62  ;;  %v7507_v33 = vmul.f32 -1.442695, %v3730_v25  ;;  %v3707_v21 = vmul.f32 %v9058_v43, %v12537_v9  ;;  %v15112_v62 = vld [vmem:[#allocation84_spill] sm:$0xff] }
 0x74a   :  { %v9060_v58 = vpop.eup %9059 }
 0x74b   :  { %v9062_v8 = vpop.eup %9061  ;;  %9071 = vpow2.f32 %v7507_v33  ;;  %v12625_v52 = vpop.f32.mrb[172].mxu1  ;;  %v3708_v20 = vmul.f32 %v9060_v58, %v12548_v50  ;;  %v12629_v39 = vadd.f32 %v3707_v21, %v12453_v2  ;;  %v15114_v21 = vld [vmem:[#allocation45_spill] sm:$0xff] }
 0x74c   :  { %v3791_v51 = vadd.f32 1.0, %v9062_v8  ;;  %v12633_v48 = vadd.f32 %v12462_v1, %v12625_v52  ;;  %v3270_v56 = vpop.f32.mrb[173].mxu1 }
 0x74d   :  { %v9064_v11 = vpop.eup %9063  ;;  %v3731_v34 = vadd.f32 %v3270_v56, %v15089_v54  ;;  %v12636_v9 = vpop.f32.mrb[174].mxu1  ;;  %v12639_v25 = vadd.f32 %v3708_v20, %v15112_v62 }
 0x74e   :  { %15111 = vst [vmem:[#allocation94_spill] sm:$0xff] %v12633_v48  ;;  %9073 = vrcp.f32 %v3791_v51  ;;  %v3792_v43 = vadd.f32 1.0, %v9064_v11  ;;  %v12643_v2 = vadd.f32 %v12469_v23, %v12636_v9  ;;  %v3274_v50 = vpop.f32.mrb[175].mxu1  ;;  %v15115_v11 = vld [vmem:[#allocation86_spill] sm:$0xff] }
 0x74f   :  { %v7508_v33 = vmul.f32 -1.442695, %v3731_v34  ;;  %v3732_v1 = vadd.f32 %v3274_v50, %v15114_v21  ;;  %v15116_v34 = vld [vmem:[#allocation91_spill] sm:$0xff] }
 0x750   :  { %15113 = vst [vmem:[#allocation96_spill] sm:$0xff] %v12643_v2  ;;  %v9066_v58 = vpop.eup %9065  ;;  %9075 = vrcp.f32 %v3792_v43 }
 0x751   :  { %9077 = vpow2.f32 %v7508_v33  ;;  %v7509_v8 = vmul.f32 -1.442695, %v3732_v1  ;;  %v3709_v56 = vmul.f32 %v9066_v58, %v12559_v47  ;;  %v15118_v1 = vld [vmem:[#allocation42_spill] sm:$0xff]  ;;  %v15119_v58 = vld [vmem:[#allocation89_spill] sm:$0xff] }
 0x752   :  { %v9068_v54 = vpop.eup %9067 }
 0x753   :  { %v9070_v48 = vpop.eup %9069  ;;  %9079 = vpow2.f32 %v7509_v8  ;;  %v12647_v20 = vpop.f32.mrb[176].mxu1  ;;  %v3710_v51 = vmul.f32 %v9068_v54, %v12570_v16  ;;  %v12651_v23 = vadd.f32 %v3709_v56, %v15115_v11 }
 0x754   :  { %v3793_v62 = vadd.f32 1.0, %v9070_v48  ;;  %v12655_v50 = vadd.f32 %v15116_v34, %v12647_v20  ;;  %v3280_v43 = vpop.f32.mrb[177].mxu1 }
 0x755   :  { %v9072_v33 = vpop.eup %9071  ;;  %v3733_v21 = vadd.f32 %v3280_v43, %v15118_v1  ;;  %v12658_v47 = vpop.f32.mrb[178].mxu1  ;;  %v12661_v8 = vadd.f32 %v3710_v51, %v15119_v58 }
 0x756   :  { %15117 = vst [vmem:[#allocation99_spill] sm:$0xff] %v12655_v50  ;;  %9081 = vrcp.f32 %v3793_v62  ;;  %v3794_v2 = vadd.f32 1.0, %v9072_v33  ;;  %v12665_v54 = vadd.f32 %v12489_v0, %v12658_v47  ;;  %v3284_v16 = vpop.f32.mrb[179].mxu1 }
 0x757   :  { %v7510_v48 = vmul.f32 -1.442695, %v3733_v21  ;;  %v3734_v56 = vadd.f32 %v3284_v16, %v15094_v57  ;;  %v15120_v16 = vld [vmem:[#allocation47_spill] sm:$0xff] }
 0x758   :  { %v9074_v11 = vpop.eup %9073  ;;  %9083 = vrcp.f32 %v3794_v2 }
 0x759   :  { %9085 = vpow2.f32 %v7510_v48  ;;  %v7511_v34 = vmul.f32 -1.442695, %v3734_v56  ;;  %v3855_v43 = vmul.f32 %v9074_v11, %v12581_v36 }
 0x75a   :  { %v9076_v1 = vpop.eup %9075 }
 0x75b   :  { %v9078_v50 = vpop.eup %9077  ;;  %9087 = vpow2.f32 %v7511_v34  ;;  %v12669_v51 = vpop.f32.mrb[180].mxu1  ;;  %v3856_v62 = vmul.f32 %v9076_v1, %v12592_v5  ;;  %v12673_v0 = vadd.f32 %v3855_v43, %v12497_v3 }
 0x75c   :  { %v3795_v33 = vadd.f32 1.0, %v9078_v50  ;;  %v12677_v21 = vadd.f32 %v12501_v63, %v12669_v51  ;;  %v3290_v2 = vpop.f32.mrb[181].mxu1 }
 0x75d   :  { %v9080_v58 = vpop.eup %9079  ;;  %v3735_v48 = vadd.f32 %v3290_v2, %v15120_v16  ;;  %v12680_v36 = vpop.f32.mrb[182].mxu1  ;;  %v12683_v56 = vadd.f32 %v3856_v62, %v12507_v4 }
 0x75e   :  { %9089 = vrcp.f32 %v3795_v33  ;;  %v3796_v11 = vadd.f32 1.0, %v9080_v58  ;;  %v12687_v3 = vadd.f32 %v12511_v31, %v12680_v36  ;;  %v3294_v5 = vpop.f32.mrb[183].mxu1 }
 0x75f   :  { %v7512_v50 = vmul.f32 -1.442695, %v3735_v48  ;;  %v3736_v63 = vadd.f32 %v3294_v5, %v15098_v49 }
 0x760   :  { %v9082_v1 = vpop.eup %9081  ;;  %9091 = vrcp.f32 %v3796_v11 }
 0x761   :  { %v3857_v34 = vmul.f32 %v9082_v1, %v12603_v40  ;;  %9093 = vpow2.f32 %v7512_v50  ;;  %v7513_v43 = vmul.f32 -1.442695, %v3736_v63 }
 0x762   :  { %v9084_v2 = vpop.eup %9083 }
 0x763   :  { %v9086_v16 = vpop.eup %9085  ;;  %v3858_v4 = vmul.f32 %v9084_v2, %v12614_v12  ;;  %9095 = vpow2.f32 %v7513_v43  ;;  %v12692_v62 = vpop.f32.mrb[184].mxu1  ;;  %v12695_v31 = vadd.f32 %v3857_v34, %v12516_v61 }
 0x764   :  { %v3797_v33 = vadd.f32 1.0, %v9086_v16  ;;  %v12699_v58 = vadd.f32 %v12523_v27, %v12692_v62  ;;  %v3300_v48 = vpop.f32.mrb[185].mxu1 }
 0x765   :  { %v9088_v11 = vpop.eup %9087  ;;  %v3737_v40 = vadd.f32 %v3300_v48, %v15101_v28  ;;  %v12702_v5 = vpop.f32.mrb[186].mxu1  ;;  %v12705_v50 = vadd.f32 %v3858_v4, %v12526_v59 }
 0x766   :  { %9097 = vrcp.f32 %v3797_v33  ;;  %v3798_v12 = vadd.f32 1.0, %v9088_v11  ;;  %v12709_v61 = vadd.f32 %v12533_v41, %v12702_v5  ;;  %v3304_v16 = vpop.f32.mrb[187].mxu1 }
 0x767   :  { %v7514_v63 = vmul.f32 -1.442695, %v3737_v40  ;;  %v3738_v27 = vadd.f32 %v3304_v16, %v15102_v6 }
 0x768   :  { %v9090_v1 = vpop.eup %9089  ;;  %9099 = vrcp.f32 %v3798_v12 }
 0x769   :  { %9101 = vpow2.f32 %v7514_v63  ;;  %v7515_v34 = vmul.f32 -1.442695, %v3738_v27  ;;  %v3859_v43 = vmul.f32 %v9090_v1, %v12625_v52 }
 0x76a   :  { %v9092_v2 = vpop.eup %9091 }
 0x76b   :  { %v9094_v48 = vpop.eup %9093  ;;  %9103 = vpow2.f32 %v7515_v34  ;;  %v12713_v59 = vpop.f32.mrb[188].mxu1  ;;  %v3860_v4 = vmul.f32 %v9092_v2, %v12636_v9  ;;  %v12717_v41 = vadd.f32 %v3859_v43, %v12541_v55 }
 0x76c   :  { %v3799_v33 = vadd.f32 1.0, %v9094_v48  ;;  %v12721_v11 = vadd.f32 %v12545_v19, %v12713_v59  ;;  %v3310_v40 = vpop.f32.mrb[189].mxu1 }
 0x76d   :  { %v9096_v12 = vpop.eup %9095  ;;  %v3739_v16 = vadd.f32 %v3310_v40, %v15103_v26  ;;  %v12724_v52 = vpop.f32.mrb[190].mxu1  ;;  %v12727_v63 = vadd.f32 %v3860_v4, %v12551_v14 }
 0x76e   :  { %9105 = vrcp.f32 %v3799_v33  ;;  %v3800_v27 = vadd.f32 1.0, %v9096_v12  ;;  %v12731_v55 = vadd.f32 %v12555_v35, %v12724_v52  ;;  %v3314_v9 = vpop.f32.mrb[191].mxu1 }
 0x76f   :  { %v7516_v1 = vmul.f32 -1.442695, %v3739_v16  ;;  %v3740_v19 = vadd.f32 %v3314_v9, %v15104_v18 }
 0x770   :  { %v9098_v34 = vpop.eup %9097  ;;  %9107 = vrcp.f32 %v3800_v27 }
 0x771   :  { %9109 = vpow2.f32 %v7516_v1  ;;  %v7517_v43 = vmul.f32 -1.442695, %v3740_v19  ;;  %v3861_v2 = vmul.f32 %v9098_v34, %v12647_v20 }
 0x772   :  { %v9100_v48 = vpop.eup %9099 }
 0x773   :  { %v9102_v40 = vpop.eup %9101  ;;  %9111 = vpow2.f32 %v7517_v43  ;;  %v12735_v14 = vpop.f32.mrb[192].mxu1  ;;  %v3862_v4 = vmul.f32 %v9100_v48, %v12658_v47  ;;  %v12739_v35 = vadd.f32 %v3861_v2, %v12563_v46 }
 0x774   :  { %v3801_v33 = vadd.f32 1.0, %v9102_v40  ;;  %v12743_v12 = vadd.f32 %v12567_v37, %v12735_v14  ;;  %v3320_v16 = vpop.f32.mrb[193].mxu1 }
 0x775   :  { %v9104_v27 = vpop.eup %9103  ;;  %v3741_v9 = vadd.f32 %v3320_v16, %v15105_v32  ;;  %v12746_v20 = vpop.f32.mrb[194].mxu1  ;;  %v12749_v1 = vadd.f32 %v3862_v4, %v12573_v13 }
 0x776   :  { %9113 = vrcp.f32 %v3801_v33  ;;  %v3802_v19 = vadd.f32 1.0, %v9104_v27  ;;  %v12753_v46 = vadd.f32 %v12577_v60, %v12746_v20  ;;  %v3324_v47 = vpop.f32.mrb[195].mxu1 }
 0x777   :  { %v7518_v34 = vmul.f32 -1.442695, %v3741_v9  ;;  %v3742_v37 = vadd.f32 %v3324_v47, %v15106_v29 }
 0x778   :  { %v9106_v43 = vpop.eup %9105  ;;  %9115 = vrcp.f32 %v3802_v19 }
 0x779   :  { %9117 = vpow2.f32 %v7518_v34  ;;  %v7519_v2 = vmul.f32 -1.442695, %v3742_v37  ;;  %v3863_v48 = vmul.f32 %v9106_v43, %v12669_v51 }
 0x77a   :  { %v9108_v40 = vpop.eup %9107 }
 0x77b   :  { %v9110_v16 = vpop.eup %9109  ;;  %9119 = vpow2.f32 %v7519_v2  ;;  %v12757_v13 = vpop.f32.mrb[196].mxu1  ;;  %v3864_v4 = vmul.f32 %v9108_v40, %v12680_v36  ;;  %v12761_v60 = vadd.f32 %v3863_v48, %v12585_v44 }
 0x77c   :  { %v3803_v33 = vadd.f32 1.0, %v9110_v16  ;;  %v12765_v27 = vadd.f32 %v12589_v45, %v12757_v13  ;;  %v3330_v9 = vpop.f32.mrb[197].mxu1 }
 0x77d   :  { %v9112_v19 = vpop.eup %9111  ;;  %v3887_v47 = vadd.f32 %v3330_v9, %v15081_v22  ;;  %v12768_v51 = vpop.f32.mrb[198].mxu1  ;;  %v12771_v34 = vadd.f32 %v3864_v4, %v12595_v15 }
 0x77e   :  { %9121 = vrcp.f32 %v3803_v33  ;;  %v3804_v37 = vadd.f32 1.0, %v9112_v19  ;;  %v12775_v44 = vadd.f32 %v12599_v10, %v12768_v51  ;;  %v3334_v36 = vpop.f32.mrb[199].mxu1 }
 0x77f   :  { %v7520_v43 = vmul.f32 -1.442695, %v3887_v47  ;;  %v3888_v45 = vadd.f32 %v3334_v36, %v15082_v42 }
 0x780   :  { %v9114_v2 = vpop.eup %9113  ;;  %9123 = vrcp.f32 %v3804_v37  ;;  %v4047_v48 = vpack.c.bf16 %v12775_v44, %v12765_v27 }
 0x781   :  { %9125 = vpow2.f32 %v7520_v43  ;;  %v7521_v40 = vmul.f32 -1.442695, %v3888_v45  ;;  %v3865_v15 = vmul.f32 %v9114_v2, %v12692_v62 }
 0x782   :  { %v9116_v16 = vpop.eup %9115  ;;  %8214 = vmatprep.mubr.bf16.mxu0 %v4047_v48 }
 0x783   :  { %v9118_v4 = vpop.eup %9117  ;;  %9127 = vpow2.f32 %v7521_v40  ;;  %v12781_v33 = vpop.f32.mrb[200].mxu1  ;;  %v3866_v10 = vmul.f32 %v9116_v16, %v12702_v5  ;;  %v12785_v9 = vadd.f32 %v3865_v15, %v12607_v30 }
 0x784   :  { %v3805_v19 = vadd.f32 1.0, %v9118_v4  ;;  %v12789_v47 = vadd.f32 %v12611_v17, %v12781_v33  ;;  %v3340_v37 = vpop.f32.mrb[201].mxu1 }
 0x785   :  { %v9120_v36 = vpop.eup %9119  ;;  %v3889_v62 = vadd.f32 %v3340_v37, %v15085_v7  ;;  %v12792_v43 = vpop.f32.mrb[202].mxu1  ;;  %v12795_v45 = vadd.f32 %v3866_v10, %v12617_v53 }
 0x786   :  { %9129 = vrcp.f32 %v3805_v19  ;;  %v3806_v2 = vadd.f32 1.0, %v9120_v36  ;;  %v12799_v30 = vadd.f32 %v12621_v38, %v12792_v43  ;;  %v3344_v5 = vpop.f32.mrb[203].mxu1  ;;  %v9659_v38 = vld [vmem:[#allocation20] sm:$0xff]  }
 0x787   :  { %v7522_v48 = vmul.f32 -1.442695, %v3889_v62  ;;  %v3890_v17 = vadd.f32 %v3344_v5, %v15086_v24 }
 0x788   :  { %v9122_v40 = vpop.eup %9121  ;;  %9131 = vrcp.f32 %v3806_v2  ;;  %v4048_v15 = vpack.c.bf16 %v12799_v30, %v12789_v47  ;;  %v15121_v2 = vld [vmem:[#allocation94_spill] sm:$0xff] }
 0x789   :  { %9133 = vpow2.f32 %v7522_v48  ;;  %v7523_v16 = vmul.f32 -1.442695, %v3890_v17  ;;  %v3867_v53 = vmul.f32 %v9122_v40, %v12713_v59  ;;  %v9660_v59 = vld [vmem:[#allocation20 + $0x8] sm:$0xff]   ;;  %v15122_v40 = vld [vmem:[#allocation43_spill] sm:$0xff] }
 0x78a   :  { %v9124_v4 = vpop.eup %9123  ;;  %8215 = vmatmul.mubr.bf16.vlgmr.msra.gmra.mrb[140].mxu0 %v4048_v15 }
 0x78b   :  { %v9126_v10 = vpop.eup %9125  ;;  %9135 = vpow2.f32 %v7523_v16  ;;  %v12805_v19 = vpop.f32.mrb[204].mxu1  ;;  %8231 = vmatpush3.bf16.msra.mxu0 %v9659_v38  ;;  %v3868_v37 = vmul.f32 %v9124_v4, %v12724_v52  ;;  %v12809_v36 = vadd.f32 %v3867_v53, %v12629_v39  ;;  %v15123_v39 = vld [vmem:[#allocation96_spill] sm:$0xff] }
 0x78c   :  { %v3951_v62 = vadd.f32 1.0, %v9126_v10  ;;  %v12813_v5 = vadd.f32 %v15121_v2, %v12805_v19  ;;  %v3350_v48 = vpop.f32.mrb[205].mxu1  ;;  %8232 = vmatprep.subr.bf16.mxu0 %v9660_v59  ;;  %v15124_v2 = vld [vmem:[#allocation45_spill] sm:$0xff] }
 0x78d   :  { %v9128_v17 = vpop.eup %9127  ;;  %v3891_v15 = vadd.f32 %v3350_v48, %v15122_v40  ;;  %v12816_v16 = vpop.f32.mrb[206].mxu1  ;;  %v12819_v38 = vadd.f32 %v3868_v37, %v12639_v25  ;;  %v9661_v40 = vld [vmem:[#allocation20 + $0x10] sm:$0xff]  }
 0x78e   :  { %9137 = vrcp.f32 %v3951_v62  ;;  %v3952_v52 = vadd.f32 1.0, %v9128_v17  ;;  %v12823_v53 = vadd.f32 %v15123_v39, %v12816_v16  ;;  %v3354_v4 = vpop.f32.mrb[207].mxu1 }
 0x78f   :  { %v7524_v10 = vmul.f32 -1.442695, %v3891_v15  ;;  %v3892_v24 = vadd.f32 %v3354_v4, %v15124_v2  ;;  %8233 = vmatpush3.bf16.msra.mxu0 %v9660_v59  ;;  %v15125_v4 = vld [vmem:[#allocation99_spill] sm:$0xff] }
 0x790   :  { %v9130_v7 = vpop.eup %9129  ;;  %9139 = vrcp.f32 %v3952_v52  ;;  %v4049_v48 = vpack.c.bf16 %v12823_v53, %v12813_v5  ;;  %8234 = vmatprep.subr.bf16.mxu0 %v9661_v40 }
 0x791   :  { %9141 = vpow2.f32 %v7524_v10  ;;  %v7525_v25 = vmul.f32 -1.442695, %v3892_v24  ;;  %v3869_v37 = vmul.f32 %v9130_v7, %v12735_v14  ;;  %v9662_v10 = vld [vmem:[#allocation20 + $0x18] sm:$0xff]   ;;  %v15126_v14 = vld [vmem:[#allocation42_spill] sm:$0xff] }
 0x792   :  { %v9132_v62 = vpop.eup %9131  ;;  %8218 = vmatprep.mubr.bf16.mxu0 %v4049_v48 }
 0x793   :  { %v9134_v17 = vpop.eup %9133  ;;  %9143 = vpow2.f32 %v7525_v25  ;;  %v12829_v39 = vpop.f32.mrb[208].mxu1  ;;  %8235 = vmatpush3.bf16.msra.mxu0 %v9661_v40  ;;  %v3870_v59 = vmul.f32 %v9132_v62, %v12746_v20  ;;  %v12833_v15 = vadd.f32 %v3869_v37, %v12651_v23 }
 0x794   :  { %v3953_v52 = vadd.f32 1.0, %v9134_v17  ;;  %v12837_v2 = vadd.f32 %v15125_v4, %v12829_v39  ;;  %v3360_v24 = vpop.f32.mrb[209].mxu1  ;;  %8236 = vmatprep.subr.bf16.mxu0 %v9662_v10 }
 0x795   :  { %v9136_v7 = vpop.eup %9135  ;;  %v3893_v48 = vadd.f32 %v3360_v24, %v15126_v14  ;;  %v12840_v25 = vpop.f32.mrb[210].mxu1  ;;  %v12843_v40 = vadd.f32 %v3870_v59, %v12661_v8  ;;  %v9663_v14 = vld [vmem:[#allocation20 + $0x20] sm:$0xff]  }
 0x796   :  { %9145 = vrcp.f32 %v3953_v52  ;;  %v3954_v20 = vadd.f32 1.0, %v9136_v7  ;;  %v12847_v23 = vadd.f32 %v12665_v54, %v12840_v25  ;;  %v3364_v37 = vpop.f32.mrb[211].mxu1 }
 0x797   :  { %v7526_v62 = vmul.f32 -1.442695, %v3893_v48  ;;  %v3894_v17 = vadd.f32 %v3364_v37, %v15094_v57  ;;  %8237 = vmatpush3.bf16.msra.mxu0 %v9662_v10 }
 0x798   :  { %v9138_v4 = vpop.eup %9137  ;;  %9147 = vrcp.f32 %v3954_v20  ;;  %v4050_v24 = vpack.c.bf16 %v12847_v23, %v12837_v2  ;;  %8238 = vmatprep.subr.bf16.mxu0 %v9663_v14 }
 0x799   :  { %9149 = vpow2.f32 %v7526_v62  ;;  %v7527_v8 = vmul.f32 -1.442695, %v3894_v17  ;;  %v4015_v59 = vmul.f32 %v9138_v4, %v12757_v13  ;;  %v9664_v17 = vld [vmem:[#allocation20 + $0x28] sm:$0xff]   ;;  %v15127_v4 = vld [vmem:[#allocation47_spill] sm:$0xff] }
 0x79a   :  { %v9140_v52 = vpop.eup %9139  ;;  %8219 = vmatmul.mubr.bf16.gmra.mrb[144].mxu0 %v4050_v24 }
 0x79b   :  { %v9142_v54 = vpop.eup %9141  ;;  %9151 = vpow2.f32 %v7527_v8  ;;  %v12853_v7 = vpop.f32.mrb[212].mxu1  ;;  %8239 = vmatpush3.bf16.msra.mxu0 %v9663_v14  ;;  %v4016_v10 = vmul.f32 %v9140_v52, %v12768_v51  ;;  %v12857_v48 = vadd.f32 %v4015_v59, %v12673_v0 }
 0x79c   :  { %v3955_v20 = vadd.f32 1.0, %v9142_v54  ;;  %v12861_v37 = vadd.f32 %v12677_v21, %v12853_v7  ;;  %v3370_v62 = vpop.f32.mrb[213].mxu1  ;;  %8240 = vmatprep.subr.bf16.mxu0 %v9664_v17 }
 0x79d   :  { %v9144_v13 = vpop.eup %9143  ;;  %v3895_v24 = vadd.f32 %v3370_v62, %v15127_v4  ;;  %v12864_v8 = vpop.f32.mrb[214].mxu1  ;;  %v12867_v14 = vadd.f32 %v4016_v10, %v12683_v56  ;;  %v9665_v10 = vld [vmem:[#allocation20 + $0x30] sm:$0xff]  }
 0x79e   :  { %9153 = vrcp.f32 %v3955_v20  ;;  %v3956_v51 = vadd.f32 1.0, %v9144_v13  ;;  %v12871_v0 = vadd.f32 %v12687_v3, %v12864_v8  ;;  %v3374_v59 = vpop.f32.mrb[215].mxu1 }
 0x79f   :  { %v7528_v21 = vmul.f32 -1.442695, %v3895_v24  ;;  %v3896_v52 = vadd.f32 %v3374_v59, %v15098_v49  ;;  %8241 = vmatpush3.bf16.msra.mxu0 %v9664_v17 }
 0x7a0   :  { %v9146_v62 = vpop.eup %9145  ;;  %9155 = vrcp.f32 %v3956_v51  ;;  %v4051_v56 = vpack.c.bf16 %v12871_v0, %v12861_v37  ;;  %8242 = vmatprep.subr.bf16.mxu0 %v9665_v10 }
 0x7a1   :  { %v4017_v20 = vmul.f32 %v9146_v62, %v12781_v33  ;;  %9157 = vpow2.f32 %v7528_v21  ;;  %v7529_v3 = vmul.f32 -1.442695, %v3896_v52  ;;  %v9666_v21 = vld [vmem:[#allocation20 + $0x38] sm:$0xff]  }
 0x7a2   :  { %v9148_v13 = vpop.eup %9147  ;;  %8222 = vmatprep.mubr.bf16.mxu0 %v4051_v56 }
 0x7a3   :  { %v9150_v24 = vpop.eup %9149  ;;  %v4018_v59 = vmul.f32 %v9148_v13, %v12792_v43  ;;  %9159 = vpow2.f32 %v7529_v3  ;;  %v12880_v17 = vpop.f32.mrb[216].mxu1  ;;  %8243 = vmatpush3.bf16.msra.mxu0 %v9665_v10  ;;  %v12883_v51 = vadd.f32 %v4017_v20, %v12695_v31 }
 0x7a4   :  { %v3957_v54 = vadd.f32 1.0, %v9150_v24  ;;  %v12887_v49 = vadd.f32 %v12699_v58, %v12880_v17  ;;  %v3380_v33 = vpop.f32.mrb[217].mxu1  ;;  %8244 = vmatprep.subr.bf16.mxu0 %v9666_v21 }
 0x7a5   :  { %v9152_v52 = vpop.eup %9151  ;;  %v3897_v62 = vadd.f32 %v3380_v33, %v15101_v28  ;;  %v12890_v56 = vpop.f32.mrb[218].mxu1  ;;  %v12893_v43 = vadd.f32 %v4018_v59, %v12705_v50  ;;  %v12904_v59 = vld [vmem:[#allocation19] sm:$0xff]  }
 0x7a6   :  { %9161 = vrcp.f32 %v3957_v54  ;;  %v3958_v10 = vadd.f32 1.0, %v9152_v52  ;;  %v12897_v31 = vadd.f32 %v12709_v61, %v12890_v56  ;;  %v3384_v20 = vpop.f32.mrb[219].mxu1 }
 0x7a7   :  { %v7530_v58 = vmul.f32 -1.442695, %v3897_v62  ;;  %v3898_v3 = vadd.f32 %v3384_v20, %v15102_v6  ;;  %8245 = vmatpush3.bf16.msra.mxu0 %v9666_v21 }
 0x7a8   :  { %v9154_v24 = vpop.eup %9153  ;;  %9163 = vrcp.f32 %v3958_v10  ;;  %v4052_v50 = vpack.c.bf16 %v12897_v31, %v12887_v49  ;;  %8262 = vmatprep.subr.bf16.mxu0 %v12904_v59 }
 0x7a9   :  { %9165 = vpow2.f32 %v7530_v58  ;;  %v7531_v61 = vmul.f32 -1.442695, %v3898_v3  ;;  %v4019_v54 = vmul.f32 %v9154_v24, %v12805_v19 }
 0x7aa   :  { %v9156_v33 = vpop.eup %9155  ;;  %8223 = vmatmul.mubr.bf16.gmra.mrb[148].mxu0 %v4052_v50 }
 0x7ab   :  { %v9158_v52 = vpop.eup %9157  ;;  %9167 = vpow2.f32 %v7531_v61  ;;  %v12908_v21 = vpop.f32.mrb[220].mxu1  ;;  %v4020_v62 = vmul.f32 %v9156_v33, %v12816_v16  ;;  %v12912_v10 = vadd.f32 %v4019_v54, %v12717_v41 }
 0x7ac   :  { %v3959_v20 = vadd.f32 1.0, %v9158_v52  ;;  %v12916_v13 = vadd.f32 %v12721_v11, %v12908_v21  ;;  %v3390_v58 = vpop.f32.mrb[221].mxu1 }
 0x7ad   :  { %v9160_v3 = vpop.eup %9159  ;;  %v3899_v19 = vadd.f32 %v3390_v58, %v15103_v26  ;;  %v12919_v24 = vpop.f32.mrb[222].mxu1  ;;  %v4036_v50 = vadd.f32 %v4020_v62, %v12727_v63 }
 0x7ae   :  { %9169 = vrcp.f32 %v3959_v20  ;;  %v3960_v61 = vadd.f32 1.0, %v9160_v3  ;;  %v12924_v16 = vadd.f32 %v12731_v55, %v12919_v24  ;;  %v3394_v41 = vpop.f32.mrb[223].mxu1 }
 0x7af   :  { %v7532_v54 = vmul.f32 -1.442695, %v3899_v19  ;;  %v3900_v33 = vadd.f32 %v3394_v41, %v15104_v18  ;;  %v4266_v11 = vpack.c.bf16 %v4036_v50, %v12912_v10 }
 0x7b0   :  { %v9162_v52 = vpop.eup %9161  ;;  %9171 = vrcp.f32 %v3960_v61  ;;  %v4053_v58 = vpack.c.bf16 %v12924_v16, %v12916_v13 }
 0x7b1   :  { %9173 = vpow2.f32 %v7532_v54  ;;  %v7533_v26 = vmul.f32 -1.442695, %v3900_v33  ;;  %v4021_v63 = vmul.f32 %v9162_v52, %v12829_v39 }
 0x7b2   :  { %v9164_v62 = vpop.eup %9163  ;;  %8226 = vmatprep.mubr.bf16.mxu0 %v4053_v58 }
 0x7b3   :  { %v9166_v20 = vpop.eup %9165  ;;  %9175 = vpow2.f32 %v7533_v26  ;;  %v12931_v55 = vpop.f32.mrb[224].mxu1  ;;  %v4022_v3 = vmul.f32 %v9164_v62, %v12840_v25  ;;  %v4037_v19 = vadd.f32 %v4021_v63, %v12739_v35 }
 0x7b4   :  { %v3961_v10 = vadd.f32 1.0, %v9166_v20  ;;  %v12937_v50 = vadd.f32 %v12743_v12, %v12931_v55  ;;  %v3400_v61 = vpop.f32.mrb[225].mxu1 }
 0x7b5   :  { %v9168_v41 = vpop.eup %9167  ;;  %v3901_v54 = vadd.f32 %v3400_v61, %v15105_v32  ;;  %v12940_v39 = vpop.f32.mrb[226].mxu1  ;;  %v4038_v33 = vadd.f32 %v4022_v3, %v12749_v1 }
 0x7b6   :  { %9177 = vrcp.f32 %v3961_v10  ;;  %v3962_v26 = vadd.f32 1.0, %v9168_v41  ;;  %v12945_v25 = vadd.f32 %v12753_v46, %v12940_v39  ;;  %v3404_v35 = vpop.f32.mrb[227].mxu1  ;;  %v15128_v46 = vpack.c.bf16 %v12867_v14, %v12857_v48 }
 0x7b7   :  { %v7534_v52 = vmul.f32 -1.442695, %v3901_v54  ;;  %v3902_v58 = vadd.f32 %v3404_v35, %v15106_v29  ;;  %v4267_v12 = vpack.c.bf16 %v4038_v33, %v4037_v19  ;;  %v15129_v48 = vpack.c.bf16 %v12893_v43, %v12883_v51  ;;  %v9669_v43 = vld [vmem:[#allocation19 + $0x10] sm:$0xff]  }
 0x7b8   :  { %v9170_v63 = vpop.eup %9169  ;;  %9179 = vrcp.f32 %v3962_v26  ;;  %v4054_v62 = vpack.c.bf16 %v12945_v25, %v12937_v50 }
 0x7b9   :  { %9181 = vpow2.f32 %v7534_v52  ;;  %v7535_v20 = vmul.f32 -1.442695, %v3902_v58  ;;  %v4023_v1 = vmul.f32 %v9170_v63, %v12853_v7  ;;  %v9668_v63 = vld [vmem:[#allocation19 + $0x8] sm:$0xff]  }
 0x7ba   :  { %v9172_v3 = vpop.eup %9171  ;;  %8227 = vmatmul.mubr.bf16.gmra.mrb[152].mxu0 %v4054_v62 }
 0x7bb   :  { %v9174_v10 = vpop.eup %9173  ;;  %9183 = vpow2.f32 %v7535_v20  ;;  %8246 = vmatprep.mubr.bf16.mxu0 %v15128_v46  ;;  %v4024_v61 = vmul.f32 %v9172_v3, %v12864_v8  ;;  %v4039_v19 = vadd.f32 %v4023_v1, %v12761_v60  ;;  %v9670_v3 = vld [vmem:[#allocation19 + $0x18] sm:$0xff]  }
 0x7bc   :  { %v3963_v41 = vadd.f32 1.0, %v9174_v10 }
 0x7bd   :  { %v9176_v54 = vpop.eup %9175  ;;  %v4040_v33 = vadd.f32 %v4024_v61, %v12771_v34  ;;  %v9671_v61 = vld [vmem:[#allocation19 + $0x20] sm:$0xff]  }
 0x7be   :  { %9185 = vrcp.f32 %v3963_v41  ;;  %v3964_v26 = vadd.f32 1.0, %v9176_v54  ;;  %v9673_v54 = vld [vmem:[#allocation19 + $0x30] sm:$0xff]  }
 0x7bf   :  { %v4268_v35 = vpack.c.bf16 %v4040_v33, %v4039_v19  ;;  %v9674_v33 = vld [vmem:[#allocation19 + $0x38] sm:$0xff]  }
 0x7c0   :  { %v9178_v7 = vpop.eup %9177  ;;  %9187 = vrcp.f32 %v3964_v26 }
 0x7c1   :  { %v4025_v52 = vmul.f32 %v9178_v7, %v12880_v17 }
 0x7c2   :  { %v9180_v58 = vpop.eup %9179  ;;  %8247 = vmatmul.mubr.bf16.vlgmr.msra.gmra.mrb[156].mxu0 %v15129_v48 }
 0x7c3   :  { %v9182_v14 = vpop.eup %9181  ;;  %8250 = vmatprep.mubr.bf16.mxu0 %v4266_v11  ;;  %v4026_v60 = vmul.f32 %v9180_v58, %v12890_v56  ;;  %v4041_v8 = vadd.f32 %v4025_v52, %v12785_v9  ;;  %8263 = vmatpush3.bf16.msra.mxu0 %v12904_v59  ;;  %v15130_v58 = vld [vmem:[#allocation131_spill] sm:$0xff] }
 0x7c4   :  { %v3965_v34 = vadd.f32 1.0, %v9182_v14  ;;  %8264 = vmatprep.subr.bf16.mxu0 %v9668_v63 }
 0x7c5   :  { %v9184_v62 = vpop.eup %9183  ;;  %v4042_v20 = vadd.f32 %v4026_v60, %v12795_v45 }
 0x7c6   :  { %9189 = vrcp.f32 %v3965_v34  ;;  %v3966_v17 = vadd.f32 1.0, %v9184_v62 }
 0x7c7   :  { %v4269_v1 = vpack.c.bf16 %v4042_v20, %v4041_v8  ;;  %8265 = vmatpush3.bf16.msra.mxu0 %v9668_v63  ;;  %v15132_v8 = vld [vmem:[#allocation133_spill] sm:$0xff] }
 0x7c8   :  { %v9186_v51 = vpop.eup %9185  ;;  %9191 = vrcp.f32 %v3966_v17  ;;  %8266 = vmatprep.subr.bf16.mxu0 %v9669_v43  ;;  %v15133_v17 = vld [vmem:[#allocation146_spill] sm:$0xff] }
 0x7c9   :  { %v4027_v56 = vmul.f32 %v9186_v51, %v12908_v21  ;;  %v15134_v51 = vld [vmem:[#allocation134_spill] sm:$0xff] }
 0x7ca   :  { %v9188_v11 = vpop.eup %9187  ;;  %8251 = vmatmul.mubr.bf16.gmra.mrb[160].mxu0 %v4267_v12 }
 0x7cb   :  { %8254 = vmatprep.mubr.bf16.mxu0 %v4268_v35  ;;  %v4028_v9 = vmul.f32 %v9188_v11, %v12919_v24  ;;  %v4043_v59 = vadd.f32 %v4027_v56, %v12809_v36  ;;  %8267 = vmatpush3.bf16.msra.mxu0 %v9669_v43  ;;  %v9672_v36 = vld [vmem:[#allocation19 + $0x28] sm:$0xff]   ;;  %v15135_v11 = vld [vmem:[#allocation135_spill] sm:$0xff] }
 0x7cc   :  { %8268 = vmatprep.subr.bf16.mxu0 %v9670_v3 }
 0x7cd   :  { %v4044_v45 = vadd.f32 %v4028_v9, %v12819_v38 }
 0x7cf   :  { %v4270_v10 = vpack.c.bf16 %v4044_v45, %v4043_v59  ;;  %8269 = vmatpush3.bf16.msra.mxu0 %v9670_v3  ;;  %v15136_v3 = vld [vmem:[#allocation140_spill] sm:$0xff] }
 0x7d0   :  { %v9190_v46 = vpop.eup %9189  ;;  %8270 = vmatprep.subr.bf16.mxu0 %v9671_v61 }
 0x7d1   :  { %v4029_v19 = vmul.f32 %v9190_v46, %v12931_v55 }
 0x7d2   :  { %v9192_v21 = vpop.eup %9191  ;;  %8255 = vmatmul.mubr.bf16.gmra.mrb[164].mxu0 %v4269_v1 }
 0x7d3   :  { %8258 = vmatprep.mubr.bf16.mxu0 %v4270_v10  ;;  %v4030_v12 = vmul.f32 %v9192_v21, %v12940_v39  ;;  %v4045_v24 = vadd.f32 %v4029_v19, %v12833_v15  ;;  %8271 = vmatpush3.bf16.msra.mxu0 %v9671_v61 }
 0x7d4   :  { %8272 = vmatprep.subr.bf16.mxu0 %v9672_v36 }
 0x7d5   :  { %v4046_v41 = vadd.f32 %v4030_v12, %v12843_v40  ;;  %v15131_v40 = vld [vmem:[#allocation132_spill] sm:$0xff] }
 0x7d7   :  { %v4271_v38 = vpack.c.bf16 %v4046_v41, %v4045_v24  ;;  %8273 = vmatpush3.bf16.msra.mxu0 %v9672_v36 }
 0x7d8   :  { %8274 = vmatprep.subr.bf16.mxu0 %v9673_v54 }
 0x7da   :  { %8259 = vmatmul.mubr.bf16.gmra.mrb[168].mxu0 %v4271_v38  ;;  %v15137_v38 = vld [vmem:[#allocation147_spill] sm:$0xff] }
 0x7db   :  { %8275 = vmatpush3.bf16.msra.mxu0 %v9673_v54 }
 0x7dc   :  { %8276 = vmatprep.subr.bf16.mxu0 %v9674_v33 }
 0x7df   :  { %8277 = vmatpush3.bf16.msra.mxu0 %v9674_v33 }
 0x85d   :  { %v8216_v55 = vpop.f32.mrb[140].mxu0 }
 0x85e   :  { %v4089_v26 = vpop.f32.mrb[141].mxu0  ;;  %v4154_v48 = vadd.f32 %v8216_v55, %v15130_v58  ;;  %v15138_v55 = vld [vmem:[#allocation141_spill] sm:$0xff] }
 0x85f   :  { %v8217_v35 = vpop.f32.mrb[142].mxu0  ;;  %v4152_v60 = vadd.f32 %v4089_v26, %v15131_v40 }
 0x860   :  { %v4092_v39 = vpop.f32.mrb[143].mxu0  ;;  %v4155_v34 = vadd.f32 %v8217_v35, %v15132_v8  ;;  %v7538_v63 = vmul.f32 -1.442695, %v4154_v48 }
 0x861   :  { %v7536_v62 = vmul.f32 -1.442695, %v4152_v60  ;;  %v4153_v1 = vadd.f32 %v4092_v39, %v15133_v17  ;;  %v15139_v39 = vld [vmem:[#allocation136_spill] sm:$0xff] }
 0x862   :  { %v7539_v20 = vmul.f32 -1.442695, %v4155_v34  ;;  %9193 = vpow2.f32 %v7538_v63  ;;  %v15140_v63 = vld [vmem:[#allocation142_spill] sm:$0xff] }
 0x863   :  { %9195 = vpow2.f32 %v7536_v62  ;;  %v7537_v56 = vmul.f32 -1.442695, %v4153_v1  ;;  %v15141_v1 = vld [vmem:[#allocation137_spill] sm:$0xff] }
 0x864   :  { %9197 = vpow2.f32 %v7539_v20 }
 0x865   :  { %9199 = vpow2.f32 %v7537_v56 }
 0x86c   :  { %v9194_v24 = vpop.eup %9193 }
 0x86d   :  { %v8220_v7 = vpop.f32.mrb[144].mxu0  ;;  %v9196_v36 = vpop.eup %9195  ;;  %v4218_v33 = vadd.f32 1.0, %v9194_v24 }
 0x86e   :  { %v4105_v15 = vpop.f32.mrb[145].mxu0  ;;  %v4158_v43 = vadd.f32 %v8220_v7, %v15134_v51  ;;  %v9198_v41 = vpop.eup %9197  ;;  %v4216_v35 = vadd.f32 1.0, %v9196_v36  ;;  %v15143_v36 = vld [vmem:[#allocation138_spill] sm:$0xff] }
 0x86f   :  { %v8221_v52 = vpop.f32.mrb[146].mxu0  ;;  %v4156_v9 = vadd.f32 %v4105_v15, %v15135_v11  ;;  %v4219_v15 = vadd.f32 1.0, %v9198_v41 }
 0x870   :  { %v4108_v14 = vpop.f32.mrb[147].mxu0  ;;  %v7542_v59 = vmul.f32 -1.442695, %v4158_v43  ;;  %v4159_v45 = vadd.f32 %v8221_v52, %v15136_v3  ;;  %v9200_v52 = vpop.eup %9199 }
 0x871   :  { %v7540_v46 = vmul.f32 -1.442695, %v4156_v9  ;;  %v4157_v54 = vadd.f32 %v4108_v14, %v15137_v38  ;;  %v4217_v14 = vadd.f32 1.0, %v9200_v52 }
 0x872   :  { %9201 = vpow2.f32 %v7542_v59  ;;  %v7543_v19 = vmul.f32 -1.442695, %v4159_v45 }
 0x873   :  { %9203 = vpow2.f32 %v7540_v46  ;;  %v7541_v48 = vmul.f32 -1.442695, %v4157_v54 }
 0x874   :  { %9205 = vpow2.f32 %v7543_v19 }
 0x875   :  { %9207 = vrcp.f32 %v4218_v33  ;;  %v15144_v33 = vld [vmem:[#allocation139_spill] sm:$0xff] }
 0x876   :  { %9209 = vrcp.f32 %v4216_v35 }
 0x877   :  { %9211 = vrcp.f32 %v4219_v15  ;;  %v15145_v15 = vld [vmem:[#allocation67_spill] sm:$0xff] }
 0x878   :  { %9213 = vpow2.f32 %v7541_v48 }
 0x87c   :  { %v9202_v60 = vpop.eup %9201 }
 0x87d   :  { %v8224_v10 = vpop.f32.mrb[148].mxu0  ;;  %v9204_v56 = vpop.eup %9203  ;;  %v4222_v9 = vadd.f32 1.0, %v9202_v60 }
 0x87e   :  { %v4121_v61 = vpop.f32.mrb[149].mxu0  ;;  %v4162_v26 = vadd.f32 %v8224_v10, %v15138_v55  ;;  %v9206_v59 = vpop.eup %9205 }
 0x87f   :  { %v8225_v21 = vpop.f32.mrb[150].mxu0  ;;  %v4160_v7 = vadd.f32 %v4121_v61, %v15139_v39  ;;  %v15142_v61 = vld [vmem:[#allocation148_spill] sm:$0xff]  ;;  %v12989_v60 = vpop.eup %9207 }
 0x880   :  { %v4124_v12 = vpop.f32.mrb[151].mxu0  ;;  %v7546_v34 = vmul.f32 -1.442695, %v4162_v26  ;;  %v4163_v62 = vadd.f32 %v8225_v21, %v15140_v63  ;;  %v4220_v21 = vadd.f32 1.0, %v9204_v56 }
 0x881   :  { %v7544_v20 = vmul.f32 -1.442695, %v4160_v7  ;;  %v4161_v43 = vadd.f32 %v4124_v12, %v15141_v1  ;;  %v4223_v12 = vadd.f32 1.0, %v9206_v59 }
 0x882   :  { %9215 = vpow2.f32 %v7546_v34  ;;  %v7547_v45 = vmul.f32 -1.442695, %v4163_v62  ;;  %v12991_v62 = vpop.eup %9209 }
 0x883   :  { %9217 = vpow2.f32 %v7544_v20  ;;  %v7545_v46 = vmul.f32 -1.442695, %v4161_v43  ;;  %v12993_v43 = vpop.eup %9211 }
 0x884   :  { %9219 = vrcp.f32 %v4217_v14  ;;  %v9214_v56 = vpop.eup %9213 }
 0x885   :  { %9221 = vrcp.f32 %v4222_v9  ;;  %v15146_v9 = vld [vmem:[#allocation61_spill] sm:$0xff] }
 0x886   :  { %9223 = vpow2.f32 %v7547_v45 }
 0x887   :  { %9225 = vpow2.f32 %v7545_v46  ;;  %v15147_v46 = vld [vmem:[#allocation69_spill] sm:$0xff] }
 0x888   :  { %9227 = vrcp.f32 %v4220_v21 }
 0x889   :  { %9229 = vrcp.f32 %v4223_v12 }
 0x88d   :  { %v8228_v10 = vpop.f32.mrb[152].mxu0 }
 0x88e   :  { %v4166_v19 = vadd.f32 %v8228_v10, %v15142_v61  ;;  %v4137_v24 = vpop.f32.mrb[153].mxu0  ;;  %v9216_v10 = vpop.eup %9215 }
 0x88f   :  { %v4164_v41 = vadd.f32 %v4137_v24, %v15143_v36  ;;  %v8229_v54 = vpop.f32.mrb[154].mxu0  ;;  %v9218_v21 = vpop.eup %9217 }
 0x890   :  { %v4167_v26 = vadd.f32 %v8229_v54, %v15144_v33  ;;  %v4140_v35 = vpop.f32.mrb[155].mxu0  ;;  %v7550_v7 = vmul.f32 -1.442695, %v4166_v19 }
 0x891   :  { %v4165_v52 = vadd.f32 %v4140_v35, %v15145_v15  ;;  %v7548_v48 = vmul.f32 -1.442695, %v4164_v41  ;;  %v15148_v41 = vld [vmem:[#allocation63_spill] sm:$0xff]  ;;  %v4221_v35 = vadd.f32 1.0, %v9214_v56  ;;  %v4403_v56 = vsub.f32 1.0, %v12989_v60 }
 0x892   :  { %v7551_v34 = vmul.f32 -1.442695, %v4167_v26  ;;  %9231 = vpow2.f32 %v7550_v7  ;;  %v12998_v26 = vpop.eup %9219  ;;  %v15149_v7 = vld [vmem:[#allocation78_spill] sm:$0xff] }
 0x893   :  { %v7549_v20 = vmul.f32 -1.442695, %v4165_v52  ;;  %9233 = vpow2.f32 %v7548_v48  ;;  %v13001_v48 = vpop.eup %9221 }
 0x894   :  { %9235 = vpow2.f32 %v7551_v34  ;;  %v4224_v34 = vadd.f32 1.0, %v9218_v21  ;;  %v15151_v21 = vld [vmem:[#allocation73_spill] sm:$0xff] }
 0x895   :  { %v8248_v14 = vpop.f32.mrb[156].mxu0  ;;  %9237 = vpow2.f32 %v7549_v20 }
 0x896   :  { %v4371_v59 = vadd.f32 %v8248_v14, %v15146_v9  ;;  %v4306_v45 = vpop.f32.mrb[157].mxu0  ;;  %v4226_v14 = vadd.f32 1.0, %v9216_v10  ;;  %v9224_v9 = vpop.eup %9223 }
 0x897   :  { %v4369_v19 = vadd.f32 %v4306_v45, %v15147_v46  ;;  %v8249_v24 = vpop.f32.mrb[158].mxu0  ;;  %v9226_v45 = vpop.eup %9225 }
 0x898   :  { %v4372_v54 = vadd.f32 %v8249_v24, %v15148_v41  ;;  %v4309_v12 = vpop.f32.mrb[159].mxu0  ;;  %9239 = vtanh.f32 %v4371_v59  ;;  %v13003_v46 = vpop.eup %9227  ;;  %v4227_v59 = vadd.f32 1.0, %v9224_v9 }
 0x899   :  { %v4370_v52 = vadd.f32 %v4309_v12, %v15149_v7  ;;  %9241 = vtanh.f32 %v4369_v19  ;;  %v13005_v24 = vpop.eup %9229  ;;  %v15150_v12 = vld [vmem:[#allocation88_spill] sm:$0xff]  ;;  %v4225_v19 = vadd.f32 1.0, %v9226_v45 }
 0x89a   :  { %9243 = vtanh.f32 %v4372_v54 }
 0x89b   :  { %9245 = vtanh.f32 %v4370_v52  ;;  %v4401_v52 = vsub.f32 1.0, %v12991_v62 }
 0x89c   :  { %9247 = vrcp.f32 %v4221_v35  ;;  %v9232_v10 = vpop.eup %9231  ;;  %v4404_v35 = vsub.f32 1.0, %v12993_v43 }
 0x89d   :  { %v8252_v20 = vpop.f32.mrb[160].mxu0  ;;  %9249 = vrcp.f32 %v4226_v14  ;;  %v9234_v33 = vpop.eup %9233  ;;  %v4230_v36 = vadd.f32 1.0, %v9232_v10  ;;  %v4402_v14 = vsub.f32 1.0, %v12998_v26  ;;  %v4417_v39 = vmul.f32 %v4401_v52, %v12765_v27 }
 0x89e   :  { %v4375_v7 = vadd.f32 %v8252_v20, %v15150_v12  ;;  %v4322_v41 = vpop.f32.mrb[161].mxu0  ;;  %9251 = vrcp.f32 %v4224_v34  ;;  %v9236_v9 = vpop.eup %9235  ;;  %v4228_v1 = vadd.f32 1.0, %v9234_v33  ;;  %v15152_v34 = vld [vmem:[#allocation83_spill] sm:$0xff]  ;;  %v4420_v55 = vmul.f32 %v4404_v35, %v12799_v30 }
 0x89f   :  { %v4373_v54 = vadd.f32 %v4322_v41, %v15151_v21  ;;  %v8253_v15 = vpop.f32.mrb[162].mxu0  ;;  %v9238_v20 = vpop.eup %9237  ;;  %v4419_v41 = vmul.f32 %v4403_v56, %v12789_v47  ;;  %v15153_v21 = vld [vmem:[#allocation80_spill] sm:$0xff]  ;;  %v4418_v33 = vmul.f32 %v4402_v14, %v12775_v44  ;;  %v4407_v47 = vsub.f32 1.0, %v13001_v48  ;;  %v15155_v44 = vld [vmem:[#allocation90_spill] sm:$0xff] }
 0x8a0   :  { %9253 = vtanh.f32 %v4375_v7  ;;  %v4325_v61 = vpop.f32.mrb[163].mxu0  ;;  %v4376_v45 = vadd.f32 %v8253_v15, %v15152_v34 }
 0x8a1   :  { %9255 = vtanh.f32 %v4373_v54  ;;  %v4374_v63 = vadd.f32 %v4325_v61, %v15153_v21 }
 0x8a2   :  { %9257 = vrcp.f32 %v4227_v59  ;;  %v9240_v12 = vpop.eup %9239 }
 0x8a3   :  { %9259 = vrcp.f32 %v4225_v19  ;;  %v9242_v10 = vpop.eup %9241  ;;  %v4435_v7 = vmul.f32 %v9240_v12, %v12989_v60  ;;  %v4405_v19 = vsub.f32 1.0, %v13003_v46 }
 0x8a4   :  { %9261 = vrcp.f32 %v4230_v36  ;;  %v9244_v54 = vpop.eup %9243  ;;  %v4433_v15 = vmul.f32 %v9242_v10, %v12991_v62  ;;  %v15154_v36 = vld [vmem:[#allocation98_spill] sm:$0xff]  ;;  %v4231_v10 = vadd.f32 1.0, %v9236_v9 }
 0x8a5   :  { %9263 = vrcp.f32 %v4228_v1  ;;  %v8256_v59 = vpop.f32.mrb[164].mxu0  ;;  %v9246_v61 = vpop.eup %9245  ;;  %v4451_v56 = vadd.f32 %v4435_v7, %v4419_v41  ;;  %v4436_v27 = vmul.f32 %v9244_v54, %v12993_v43  ;;  %v15156_v41 = vld [vmem:[#allocation93_spill] sm:$0xff]  ;;  %v4229_v54 = vadd.f32 1.0, %v9238_v20 }
 0x8a6   :  { %9265 = vtanh.f32 %v4376_v45  ;;  %v4379_v60 = vadd.f32 %v8256_v59, %v15154_v36  ;;  %v4338_v12 = vpop.f32.mrb[165].mxu0  ;;  %v13025_v30 = vpop.eup %9247  ;;  %v4434_v62 = vmul.f32 %v9246_v61, %v12998_v26  ;;  %v4449_v35 = vadd.f32 %v4433_v15, %v4417_v39  ;;  %v15157_v59 = vld [vmem:[#allocation85_spill] sm:$0xff]  ;;  %v15159_v26 = vld [vmem:[#allocation120_spill] sm:$0xff] }
 0x8a7   :  { %9267 = vtanh.f32 %v4374_v63  ;;  %v4377_v1 = vadd.f32 %v4338_v12, %v15155_v44  ;;  %v8257_v52 = vpop.f32.mrb[166].mxu0  ;;  %v13029_v14 = vpop.eup %9249  ;;  %v4452_v21 = vadd.f32 %v4436_v27, %v4420_v55  ;;  %v15158_v12 = vld [vmem:[#allocation143_spill] sm:$0xff]  ;;  %v4423_v15 = vmul.f32 %v4407_v47, %v12837_v2  ;;  %v15160_v55 = vld [vmem:[#allocation144_spill] sm:$0xff] }
 0x8a8   :  { %9269 = vtanh.f32 %v4379_v60  ;;  %v4380_v43 = vadd.f32 %v8257_v52, %v15156_v41  ;;  %v4341_v45 = vpop.f32.mrb[167].mxu0  ;;  %v9252_v7 = vpop.eup %9251  ;;  %v4450_v63 = vadd.f32 %v4434_v62, %v4418_v33  ;;  %v4467_v44 = vmul.f32 %v4451_v56, %v15158_v12  ;;  %v15161_v27 = vld [vmem:[#allocation75_spill] sm:$0xff] }
 0x8a9   :  { %9271 = vtanh.f32 %v4377_v1  ;;  %v4378_v36 = vadd.f32 %v4341_v45, %v15157_v59  ;;  %v4468_v39 = vmul.f32 %v4452_v21, %v15159_v26  ;;  %v4465_v61 = vmul.f32 %v4449_v35, %v15160_v55 }
 0x8aa   :  { %v9254_v34 = vpop.eup %9253  ;;  %9273 = vtanh.f32 %v4380_v43  ;;  %v4466_v60 = vmul.f32 %v4450_v63, %v15161_v27  ;;  %v4421_v33 = vmul.f32 %v4405_v19, %v12813_v5  ;;  %v4408_v47 = vsub.f32 1.0, %v13005_v24  ;;  %v15162_v43 = vld [vmem:[#allocation70_spill] sm:$0xff] }
 0x8ab   :  { %v9256_v9 = vpop.eup %9255  ;;  %9275 = vtanh.f32 %v4378_v36  ;;  %v4439_v20 = vmul.f32 %v9254_v34, %v13001_v48  ;;  %v13039_v52 = vpack.c.bf16 %v4468_v39, %v4467_v44  ;;  %v4406_v44 = vsub.f32 1.0, %v13025_v30 }
 0x8ac   :  { %v9258_v1 = vpop.eup %9257  ;;  %9277 = vrcp.f32 %v4231_v10  ;;  %v4437_v56 = vmul.f32 %v9256_v9, %v13003_v46  ;;  %v13043_v2 = vpack.c.bf16 %v4466_v60, %v4465_v61  ;;  %v4411_v5 = vsub.f32 1.0, %v13029_v14  ;;  %v15163_v46 = vld [vmem:[#allocation100_spill] sm:$0xff] }
 0x8ad   :  { %v9260_v62 = vpop.eup %9259  ;;  %9279 = vrcp.f32 %v4229_v54  ;;  %v8260_v21 = vpop.f32.mrb[168].mxu0  ;;  %v4455_v36 = vadd.f32 %v4439_v20, %v4423_v15  ;;  %v4409_v63 = vsub.f32 1.0, %v9252_v7  ;;  %v15164_v15 = vld [vmem:[#allocation64_spill] sm:$0xff]  ;;  %v4412_v20 = vsub.f32 1.0, %v9258_v1 }
 0x8ae   :  { %v13046_v35 = vpop.eup %9261  ;;  %v4383_v48 = vadd.f32 %v8260_v21, %v15162_v43  ;;  %v4354_v34 = vpop.f32.mrb[169].mxu0  ;;  %v4453_v10 = vadd.f32 %v4437_v56, %v4421_v33  ;;  %8278 = vmatprep.mubr.bf16.mxu0 %v13043_v2  ;;  %v4410_v60 = vsub.f32 1.0, %v9260_v62  ;;  %v15165_v56 = vld [vmem:[#allocation95_spill] sm:$0xff]  ;;  %v4424_v43 = vmul.f32 %v4408_v47, %v12847_v23 }
 0x8af   :  { %v13051_v19 = vpop.eup %9263  ;;  %v4381_v45 = vadd.f32 %v4354_v34, %v15163_v46  ;;  %v8261_v54 = vpop.f32.mrb[170].mxu0  ;;  %8279 = vmatmul.mubr.bf16.vlgmr.msra.gmra.mrb[172].mxu0 %v13039_v52  ;;  %v4422_v27 = vmul.f32 %v4406_v44, %v12823_v53  ;;  %v4425_v26 = vmul.f32 %v4409_v63, %v12861_v37  ;;  %v4428_v47 = vmul.f32 %v4412_v20, %v12897_v31  ;;  %v15166_v53 = vld [vmem:[#allocation62_spill] sm:$0xff]  ;;  %v15169_v37 = vld [vmem:[#allocation145_spill] sm:$0xff] }
 0x8b0   :  { %v9266_v39 = vpop.eup %9265  ;;  %9281 = vtanh.f32 %v4383_v48  ;;  %v4384_v9 = vadd.f32 %v8261_v54, %v15164_v15  ;;  %v4357_v61 = vpop.f32.mrb[171].mxu0  ;;  %v4427_v54 = vmul.f32 %v4411_v5, %v12887_v49  ;;  %v4426_v23 = vmul.f32 %v4410_v60, %v12871_v0  ;;  %v15171_v60 = vld [vmem:[#allocation123_spill] sm:$0xff] }
 0x8b1   :  { %v9268_v33 = vpop.eup %9267  ;;  %9283 = vtanh.f32 %v4381_v45  ;;  %v4382_v21 = vadd.f32 %v4357_v61, %v15165_v56  ;;  %v4440_v34 = vmul.f32 %v9266_v39, %v13005_v24  ;;  %v4471_v44 = vmul.f32 %v4455_v36, %v15166_v53 }
 0x8b2   :  { %v9270_v46 = vpop.eup %9269  ;;  %9285 = vtanh.f32 %v4384_v9  ;;  %v4438_v48 = vmul.f32 %v9268_v33, %v13025_v30  ;;  %v15167_v30 = vld [vmem:[#allocation121_spill] sm:$0xff]  ;;  %v4415_v31 = vsub.f32 1.0, %v13046_v35  ;;  %v4413_v36 = vsub.f32 1.0, %v13051_v19 }
 0x8b3   :  { %v9272_v15 = vpop.eup %9271  ;;  %9287 = vtanh.f32 %v4382_v21  ;;  %v4456_v55 = vadd.f32 %v4440_v34, %v4424_v43  ;;  %v4443_v45 = vmul.f32 %v9270_v46, %v13029_v14  ;;  %v15168_v43 = vld [vmem:[#allocation68_spill] sm:$0xff] }
 0x8b4   :  { %v9274_v61 = vpop.eup %9273  ;;  %v4454_v56 = vadd.f32 %v4438_v48, %v4422_v27  ;;  %v4441_v24 = vmul.f32 %v9272_v15, %v9252_v7  ;;  %v4469_v21 = vmul.f32 %v4453_v10, %v15168_v43 }
 0x8b5   :  { %v9276_v39 = vpop.eup %9275  ;;  %v4472_v9 = vmul.f32 %v4456_v55, %v15167_v30  ;;  %v4444_v49 = vmul.f32 %v9274_v61, %v9258_v1  ;;  %v4459_v5 = vadd.f32 %v4443_v45, %v4427_v54  ;;  %v15170_v55 = vld [vmem:[#allocation76_spill] sm:$0xff] }
 0x8b6   :  { %v9278_v33 = vpop.eup %9277  ;;  %v4470_v63 = vmul.f32 %v4454_v56, %v15169_v37  ;;  %v4442_v14 = vmul.f32 %v9276_v39, %v9260_v62  ;;  %v4457_v46 = vadd.f32 %v4441_v24, %v4425_v26  ;;  %v15172_v56 = vld [vmem:[#allocation74_spill] sm:$0xff] }
 0x8b7   :  { %v9280_v27 = vpop.eup %9279  ;;  %v13071_v34 = vpack.c.bf16 %v4472_v9, %v4471_v44  ;;  %v4460_v0 = vadd.f32 %v4444_v49, %v4428_v47  ;;  %v4475_v1 = vmul.f32 %v4459_v5, %v15170_v55  ;;  %v4416_v48 = vsub.f32 1.0, %v9278_v33  ;;  %v15173_v26 = vld [vmem:[#allocation122_spill] sm:$0xff] }
 0x8b8   :  { %v4483_v7 = vpack.c.bf16 %v4470_v63, %v4469_v21  ;;  %v4458_v15 = vadd.f32 %v4442_v14, %v4426_v23  ;;  %v4473_v62 = vmul.f32 %v4457_v46, %v15172_v56  ;;  %v4414_v45 = vsub.f32 1.0, %v9280_v27  ;;  %v15234_v56 = vld [vmem:[#allocation51_spill] sm:$0xff] }
 0x8b9   :  { %v4476_v20 = vmul.f32 %v4460_v0, %v15171_v60  ;;  %v4431_v23 = vmul.f32 %v4415_v31, %v12937_v50  ;;  %v4429_v9 = vmul.f32 %v4413_v36, %v12916_v13  ;;  %v4432_v21 = vmul.f32 %v4416_v48, %v12945_v25  ;;  %v15174_v31 = vld [vmem:[#allocation81_spill] sm:$0xff]  ;;  %v15177_v36 = vld [vmem:[#allocation124_spill] sm:$0xff] }
 0x8ba   :  { %v9282_v10 = vpop.eup %9281  ;;  %8282 = vmatprep.mubr.bf16.mxu0 %v4483_v7  ;;  %v4474_v54 = vmul.f32 %v4458_v15, %v15173_v26  ;;  %v4430_v46 = vmul.f32 %v4414_v45, %v12924_v16 }
 0x8bb   :  { %v9284_v61 = vpop.eup %9283  ;;  %8283 = vmatmul.mubr.bf16.gmra.mrb[176].mxu0 %v13071_v34  ;;  %v4486_v24 = vpack.c.bf16 %v4476_v20, %v4475_v1  ;;  %v4447_v47 = vmul.f32 %v9282_v10, %v13046_v35  ;;  %v15175_v20 = vld [vmem:[#allocation125_spill] sm:$0xff] }
 0x8bc   :  { %v9286_v39 = vpop.eup %9285  ;;  %v4485_v44 = vpack.c.bf16 %v4474_v54, %v4473_v62  ;;  %v4445_v49 = vmul.f32 %v9284_v61, %v13051_v19  ;;  %v15176_v62 = vld [vmem:[#allocation79_spill] sm:$0xff] }
 0x8bd   :  { %v9288_v5 = vpop.eup %9287  ;;  %v4448_v63 = vmul.f32 %v9286_v39, %v9278_v33  ;;  %v4463_v14 = vadd.f32 %v4447_v47, %v4431_v23  ;;  %v15178_v33 = vmov 0  }
 0x8be   :  { %8286 = vmatprep.mubr.bf16.mxu0 %v4485_v44  ;;  %v4446_v0 = vmul.f32 %v9288_v5, %v9280_v27  ;;  %v4461_v15 = vadd.f32 %v4445_v49, %v4429_v9 }
 0x8bf   :  { %v4464_v1 = vadd.f32 %v4448_v63, %v4432_v21  ;;  %v4479_v35 = vmul.f32 %v4463_v14, %v15174_v31 }
 0x8c0   :  { %v4462_v50 = vadd.f32 %v4446_v0, %v4430_v46  ;;  %v4477_v13 = vmul.f32 %v4461_v15, %v15176_v62 }
 0x8c1   :  { %v4480_v10 = vmul.f32 %v4464_v1, %v15175_v20 }
 0x8c2   :  { %v4478_v19 = vmul.f32 %v4462_v50, %v15177_v36 }
 0x8c3   :  { %8287 = vmatmul.mubr.bf16.gmra.mrb[180].mxu0 %v4486_v24  ;;  %v4488_v54 = vpack.c.bf16 %v4480_v10, %v4479_v35 }
 0x8c4   :  { %v4487_v25 = vpack.c.bf16 %v4478_v19, %v4477_v13 }
 0x8c6   :  { %8290 = vmatprep.mubr.bf16.mxu0 %v4487_v25 }
 0x8cb   :  { %8291 = vmatmul.mubr.bf16.gmra.mrb[184].mxu0 %v4488_v54 }
 0x8cc   :  { %4626 = vmatprep.mubr.bf16.mxu0 %v15178_v33 }
 0x982   :  { %v8280_v16 = vpop.f32.mrb[172].mxu0 }
 0x983   :  { %v4523_v27 = vpop.f32.mrb[173].mxu0 }
 0x984   :  { %v8281_v48 = vpop.f32.mrb[174].mxu0 }
 0x985   :  { %v4587_v45 = vpack.c.bf16 %v8281_v48, %v8280_v16  ;;  %v4526_v61 = vpop.f32.mrb[175].mxu0  ;;  %v15221_v48 = vld [vmem:[#allocation38_spill] sm:$0xff] }
 0x986   :  { %v4586_v23 = vpack.c.bf16 %v4526_v61, %v4523_v27  ;;  %v15191_v61 = vld [vmem:[#allocation102_spill] sm:$0xff] }
 0x988   :  { %4594 = vmatprep.subr.bf16.mxu0 %v4586_v23  ;;  %v15193_v23 = vld [vmem:[#allocation103_spill] sm:$0xff] }
 0x989   :  { %4595 = vmatpush1.bf16.msra.mxu0 %v13043_v2 }
 0x98a   :  { %4596 = vmatprep.subr.bf16.mxu0 %v4587_v45  ;;  %v15189_v45 = vld [vmem:[#allocation97_spill] sm:$0xff] }
 0x98d   :  { %4597 = vmatpush1.bf16.msra.mxu0 %v13039_v52 }
 0x98e   :  { %v8284_v47 = vpop.f32.mrb[176].mxu0 }
 0x98f   :  { %v4539_v39 = vpop.f32.mrb[177].mxu0 }
 0x990   :  { %v8285_v9 = vpop.f32.mrb[178].mxu0 }
 0x991   :  { %v4589_v49 = vpack.c.bf16 %v8285_v9, %v8284_v47  ;;  %v4542_v5 = vpop.f32.mrb[179].mxu0  ;;  %v15195_v47 = vld [vmem:[#allocation104_spill] sm:$0xff]  ;;  %v15199_v9 = vld [vmem:[#allocation106_spill] sm:$0xff] }
 0x992   :  { %v4588_v21 = vpack.c.bf16 %v4542_v5, %v4539_v39  ;;  %v15197_v39 = vld [vmem:[#allocation105_spill] sm:$0xff]  ;;  %v15203_v5 = vld [vmem:[#allocation108_spill] sm:$0xff] }
 0x994   :  { %4598 = vmatprep.subr.bf16.mxu0 %v4588_v21  ;;  %v15205_v21 = vld [vmem:[#allocation109_spill] sm:$0xff] }
 0x995   :  { %4599 = vmatpush1.bf16.msra.mxu0 %v4483_v7  ;;  %v15179_v7 = vmov 1.0|1.0  }
 0x996   :  { %v8288_v63 = vpop.f32.mrb[180].mxu0  ;;  %4600 = vmatprep.subr.bf16.mxu0 %v4589_v49  ;;  %v15201_v49 = vld [vmem:[#allocation107_spill] sm:$0xff] }
 0x997   :  { %v4555_v14 = vpop.f32.mrb[181].mxu0 }
 0x998   :  { %v8289_v46 = vpop.f32.mrb[182].mxu0 }
 0x999   :  { %v4591_v0 = vpack.c.bf16 %v8289_v46, %v8288_v63  ;;  %v4558_v15 = vpop.f32.mrb[183].mxu0  ;;  %4601 = vmatpush1.bf16.msra.mxu0 %v13071_v34  ;;  %v15207_v63 = vld [vmem:[#allocation110_spill] sm:$0xff] }
 0x99a   :  { %v4590_v2 = vpack.c.bf16 %v4558_v15, %v4555_v14  ;;  %v15209_v14 = vld [vmem:[#allocation111_spill] sm:$0xff] }
 0x99b   :  { %v15225_v15 = vld [vmem:[#allocation43_spill] sm:$0xff] }
 0x99c   :  { %4602 = vmatprep.subr.bf16.mxu0 %v4590_v2 }
 0x99d   :  { %4603 = vmatpush1.bf16.msra.mxu0 %v4485_v44 }
 0x99e   :  { %v8292_v1 = vpop.f32.mrb[184].mxu0  ;;  %4604 = vmatprep.subr.bf16.mxu0 %v4591_v0 }
 0x99f   :  { %v4571_v52 = vpop.f32.mrb[185].mxu0 }
 0x9a0   :  { %v8293_v50 = vpop.f32.mrb[186].mxu0 }
 0x9a1   :  { %v4593_v35 = vpack.c.bf16 %v8293_v50, %v8292_v1  ;;  %v4574_v10 = vpop.f32.mrb[187].mxu0  ;;  %4605 = vmatpush1.bf16.msra.mxu0 %v4486_v24  ;;  %v15218_v50 = vld [vmem:[#allocation119_spill] sm:$0xff] }
 0x9a2   :  { %v4592_v13 = vpack.c.bf16 %v4574_v10, %v4571_v52  ;;  %v15216_v52 = vld [vmem:[#allocation118_spill] sm:$0xff] }
 0x9a4   :  { %4606 = vmatprep.subr.bf16.mxu0 %v4592_v13 }
 0x9a5   :  { %4607 = vmatpush1.bf16.msra.mxu0 %v4487_v25 }
 0x9a6   :  { %4608 = vmatprep.subr.bf16.mxu0 %v4593_v35 }
 0x9a9   :  { %4609 = vmatpush1.bf16.msra.mxu0 %v4488_v54 }
 0x9ac   :  { %7553 = vmatmul.mubr.msk.bf16.vlgmr.msra.gmra.mrb[188].mxu0 %vm10717_vm5, %v15179_v7  ;;  %vm15190_vm5 = vnez %v15189_v45 }
 0x9ad   :  { %4636 = vmatprep.mubr.bf16.mxu0 %v15178_v33 }
 0x9b4   :  { %7555 = vmatmul.mubr.msk.bf16.gmra.mrb[192].mxu0 %vm10743_vm11, %v15179_v7  ;;  %vm15192_vm11 = vnez %v15191_v61 }
 0x9b5   :  { %4646 = vmatprep.mubr.bf16.mxu0 %v15178_v33 }
 0x9bc   :  { %7557 = vmatmul.mubr.msk.bf16.gmra.mrb[196].mxu0 %vm10765_vm1, %v15179_v7  ;;  %vm15194_vm1 = vnez %v15193_v23 }
 0x9bd   :  { %4656 = vmatprep.mubr.bf16.mxu0 %v15178_v33 }
 0x9c4   :  { %7559 = vmatmul.mubr.msk.bf16.gmra.mrb[200].mxu0 %vm10795_vm9, %v15179_v7  ;;  %vm15196_vm9 = vnez %v15195_v47 }
 0x9c5   :  { %4666 = vmatprep.mubr.bf16.mxu0 %v15178_v33 }
 0x9cc   :  { %7561 = vmatmul.mubr.msk.bf16.gmra.mrb[204].mxu0 %vm10825_vm3, %v15179_v7  ;;  %vm15198_vm3 = vnez %v15197_v39  ;;  %v15222_v39 = vld [vmem:[#allocation40_spill] sm:$0xff] }
 0x9cd   :  { %4676 = vmatprep.mubr.bf16.mxu0 %v15178_v33 }
 0x9d4   :  { %7563 = vmatmul.mubr.msk.bf16.gmra.mrb[208].mxu0 %vm10848_vm12, %v15179_v7  ;;  %vm15200_vm12 = vnez %v15199_v9 }
 0x9d5   :  { %4686 = vmatprep.mubr.bf16.mxu0 %v15178_v33 }
 0x9dc   :  { %7565 = vmatmul.mubr.msk.bf16.gmra.mrb[212].mxu0 %vm10868_vm15, %v15179_v7  ;;  %vm15202_vm15 = vnez %v15201_v49  ;;  %v15223_v49 = vld [vmem:[#allocation57_spill] sm:$0xff] }
 0x9dd   :  { %4696 = vmatprep.mubr.bf16.mxu0 %v15178_v33 }
 0x9e4   :  { %7567 = vmatmul.mubr.msk.bf16.gmra.mrb[216].mxu0 %vm10888_vm13, %v15179_v7  ;;  %vm15204_vm13 = vnez %v15203_v5 }
 0x9e5   :  { %4706 = vmatprep.mubr.bf16.mxu0 %v15178_v33 }
 0x9ec   :  { %7569 = vmatmul.mubr.msk.bf16.gmra.mrb[220].mxu0 %vm10908_vm6, %v15179_v7  ;;  %vm15206_vm6 = vnez %v15205_v21 }
 0x9ed   :  { %4716 = vmatprep.mubr.bf16.mxu0 %v15178_v33 }
 0x9f4   :  { %7571 = vmatmul.mubr.msk.bf16.gmra.mrb[224].mxu0 %vm15190_vm5, %v15179_v7  ;;  %vm15208_vm5 = vnez %v15207_v63 }
 0x9f5   :  { %4726 = vmatprep.mubr.bf16.mxu0 %v15178_v33 }
 0x9fc   :  { %7573 = vmatmul.mubr.msk.bf16.gmra.mrb[228].mxu0 %vm15192_vm11, %v15179_v7  ;;  %vm15210_vm11 = vnez %v15209_v14 }
 0x9fd   :  { %4736 = vmatprep.mubr.bf16.mxu0 %v15178_v33 }
 0xa04   :  { %7575 = vmatmul.mubr.msk.bf16.gmra.mrb[232].mxu0 %vm15194_vm1, %v15179_v7 }
 0xa05   :  { %4746 = vmatprep.mubr.bf16.mxu0 %v15178_v33 }
 0xa0c   :  { %7577 = vmatmul.mubr.msk.bf16.gmra.mrb[236].mxu0 %vm15196_vm9, %v15179_v7 }
 0xa0d   :  { %4756 = vmatprep.mubr.bf16.mxu0 %v15178_v33 }
 0xa14   :  { %7579 = vmatmul.mubr.msk.bf16.gmra.mrb[240].mxu0 %vm15198_vm3, %v15179_v7 }
 0xa15   :  { %4766 = vmatprep.mubr.bf16.mxu0 %v15178_v33 }
 0xa1c   :  { %7581 = vmatmul.mubr.msk.bf16.gmra.mrb[244].mxu0 %vm15200_vm12, %v15179_v7 }
 0xa1d   :  { %4776 = vmatprep.mubr.bf16.mxu0 %v15178_v33 }
 0xa24   :  { %7583 = vmatmul.mubr.msk.bf16.gmra.mrb[248].mxu0 %vm15202_vm15, %v15179_v7 }
 0xa25   :  { %4786 = vmatprep.mubr.bf16.mxu0 %v15178_v33 }
 0xa2c   :  { %7585 = vmatmul.mubr.msk.bf16.gmra.mrb[252].mxu0 %vm15204_vm13, %v15179_v7 }
 0xa2d   :  { %4796 = vmatprep.mubr.bf16.mxu0 %v15178_v33 }
 0xa34   :  { %7587 = vmatmul.mubr.msk.bf16.gmra.mrb[0].mxu0 %vm15206_vm6, %v15179_v7 }
 0xa35   :  { %4806 = vmatprep.mubr.bf16.mxu0 %v15178_v33 }
 0xa3c   :  { %7589 = vmatmul.mubr.msk.bf16.gmra.mrb[4].mxu0 %vm15208_vm5, %v15179_v7 }
 0xa3d   :  { %4816 = vmatprep.mubr.bf16.mxu0 %v15178_v33 }
 0xa44   :  { %7591 = vmatmul.mubr.msk.bf16.gmra.mrb[8].mxu0 %vm15210_vm11, %v15179_v7 }
 0xa45   :  { %4826 = vmatprep.mubr.bf16.mxu0 %v15178_v33 }
 0xa4c   :  { %7593 = vmatmul.mubr.msk.bf16.gmra.mrb[12].mxu0 %vm15071_vm7, %v15179_v7 }
 0xa4d   :  { %4836 = vmatprep.mubr.bf16.mxu0 %v15178_v33 }
 0xa54   :  { %7595 = vmatmul.mubr.msk.bf16.gmra.mrb[16].mxu0 %vm15073_vm14, %v15179_v7  ;;  %vm15217_vm14 = vnez %v15216_v52 }
 0xa55   :  { %4846 = vmatprep.mubr.bf16.mxu0 %v15178_v33 }
 0xa5c   :  { %7597 = vmatmul.mubr.msk.bf16.gmra.mrb[20].mxu0 %vm15075_vm0, %v15179_v7  ;;  %vm15219_vm0 = vnez %v15218_v50 }
 0xa5d   :  { %4856 = vmatprep.mubr.bf16.mxu0 %v15178_v33 }
 0xa64   :  { %7599 = vmatmul.mubr.msk.bf16.gmra.mrb[24].mxu0 %vm15077_vm2, %v15179_v7 }
 0xa65   :  { %4866 = vmatprep.mubr.bf16.mxu0 %v15178_v33 }
 0xa6c   :  { %7601 = vmatmul.mubr.msk.bf16.gmra.mrb[28].mxu0 %vm11116_vm8, %v15179_v7  ;;  %vm15224_vm8 = vnez %v15223_v49 }
 0xa6d   :  { %4876 = vmatprep.mubr.bf16.mxu0 %v15178_v33 }
 0xa74   :  { %7603 = vmatmul.mubr.msk.bf16.gmra.mrb[32].mxu0 %vm15217_vm14, %v15179_v7 }
 0xa75   :  { %4886 = vmatprep.mubr.bf16.mxu0 %v15178_v33 }
 0xa7c   :  { %7605 = vmatmul.mubr.msk.bf16.gmra.mrb[36].mxu0 %vm15219_vm0, %v15179_v7 }
 0xa7d   :  { %4896 = vmatprep.mubr.bf16.mxu0 %v15178_v33 }
 0xa7f   :  { %v13202_v35 = vpop.f32.mrb[188].mxu0 }
 0xa80   :  { %v4630_v10 = vpop.f32.mrb[189].mxu0 }
 0xa81   :  { %v4947_v13 = vadd.f32 %v4630_v10, %v15081_v22  ;;  %v13205_v19 = vpop.f32.mrb[190].mxu0 }
 0xa82   :  { %v4634_v34 = vpop.f32.mrb[191].mxu0 }
 0xa83   :  { %v7616_v44 = vmul.f32 -1.442695, %v4947_v13  ;;  %v4948_v24 = vadd.f32 %v4634_v34, %v15082_v42  ;;  %v15226_v13 = vld [vmem:[#allocation45_spill] sm:$0xff] }
 0xa84   :  { %7607 = vmatmul.mubr.msk.bf16.gmra.mrb[40].mxu0 %vm15084_vm4, %v15179_v7 }
 0xa85   :  { %9289 = vpow2.f32 %v7616_v44  ;;  %v7617_v25 = vmul.f32 -1.442695, %v4948_v24  ;;  %4906 = vmatprep.mubr.bf16.mxu0 %v15178_v33  ;;  %v15227_v44 = vld [vmem:[#allocation59_spill] sm:$0xff] }
 0xa86   :  { %vm15228_vm4 = vnez %v15227_v44 }
 0xa87   :  { %9291 = vpow2.f32 %v7617_v25  ;;  %v13212_v16 = vpop.f32.mrb[192].mxu0 }
 0xa88   :  { %v4640_v27 = vpop.f32.mrb[193].mxu0 }
 0xa89   :  { %v4949_v45 = vadd.f32 %v4640_v27, %v15221_v48  ;;  %v13215_v61 = vpop.f32.mrb[194].mxu0 }
 0xa8a   :  { %v4644_v23 = vpop.f32.mrb[195].mxu0 }
 0xa8b   :  { %v7618_v47 = vmul.f32 -1.442695, %v4949_v45  ;;  %v4950_v9 = vadd.f32 %v4644_v23, %v15222_v39 }
 0xa8c   :  { %7609 = vmatmul.mubr.msk.bf16.gmra.mrb[44].mxu0 %vm15224_vm8, %v15179_v7 }
 0xa8d   :  { %9293 = vpow2.f32 %v7618_v47  ;;  %v7619_v5 = vmul.f32 -1.442695, %v4950_v9  ;;  %4916 = vmatprep.mubr.bf16.mxu0 %v15178_v33  ;;  %v15229_v47 = vld [vmem:[#allocation42_spill] sm:$0xff] }
 0xa8f   :  { %v9290_v21 = vpop.eup %9289  ;;  %9295 = vpow2.f32 %v7619_v5  ;;  %v13222_v63 = vpop.f32.mrb[196].mxu0 }
 0xa90   :  { %v5011_v14 = vadd.f32 1.0, %v9290_v21  ;;  %v4650_v46 = vpop.f32.mrb[197].mxu0 }
 0xa91   :  { %v9292_v0 = vpop.eup %9291  ;;  %v4951_v2 = vadd.f32 %v4650_v46, %v15225_v15  ;;  %v13225_v1 = vpop.f32.mrb[198].mxu0 }
 0xa92   :  { %9297 = vrcp.f32 %v5011_v14  ;;  %v5012_v52 = vadd.f32 1.0, %v9292_v0  ;;  %v4654_v50 = vpop.f32.mrb[199].mxu0 }
 0xa93   :  { %v7620_v10 = vmul.f32 -1.442695, %v4951_v2  ;;  %v4952_v34 = vadd.f32 %v4654_v50, %v15226_v13  ;;  %v15230_v2 = vld [vmem:[#allocation65_spill] sm:$0xff] }
 0xa94   :  { %9299 = vrcp.f32 %v5012_v52  ;;  %7611 = vmatmul.mubr.msk.bf16.gmra.mrb[48].mxu0 %vm15228_vm4, %v15179_v7  ;;  %vm15231_vm2 = vnez %v15230_v2 }
 0xa95   :  { %9301 = vpow2.f32 %v7620_v10  ;;  %v7621_v24 = vmul.f32 -1.442695, %v4952_v34  ;;  %4926 = vmatprep.mubr.bf16.mxu0 %v15178_v33 }
 0xa97   :  { %v9294_v54 = vpop.eup %9293  ;;  %9303 = vpow2.f32 %v7621_v24  ;;  %v13232_v25 = vpop.f32.mrb[200].mxu0 }
 0xa98   :  { %v5013_v27 = vadd.f32 1.0, %v9294_v54  ;;  %v4660_v45 = vpop.f32.mrb[201].mxu0 }
 0xa99   :  { %v9296_v23 = vpop.eup %9295  ;;  %v4953_v9 = vadd.f32 %v4660_v45, %v15229_v47  ;;  %v13235_v49 = vpop.f32.mrb[202].mxu0 }
 0xa9a   :  { %9305 = vrcp.f32 %v5013_v27  ;;  %v5014_v5 = vadd.f32 1.0, %v9296_v23  ;;  %v4664_v21 = vpop.f32.mrb[203].mxu0 }
 0xa9b   :  { %v7622_v14 = vmul.f32 -1.442695, %v4953_v9  ;;  %v4954_v46 = vadd.f32 %v4664_v21, %v15094_v57 }
 0xa9c   :  { %v9298_v0 = vpop.eup %9297  ;;  %9307 = vrcp.f32 %v5014_v5  ;;  %7613 = vmatmul.mubr.msk.bf16.gmra.mrb[52].mxu0 %vm15231_vm2, %v15179_v7 }
 0xa9d   :  { %9309 = vpow2.f32 %v7622_v14  ;;  %v7623_v52 = vmul.f32 -1.442695, %v4954_v46  ;;  %4936 = vmatprep.mubr.bf16.mxu0 %v15178_v33  ;;  %v13243_v50 = vmul.f32 %v9298_v0, %v13202_v35  ;;  %v15232_v46 = vld [vmem:[#allocation49_spill] sm:$0xff] }
 0xa9e   :  { %v9300_v10 = vpop.eup %9299 }
 0xa9f   :  { %v9302_v34 = vpop.eup %9301  ;;  %9311 = vpow2.f32 %v7623_v52  ;;  %v13245_v44 = vpop.f32.mrb[204].mxu0  ;;  %v13248_v24 = vmul.f32 %v9300_v10, %v13205_v19 }
 0xaa0   :  { %v5015_v54 = vadd.f32 1.0, %v9302_v34  ;;  %v4670_v27 = vpop.f32.mrb[205].mxu0 }
 0xaa1   :  { %v9304_v45 = vpop.eup %9303  ;;  %v4955_v23 = vadd.f32 %v4670_v27, %v15127_v4  ;;  %v13251_v9 = vpop.f32.mrb[206].mxu0 }
 0xaa2   :  { %9313 = vrcp.f32 %v5015_v54  ;;  %v5016_v5 = vadd.f32 1.0, %v9304_v45  ;;  %v4674_v21 = vpop.f32.mrb[207].mxu0 }
 0xaa3   :  { %v7624_v14 = vmul.f32 -1.442695, %v4955_v23  ;;  %v4956_v0 = vadd.f32 %v4674_v21, %v15232_v46 }
 0xaa4   :  { %v9306_v2 = vpop.eup %9305  ;;  %9315 = vrcp.f32 %v5016_v5  ;;  %7615 = vmatmul.mubr.msk.bf16.gmra.mrb[56].mxu0 %vm15100_vm10, %v15179_v7 }
 0xaa5   :  { %v13258_v10 = vmul.f32 %v9306_v2, %v13212_v16  ;;  %9317 = vpow2.f32 %v7624_v14  ;;  %v7625_v34 = vmul.f32 -1.442695, %v4956_v0 }
 0xaa6   :  { %v9308_v27 = vpop.eup %9307 }
 0xaa7   :  { %v9310_v36 = vpop.eup %9309  ;;  %v13261_v54 = vmul.f32 %v9308_v27, %v13215_v61  ;;  %9319 = vpow2.f32 %v7625_v34  ;;  %v13263_v45 = vpop.f32.mrb[208].mxu0 }
 0xaa8   :  { %v5017_v23 = vadd.f32 1.0, %v9310_v36  ;;  %v4680_v21 = vpop.f32.mrb[209].mxu0 }
 0xaa9   :  { %v9312_v5 = vpop.eup %9311  ;;  %v4957_v62 = vadd.f32 %v4680_v21, %v15101_v28  ;;  %v13266_v52 = vpop.f32.mrb[210].mxu0 }
 0xaaa   :  { %9321 = vrcp.f32 %v5017_v23  ;;  %v5018_v2 = vadd.f32 1.0, %v9312_v5  ;;  %v4684_v7 = vpop.f32.mrb[211].mxu0 }
 0xaab   :  { %v7626_v14 = vmul.f32 -1.442695, %v4957_v62  ;;  %v4958_v0 = vadd.f32 %v4684_v7, %v15102_v6 }
 0xaac   :  { %v9314_v20 = vpop.eup %9313  ;;  %9323 = vrcp.f32 %v5018_v2 }
 0xaad   :  { %9325 = vpow2.f32 %v7626_v14  ;;  %v7627_v27 = vmul.f32 -1.442695, %v4958_v0  ;;  %v13270_v34 = vmul.f32 %v9314_v20, %v13222_v63 }
 0xaae   :  { %v9316_v36 = vpop.eup %9315 }
 0xaaf   :  { %v9318_v31 = vpop.eup %9317  ;;  %9327 = vpow2.f32 %v7627_v27  ;;  %v13272_v26 = vpop.f32.mrb[212].mxu0  ;;  %v13275_v21 = vmul.f32 %v9316_v36, %v13225_v1 }
 0xab0   :  { %v5019_v23 = vadd.f32 1.0, %v9318_v31  ;;  %v4690_v5 = vpop.f32.mrb[213].mxu0 }
 0xab1   :  { %v9320_v62 = vpop.eup %9319  ;;  %v4959_v7 = vadd.f32 %v4690_v5, %v15234_v56  ;;  %v13278_v60 = vpop.f32.mrb[214].mxu0 }
 0xab2   :  { %9329 = vrcp.f32 %v5019_v23  ;;  %v5020_v2 = vadd.f32 1.0, %v9320_v62  ;;  %v4694_v14 = vpop.f32.mrb[215].mxu0 }
 0xab3   :  { %v7628_v20 = vmul.f32 -1.442695, %v4959_v7  ;;  %v4960_v0 = vadd.f32 %v4694_v14, %v15104_v18 }
 0xab4   :  { %v9322_v55 = vpop.eup %9321  ;;  %9331 = vrcp.f32 %v5020_v2 }
 0xab5   :  { %9333 = vpow2.f32 %v7628_v20  ;;  %v7629_v27 = vmul.f32 -1.442695, %v4960_v0  ;;  %v13282_v36 = vmul.f32 %v9322_v55, %v13232_v25 }
 0xab6   :  { %v9324_v31 = vpop.eup %9323 }
 0xab7   :  { %v9326_v37 = vpop.eup %9325  ;;  %9335 = vpow2.f32 %v7629_v27  ;;  %v13284_v43 = vpop.f32.mrb[216].mxu0  ;;  %v13287_v5 = vmul.f32 %v9324_v31, %v13235_v49 }
 0xab8   :  { %v5021_v23 = vadd.f32 1.0, %v9326_v37  ;;  %v4700_v62 = vpop.f32.mrb[217].mxu0 }
 0xab9   :  { %v9328_v7 = vpop.eup %9327  ;;  %v4961_v14 = vadd.f32 %v4700_v62, %v15105_v32  ;;  %v13290_v30 = vpop.f32.mrb[218].mxu0 }
 0xaba   :  { %9337 = vrcp.f32 %v5021_v23  ;;  %v5022_v2 = vadd.f32 1.0, %v9328_v7  ;;  %v4704_v20 = vpop.f32.mrb[219].mxu0 }
 0xabb   :  { %v7630_v55 = vmul.f32 -1.442695, %v4961_v14  ;;  %v4962_v0 = vadd.f32 %v4704_v20, %v15106_v29 }
 0xabc   :  { %v9330_v53 = vpop.eup %9329  ;;  %9339 = vrcp.f32 %v5022_v2 }
 0xabd   :  { %9341 = vpow2.f32 %v7630_v55  ;;  %v7631_v27 = vmul.f32 -1.442695, %v4962_v0  ;;  %v13294_v31 = vmul.f32 %v9330_v53, %v13245_v44 }
 0xabe   :  { %v9332_v37 = vpop.eup %9331 }
 0xabf   :  { %v9334_v12 = vpop.eup %9333  ;;  %9343 = vpow2.f32 %v7631_v27  ;;  %v13296_v59 = vpop.f32.mrb[220].mxu0  ;;  %v13299_v62 = vmul.f32 %v9332_v37, %v13251_v9 }
 0xac0   :  { %v5023_v23 = vadd.f32 1.0, %v9334_v12  ;;  %v13303_v7 = vadd.f32 %v13296_v59, %v13202_v35  ;;  %v4710_v14 = vpop.f32.mrb[221].mxu0 }
 0xac1   :  { %v9336_v2 = vpop.eup %9335  ;;  %v5107_v20 = vadd.f32 %v4710_v14, %v15081_v22  ;;  %v13306_v55 = vpop.f32.mrb[222].mxu0 }
 0xac2   :  { %9345 = vrcp.f32 %v5023_v23  ;;  %v5024_v53 = vadd.f32 1.0, %v9336_v2  ;;  %v13310_v0 = vadd.f32 %v13306_v55, %v13205_v19  ;;  %v4714_v27 = vpop.f32.mrb[223].mxu0 }
 0xac3   :  { %v7632_v37 = vmul.f32 -1.442695, %v5107_v20  ;;  %v5108_v12 = vadd.f32 %v4714_v27, %v15082_v42 }
 0xac4   :  { %v9338_v41 = vpop.eup %9337  ;;  %9347 = vrcp.f32 %v5024_v53 }
 0xac5   :  { %9349 = vpow2.f32 %v7632_v37  ;;  %v7633_v35 = vmul.f32 -1.442695, %v5108_v12  ;;  %v13314_v38 = vmul.f32 %v9338_v41, %v13263_v45 }
 0xac6   :  { %v9340_v14 = vpop.eup %9339 }
 0xac7   :  { %v9342_v3 = vpop.eup %9341  ;;  %9351 = vpow2.f32 %v7633_v35  ;;  %v13316_v23 = vpop.f32.mrb[224].mxu0  ;;  %v13319_v2 = vmul.f32 %v9340_v14, %v13266_v52 }
 0xac8   :  { %v5025_v19 = vadd.f32 1.0, %v9342_v3  ;;  %v13323_v20 = vadd.f32 %v13316_v23, %v13212_v16  ;;  %v4720_v27 = vpop.f32.mrb[225].mxu0 }
 0xac9   :  { %v9344_v53 = vpop.eup %9343  ;;  %v5109_v37 = vadd.f32 %v4720_v27, %v15221_v48  ;;  %v13326_v12 = vpop.f32.mrb[226].mxu0 }
 0xaca   :  { %9353 = vrcp.f32 %v5025_v19  ;;  %v5026_v41 = vadd.f32 1.0, %v9344_v53  ;;  %v13330_v35 = vadd.f32 %v13326_v12, %v13215_v61  ;;  %v4724_v11 = vpop.f32.mrb[227].mxu0 }
 0xacb   :  { %v7634_v14 = vmul.f32 -1.442695, %v5109_v37  ;;  %v5110_v3 = vadd.f32 %v4724_v11, %v15222_v39 }
 0xacc   :  { %v9346_v51 = vpop.eup %9345  ;;  %9355 = vrcp.f32 %v5026_v41 }
 0xacd   :  { %9357 = vpow2.f32 %v7634_v14  ;;  %v7635_v16 = vmul.f32 -1.442695, %v5110_v3  ;;  %v13334_v17 = vmul.f32 %v9346_v51, %v13272_v26 }
 0xace   :  { %v9348_v27 = vpop.eup %9347 }
 0xacf   :  { %v9350_v8 = vpop.eup %9349  ;;  %9359 = vpow2.f32 %v7635_v16  ;;  %v13336_v19 = vpop.f32.mrb[228].mxu0  ;;  %v13339_v53 = vmul.f32 %v9348_v27, %v13278_v60 }
 0xad0   :  { %v5171_v61 = vadd.f32 1.0, %v9350_v8  ;;  %v13343_v37 = vadd.f32 %v13336_v19, %v13222_v63  ;;  %v4730_v11 = vpop.f32.mrb[229].mxu0 }
 0xad1   :  { %15235 = vst [vmem:[#allocation101_spill] sm:$0xff] %v13339_v53  ;;  %v9352_v41 = vpop.eup %9351  ;;  %v5111_v14 = vadd.f32 %v4730_v11, %v15225_v15  ;;  %v13346_v3 = vpop.f32.mrb[230].mxu0 }
 0xad2   :  { %9361 = vrcp.f32 %v5171_v61  ;;  %v5172_v51 = vadd.f32 1.0, %v9352_v41  ;;  %v13350_v16 = vadd.f32 %v13346_v3, %v13225_v1  ;;  %v4734_v40 = vpop.f32.mrb[231].mxu0 }
 0xad3   :  { %v7636_v27 = vmul.f32 -1.442695, %v5111_v14  ;;  %v5112_v8 = vadd.f32 %v4734_v40, %v15226_v13 }
 0xad4   :  { %v9354_v58 = vpop.eup %9353  ;;  %9363 = vrcp.f32 %v5172_v51 }
 0xad5   :  { %v13354_v63 = vmul.f32 %v9354_v58, %v13284_v43  ;;  %9365 = vpow2.f32 %v7636_v27  ;;  %v7637_v33 = vmul.f32 -1.442695, %v5112_v8 }
 0xad6   :  { %v9356_v11 = vpop.eup %9355 }
 0xad7   :  { %15236 = vst [vmem:[#allocation39_spill] sm:$0xff] %v13354_v63  ;;  %v9358_v53 = vpop.eup %9357  ;;  %v13357_v61 = vmul.f32 %v9356_v11, %v13290_v30  ;;  %9367 = vpow2.f32 %v7637_v33  ;;  %v13359_v41 = vpop.f32.mrb[232].mxu0 }
 0xad8   :  { %v5173_v1 = vadd.f32 1.0, %v9358_v53  ;;  %v13363_v14 = vadd.f32 %v13359_v41, %v13232_v25  ;;  %v4740_v40 = vpop.f32.mrb[233].mxu0 }
 0xad9   :  { %15237 = vst [vmem:[#allocation41_spill] sm:$0xff] %v13357_v61  ;;  %v9360_v51 = vpop.eup %9359  ;;  %v5113_v58 = vadd.f32 %v4740_v40, %v15229_v47  ;;  %v13366_v63 = vpop.f32.mrb[234].mxu0 }
 0xada   :  { %15238 = vst [vmem:[#allocation46_spill] sm:$0xff] %v13363_v14  ;;  %9369 = vrcp.f32 %v5173_v1  ;;  %v5174_v27 = vadd.f32 1.0, %v9360_v51  ;;  %v13370_v8 = vadd.f32 %v13366_v63, %v13235_v49  ;;  %v4744_v33 = vpop.f32.mrb[235].mxu0 }
 0xadb   :  { %v7638_v11 = vmul.f32 -1.442695, %v5113_v58  ;;  %v5114_v53 = vadd.f32 %v4744_v33, %v15094_v57 }
 0xadc   :  { %v9362_v61 = vpop.eup %9361  ;;  %9371 = vrcp.f32 %v5174_v27 }
 0xadd   :  { %9373 = vpow2.f32 %v7638_v11  ;;  %v7639_v25 = vmul.f32 -1.442695, %v5114_v53  ;;  %v5235_v14 = vmul.f32 %v9362_v61, %v13296_v59 }
 0xade   :  { %v9364_v13 = vpop.eup %9363 }
 0xadf   :  { %v9366_v40 = vpop.eup %9365  ;;  %9375 = vpow2.f32 %v7639_v25  ;;  %v13374_v47 = vpop.f32.mrb[236].mxu0  ;;  %v5236_v1 = vmul.f32 %v9364_v13, %v13306_v55  ;;  %v13378_v49 = vadd.f32 %v5235_v14, %v13243_v50 }
 0xae0   :  { %v5175_v51 = vadd.f32 1.0, %v9366_v40  ;;  %v13382_v58 = vadd.f32 %v13374_v47, %v13245_v44  ;;  %v4750_v27 = vpop.f32.mrb[237].mxu0 }
 0xae1   :  { %v9368_v33 = vpop.eup %9367  ;;  %v5115_v11 = vadd.f32 %v4750_v27, %v15127_v4  ;;  %v13385_v59 = vpop.f32.mrb[238].mxu0  ;;  %v13388_v61 = vadd.f32 %v5236_v1, %v13248_v24 }
 0xae2   :  { %9377 = vrcp.f32 %v5175_v51  ;;  %v5176_v53 = vadd.f32 1.0, %v9368_v33  ;;  %v13392_v13 = vadd.f32 %v13385_v59, %v13251_v9  ;;  %v4754_v50 = vpop.f32.mrb[239].mxu0 }
 0xae3   :  { %v7640_v55 = vmul.f32 -1.442695, %v5115_v11  ;;  %v5116_v44 = vadd.f32 %v4754_v50, %v15232_v46 }
 0xae4   :  { %v9370_v14 = vpop.eup %9369  ;;  %9379 = vrcp.f32 %v5176_v53 }
 0xae5   :  { %v5237_v25 = vmul.f32 %v9370_v14, %v13316_v23  ;;  %9381 = vpow2.f32 %v7640_v55  ;;  %v7641_v40 = vmul.f32 -1.442695, %v5116_v44 }
 0xae6   :  { %v9372_v27 = vpop.eup %9371 }
 0xae7   :  { %v9374_v4 = vpop.eup %9373  ;;  %v13397_v24 = vadd.f32 %v5237_v25, %v13258_v10  ;;  %v5238_v1 = vmul.f32 %v9372_v27, %v13326_v12  ;;  %9383 = vpow2.f32 %v7641_v40  ;;  %v13400_v9 = vpop.f32.mrb[240].mxu0 }
 0xae8   :  { %v5177_v51 = vadd.f32 1.0, %v9374_v4  ;;  %v13404_v33 = vadd.f32 %v13400_v9, %v13263_v45  ;;  %v4760_v11 = vpop.f32.mrb[241].mxu0 }
 0xae9   :  { %v9376_v53 = vpop.eup %9375  ;;  %v13407_v23 = vadd.f32 %v5238_v1, %v13261_v54  ;;  %v5117_v50 = vadd.f32 %v4760_v11, %v15101_v28  ;;  %v13410_v55 = vpop.f32.mrb[242].mxu0 }
 0xaea   :  { %9385 = vrcp.f32 %v5177_v51  ;;  %v5178_v10 = vadd.f32 1.0, %v9376_v53  ;;  %v13414_v12 = vadd.f32 %v13410_v55, %v13266_v52  ;;  %v4764_v4 = vpop.f32.mrb[243].mxu0 }
 0xaeb   :  { %v7642_v44 = vmul.f32 -1.442695, %v5117_v50  ;;  %v5118_v45 = vadd.f32 %v4764_v4, %v15102_v6 }
 0xaec   :  { %v9378_v14 = vpop.eup %9377  ;;  %9387 = vrcp.f32 %v5178_v10 }
 0xaed   :  { %9389 = vpow2.f32 %v7642_v44  ;;  %v7643_v25 = vmul.f32 -1.442695, %v5118_v45  ;;  %v5239_v54 = vmul.f32 %v9378_v14, %v13336_v19 }
 0xaee   :  { %v9380_v40 = vpop.eup %9379 }
 0xaef   :  { %v9382_v27 = vpop.eup %9381  ;;  %9391 = vpow2.f32 %v7643_v25  ;;  %v13418_v1 = vpop.f32.mrb[244].mxu0  ;;  %v5240_v51 = vmul.f32 %v9380_v40, %v13346_v3  ;;  %v13422_v52 = vadd.f32 %v5239_v54, %v13270_v34 }
 0xaf0   :  { %v5179_v11 = vadd.f32 1.0, %v9382_v27  ;;  %v13426_v53 = vadd.f32 %v13418_v1, %v13272_v26  ;;  %v4770_v50 = vpop.f32.mrb[245].mxu0 }
 0xaf1   :  { %v9384_v10 = vpop.eup %9383  ;;  %v5119_v4 = vadd.f32 %v4770_v50, %v15234_v56  ;;  %v13429_v19 = vpop.f32.mrb[246].mxu0  ;;  %v13432_v44 = vadd.f32 %v5240_v51, %v13275_v21 }
 0xaf2   :  { %9393 = vrcp.f32 %v5179_v11  ;;  %v5180_v45 = vadd.f32 1.0, %v9384_v10  ;;  %v13436_v34 = vadd.f32 %v13429_v19, %v13278_v60  ;;  %v4774_v3 = vpop.f32.mrb[247].mxu0 }
 0xaf3   :  { %v7644_v14 = vmul.f32 -1.442695, %v5119_v4  ;;  %v5120_v26 = vadd.f32 %v4774_v3, %v15104_v18 }
 0xaf4   :  { %v9386_v25 = vpop.eup %9385  ;;  %9395 = vrcp.f32 %v5180_v45 }
 0xaf5   :  { %9397 = vpow2.f32 %v7644_v14  ;;  %v7645_v54 = vmul.f32 -1.442695, %v5120_v26  ;;  %v5241_v40 = vmul.f32 %v9386_v25, %v13359_v41 }
 0xaf6   :  { %v9388_v27 = vpop.eup %9387 }
 0xaf7   :  { %v9390_v50 = vpop.eup %9389  ;;  %9399 = vpow2.f32 %v7645_v54  ;;  %v13440_v21 = vpop.f32.mrb[248].mxu0  ;;  %v5242_v51 = vmul.f32 %v9388_v27, %v13366_v63  ;;  %v13444_v60 = vadd.f32 %v5241_v40, %v13282_v36 }
 0xaf8   :  { %v5181_v11 = vadd.f32 1.0, %v9390_v50  ;;  %v13448_v10 = vadd.f32 %v13440_v21, %v13284_v43  ;;  %v4780_v4 = vpop.f32.mrb[249].mxu0 }
 0xaf9   :  { %v9392_v45 = vpop.eup %9391  ;;  %v5121_v3 = vadd.f32 %v4780_v4, %v15105_v32  ;;  %v13451_v41 = vpop.f32.mrb[250].mxu0  ;;  %v13454_v14 = vadd.f32 %v5242_v51, %v13287_v5 }
 0xafa   :  { %9401 = vrcp.f32 %v5181_v11  ;;  %v5182_v26 = vadd.f32 1.0, %v9392_v45  ;;  %v13458_v36 = vadd.f32 %v13451_v41, %v13290_v30  ;;  %v4784_v63 = vpop.f32.mrb[251].mxu0 }
 0xafb   :  { %v7646_v25 = vmul.f32 -1.442695, %v5121_v3  ;;  %v5122_v43 = vadd.f32 %v4784_v63, %v15106_v29 }
 0xafc   :  { %v9394_v54 = vpop.eup %9393  ;;  %9403 = vrcp.f32 %v5182_v26 }
 0xafd   :  { %9405 = vpow2.f32 %v7646_v25  ;;  %v7647_v40 = vmul.f32 -1.442695, %v5122_v43  ;;  %v5243_v27 = vmul.f32 %v9394_v54, %v13374_v47 }
 0xafe   :  { %v9396_v50 = vpop.eup %9395 }
 0xaff   :  { %v9398_v4 = vpop.eup %9397  ;;  %9407 = vpow2.f32 %v7647_v40  ;;  %v13462_v5 = vpop.f32.mrb[252].mxu0  ;;  %v5244_v51 = vmul.f32 %v9396_v50, %v13385_v59  ;;  %v13466_v30 = vadd.f32 %v5243_v27, %v13294_v31 }
 0xb00   :  { %v5183_v11 = vadd.f32 1.0, %v9398_v4  ;;  %v13470_v45 = vadd.f32 %v13303_v7, %v13462_v5  ;;  %v4790_v3 = vpop.f32.mrb[253].mxu0 }
 0xb01   :  { %v9400_v26 = vpop.eup %9399  ;;  %v5267_v63 = vadd.f32 %v4790_v3, %v15081_v22  ;;  %v13473_v47 = vpop.f32.mrb[254].mxu0  ;;  %v13476_v25 = vadd.f32 %v5244_v51, %v13299_v62 }
 0xb02   :  { %9409 = vrcp.f32 %v5183_v11  ;;  %v5184_v43 = vadd.f32 1.0, %v9400_v26  ;;  %v13480_v31 = vadd.f32 %v13310_v0, %v13473_v47  ;;  %v4794_v59 = vpop.f32.mrb[255].mxu0 }
 0xb03   :  { %v7648_v54 = vmul.f32 -1.442695, %v5267_v63  ;;  %v5268_v7 = vadd.f32 %v4794_v59, %v15082_v42 }
 0xb04   :  { %v9402_v40 = vpop.eup %9401  ;;  %9411 = vrcp.f32 %v5184_v43 }
 0xb05   :  { %9413 = vpow2.f32 %v7648_v54  ;;  %v7649_v27 = vmul.f32 -1.442695, %v5268_v7  ;;  %v5245_v50 = vmul.f32 %v9402_v40, %v13400_v9 }
 0xb06   :  { %v9404_v4 = vpop.eup %9403 }
 0xb07   :  { %v9406_v3 = vpop.eup %9405  ;;  %9415 = vpow2.f32 %v7649_v27  ;;  %v13484_v62 = vpop.f32.mrb[0].mxu0  ;;  %v5246_v51 = vmul.f32 %v9404_v4, %v13410_v55  ;;  %v13488_v0 = vadd.f32 %v5245_v50, %v13314_v38 }
 0xb08   :  { %v5185_v11 = vadd.f32 1.0, %v9406_v3  ;;  %v13492_v26 = vadd.f32 %v13323_v20, %v13484_v62  ;;  %v4800_v63 = vpop.f32.mrb[1].mxu0  ;;  %v13506_v3 = vld [vmem:[#allocation8 + $0x30] sm:$0xff] }
 0xb09   :  { %v9408_v43 = vpop.eup %9407  ;;  %v5269_v59 = vadd.f32 %v4800_v63, %v15221_v48  ;;  %v13495_v9 = vpop.f32.mrb[2].mxu0  ;;  %v13498_v54 = vadd.f32 %v5246_v51, %v13319_v2  ;;  %6064 = vperm.xlu1 %8474, %v13506_v3  }
 0xb0a   :  { %9417 = vrcp.f32 %v5185_v11  ;;  %v5186_v7 = vadd.f32 1.0, %v9408_v43  ;;  %v13502_v38 = vadd.f32 %v13330_v35, %v13495_v9  ;;  %v4804_v55 = vpop.f32.mrb[3].mxu0 }
 0xb0b   :  { %v7650_v40 = vmul.f32 -1.442695, %v5269_v59  ;;  %v5270_v20 = vadd.f32 %v4804_v55, %v15222_v39 }
 0xb0c   :  { %v9410_v27 = vpop.eup %9409  ;;  %9419 = vrcp.f32 %v5186_v7 }
 0xb0d   :  { %9421 = vpow2.f32 %v7650_v40  ;;  %v7651_v50 = vmul.f32 -1.442695, %v5270_v20  ;;  %v5247_v4 = vmul.f32 %v9410_v27, %v13418_v1  ;;  %v15240_v20 = vld [vmem:[#allocation101_spill] sm:$0xff] }
 0xb0e   :  { %v9412_v2 = vpop.eup %9411 }
 0xb0f   :  { %v9414_v51 = vpop.eup %9413  ;;  %9423 = vpow2.f32 %v7651_v50  ;;  %v13509_v11 = vpop.f32.mrb[4].mxu0  ;;  %v5248_v35 = vmul.f32 %v9412_v2, %v13429_v19  ;;  %v13513_v63 = vadd.f32 %v5247_v4, %v13334_v17  ;;  %v13529_v4 = vld [vmem:[#allocation8 + $0x38] sm:$0xff]  ;;  %v15243_v2 = vld [vmem:[#allocation45_spill] sm:$0xff] }
 0xb10   :  { %v5331_v43 = vadd.f32 1.0, %v9414_v51  ;;  %v13517_v59 = vadd.f32 %v13343_v37, %v13509_v11  ;;  %v4810_v1 = vpop.f32.mrb[5].mxu0  ;;  %6067 = vperm.xlu1 %8474, %v13529_v4  }
 0xb11   :  { %v9416_v7 = vpop.eup %9415  ;;  %v5271_v55 = vadd.f32 %v4810_v1, %v15225_v15  ;;  %v13520_v40 = vpop.f32.mrb[6].mxu0  ;;  %v13523_v27 = vadd.f32 %v5248_v35, %v15240_v20 }
 0xb12   :  { %15239 = vst [vmem:[#allocation48_spill] sm:$0xff] %v13517_v59  ;;  %9425 = vrcp.f32 %v5331_v43  ;;  %v5332_v50 = vadd.f32 1.0, %v9416_v7  ;;  %v13527_v17 = vadd.f32 %v13350_v16, %v13520_v40  ;;  %v4814_v19 = vpop.f32.mrb[7].mxu0  ;;  %v15244_v7 = vmov 1   ;;  %v15245_v16 = vld [vmem:[#allocation39_spill] sm:$0xff] }
 0xb13   :  { %15241 = vst [vmem:[#allocation50_spill] sm:$0xff] %v13523_v27  ;;  %v7652_v37 = vmul.f32 -1.442695, %v5271_v55  ;;  %v5272_v51 = vadd.f32 %v4814_v19, %v15243_v2  ;;  %v15250_v2 = vld [vmem:[#allocation42_spill] sm:$0xff] }
 0xb14   :  { %15242 = vst [vmem:[#allocation84_spill] sm:$0xff] %v13527_v17  ;;  %v9418_v1 = vpop.eup %9417  ;;  %9427 = vrcp.f32 %v5332_v50  ;;  %8475 = vset.pattern.permute.xlu1 %v15244_v7  ;;  %v15247_v50 = vld [vmem:[#allocation46_spill] sm:$0xff] }
 0xb15   :  { %v5249_v15 = vmul.f32 %v9418_v1, %v13440_v21  ;;  %9429 = vpow2.f32 %v7652_v37  ;;  %v7653_v35 = vmul.f32 -1.442695, %v5272_v51  ;;  %6179 = vperm.xlu1 %8475, %v13529_v4   ;;  %v15249_v51 = vld [vmem:[#allocation41_spill] sm:$0xff] }
 0xb16   :  { %v9420_v43 = vpop.eup %9419 }
 0xb17   :  { %v9422_v20 = vpop.eup %9421  ;;  %v13536_v17 = vadd.f32 %v5249_v15, %v15245_v16  ;;  %v5250_v27 = vmul.f32 %v9420_v43, %v13451_v41  ;;  %9431 = vpow2.f32 %v7653_v35  ;;  %v13539_v59 = vpop.f32.mrb[8].mxu0 }
 0xb18   :  { %v5333_v55 = vadd.f32 1.0, %v9422_v20  ;;  %v13544_v21 = vadd.f32 %v15247_v50, %v13539_v59  ;;  %v4820_v19 = vpop.f32.mrb[9].mxu0 }
 0xb19   :  { %15246 = vst [vmem:[#allocation86_spill] sm:$0xff] %v13536_v17  ;;  %v9424_v37 = vpop.eup %9423  ;;  %v13547_v1 = vadd.f32 %v5250_v27, %v15249_v51  ;;  %v5273_v15 = vadd.f32 %v4820_v19, %v15250_v2  ;;  %v13550_v16 = vpop.f32.mrb[10].mxu0  ;;  %v9676_v27 = vld [vmem:[#allocation8 + $0x28] sm:$0xff] }
 0xb1a   :  { %15248 = vst [vmem:[#allocation91_spill] sm:$0xff] %v13544_v21  ;;  %9433 = vrcp.f32 %v5333_v55  ;;  %v5334_v41 = vadd.f32 1.0, %v9424_v37  ;;  %v13554_v35 = vadd.f32 %v13370_v8, %v13550_v16  ;;  %v4824_v43 = vpop.f32.mrb[11].mxu0  ;;  %v15251_v21 = vmov 2  }
 0xb1b   :  { %v7654_v20 = vmul.f32 -1.442695, %v5273_v15  ;;  %v5274_v50 = vadd.f32 %v4824_v43, %v15094_v57  ;;  %8476 = vset.pattern.permute.xlu1 %v15251_v21  ;;  %v13565_v43 = vld [vmem:[#allocation8 + $0x60] sm:$0xff] }
 0xb1c   :  { %v9426_v17 = vpop.eup %9425  ;;  %9435 = vrcp.f32 %v5334_v41  ;;  %6285 = vperm.xlu1 %8476, %v9676_v27   ;;  %6082 = vperm.xlu0 %8485, %v13565_v43  }
 0xb1d   :  { %9437 = vpow2.f32 %v7654_v20  ;;  %v7655_v19 = vmul.f32 -1.442695, %v5274_v50  ;;  %v5395_v51 = vmul.f32 %v9426_v17, %v13462_v5  ;;  %v15254_v17 = vld [vmem:[#allocation47_spill] sm:$0xff] }
 0xb1e   :  { %v9428_v55 = vpop.eup %9427 }
 0xb1f   :  { %v9430_v37 = vpop.eup %9429  ;;  %9439 = vpow2.f32 %v7655_v19  ;;  %v13559_v2 = vpop.f32.mrb[12].mxu0  ;;  %v5396_v8 = vmul.f32 %v9428_v55, %v13473_v47  ;;  %v13563_v15 = vadd.f32 %v5395_v51, %v13378_v49 }
 0xb20   :  { %v5335_v57 = vadd.f32 1.0, %v9430_v37  ;;  %v13569_v41 = vadd.f32 %v13382_v58, %v13559_v2  ;;  %v4830_v20 = vpop.f32.mrb[13].mxu0  ;;  %6288 = vperm.xlu1 %8476, %v13506_v3   ;;  %8486 = vset.pattern.permute.xlu0 %v15244_v7 }
 0xb21   :  { %15252 = vst [vmem:[#allocation89_spill] sm:$0xff] %v13563_v15  ;;  %v9432_v5 = vpop.eup %9431  ;;  %v5275_v50 = vadd.f32 %v4830_v20, %v15254_v17  ;;  %v13574_v19 = vpop.f32.mrb[14].mxu0  ;;  %v13577_v49 = vadd.f32 %v5396_v8, %v13388_v61  ;;  %v15255_v15 = vmov 3   ;;  %6173 = vperm.xlu0 %8486, %v9676_v27  }
 0xb22   :  { %15253 = vst [vmem:[#allocation94_spill] sm:$0xff] %v13569_v41  ;;  %9441 = vrcp.f32 %v5335_v57  ;;  %v5336_v47 = vadd.f32 1.0, %v9432_v5  ;;  %v13581_v51 = vadd.f32 %v13392_v13, %v13574_v19  ;;  %v4834_v58 = vpop.f32.mrb[15].mxu0  ;;  %v9677_v57 = vld [vmem:[#allocation8 + $0x20] sm:$0xff] }
 0xb23   :  { %v7656_v55 = vmul.f32 -1.442695, %v5275_v50  ;;  %v5276_v37 = vadd.f32 %v4834_v58, %v15232_v46 }
 0xb24   :  { %v9434_v41 = vpop.eup %9433  ;;  %9443 = vrcp.f32 %v5336_v47  ;;  %8477 = vset.pattern.permute.xlu1 %v15255_v15 }
 0xb25   :  { %v5397_v20 = vmul.f32 %v9434_v41, %v13484_v62  ;;  %9445 = vpow2.f32 %v7656_v55  ;;  %v7657_v61 = vmul.f32 -1.442695, %v5276_v37  ;;  %6394 = vperm.xlu1 %8477, %v9677_v57   ;;  %6176 = vperm.xlu0 %8486, %v13506_v3  }
 0xb26   :  { %v9436_v8 = vpop.eup %9435 }
 0xb27   :  { %v9438_v13 = vpop.eup %9437  ;;  %v5398_v5 = vmul.f32 %v9436_v8, %v13495_v9  ;;  %9447 = vpow2.f32 %v7657_v61  ;;  %v13588_v50 = vpop.f32.mrb[16].mxu0  ;;  %v13591_v47 = vadd.f32 %v5397_v20, %v13397_v24 }
 0xb28   :  { %v5337_v58 = vadd.f32 1.0, %v9438_v13  ;;  %v13595_v46 = vadd.f32 %v13404_v33, %v13588_v50  ;;  %v4840_v62 = vpop.f32.mrb[17].mxu0  ;;  %v13612_v13 = vld [vmem:[#allocation8 + $0x48] sm:$0xff] }
 0xb29   :  { %v9440_v41 = vpop.eup %9439  ;;  %v5277_v55 = vadd.f32 %v4840_v62, %v15101_v28  ;;  %v13598_v27 = vpop.f32.mrb[18].mxu0  ;;  %v13601_v37 = vadd.f32 %v5398_v5, %v13407_v23  ;;  %6400 = vperm.xlu1 %8477, %v13506_v3   ;;  %6185 = vperm.xlu0 %8486, %v13612_v13  }
 0xb2a   :  { %9449 = vrcp.f32 %v5337_v58  ;;  %v5338_v24 = vadd.f32 1.0, %v9440_v41  ;;  %v13607_v9 = vadd.f32 %v13414_v12, %v13598_v27  ;;  %v4844_v33 = vpop.f32.mrb[19].mxu0 }
 0xb2b   :  { %v7658_v20 = vmul.f32 -1.442695, %v5277_v55  ;;  %v5278_v61 = vadd.f32 %v4844_v33, %v15102_v6  ;;  %v13625_v55 = vld [vmem:[#allocation8 + $0x50] sm:$0xff] }
 0xb2c   :  { %v9442_v57 = vpop.eup %9441  ;;  %9451 = vrcp.f32 %v5338_v24 }
 0xb2d   :  { %9453 = vpow2.f32 %v7658_v20  ;;  %v7659_v8 = vmul.f32 -1.442695, %v5278_v61  ;;  %v5399_v23 = vmul.f32 %v9442_v57, %v13509_v11  ;;  %6403 = vperm.xlu1 %8477, %v13529_v4   ;;  %6188 = vperm.xlu0 %8486, %v13625_v55  }
 0xb2e   :  { %v9444_v3 = vpop.eup %9443 }
 0xb2f   :  { %v9446_v5 = vpop.eup %9445  ;;  %9455 = vpow2.f32 %v7659_v8  ;;  %v13615_v12 = vpop.f32.mrb[20].mxu0  ;;  %v5400_v58 = vmul.f32 %v9444_v3, %v13520_v40  ;;  %v13619_v62 = vadd.f32 %v5399_v23, %v13422_v52  ;;  %v15256_v40 = vmov 0  }
 0xb30   :  { %v5339_v41 = vadd.f32 1.0, %v9446_v5  ;;  %v13623_v11 = vadd.f32 %v13426_v53, %v13615_v12  ;;  %v4850_v4 = vpop.f32.mrb[21].mxu0 }
 0xb31   :  { %v9448_v24 = vpop.eup %9447  ;;  %v5279_v33 = vadd.f32 %v4850_v4, %v15234_v56  ;;  %v13628_v20 = vpop.f32.mrb[22].mxu0  ;;  %v13631_v61 = vadd.f32 %v5400_v58, %v13432_v44  ;;  %8478 = vset.pattern.permute.xlu1 %v15256_v40  ;;  %v13641_v44 = vld [vmem:[#allocation8 + $0x68] sm:$0xff] }
 0xb32   :  { %9457 = vrcp.f32 %v5339_v41  ;;  %v5340_v52 = vadd.f32 1.0, %v9448_v24  ;;  %v13637_v53 = vadd.f32 %v13436_v34, %v13628_v20  ;;  %v4854_v57 = vpop.f32.mrb[23].mxu0  ;;  %6073 = vperm.xlu1 %8478, %v13612_v13   ;;  %6197 = vperm.xlu0 %8486, %v13641_v44  }
 0xb33   :  { %v7660_v8 = vmul.f32 -1.442695, %v5279_v33  ;;  %v5280_v23 = vadd.f32 %v4854_v57, %v15104_v18 }
 0xb34   :  { %v9450_v3 = vpop.eup %9449  ;;  %9459 = vrcp.f32 %v5340_v52  ;;  %v13652_v52 = vld [vmem:[#allocation8 + $0x40] sm:$0xff] }
 0xb35   :  { %9461 = vpow2.f32 %v7660_v8  ;;  %v7661_v5 = vmul.f32 -1.442695, %v5280_v23  ;;  %v5401_v58 = vmul.f32 %v9450_v3, %v13539_v59  ;;  %v13659_v23 = vld [vmem:[#allocation8 + $0x70] sm:$0xff] }
 0xb36   :  { %v9452_v41 = vpop.eup %9451  ;;  %8479 = vset.pattern.permute.xlu1 %v15244_v7  ;;  %6200 = vperm.xlu0 %8486, %v13659_v23  }
 0xb37   :  { %v9454_v34 = vpop.eup %9453  ;;  %9463 = vpow2.f32 %v7661_v5  ;;  %v13646_v4 = vpop.f32.mrb[24].mxu0  ;;  %v5402_v24 = vmul.f32 %v9452_v41, %v13550_v16  ;;  %v13650_v33 = vadd.f32 %v5401_v58, %v13444_v60  ;;  %6182 = vperm.xlu1 %8479, %v13652_v52  }
 0xb38   :  { %v5341_v57 = vadd.f32 1.0, %v9454_v34  ;;  %v13657_v59 = vadd.f32 %v13448_v10, %v13646_v4  ;;  %v4860_v8 = vpop.f32.mrb[25].mxu0 }
 0xb39   :  { %v9456_v3 = vpop.eup %9455  ;;  %v5281_v5 = vadd.f32 %v4860_v8, %v15105_v32  ;;  %v13662_v18 = vpop.f32.mrb[26].mxu0  ;;  %v13665_v60 = vadd.f32 %v5402_v24, %v13454_v14 }
 0xb3a   :  { %9465 = vrcp.f32 %v5341_v57  ;;  %v5342_v16 = vadd.f32 1.0, %v9456_v3  ;;  %v13670_v58 = vadd.f32 %v13458_v36, %v13662_v18  ;;  %v4864_v10 = vpop.f32.mrb[27].mxu0  ;;  %8491 = vset.pattern.permute.xlu0 %v15251_v21 }
 0xb3b   :  { %v7662_v41 = vmul.f32 -1.442695, %v5281_v5  ;;  %v5282_v34 = vadd.f32 %v4864_v10, %v15106_v29  ;;  %8480 = vset.pattern.permute.xlu1 %v15256_v40  ;;  %6306 = vperm.xlu0 %8491, %v13565_v43  }
 0xb3c   :  { %v9458_v8 = vpop.eup %9457  ;;  %9467 = vrcp.f32 %v5342_v16  ;;  %6076 = vperm.xlu1 %8480, %v13625_v55  }
 0xb3d   :  { %9469 = vpow2.f32 %v7662_v41  ;;  %v7663_v14 = vmul.f32 -1.442695, %v5282_v34  ;;  %v5403_v24 = vmul.f32 %v9458_v8, %v13559_v2  ;;  %v13688_v34 = vld [vmem:[#allocation8 + $0x58] sm:$0xff] }
 0xb3e   :  { %v9460_v57 = vpop.eup %9459 }
 0xb3f   :  { %v9462_v36 = vpop.eup %9461  ;;  %9471 = vpow2.f32 %v7663_v14  ;;  %v13678_v3 = vpop.f32.mrb[28].mxu0  ;;  %v5404_v5 = vmul.f32 %v9460_v57, %v13574_v19  ;;  %v13682_v10 = vadd.f32 %v5403_v24, %v13466_v30  ;;  %v13697_v30 = vld [vmem:[#allocation8 + $0x78] sm:$0xff] }
 0xb40   :  { %v5343_v16 = vadd.f32 1.0, %v9462_v36  ;;  %v13686_v41 = vadd.f32 %v13470_v45, %v13678_v3  ;;  %v4870_v2 = vpop.f32.mrb[29].mxu0  ;;  %6079 = vperm.xlu1 %8480, %v13688_v34   ;;  %6315 = vperm.xlu0 %8491, %v13697_v30  }
 0xb41   :  { %15257 = vst [vmem:[#allocation96_spill] sm:$0xff] %v13682_v10  ;;  %v9464_v8 = vpop.eup %9463  ;;  %v5427_v14 = vadd.f32 %v4870_v2, %v15081_v22  ;;  %v13692_v29 = vpop.f32.mrb[30].mxu0  ;;  %v13695_v19 = vadd.f32 %v5404_v5, %v13476_v25 }
 0xb42   :  { %15258 = vst [vmem:[#allocation99_spill] sm:$0xff] %v13686_v41  ;;  %9473 = vrcp.f32 %v5343_v16  ;;  %v5344_v24 = vadd.f32 1.0, %v9464_v8  ;;  %v13701_v45 = vadd.f32 %v13480_v31, %v13692_v29  ;;  %v4874_v57 = vpop.f32.mrb[31].mxu0 }
 0xb43   :  { %v7664_v36 = vmul.f32 -1.442695, %v5427_v14  ;;  %v5428_v10 = vadd.f32 %v4874_v57, %v15082_v42 }
 0xb44   :  { %15259 = vst [vmem:[#allocation56_spill] sm:$0xff] %v13701_v45  ;;  %v9466_v22 = vpop.eup %9465  ;;  %9475 = vrcp.f32 %v5344_v24  ;;  %v5587_v25 = vpack.c.bf16 %v13701_v45, %v13686_v41  ;;  %8481 = vset.pattern.permute.xlu1 %v15244_v7  ;;  %8494 = vset.pattern.permute.xlu0 %v15255_v15  ;;  %v15267_v45 = vld [vmem:[#allocation45_spill] sm:$0xff] }
 0xb45   :  { %9477 = vpow2.f32 %v7664_v36  ;;  %v7665_v5 = vmul.f32 -1.442695, %v5428_v10  ;;  %v5405_v16 = vmul.f32 %v9466_v22, %v13588_v50  ;;  %6191 = vperm.xlu1 %8481, %v13688_v34   ;;  %6421 = vperm.xlu0 %8494, %v13641_v44  }
 0xb46   :  { %v9468_v31 = vpop.eup %9467  ;;  %8310 = vmatprep.mubr.bf16.mxu1 %v5587_v25 }
 0xb47   :  { %v9470_v2 = vpop.eup %9469  ;;  %9479 = vpow2.f32 %v7665_v5  ;;  %v13711_v42 = vpop.f32.mrb[32].mxu0  ;;  %v5406_v8 = vmul.f32 %v9468_v31, %v13598_v27  ;;  %v13715_v14 = vadd.f32 %v5405_v16, %v13488_v0 }
 0xb48   :  { %v5345_v10 = vadd.f32 1.0, %v9470_v2  ;;  %v13720_v50 = vadd.f32 %v13492_v26, %v13711_v42  ;;  %v4880_v24 = vpop.f32.mrb[33].mxu0  ;;  %v13736_v31 = vpop.permute.xlu0 %6158 }
 0xb49   :  { %v9472_v57 = vpop.eup %9471  ;;  %v5429_v36 = vadd.f32 %v4880_v24, %v15221_v48  ;;  %v13723_v22 = vpop.f32.mrb[34].mxu0  ;;  %v13726_v25 = vadd.f32 %v5406_v8, %v13498_v54  ;;  %8482 = vset.pattern.permute.xlu1 %v15251_v21  ;;  %8495 = vset.pattern.permute.xlu0 %v15256_v40 }
 0xb4a   :  { %15260 = vst [vmem:[#allocation58_spill] sm:$0xff] %v13720_v50  ;;  %9481 = vrcp.f32 %v5345_v10  ;;  %v5346_v0 = vadd.f32 1.0, %v9472_v57  ;;  %v13731_v27 = vadd.f32 %v13502_v38, %v13723_v22  ;;  %v4884_v5 = vpop.f32.mrb[35].mxu0  ;;  %6297 = vperm.xlu1 %8482, %v13612_v13   ;;  %v9681_v10 = vld [vmem:[#allocation20] sm:$0xff]  }
 0xb4b   :  { %v7666_v26 = vmul.f32 -1.442695, %v5429_v36  ;;  %v5430_v16 = vadd.f32 %v4884_v5, %v15222_v39 }
 0xb4c   :  { %15261 = vst [vmem:[#allocation60_spill] sm:$0xff] %v13731_v27  ;;  %v9474_v48 = vpop.eup %9473  ;;  %9483 = vrcp.f32 %v5346_v0  ;;  %v5588_v54 = vpack.c.bf16 %v13731_v27, %v13720_v50  ;;  %v15262_v0 = vld [vmem:[#allocation48_spill] sm:$0xff]  ;;  %v15264_v27 = vld [vmem:[#allocation50_spill] sm:$0xff] }
 0xb4d   :  { %9485 = vpow2.f32 %v7666_v26  ;;  %v7667_v2 = vmul.f32 -1.442695, %v5430_v16  ;;  %v5407_v38 = vmul.f32 %v9474_v48, %v13615_v12  ;;  %v9682_v26 = vld [vmem:[#allocation20 + $0x8] sm:$0xff]   ;;  %v15263_v48 = vld [vmem:[#allocation43_spill] sm:$0xff] }
 0xb4e   :  { %v9476_v8 = vpop.eup %9475  ;;  %8311 = vmatmul.mubr.bf16.vlgmr.msra.gmra.mrb[228].mxu1 %v5588_v54  ;;  %6300 = vperm.xlu1 %8482, %v13625_v55  }
 0xb4f   :  { %v9478_v13 = vpop.eup %9477  ;;  %9487 = vpow2.f32 %v7667_v2  ;;  %v13742_v39 = vpop.f32.mrb[36].mxu0  ;;  %8327 = vmatpush3.bf16.msra.mxu1 %v9681_v10  ;;  %v5408_v24 = vmul.f32 %v9476_v8, %v13628_v20  ;;  %v13746_v57 = vadd.f32 %v5407_v38, %v13513_v63  ;;  %v15265_v38 = vld [vmem:[#allocation84_spill] sm:$0xff] }
 0xb50   :  { %v5491_v36 = vadd.f32 1.0, %v9478_v13  ;;  %v13750_v5 = vadd.f32 %v15262_v0, %v13742_v39  ;;  %v4890_v12 = vpop.f32.mrb[37].mxu0  ;;  %8328 = vmatprep.subr.bf16.mxu1 %v9682_v26  ;;  %v13758_v20 = vpop.permute.xlu0 %6270 }
 0xb51   :  { %v9480_v16 = vpop.eup %9479  ;;  %v5431_v54 = vadd.f32 %v4890_v12, %v15263_v48  ;;  %v13753_v2 = vpop.f32.mrb[38].mxu0  ;;  %v13756_v10 = vadd.f32 %v5408_v24, %v15264_v27  ;;  %v9683_v24 = vld [vmem:[#allocation20 + $0x10] sm:$0xff]  }
 0xb52   :  { %9489 = vrcp.f32 %v5491_v36  ;;  %v5492_v63 = vadd.f32 1.0, %v9480_v16  ;;  %v13762_v8 = vadd.f32 %v15265_v38, %v13753_v2  ;;  %v4894_v13 = vpop.f32.mrb[39].mxu0  ;;  %8484 = vset.pattern.permute.xlu1 %v15255_v15 }
 0xb53   :  { %v7668_v0 = vmul.f32 -1.442695, %v5431_v54  ;;  %v5432_v50 = vadd.f32 %v4894_v13, %v15267_v45  ;;  %8329 = vmatpush3.bf16.msra.mxu1 %v9682_v26  ;;  %6406 = vperm.xlu1 %8484, %v13652_v52   ;;  %v15268_v54 = vld [vmem:[#allocation86_spill] sm:$0xff] }
 0xb54   :  { %15266 = vst [vmem:[#allocation66_spill] sm:$0xff] %v13762_v8  ;;  %v9482_v12 = vpop.eup %9481  ;;  %9491 = vrcp.f32 %v5492_v63  ;;  %v5589_v27 = vpack.c.bf16 %v13762_v8, %v13750_v5  ;;  %8330 = vmatprep.subr.bf16.mxu1 %v9683_v24  ;;  %v13777_v26 = vpop.permute.xlu0 %6279 }
 0xb55   :  { %v5409_v36 = vmul.f32 %v9482_v12, %v13646_v4  ;;  %9493 = vpow2.f32 %v7668_v0  ;;  %v7669_v16 = vmul.f32 -1.442695, %v5432_v50  ;;  %v15269_v4 = vld [vmem:[#allocation91_spill] sm:$0xff] }
 0xb56   :  { %v9484_v48 = vpop.eup %9483  ;;  %8314 = vmatprep.mubr.bf16.mxu1 %v5589_v27  ;;  %v9684_v0 = vld [vmem:[#allocation20 + $0x18] sm:$0xff]  }
 0xb57   :  { %v9486_v38 = vpop.eup %9485  ;;  %v13771_v41 = vadd.f32 %v5409_v36, %v15268_v54  ;;  %v5410_v45 = vmul.f32 %v9484_v48, %v13662_v18  ;;  %9495 = vpow2.f32 %v7669_v16  ;;  %v13774_v52 = vpop.f32.mrb[40].mxu0  ;;  %8331 = vmatpush3.bf16.msra.mxu1 %v9683_v24  ;;  %6412 = vperm.xlu1 %8484, %v13625_v55   ;;  %v15270_v18 = vld [vmem:[#allocation42_spill] sm:$0xff]  ;;  %v15272_v54 = vld [vmem:[#allocation44_spill] sm:$0xff] }
 0xb58   :  { %v5493_v63 = vadd.f32 1.0, %v9486_v38  ;;  %v13781_v50 = vadd.f32 %v15269_v4, %v13774_v52  ;;  %v4900_v13 = vpop.f32.mrb[41].mxu0  ;;  %8332 = vmatprep.subr.bf16.mxu1 %v9684_v0 }
 0xb59   :  { %v9488_v12 = vpop.eup %9487  ;;  %v13784_v27 = vadd.f32 %v5410_v45, %v13547_v1  ;;  %v5433_v36 = vadd.f32 %v4900_v13, %v15270_v18  ;;  %v13787_v16 = vpop.f32.mrb[42].mxu0  ;;  %v9685_v45 = vld [vmem:[#allocation20 + $0x20] sm:$0xff]  }
 0xb5a   :  { %9497 = vrcp.f32 %v5493_v63  ;;  %v5494_v55 = vadd.f32 1.0, %v9488_v12  ;;  %v13791_v24 = vadd.f32 %v13554_v35, %v13787_v16  ;;  %v4904_v48 = vpop.f32.mrb[43].mxu0  ;;  %v13798_v12 = vpop.permute.xlu0 %6282 }
 0xb5b   :  { %v7670_v38 = vmul.f32 -1.442695, %v5433_v36  ;;  %v5434_v4 = vadd.f32 %v4904_v48, %v15272_v54  ;;  %8333 = vmatpush3.bf16.msra.mxu1 %v9684_v0  ;;  %6415 = vperm.xlu1 %8484, %v13688_v34   ;;  %v15273_v36 = vld [vmem:[#allocation89_spill] sm:$0xff] }
 0xb5c   :  { %15271 = vst [vmem:[#allocation72_spill] sm:$0xff] %v13791_v24  ;;  %v9490_v8 = vpop.eup %9489  ;;  %9499 = vrcp.f32 %v5494_v55  ;;  %v5590_v1 = vpack.c.bf16 %v13791_v24, %v13781_v50  ;;  %8334 = vmatprep.subr.bf16.mxu1 %v9685_v45  ;;  %v9686_v54 = vld [vmem:[#allocation20 + $0x28] sm:$0xff]  }
 0xb5d   :  { %9501 = vpow2.f32 %v7670_v38  ;;  %v7671_v63 = vmul.f32 -1.442695, %v5434_v4  ;;  %v5555_v13 = vmul.f32 %v9490_v8, %v13678_v3  ;;  %v15274_v38 = vld [vmem:[#allocation94_spill] sm:$0xff] }
 0xb5e   :  { %v9492_v35 = vpop.eup %9491  ;;  %8315 = vmatmul.mubr.bf16.gmra.mrb[232].mxu1 %v5590_v1 }
 0xb5f   :  { %v9494_v18 = vpop.eup %9493  ;;  %9503 = vpow2.f32 %v7671_v63  ;;  %v13800_v0 = vpop.f32.mrb[44].mxu0  ;;  %8335 = vmatpush3.bf16.msra.mxu1 %v9685_v45  ;;  %v5556_v34 = vmul.f32 %v9492_v35, %v13692_v29  ;;  %v13804_v55 = vadd.f32 %v5555_v13, %v15273_v36  ;;  %8487 = vset.pattern.permute.xlu1 %v15256_v40  ;;  %v15275_v36 = vld [vmem:[#allocation49_spill] sm:$0xff] }
 0xb60   :  { %v5495_v48 = vadd.f32 1.0, %v9494_v18  ;;  %v13809_v3 = vadd.f32 %v15274_v38, %v13800_v0  ;;  %v4910_v8 = vpop.f32.mrb[45].mxu0  ;;  %8336 = vmatprep.subr.bf16.mxu1 %v9686_v54  ;;  %6085 = vperm.xlu1 %8487, %v13641_v44  }
 0xb61   :  { %v9496_v4 = vpop.eup %9495  ;;  %v5435_v1 = vadd.f32 %v4910_v8, %v15254_v17  ;;  %v13813_v45 = vpop.f32.mrb[46].mxu0  ;;  %v13816_v29 = vadd.f32 %v5556_v34, %v13577_v49  ;;  %v9687_v34 = vld [vmem:[#allocation20 + $0x30] sm:$0xff]  }
 0xb62   :  { %9505 = vrcp.f32 %v5495_v48  ;;  %v5496_v63 = vadd.f32 1.0, %v9496_v4  ;;  %v13820_v13 = vadd.f32 %v13581_v51, %v13813_v45  ;;  %v4914_v35 = vpop.f32.mrb[47].mxu0  ;;  %v13825_v8 = vpop.permute.xlu0 %6291 }
 0xb63   :  { %v7672_v18 = vmul.f32 -1.442695, %v5435_v1  ;;  %v5436_v38 = vadd.f32 %v4914_v35, %v15275_v36  ;;  %8337 = vmatpush3.bf16.msra.mxu1 %v9686_v54 }
 0xb64   :  { %v9498_v17 = vpop.eup %9497  ;;  %9507 = vrcp.f32 %v5496_v63  ;;  %v5591_v49 = vpack.c.bf16 %v13820_v13, %v13809_v3  ;;  %8338 = vmatprep.subr.bf16.mxu1 %v9687_v34  ;;  %8488 = vset.pattern.permute.xlu1 %v15244_v7 }
 0xb65   :  { %v5557_v51 = vmul.f32 %v9498_v17, %v13711_v42  ;;  %9509 = vpow2.f32 %v7672_v18  ;;  %v7673_v48 = vmul.f32 -1.442695, %v5436_v38  ;;  %6194 = vperm.xlu1 %8488, %v13565_v43   ;;  %v9688_v38 = vld [vmem:[#allocation20 + $0x38] sm:$0xff]  }
 0xb66   :  { %v9500_v54 = vpop.eup %9499  ;;  %8318 = vmatprep.mubr.bf16.mxu1 %v5591_v49 }
 0xb67   :  { %v9502_v4 = vpop.eup %9501  ;;  %v5558_v1 = vmul.f32 %v9500_v54, %v13723_v22  ;;  %9511 = vpow2.f32 %v7673_v48  ;;  %v13833_v63 = vpop.f32.mrb[48].mxu0  ;;  %8339 = vmatpush3.bf16.msra.mxu1 %v9687_v34  ;;  %v13836_v35 = vadd.f32 %v5557_v51, %v13591_v47 }
 0xb68   :  { %v5497_v36 = vadd.f32 1.0, %v9502_v4  ;;  %v13840_v42 = vadd.f32 %v13595_v46, %v13833_v63  ;;  %v4920_v18 = vpop.f32.mrb[49].mxu0  ;;  %8340 = vmatprep.subr.bf16.mxu1 %v9688_v38  ;;  %v13849_v47 = vpop.permute.xlu0 %6294 }
 0xb69   :  { %v9504_v17 = vpop.eup %9503  ;;  %v5437_v49 = vadd.f32 %v4920_v18, %v15101_v28  ;;  %v13843_v24 = vpop.f32.mrb[50].mxu0  ;;  %v13846_v22 = vadd.f32 %v5558_v1, %v13601_v37  ;;  %8489 = vset.pattern.permute.xlu1 %v15256_v40 }
 0xb6a   :  { %9513 = vrcp.f32 %v5497_v36  ;;  %v5498_v34 = vadd.f32 1.0, %v9504_v17  ;;  %v13853_v46 = vadd.f32 %v13607_v9, %v13843_v24  ;;  %v4924_v51 = vpop.f32.mrb[51].mxu0  ;;  %6088 = vperm.xlu1 %8489, %v13659_v23  }
 0xb6b   :  { %v7674_v48 = vmul.f32 -1.442695, %v5437_v49  ;;  %v5438_v28 = vadd.f32 %v4924_v51, %v15102_v6  ;;  %8341 = vmatpush3.bf16.msra.mxu1 %v9688_v38  ;;  %v5805_v37 = vpack.c.bf16 %v13846_v22, %v13836_v35  ;;  %v15280_v35 = vld [vmem:[#allocation54_spill] sm:$0xff] }
 0xb6c   :  { %v9506_v54 = vpop.eup %9505  ;;  %9515 = vrcp.f32 %v5498_v34  ;;  %v5592_v4 = vpack.c.bf16 %v13853_v46, %v13840_v42  ;;  %v13869_v49 = vpop.permute.xlu0 %6303  ;;  %vm6205_vm10 = vcmp.eq.s32.totalorder %v15280_v35, %v13736_v31  ;;  %vm6317_vm3 = vcmp.eq.s32.totalorder %v15280_v35, %v13758_v20 }
 0xb6d   :  { %9517 = vpow2.f32 %v7674_v48  ;;  %v7675_v1 = vmul.f32 -1.442695, %v5438_v28  ;;  %v5559_v9 = vmul.f32 %v9506_v54, %v13742_v39  ;;  %vm6320_vm13 = vcmp.eq.s32.totalorder %v15280_v35, %v13777_v26 }
 0xb6e   :  { %v9508_v36 = vpop.eup %9507  ;;  %8319 = vmatmul.mubr.bf16.gmra.mrb[236].mxu1 %v5592_v4  ;;  %6091 = vperm.xlu1 %8489, %v13697_v30   ;;  %vm6321_vm2 = vcmp.eq.s32.totalorder %v15280_v35, %v13798_v12 }
 0xb6f   :  { %v9510_v18 = vpop.eup %9509  ;;  %9519 = vpow2.f32 %v7675_v1  ;;  %v13863_v6 = vpop.f32.mrb[52].mxu0  ;;  %v5560_v38 = vmul.f32 %v9508_v36, %v13753_v2  ;;  %v13867_v17 = vadd.f32 %v5559_v9, %v13619_v62  ;;  %v15276_v9 = vld [vmem:[#allocation53_spill] sm:$0xff] }
 0xb70   :  { %v5499_v34 = vadd.f32 1.0, %v9510_v18  ;;  %v13873_v51 = vadd.f32 %v13623_v11, %v13863_v6  ;;  %v4930_v39 = vpop.f32.mrb[53].mxu0 }
 0xb71   :  { %v9512_v48 = vpop.eup %9511  ;;  %v5439_v28 = vadd.f32 %v4930_v39, %v15234_v56  ;;  %v13876_v54 = vpop.f32.mrb[54].mxu0  ;;  %v13879_v4 = vadd.f32 %v5560_v38, %v13631_v61 }
 0xb72   :  { %9521 = vrcp.f32 %v5499_v34  ;;  %v5500_v2 = vadd.f32 1.0, %v9512_v48  ;;  %v13883_v62 = vadd.f32 %v13637_v53, %v13876_v54  ;;  %v4934_v1 = vpop.f32.mrb[55].mxu0  ;;  %8490 = vset.pattern.permute.xlu1 %v15244_v7  ;;  %v13893_v39 = vpop.permute.xlu0 %6385 }
 0xb73   :  { %v7676_v11 = vmul.f32 -1.442695, %v5439_v28  ;;  %v5440_v36 = vadd.f32 %v4934_v1, %v15276_v9  ;;  %v5806_v56 = vpack.c.bf16 %v13879_v4, %v13867_v17  ;;  %6203 = vperm.xlu1 %8490, %v13697_v30   ;;  %v15282_v17 = vld [vmem:[#allocation127_spill] sm:$0xff]  ;;  %vm6430_vm6 = vcmp.eq.s32.totalorder %v15280_v35, %v13893_v39 }
 0xb74   :  { %v9514_v18 = vpop.eup %9513  ;;  %9523 = vrcp.f32 %v5500_v2  ;;  %v5593_v61 = vpack.c.bf16 %v13883_v62, %v13873_v51  ;;  %vm6206_vm1 = vcmp.eq.s32.totalorder %v15280_v35, %v15282_v17 }
 0xb75   :  { %9525 = vpow2.f32 %v7676_v11  ;;  %v7677_v38 = vmul.f32 -1.442695, %v5440_v36  ;;  %v5561_v53 = vmul.f32 %v9514_v18, %v13774_v52 }
 0xb76   :  { %v9516_v34 = vpop.eup %9515  ;;  %8322 = vmatprep.mubr.bf16.mxu1 %v5593_v61 }
 0xb77   :  { %v9518_v7 = vpop.eup %9517  ;;  %9527 = vpow2.f32 %v7677_v38  ;;  %v13895_v48 = vpop.f32.mrb[56].mxu0  ;;  %v5562_v28 = vmul.f32 %v9516_v34, %v13787_v16  ;;  %v13899_v1 = vadd.f32 %v5561_v53, %v13650_v33  ;;  %8492 = vset.pattern.permute.xlu1 %v15251_v21  ;;  %v15277_v38 = vld [vmem:[#allocation52_spill] sm:$0xff] }
 0xb78   :  { %v5501_v2 = vadd.f32 1.0, %v9518_v7  ;;  %v13904_v11 = vadd.f32 %v13657_v59, %v13895_v48  ;;  %v4940_v52 = vpop.f32.mrb[57].mxu0  ;;  %6309 = vperm.xlu1 %8492, %v13641_v44  }
 0xb79   :  { %v9520_v9 = vpop.eup %9519  ;;  %v5441_v36 = vadd.f32 %v4940_v52, %v15105_v32  ;;  %v13908_v18 = vpop.f32.mrb[58].mxu0  ;;  %v13911_v16 = vadd.f32 %v5562_v28, %v13665_v60 }
 0xb7a   :  { %9529 = vrcp.f32 %v5501_v2  ;;  %v5502_v33 = vadd.f32 1.0, %v9520_v9  ;;  %v13915_v21 = vadd.f32 %v13670_v58, %v13908_v18  ;;  %v4944_v61 = vpop.f32.mrb[59].mxu0  ;;  %v13920_v32 = vpop.permute.xlu0 %6397  ;;  %v15279_v9 = vld [vmem:[#allocation96_spill] sm:$0xff] }
 0xb7b   :  { %v7678_v59 = vmul.f32 -1.442695, %v5441_v36  ;;  %v5442_v53 = vadd.f32 %v4944_v61, %v15277_v38  ;;  %v5807_v44 = vpack.c.bf16 %v13911_v16, %v13899_v1  ;;  %v15278_v1 = vpack.c.bf16 %v13816_v29, %v13804_v55 }
 0xb7c   :  { %v9522_v34 = vpop.eup %9521  ;;  %9531 = vrcp.f32 %v5502_v33  ;;  %v5594_v60 = vpack.c.bf16 %v13915_v21, %v13904_v11  ;;  %6312 = vperm.xlu1 %8492, %v13659_v23  }
 0xb7d   :  { %9533 = vpow2.f32 %v7678_v59  ;;  %v7679_v7 = vmul.f32 -1.442695, %v5442_v53  ;;  %v5563_v58 = vmul.f32 %v9522_v34, %v13800_v0  ;;  %v13936_v59 = vpop.permute.xlu1 %6382 }
 0xb7e   :  { %v9524_v28 = vpop.eup %9523  ;;  %8323 = vmatmul.mubr.bf16.gmra.mrb[240].mxu1 %v5594_v60  ;;  %v13934_v0 = vpop.permute.xlu0 %6409  ;;  %vm6429_vm5 = vcmp.eq.s32.totalorder %v15280_v35, %v13936_v59 }
 0xb7f   :  { %v9526_v2 = vpop.eup %9525  ;;  %9535 = vpow2.f32 %v7679_v7  ;;  %8342 = vmatprep.mubr.bf16.mxu1 %v15278_v1  ;;  %v5564_v52 = vmul.f32 %v9524_v28, %v13813_v45  ;;  %v5579_v36 = vadd.f32 %v5563_v58, %v15279_v9  ;;  %v15281_v58 = vld [vmem:[#allocation126_spill] sm:$0xff]  ;;  %v15285_v9 = vld [vmem:[#allocation129_spill] sm:$0xff] }
 0xb80   :  { %v5503_v16 = vadd.f32 1.0, %v9526_v2  ;;  %8493 = vset.pattern.permute.xlu1 %v15255_v15  ;;  %vm6094_vm7 = vcmp.eq.s32.totalorder %v15280_v35, %v15281_v58  ;;  %vm6318_vm15 = vcmp.eq.s32.totalorder %v15280_v35, %v15285_v9 }
 0xb81   :  { %v9528_v33 = vpop.eup %9527  ;;  %v5580_v61 = vadd.f32 %v5564_v52, %v13695_v19  ;;  %6418 = vperm.xlu1 %8493, %v13565_v43   ;;  %v13943_v15 = vpop.permute.xlu1 %6388  ;;  %v15284_v52 = vld [vmem:[#allocation128_spill] sm:$0xff] }
 0xb82   :  { %9537 = vrcp.f32 %v5503_v16  ;;  %v5504_v38 = vadd.f32 1.0, %v9528_v33  ;;  %v6047_v60 = vpop.permute.xlu0 %6046  ;;  %vm6208_vm12 = vcmp.eq.s32.totalorder %v15280_v35, %v15284_v52  ;;  %vm6431_vm14 = vcmp.eq.s32.totalorder %v15280_v35, %v13943_v15 }
 0xb83   :  { %v5808_v55 = vpack.c.bf16 %v5580_v61, %v5579_v36  ;;  %vm6093_vm9 = vcmp.eq.s32.totalorder %v15280_v35, %v6047_v60 }
 0xb84   :  { %v9530_v29 = vpop.eup %9529  ;;  %9539 = vrcp.f32 %v5504_v38 }
 0xb85   :  { %v5565_v45 = vmul.f32 %v9530_v29, %v13833_v63  ;;  %6424 = vperm.xlu1 %8493, %v13659_v23  }
 0xb86   :  { %v9532_v53 = vpop.eup %9531  ;;  %8343 = vmatmul.mubr.bf16.vlgmr.msra.gmra.mrb[244].mxu1 %v5805_v37  ;;  %v6392_v37 = vpop.permute.xlu1 %6391 }
 0xb87   :  { %v9534_v43 = vpop.eup %9533  ;;  %8346 = vmatprep.mubr.bf16.mxu1 %v5806_v56  ;;  %v5566_v19 = vmul.f32 %v9532_v53, %v13843_v24  ;;  %v5581_v34 = vadd.f32 %v5565_v45, %v13715_v14  ;;  %v6056_v38 = vpop.permute.xlu0 %6055  ;;  %vm6432_vm0 = vcmp.eq.s32.totalorder %v15280_v35, %v6392_v37 }
 0xb88   :  { %v5505_v63 = vadd.f32 1.0, %v9534_v43  ;;  %vm6096_vm11 = vcmp.eq.s32.totalorder %v15280_v35, %v6056_v38 }
 0xb89   :  { %v9536_v7 = vpop.eup %9535  ;;  %v5582_v23 = vadd.f32 %v5566_v19, %v13726_v25  ;;  %6427 = vperm.xlu1 %8493, %v13697_v30   ;;  %v15283_v25 = vmov 0.0  }
 0xb8a   :  { %9541 = vrcp.f32 %v5505_v63  ;;  %v5506_v22 = vadd.f32 1.0, %v9536_v7  ;;  %v7712_v4 = vsel %vm6205_vm10, 1.0, %v15283_v25  ;;  %v7697_v56 = vsel %vm6094_vm7, 1.0, %v15283_v25  ;;  %v13967_v1 = vpop.permute.xlu1 %6061 }
 0xb8b   :  { %v5809_v14 = vpack.c.bf16 %v5582_v23, %v5581_v34  ;;  %v7713_v28 = vsel %vm6206_vm1, 1.0, %v15283_v25  ;;  %v7696_v2 = vsel %vm6093_vm9, 1.0, %v15283_v25  ;;  %v7728_v16 = vsel %vm6317_vm3, 1.0, %v15283_v25 }
 0xb8c   :  { %v9538_v24 = vpop.eup %9537  ;;  %9543 = vrcp.f32 %v5506_v22  ;;  %v6253_v36 = vadd.f32 %v7712_v4, %v7696_v2  ;;  %v7715_v33 = vsel %vm6208_vm12, 1.0, %v15283_v25  ;;  %v7729_v61 = vsel %vm6318_vm15, 1.0, %v15283_v25 }
 0xb8d   :  { %v5567_v30 = vmul.f32 %v9538_v24, %v13863_v6  ;;  %8496 = vset.pattern.permute.xlu1 %v15256_v40  ;;  %v6254_v6 = vadd.f32 %v7713_v28, %v7697_v56  ;;  %v7745_v34 = vsel %vm6430_vm6, 1.0, %v15283_v25  ;;  %v7744_v39 = vsel %vm6429_vm5, 1.0, %v15283_v25  ;;  %v6059_v28 = vpop.permute.xlu0 %6058 }
 0xb8e   :  { %v9540_v31 = vpop.eup %9539  ;;  %8347 = vmatmul.mubr.bf16.gmra.mrb[248].mxu1 %v5807_v44  ;;  %v6171_v29 = vpop.permute.xlu1 %6170  ;;  %v6365_v45 = vadd.f32 %v7728_v16, %v6253_v36  ;;  %v7747_v7 = vsel %vm6432_vm0, 1.0, %v15283_v25  ;;  %vm6098_vm8 = vcmp.eq.s32.totalorder %v15280_v35, %v13967_v1  ;;  %vm6097_vm10 = vcmp.eq.s32.totalorder %v15280_v35, %v6059_v28 }
 0xb8f   :  { %8350 = vmatprep.mubr.bf16.mxu1 %v5808_v55  ;;  %v5568_v40 = vmul.f32 %v9540_v31, %v13876_v54  ;;  %v5583_v20 = vadd.f32 %v5567_v30, %v13746_v57  ;;  %v7699_v54 = vsel %vm6096_vm11, 1.0, %v15283_v25  ;;  %v6366_v55 = vadd.f32 %v7729_v61, %v6254_v6 }
 0xb90   :  { %v6256_v43 = vadd.f32 %v7715_v33, %v7699_v54  ;;  %v6477_v58 = vadd.f32 %v7744_v39, %v6365_v45  ;;  %vm6209_vm4 = vcmp.eq.s32.totalorder %v15280_v35, %v6171_v29  ;;  %v7701_v6 = vsel %vm6098_vm8, 1.0, %v15283_v25 }
 0xb91   :  { %v5584_v44 = vadd.f32 %v5568_v40, %v13756_v10  ;;  %v7731_v10 = vsel %vm6320_vm13, 1.0, %v15283_v25  ;;  %v6478_v22 = vadd.f32 %v7745_v34, %v6366_v55  ;;  %v6071_v52 = vpop.permute.xlu0 %6070  ;;  %v7732_v16 = vsel %vm6321_vm2, 1.0, %v15283_v25 }
 0xb92   :  { %v6065_v63 = vpop.permute.xlu1 %6064  ;;  %v6368_v23 = vadd.f32 %v7731_v10, %v6256_v43  ;;  %v7700_v33 = vsel %vm6097_vm10, 1.0, %v15283_v25  ;;  %vm6434_vm9 = vcmp.eq.s32.totalorder %v15280_v35, %v13920_v32  ;;  %vm6324_vm12 = vcmp.eq.s32.totalorder %v15280_v35, %v13825_v8 }
 0xb93   :  { %v5810_v57 = vpack.c.bf16 %v5584_v44, %v5583_v20  ;;  %v6493_v37 = vpack.c.bf16 %v6478_v22, %v6477_v58  ;;  %v7716_v20 = vsel %vm6209_vm4, 1.0, %v15283_v25  ;;  %vm6099_vm15 = vcmp.eq.s32.totalorder %v15280_v35, %v6065_v63 }
 0xb94   :  { %v9542_v26 = vpop.eup %9541  ;;  %v6257_v1 = vadd.f32 %v7716_v20, %v7700_v33  ;;  %v7735_v39 = vsel %vm6324_vm12, 1.0, %v15283_v25  ;;  %vm6101_vm8 = vcmp.eq.s32.totalorder %v15280_v35, %v6071_v52  ;;  %vm6325_vm4 = vcmp.eq.s32.totalorder %v15280_v35, %v13849_v47 }
 0xb95   :  { %v5569_v53 = vmul.f32 %v9542_v26, %v13895_v48  ;;  %v7746_v48 = vsel %vm6431_vm14, 1.0, %v15283_v25  ;;  %v7749_v26 = vsel %vm6434_vm9, 1.0, %v15283_v25 }
 0xb96   :  { %v9544_v19 = vpop.eup %9543  ;;  %8351 = vmatmul.mubr.bf16.gmra.mrb[252].mxu1 %v5809_v14  ;;  %v15286_v14 = vld [vmem:[#allocation130_spill] sm:$0xff]  ;;  %v6068_v4 = vpop.permute.xlu1 %6067  ;;  %v6369_v29 = vadd.f32 %v7732_v16, %v6257_v1 }
 0xb97   :  { %v5585_v59 = vadd.f32 %v5569_v53, %v13771_v41  ;;  %v5570_v60 = vmul.f32 %v9544_v19, %v13908_v18  ;;  %8354 = vmatprep.mubr.bf16.mxu1 %v5810_v57  ;;  %v14000_v41 = vadd.f32 %v7746_v48, %v15286_v14  ;;  %v14002_v18 = vadd.f32 %v7747_v7, %v6368_v23 }
 0xb98   :  { %vm6100_vm13 = vcmp.eq.s32.totalorder %v15280_v35, %v6068_v4  ;;  %v7702_v53 = vsel %vm6099_vm15, 1.0, %v15283_v25 }
 0xb99   :  { %v5586_v17 = vadd.f32 %v5570_v60, %v13784_v27  ;;  %v6494_v15 = vpack.c.bf16 %v14002_v18, %v14000_v41  ;;  %v7703_v43 = vsel %vm6100_vm13, 1.0, %v15283_v25 }
 0xb9a   :  { %v6180_v30 = vpop.permute.xlu1 %6179 }
 0xb9b   :  { %v5811_v24 = vpack.c.bf16 %v5586_v17, %v5585_v59  ;;  %v14006_v9 = vpop.permute.xlu0 %6082  ;;  %vm6212_vm6 = vcmp.eq.s32.totalorder %v15280_v35, %v6180_v30 }
 0xb9c   :  { %v7719_v19 = vsel %vm6212_vm6, 1.0, %v15283_v25  ;;  %vm6105_vm12 = vcmp.eq.s32.totalorder %v15280_v35, %v14006_v9 }
 0xb9d   :  { %v6260_v59 = vadd.f32 %v7719_v19, %v7703_v43  ;;  %v15287_v43 = vld [vmem:[#allocation131_spill] sm:$0xff] }
 0xb9e   :  { %8355 = vmatmul.mubr.bf16.gmra.mrb[0].mxu1 %v5811_v24  ;;  %v6286_v31 = vpop.permute.xlu1 %6285 }
 0xb9f   :  { %8374 = vmatprep.mubr.bf16.mxu1 %v6493_v37  ;;  %vm6322_vm7 = vcmp.eq.s32.totalorder %v15280_v35, %v6286_v31  ;;  %v6372_v23 = vadd.f32 %v7735_v39, %v6260_v59  ;;  %v15288_v39 = vld [vmem:[#allocation132_spill] sm:$0xff] }
 0xba0   :  { %v6174_v36 = vpop.permute.xlu0 %6173  ;;  %v7733_v12 = vsel %vm6322_vm7, 1.0, %v15283_v25  ;;  %vm6438_vm7 = vcmp.eq.s32.totalorder %v15280_v35, %v13934_v0 }
 0xba1   :  { %vm6210_vm1 = vcmp.eq.s32.totalorder %v15280_v35, %v6174_v36 }
 0xba2   :  { %v6289_v56 = vpop.permute.xlu1 %6288  ;;  %v7717_v61 = vsel %vm6210_vm1, 1.0, %v15283_v25 }
 0xba3   :  { %v6258_v38 = vadd.f32 %v7717_v61, %v7701_v6  ;;  %vm6323_vm11 = vcmp.eq.s32.totalorder %v15280_v35, %v6289_v56  ;;  %v7704_v56 = vsel %vm6101_vm8, 1.0, %v15283_v25  ;;  %vm6328_vm8 = vcmp.eq.s32.totalorder %v15280_v35, %v13869_v49 }
 0xba4   :  { %v6177_v34 = vpop.permute.xlu0 %6176  ;;  %v7734_v63 = vsel %vm6323_vm11, 1.0, %v15283_v25 }
 0xba5   :  { %v6370_v54 = vadd.f32 %v7733_v12, %v6258_v38  ;;  %vm6211_vm5 = vcmp.eq.s32.totalorder %v15280_v35, %v6177_v34 }
 0xba6   :  { %v6395_v2 = vpop.permute.xlu1 %6394  ;;  %v7718_v60 = vsel %vm6211_vm5, 1.0, %v15283_v25 }
 0xba7   :  { %vm6433_vm3 = vcmp.eq.s32.totalorder %v15280_v35, %v6395_v2  ;;  %v14033_v45 = vadd.f32 %v7749_v26, %v6370_v54  ;;  %v6259_v48 = vadd.f32 %v7718_v60, %v7702_v53  ;;  %v15289_v60 = vld [vmem:[#allocation133_spill] sm:$0xff] }
 0xba8   :  { %v7748_v10 = vsel %vm6433_vm3, 1.0, %v15283_v25 }
 0xba9   :  { %v14027_v55 = vadd.f32 %v7748_v10, %v6369_v29  ;;  %v6371_v17 = vadd.f32 %v7734_v63, %v6259_v48 }
 0xbaa   :  { %v6401_v27 = vpop.permute.xlu1 %6400 }
 0xbab   :  { %v6495_v8 = vpack.c.bf16 %v14033_v45, %v14027_v55  ;;  %vm6435_vm14 = vcmp.eq.s32.totalorder %v15280_v35, %v6401_v27  ;;  %v6186_v27 = vpop.permute.xlu0 %6185 }
 0xbac   :  { %v7750_v22 = vsel %vm6435_vm14, 1.0, %v15283_v25  ;;  %vm6214_vm1 = vcmp.eq.s32.totalorder %v15280_v35, %v6186_v27 }
 0xbad   :  { %v14056_v24 = vadd.f32 %v7750_v22, %v6371_v17  ;;  %v7721_v47 = vsel %vm6214_vm1, 1.0, %v15283_v25 }
 0xbae   :  { %v6404_v40 = vpop.permute.xlu1 %6403 }
 0xbaf   :  { %vm6436_vm0 = vcmp.eq.s32.totalorder %v15280_v35, %v6404_v40  ;;  %v7736_v40 = vsel %vm6325_vm4, 1.0, %v15283_v25 }
 0xbb0   :  { %v7751_v58 = vsel %vm6436_vm0, 1.0, %v15283_v25 }
 0xbb1   :  { %v14054_v14 = vadd.f32 %v7751_v58, %v6372_v23  ;;  %v15290_v58 = vld [vmem:[#allocation146_spill] sm:$0xff] }
 0xbb2   :  { %v6074_v44 = vpop.permute.xlu1 %6073 }
 0xbb3   :  { %vm6102_vm2 = vcmp.eq.s32.totalorder %v15280_v35, %v6074_v44  ;;  %v7753_v44 = vsel %vm6438_vm7, 1.0, %v15283_v25 }
 0xbb4   :  { %v7705_v28 = vsel %vm6102_vm2, 1.0, %v15283_v25 }
 0xbb5   :  { %v6262_v6 = vadd.f32 %v7721_v47, %v7705_v28 }
 0xbb6   :  { %v6183_v57 = vpop.permute.xlu1 %6182 }
 0xbb7   :  { %vm6213_vm10 = vcmp.eq.s32.totalorder %v15280_v35, %v6183_v57 }
 0xbb8   :  { %v7720_v2 = vsel %vm6213_vm10, 1.0, %v15283_v25 }
 0xbb9   :  { %v6261_v52 = vadd.f32 %v7720_v2, %v7704_v56  ;;  %v15292_v2 = vld [vmem:[#allocation135_spill] sm:$0xff] }
 0xbbb   :  { %v14031_v32 = vpop.permute.xlu1 %6076  ;;  %v6373_v16 = vadd.f32 %v7736_v40, %v6261_v52  ;;  %v15293_v52 = vld [vmem:[#allocation140_spill] sm:$0xff] }
 0xbbc   :  { %vm6103_vm15 = vcmp.eq.s32.totalorder %v15280_v35, %v14031_v32  ;;  %v8562_v32 = vld [vmem:[#allocation22] sm:$0xff]  }
 0xbbf   :  { %v14048_v7 = vpop.permute.xlu1 %6079 }
 0xbc0   :  { %vm6104_vm13 = vcmp.eq.s32.totalorder %v15280_v35, %v14048_v7  ;;  %v7708_v7 = vsel %vm6105_vm12, 1.0, %v15283_v25 }
 0xbc4   :  { %v14060_v37 = vpop.permute.xlu1 %6191 }
 0xbc5   :  { %vm6216_vm6 = vcmp.eq.s32.totalorder %v15280_v35, %v14060_v37  ;;  %v7706_v37 = vsel %vm6103_vm15, 1.0, %v15283_v25 }
 0xbc9   :  { %v6298_v30 = vpop.permute.xlu1 %6297 }
 0xbca   :  { %vm6326_vm9 = vcmp.eq.s32.totalorder %v15280_v35, %v6298_v30  ;;  %v15291_v30 = vld [vmem:[#allocation134_spill] sm:$0xff] }
 0xbcb   :  { %v7737_v20 = vsel %vm6326_vm9, 1.0, %v15283_v25 }
 0xbcc   :  { %v6374_v33 = vadd.f32 %v7737_v20, %v6262_v6 }
 0xbcd   :  { %v14063_v31 = vpop.permute.xlu1 %6300 }
 0xbce   :  { %v14084_v1 = vadd.f32 %v7753_v44, %v6374_v33  ;;  %vm6327_vm4 = vcmp.eq.s32.totalorder %v15280_v35, %v14063_v31 }
 0xbcf   :  { %v7738_v49 = vsel %vm6327_vm4, 1.0, %v15283_v25 }
 0xbd2   :  { %v6407_v36 = vpop.permute.xlu1 %6406 }
 0xbd3   :  { %vm6437_vm3 = vcmp.eq.s32.totalorder %v15280_v35, %v6407_v36 }
 0xbd4   :  { %v7752_v12 = vsel %vm6437_vm3, 1.0, %v15283_v25 }
 0xbd5   :  { %v14082_v0 = vadd.f32 %v7752_v12, %v6373_v16 }
 0xc21   :  { %v8312_v38 = vpop.f32.mrb[228].mxu1 }
 0xc22   :  { %v5629_v29 = vpop.f32.mrb[229].mxu1  ;;  %v5694_v19 = vadd.f32 %v8312_v38, %v15287_v43 }
 0xc23   :  { %v8313_v57 = vpop.f32.mrb[230].mxu1  ;;  %v5692_v59 = vadd.f32 %v5629_v29, %v15288_v39 }
 0xc24   :  { %v5632_v26 = vpop.f32.mrb[231].mxu1  ;;  %v5695_v63 = vadd.f32 %v8313_v57, %v15289_v60  ;;  %v7682_v48 = vmul.f32 -1.442695, %v5694_v19  ;;  %v15294_v57 = vld [vmem:[#allocation147_spill] sm:$0xff] }
 0xc25   :  { %v7680_v23 = vmul.f32 -1.442695, %v5692_v59  ;;  %v5693_v17 = vadd.f32 %v5632_v26, %v15290_v58 }
 0xc26   :  { %v7683_v22 = vmul.f32 -1.442695, %v5695_v63  ;;  %9545 = vpow2.f32 %v7682_v48 }
 0xc27   :  { %9547 = vpow2.f32 %v7680_v23  ;;  %v7681_v28 = vmul.f32 -1.442695, %v5693_v17 }
 0xc28   :  { %9549 = vpow2.f32 %v7683_v22  ;;  %v15297_v22 = vld [vmem:[#allocation142_spill] sm:$0xff] }
 0xc29   :  { %9551 = vpow2.f32 %v7681_v28 }
 0xc30   :  { %v9546_v12 = vpop.eup %9545 }
 0xc31   :  { %v8316_v10 = vpop.f32.mrb[232].mxu1  ;;  %v9548_v38 = vpop.eup %9547 }
 0xc32   :  { %v5645_v54 = vpop.f32.mrb[233].mxu1  ;;  %v5698_v56 = vadd.f32 %v8316_v10, %v15291_v30  ;;  %v9550_v29 = vpop.eup %9549  ;;  %v5758_v10 = vadd.f32 1.0, %v9546_v12  ;;  %v5756_v19 = vadd.f32 1.0, %v9548_v38  ;;  %v15298_v30 = vld [vmem:[#allocation137_spill] sm:$0xff] }
 0xc33   :  { %v8317_v53 = vpop.f32.mrb[234].mxu1  ;;  %v5696_v27 = vadd.f32 %v5645_v54, %v15292_v2  ;;  %v15295_v54 = vld [vmem:[#allocation141_spill] sm:$0xff]  ;;  %v5759_v59 = vadd.f32 1.0, %v9550_v29  ;;  %v9552_v60 = vpop.eup %9551  ;;  %v15301_v29 = vld [vmem:[#allocation139_spill] sm:$0xff] }
 0xc34   :  { %v5648_v34 = vpop.f32.mrb[235].mxu1  ;;  %v7686_v40 = vmul.f32 -1.442695, %v5698_v56  ;;  %v5699_v47 = vadd.f32 %v8317_v53, %v15293_v52  ;;  %v15296_v53 = vld [vmem:[#allocation136_spill] sm:$0xff] }
 0xc35   :  { %v7684_v6 = vmul.f32 -1.442695, %v5696_v27  ;;  %v5697_v26 = vadd.f32 %v5648_v34, %v15294_v57  ;;  %v5757_v34 = vadd.f32 1.0, %v9552_v60 }
 0xc36   :  { %9553 = vpow2.f32 %v7686_v40  ;;  %v7687_v44 = vmul.f32 -1.442695, %v5699_v47 }
 0xc37   :  { %9555 = vpow2.f32 %v7684_v6  ;;  %v7685_v63 = vmul.f32 -1.442695, %v5697_v26 }
 0xc38   :  { %9557 = vpow2.f32 %v7687_v44 }
 0xc39   :  { %9559 = vrcp.f32 %v5758_v10 }
 0xc3a   :  { %9561 = vrcp.f32 %v5756_v19 }
 0xc3b   :  { %9563 = vrcp.f32 %v5759_v59 }
 0xc3c   :  { %9565 = vpow2.f32 %v7685_v63 }
 0xc40   :  { %v9554_v48 = vpop.eup %9553 }
 0xc41   :  { %v8320_v20 = vpop.f32.mrb[236].mxu1  ;;  %v9556_v28 = vpop.eup %9555  ;;  %v5762_v2 = vadd.f32 1.0, %v9554_v48 }
 0xc42   :  { %v5661_v36 = vpop.f32.mrb[237].mxu1  ;;  %v5702_v43 = vadd.f32 %v8320_v20, %v15295_v54  ;;  %v9558_v27 = vpop.eup %9557  ;;  %v15299_v20 = vld [vmem:[#allocation148_spill] sm:$0xff]  ;;  %v5760_v44 = vadd.f32 1.0, %v9556_v28  ;;  %v15302_v54 = vld [vmem:[#allocation67_spill] sm:$0xff] }
 0xc43   :  { %v8321_v16 = vpop.f32.mrb[238].mxu1  ;;  %v5700_v39 = vadd.f32 %v5661_v36, %v15296_v53  ;;  %v14104_v53 = vpop.eup %9559 }
 0xc44   :  { %v5664_v33 = vpop.f32.mrb[239].mxu1  ;;  %v7690_v23 = vmul.f32 -1.442695, %v5702_v43  ;;  %v5703_v58 = vadd.f32 %v8321_v16, %v15297_v22  ;;  %v15300_v16 = vld [vmem:[#allocation138_spill] sm:$0xff]  ;;  %v14106_v59 = vpop.eup %9561  ;;  %v15303_v22 = vld [vmem:[#allocation61_spill] sm:$0xff] }
 0xc45   :  { %v7688_v17 = vmul.f32 -1.442695, %v5700_v39  ;;  %v5701_v56 = vadd.f32 %v5664_v33, %v15298_v30  ;;  %v5763_v33 = vadd.f32 1.0, %v9558_v27  ;;  %v14108_v63 = vpop.eup %9563  ;;  %v15305_v27 = vld [vmem:[#allocation63_spill] sm:$0xff] }
 0xc46   :  { %9567 = vpow2.f32 %v7690_v23  ;;  %v7691_v40 = vmul.f32 -1.442695, %v5703_v58  ;;  %v9566_v23 = vpop.eup %9565 }
 0xc47   :  { %9569 = vpow2.f32 %v7688_v17  ;;  %v7689_v47 = vmul.f32 -1.442695, %v5701_v56  ;;  %v15304_v56 = vld [vmem:[#allocation69_spill] sm:$0xff] }
 0xc48   :  { %9571 = vrcp.f32 %v5757_v34 }
 0xc49   :  { %9573 = vrcp.f32 %v5762_v2 }
 0xc4a   :  { %9575 = vpow2.f32 %v7691_v40 }
 0xc4b   :  { %9577 = vpow2.f32 %v7689_v47 }
 0xc4c   :  { %9579 = vrcp.f32 %v5760_v44 }
 0xc4d   :  { %9581 = vrcp.f32 %v5763_v33 }
 0xc50   :  { %v9568_v30 = vpop.eup %9567 }
 0xc51   :  { %v8324_v52 = vpop.f32.mrb[240].mxu1  ;;  %v9570_v2 = vpop.eup %9569 }
 0xc52   :  { %v5706_v6 = vadd.f32 %v8324_v52, %v15299_v20  ;;  %v5677_v36 = vpop.f32.mrb[241].mxu1  ;;  %v14113_v47 = vpop.eup %9571  ;;  %v5761_v20 = vadd.f32 1.0, %v9566_v23 }
 0xc53   :  { %v5704_v12 = vadd.f32 %v5677_v36, %v15300_v16  ;;  %v8325_v38 = vpop.f32.mrb[242].mxu1  ;;  %v14116_v44 = vpop.eup %9573  ;;  %v5766_v16 = vadd.f32 1.0, %v9568_v30  ;;  %v5941_v30 = vsub.f32 1.0, %v14106_v59 }
 0xc54   :  { %v5707_v57 = vadd.f32 %v8325_v38, %v15301_v29  ;;  %v5680_v26 = vpop.f32.mrb[243].mxu1  ;;  %v7694_v10 = vmul.f32 -1.442695, %v5706_v6  ;;  %v15306_v6 = vld [vmem:[#allocation78_spill] sm:$0xff]  ;;  %v5764_v38 = vadd.f32 1.0, %v9570_v2  ;;  %v5942_v2 = vsub.f32 1.0, %v14113_v47 }
 0xc55   :  { %v5705_v43 = vadd.f32 %v5680_v26, %v15302_v54  ;;  %v7692_v19 = vmul.f32 -1.442695, %v5704_v12  ;;  %v9576_v12 = vpop.eup %9575  ;;  %v14120_v26 = vpop.permute.xlu1 %6412 }
 0xc56   :  { %v7695_v39 = vmul.f32 -1.442695, %v5707_v57  ;;  %9583 = vpow2.f32 %v7694_v10  ;;  %v9578_v33 = vpop.eup %9577  ;;  %v5767_v54 = vadd.f32 1.0, %v9576_v12  ;;  %v15310_v12 = vld [vmem:[#allocation80_spill] sm:$0xff]  ;;  %vm6439_vm7 = vcmp.eq.s32.totalorder %v15280_v35, %v14120_v26 }
 0xc57   :  { %v7693_v60 = vmul.f32 -1.442695, %v5705_v43  ;;  %9585 = vpow2.f32 %v7692_v19  ;;  %v14118_v29 = vpop.eup %9579  ;;  %v15307_v43 = vld [vmem:[#allocation88_spill] sm:$0xff]  ;;  %v5765_v23 = vadd.f32 1.0, %v9578_v33  ;;  %v15311_v33 = vld [vmem:[#allocation99_spill] sm:$0xff]  ;;  %v7754_v31 = vsel %vm6439_vm7, 1.0, %v15283_v25 }
 0xc58   :  { %9587 = vpow2.f32 %v7695_v39  ;;  %v14122_v10 = vpop.eup %9581 }
 0xc59   :  { %v8344_v48 = vpop.f32.mrb[244].mxu1  ;;  %9589 = vpow2.f32 %v7693_v60  ;;  %v5943_v60 = vsub.f32 1.0, %v14104_v53 }
 0xc5a   :  { %v5911_v58 = vadd.f32 %v8344_v48, %v15303_v22  ;;  %v5846_v17 = vpop.f32.mrb[245].mxu1  ;;  %v15308_v22 = vld [vmem:[#allocation73_spill] sm:$0xff] }
 0xc5b   :  { %v5909_v34 = vadd.f32 %v5846_v17, %v15304_v56  ;;  %v8345_v28 = vpop.f32.mrb[246].mxu1 }
 0xc5c   :  { %v5912_v40 = vadd.f32 %v8345_v28, %v15305_v27  ;;  %v5849_v52 = vpop.f32.mrb[247].mxu1  ;;  %9591 = vtanh.f32 %v5911_v58  ;;  %v5944_v27 = vsub.f32 1.0, %v14108_v63 }
 0xc5d   :  { %v5910_v36 = vadd.f32 %v5849_v52, %v15306_v6  ;;  %9593 = vtanh.f32 %v5909_v34  ;;  %v15309_v6 = vld [vmem:[#allocation83_spill] sm:$0xff] }
 0xc5e   :  { %9595 = vtanh.f32 %v5912_v40 }
 0xc5f   :  { %9597 = vtanh.f32 %v5910_v36 }
 0xc60   :  { %9599 = vrcp.f32 %v5761_v20  ;;  %v9584_v48 = vpop.eup %9583 }
 0xc61   :  { %v8348_v57 = vpop.f32.mrb[248].mxu1  ;;  %9601 = vrcp.f32 %v5766_v16  ;;  %v9586_v56 = vpop.eup %9585  ;;  %v5770_v34 = vadd.f32 1.0, %v9584_v48 }
 0xc62   :  { %v5915_v19 = vadd.f32 %v8348_v57, %v15307_v43  ;;  %v5862_v39 = vpop.f32.mrb[249].mxu1  ;;  %9603 = vrcp.f32 %v5764_v38  ;;  %v9588_v40 = vpop.eup %9587  ;;  %v5768_v52 = vadd.f32 1.0, %v9586_v56  ;;  %v5957_v57 = vmul.f32 %v5941_v30, %v15311_v33  ;;  %v15312_v43 = vld [vmem:[#allocation58_spill] sm:$0xff]  ;;  %v15314_v56 = vld [vmem:[#allocation60_spill] sm:$0xff] }
 0xc63   :  { %v5913_v58 = vadd.f32 %v5862_v39, %v15308_v22  ;;  %v8349_v17 = vpop.f32.mrb[250].mxu1  ;;  %v9590_v20 = vpop.eup %9589  ;;  %v15313_v22 = vld [vmem:[#allocation56_spill] sm:$0xff]  ;;  %v5947_v30 = vsub.f32 1.0, %v14116_v44 }
 0xc64   :  { %9605 = vtanh.f32 %v5915_v19  ;;  %v5865_v28 = vpop.f32.mrb[251].mxu1  ;;  %v5916_v36 = vadd.f32 %v8349_v17, %v15309_v6  ;;  %v5959_v19 = vmul.f32 %v5943_v60, %v15312_v43  ;;  %v14134_v39 = vpop.permute.xlu1 %6415  ;;  %v5958_v61 = vmul.f32 %v5942_v2, %v15313_v22  ;;  %v15315_v6 = vld [vmem:[#allocation98_spill] sm:$0xff] }
 0xc65   :  { %9607 = vtanh.f32 %v5913_v58  ;;  %v5914_v38 = vadd.f32 %v5865_v28, %v15310_v12  ;;  %v5960_v58 = vmul.f32 %v5944_v27, %v15314_v56  ;;  %v5945_v28 = vsub.f32 1.0, %v14118_v29  ;;  %v15317_v56 = vld [vmem:[#allocation93_spill] sm:$0xff] }
 0xc66   :  { %9609 = vrcp.f32 %v5767_v54  ;;  %v9592_v16 = vpop.eup %9591  ;;  %vm6440_vm1 = vcmp.eq.s32.totalorder %v15280_v35, %v14134_v39  ;;  %v8566_v39 = vld [vmem:[#allocation22 + $0x10] sm:$0xff]  }
 0xc67   :  { %9611 = vrcp.f32 %v5765_v23  ;;  %v9594_v48 = vpop.eup %9593  ;;  %v5975_v54 = vmul.f32 %v9592_v16, %v14104_v53  ;;  %v15316_v53 = vld [vmem:[#allocation90_spill] sm:$0xff] }
 0xc68   :  { %9613 = vrcp.f32 %v5770_v34  ;;  %v9596_v4 = vpop.eup %9595  ;;  %v5973_v23 = vmul.f32 %v9594_v48, %v14106_v59  ;;  %v14148_v48 = vpop.permute.xlu1 %6085 }
 0xc69   :  { %9615 = vrcp.f32 %v5768_v52  ;;  %v8352_v17 = vpop.f32.mrb[252].mxu1  ;;  %v9598_v60 = vpop.eup %9597  ;;  %v5976_v2 = vmul.f32 %v9596_v4, %v14108_v63  ;;  %v5991_v33 = vadd.f32 %v5975_v54, %v5959_v19  ;;  %v5769_v19 = vadd.f32 1.0, %v9590_v20 }
 0xc6a   :  { %9617 = vtanh.f32 %v5916_v36  ;;  %v5919_v12 = vadd.f32 %v8352_v17, %v15315_v6  ;;  %v5878_v34 = vpop.f32.mrb[253].mxu1  ;;  %v14144_v27 = vpop.eup %9599  ;;  %v5974_v59 = vmul.f32 %v9598_v60, %v14113_v47  ;;  %v5989_v43 = vadd.f32 %v5973_v23, %v5957_v57  ;;  %v15319_v47 = vld [vmem:[#allocation143_spill] sm:$0xff]  ;;  %v15320_v23 = vld [vmem:[#allocation120_spill] sm:$0xff] }
 0xc6b   :  { %9619 = vtanh.f32 %v5914_v38  ;;  %v5917_v52 = vadd.f32 %v5878_v34, %v15316_v53  ;;  %v8353_v16 = vpop.f32.mrb[254].mxu1  ;;  %v14150_v22 = vpop.eup %9601  ;;  %v5771_v36 = vadd.f32 1.0, %v9588_v40  ;;  %v5992_v4 = vadd.f32 %v5976_v2, %v5960_v58  ;;  %v15318_v38 = vld [vmem:[#allocation85_spill] sm:$0xff]  ;;  %v15322_v58 = vld [vmem:[#allocation75_spill] sm:$0xff] }
 0xc6c   :  { %9621 = vtanh.f32 %v5919_v12  ;;  %v5920_v17 = vadd.f32 %v8353_v16, %v15317_v56  ;;  %v5881_v6 = vpop.f32.mrb[255].mxu1  ;;  %v14153_v63 = vpop.eup %9603  ;;  %v5990_v34 = vadd.f32 %v5974_v59, %v5958_v61  ;;  %v6007_v57 = vmul.f32 %v5991_v33, %v15319_v47  ;;  %v15321_v16 = vld [vmem:[#allocation144_spill] sm:$0xff] }
 0xc6d   :  { %9623 = vtanh.f32 %v5917_v52  ;;  %v5918_v54 = vadd.f32 %v5881_v6, %v15318_v38  ;;  %v6008_v60 = vmul.f32 %v5992_v4, %v15320_v23  ;;  %v5963_v40 = vmul.f32 %v5947_v30, %v13781_v50  ;;  %v14165_v38 = vpop.permute.xlu1 %6194 }
 0xc6e   :  { %v9606_v53 = vpop.eup %9605  ;;  %9625 = vtanh.f32 %v5920_v17  ;;  %v6005_v56 = vmul.f32 %v5989_v43, %v15321_v16  ;;  %v6006_v2 = vmul.f32 %v5990_v34, %v15322_v58  ;;  %v5961_v61 = vmul.f32 %v5945_v28, %v13750_v5  ;;  %v15324_v28 = vld [vmem:[#allocation100_spill] sm:$0xff] }
 0xc6f   :  { %v9608_v12 = vpop.eup %9607  ;;  %9627 = vtanh.f32 %v5918_v54  ;;  %v5979_v20 = vmul.f32 %v9606_v53, %v14116_v44  ;;  %v6022_v6 = vpack.c.bf16 %v6008_v60, %v6007_v57  ;;  %v5948_v50 = vsub.f32 1.0, %v14122_v10  ;;  %v15323_v54 = vld [vmem:[#allocation70_spill] sm:$0xff]  ;;  %v15325_v60 = vld [vmem:[#allocation64_spill] sm:$0xff] }
 0xc70   :  { %v9610_v52 = vpop.eup %9609  ;;  %9629 = vrcp.f32 %v5771_v36  ;;  %v5977_v59 = vmul.f32 %v9608_v12, %v14118_v29  ;;  %v6021_v4 = vpack.c.bf16 %v6006_v2, %v6005_v56  ;;  %v5946_v36 = vsub.f32 1.0, %v14144_v27  ;;  %v15326_v2 = vld [vmem:[#allocation95_spill] sm:$0xff] }
 0xc71   :  { %v9612_v33 = vpop.eup %9611  ;;  %9631 = vrcp.f32 %v5769_v19  ;;  %v8356_v17 = vpop.f32.mrb[0].mxu1  ;;  %v5995_v30 = vadd.f32 %v5979_v20, %v5963_v40  ;;  %v5951_v5 = vsub.f32 1.0, %v14150_v22  ;;  %v5949_v57 = vsub.f32 1.0, %v14153_v63 }
 0xc72   :  { %v14167_v43 = vpop.eup %9613  ;;  %v5923_v44 = vadd.f32 %v8356_v17, %v15323_v54  ;;  %v5894_v34 = vpop.f32.mrb[1].mxu1  ;;  %v5993_v53 = vadd.f32 %v5977_v59, %v5961_v61  ;;  %8358 = vmatprep.subr.bf16.mxu1 %v6021_v4  ;;  %v5950_v16 = vsub.f32 1.0, %v9612_v33  ;;  %v5952_v56 = vsub.f32 1.0, %v9610_v52  ;;  %v15327_v61 = vld [vmem:[#allocation72_spill] sm:$0xff] }
 0xc73   :  { %v14172_v29 = vpop.eup %9615  ;;  %v5921_v19 = vadd.f32 %v5894_v34, %v15324_v28  ;;  %v8357_v47 = vpop.f32.mrb[2].mxu1  ;;  %8359 = vmatpush3.bf16.msra.mxu1 %v6021_v4  ;;  %v5964_v59 = vmul.f32 %v5948_v50, %v15327_v61  ;;  %v15328_v34 = vld [vmem:[#allocation66_spill] sm:$0xff]  ;;  %v5967_v4 = vmul.f32 %v5951_v5, %v13840_v42  ;;  %vm6106_vm11 = vcmp.eq.s32.totalorder %v15280_v35, %v14148_v48 }
 0xc74   :  { %v9618_v23 = vpop.eup %9617  ;;  %9633 = vtanh.f32 %v5923_v44  ;;  %v5924_v40 = vadd.f32 %v8357_v47, %v15325_v60  ;;  %v5897_v12 = vpop.f32.mrb[3].mxu1  ;;  %8360 = vmatprep.subr.bf16.mxu1 %v6022_v6  ;;  %v5962_v28 = vmul.f32 %v5946_v36, %v15328_v34  ;;  %v15329_v42 = vld [vmem:[#allocation62_spill] sm:$0xff]  ;;  %vm6217_vm14 = vcmp.eq.s32.totalorder %v15280_v35, %v14165_v38 }
 0xc75   :  { %v9620_v58 = vpop.eup %9619  ;;  %9635 = vtanh.f32 %v5921_v19  ;;  %v5922_v20 = vadd.f32 %v5897_v12, %v15326_v2  ;;  %v5980_v17 = vmul.f32 %v9618_v23, %v14122_v10  ;;  %v5965_v19 = vmul.f32 %v5949_v57, %v13809_v3  ;;  %v14185_v2 = vpop.permute.xlu1 %6088 }
 0xc76   :  { %v9622_v54 = vpop.eup %9621  ;;  %9637 = vtanh.f32 %v5924_v40  ;;  %v5978_v44 = vmul.f32 %v9620_v58, %v14144_v27  ;;  %v5966_v23 = vmul.f32 %v5950_v16, %v13820_v13  ;;  %v5968_v27 = vmul.f32 %v5952_v56, %v13853_v46  ;;  %v15330_v58 = vld [vmem:[#allocation121_spill] sm:$0xff]  ;;  %v14195_v46 = vpop.permute.xlu0 %6188 }
 0xc77   :  { %v9624_v47 = vpop.eup %9623  ;;  %9639 = vtanh.f32 %v5922_v20  ;;  %v5996_v60 = vadd.f32 %v5980_v17, %v5964_v59  ;;  %v5983_v12 = vmul.f32 %v9622_v54, %v14150_v22  ;;  %8361 = vmatpush3.bf16.msra.mxu1 %v6022_v6  ;;  %v6011_v5 = vmul.f32 %v5995_v30, %v15329_v42  ;;  %v15331_v22 = vld [vmem:[#allocation68_spill] sm:$0xff]  ;;  %v15332_v17 = vld [vmem:[#allocation145_spill] sm:$0xff] }
 0xc78   :  { %v9626_v50 = vpop.eup %9625  ;;  %v5994_v10 = vadd.f32 %v5978_v44, %v5962_v28  ;;  %v5981_v36 = vmul.f32 %v9624_v47, %v14153_v63  ;;  %v6009_v59 = vmul.f32 %v5993_v53, %v15331_v22  ;;  %v5955_v63 = vsub.f32 1.0, %v14167_v43  ;;  %v15334_v47 = vld [vmem:[#allocation123_spill] sm:$0xff] }
 0xc79   :  { %v9628_v40 = vpop.eup %9627  ;;  %v6012_v20 = vmul.f32 %v5996_v60, %v15330_v58  ;;  %v5984_v61 = vmul.f32 %v9626_v50, %v9610_v52  ;;  %v5999_v3 = vadd.f32 %v5983_v12, %v5967_v4  ;;  %v5953_v44 = vsub.f32 1.0, %v14172_v29  ;;  %v15333_v52 = vld [vmem:[#allocation76_spill] sm:$0xff]  ;;  %v14200_v12 = vpop.permute.xlu1 %6091 }
 0xc7a   :  { %v9630_v57 = vpop.eup %9629  ;;  %v6010_v54 = vmul.f32 %v5994_v10, %v15332_v17  ;;  %v5982_v6 = vmul.f32 %v9628_v40, %v9612_v33  ;;  %v5997_v34 = vadd.f32 %v5981_v36, %v5965_v19  ;;  %v15335_v19 = vld [vmem:[#allocation74_spill] sm:$0xff]  ;;  %v6198_v22 = vpop.permute.xlu0 %6197  ;;  %vm6215_vm5 = vcmp.eq.s32.totalorder %v15280_v35, %v14195_v46 }
 0xc7b   :  { %v9632_v28 = vpop.eup %9631  ;;  %v6024_v13 = vpack.c.bf16 %v6012_v20, %v6011_v5  ;;  %v6000_v16 = vadd.f32 %v5984_v61, %v5968_v27  ;;  %v6015_v4 = vmul.f32 %v5999_v3, %v15333_v52  ;;  %v5956_v53 = vsub.f32 1.0, %v9630_v57  ;;  %v15336_v10 = vld [vmem:[#allocation122_spill] sm:$0xff]  ;;  %v15339_v52 = vld [vmem:[#allocation79_spill] sm:$0xff] }
 0xc7c   :  { %v6023_v56 = vpack.c.bf16 %v6010_v54, %v6009_v59  ;;  %v5998_v30 = vadd.f32 %v5982_v6, %v5966_v23  ;;  %v6013_v50 = vmul.f32 %v5997_v34, %v15335_v19  ;;  %v5954_v27 = vsub.f32 1.0, %v9632_v28  ;;  %v8563_v19 = vld [vmem:[#allocation22 + $0x48] sm:$0xff]  }
 0xc7d   :  { %v6016_v60 = vmul.f32 %v6000_v16, %v15334_v47  ;;  %v5971_v23 = vmul.f32 %v5955_v63, %v13904_v11  ;;  %v5969_v61 = vmul.f32 %v5953_v44, %v13873_v51  ;;  %v5972_v17 = vmul.f32 %v5956_v53, %v13915_v21  ;;  %v15338_v44 = vld [vmem:[#allocation125_spill] sm:$0xff]  ;;  %v15340_v47 = vld [vmem:[#allocation124_spill] sm:$0xff] }
 0xc7e   :  { %v9634_v33 = vpop.eup %9633  ;;  %8362 = vmatprep.subr.bf16.mxu1 %v6023_v56  ;;  %v6014_v36 = vmul.f32 %v5998_v30, %v15336_v10  ;;  %v5970_v34 = vmul.f32 %v5954_v27, %v13883_v62  ;;  %v15337_v30 = vld [vmem:[#allocation81_spill] sm:$0xff]  ;;  %vm6218_vm0 = vcmp.eq.s32.totalorder %v15280_v35, %v6198_v22  ;;  %v7707_v46 = vsel %vm6104_vm13, 1.0, %v15283_v25 }
 0xc7f   :  { %v9636_v40 = vpop.eup %9635  ;;  %8363 = vmatpush3.bf16.msra.mxu1 %v6023_v56  ;;  %v6026_v42 = vpack.c.bf16 %v6016_v60, %v6015_v4  ;;  %v5987_v5 = vmul.f32 %v9634_v33, %v14167_v43  ;;  %v14210_v43 = vpop.permute.xlu1 %6203  ;;  %v8561_v33 = vld [vmem:[#allocation22 + $0x40] sm:$0xff]   ;;  %v7723_v48 = vsel %vm6216_vm6, 1.0, %v15283_v25  ;;  %v7722_v38 = vsel %vm6215_vm5, 1.0, %v15283_v25 }
 0xc80   :  { %v9638_v58 = vpop.eup %9637  ;;  %8364 = vmatprep.subr.bf16.mxu1 %v6024_v13  ;;  %v6025_v20 = vpack.c.bf16 %v6014_v36, %v6013_v50  ;;  %v5985_v3 = vmul.f32 %v9636_v40, %v14172_v29  ;;  %v7709_v50 = vsel %vm6106_vm11, 1.0, %v15283_v25  ;;  %v7724_v10 = vsel %vm6217_vm14, 1.0, %v15283_v25 }
 0xc81   :  { %v9640_v59 = vpop.eup %9639  ;;  %v5988_v54 = vmul.f32 %v9638_v58, %v9630_v57  ;;  %v6003_v6 = vadd.f32 %v5987_v5, %v5971_v23  ;;  %v14216_v57 = vpop.permute.xlu0 %6200  ;;  %v7725_v36 = vsel %vm6218_vm0, 1.0, %v15283_v25  ;;  %v7739_v40 = vsel %vm6328_vm8, 1.0, %v15283_v25  ;;  %v8564_v23 = vld [vmem:[#allocation22 + $0x8] sm:$0xff]   ;;  %v8565_v58 = vld [vmem:[#allocation22 + $0x50] sm:$0xff]  }
 0xc82   :  { %v5986_v16 = vmul.f32 %v9640_v59, %v9632_v28  ;;  %v6001_v56 = vadd.f32 %v5985_v3, %v5969_v61  ;;  %v6263_v5 = vadd.f32 %v7722_v38, %v7706_v37  ;;  %v6265_v41 = vadd.f32 %v7724_v10, %v7708_v7  ;;  %v8567_v59 = vld [vmem:[#allocation22 + $0x58] sm:$0xff]   ;;  %v6920_v38 = vld [vmem:[#allocation13 + $0x10] sm:$0xff] }
 0xc83   :  { %8365 = vmatpush3.bf16.msra.mxu1 %v6024_v13  ;;  %v6004_v11 = vadd.f32 %v5988_v54, %v5972_v17  ;;  %v6019_v51 = vmul.f32 %v6003_v6, %v15337_v30  ;;  %v6310_v13 = vpop.permute.xlu1 %6309  ;;  %v6266_v18 = vadd.f32 %v7725_v36, %v7709_v50  ;;  %vm6107_vm9 = vcmp.eq.s32.totalorder %v15280_v35, %v14185_v2  ;;  %v8575_v7 = vld [vmem:[#allocation22 + $0x78] sm:$0xff]   ;;  %v6923_v50 = vld [vmem:[#allocation13 + $0x28] sm:$0xff] }
 0xc84   :  { %8366 = vmatprep.subr.bf16.mxu1 %v6025_v20  ;;  %v6002_v63 = vadd.f32 %v5986_v16, %v5970_v34  ;;  %v6017_v4 = vmul.f32 %v6001_v56, %v15339_v52  ;;  %vm6330_vm10 = vcmp.eq.s32.totalorder %v15280_v35, %v6310_v13  ;;  %vm6108_vm3 = vcmp.eq.s32.totalorder %v15280_v35, %v14200_v12  ;;  %v8576_v37 = vld [vmem:[#allocation22 + $0x38] sm:$0xff]  }
 0xc85   :  { %v6020_v29 = vmul.f32 %v6004_v11, %v15338_v44  ;;  %v6307_v60 = vpop.permute.xlu0 %6306  ;;  %v7741_v45 = vsel %vm6330_vm10, 1.0, %v15283_v25  ;;  %vm6219_vm12 = vcmp.eq.s32.totalorder %v15280_v35, %v14216_v57  ;;  %vm6220_vm15 = vcmp.eq.s32.totalorder %v15280_v35, %v14210_v43  ;;  %v8568_v43 = vld [vmem:[#allocation22 + $0x18] sm:$0xff]   ;;  %v8571_v57 = vld [vmem:[#allocation22 + $0x68] sm:$0xff]  }
 0xc86   :  { %v6018_v21 = vmul.f32 %v6002_v63, %v15340_v47  ;;  %vm6329_vm2 = vcmp.eq.s32.totalorder %v15280_v35, %v6307_v60  ;;  %v7755_v61 = vsel %vm6440_vm1, 1.0, %v15283_v25  ;;  %v6378_v22 = vadd.f32 %v7741_v45, %v6266_v18  ;;  %v8572_v60 = vld [vmem:[#allocation22 + $0x28] sm:$0xff]   ;;  %v6922_v10 = vld [vmem:[#allocation13 + $0x20] sm:$0xff]  ;;  %v6925_v36 = vld [vmem:[#allocation13 + $0x38] sm:$0xff] }
 0xc87   :  { %8367 = vmatpush3.bf16.msra.mxu1 %v6025_v20  ;;  %v6028_v62 = vpack.c.bf16 %v6020_v29, %v6019_v51  ;;  %v14218_v53 = vpop.permute.xlu1 %6312  ;;  %v7740_v55 = vsel %vm6329_vm2, 1.0, %v15283_v25  ;;  %v6375_v20 = vadd.f32 %v7738_v49, %v6263_v5  ;;  %v7710_v17 = vsel %vm6107_vm9, 1.0, %v15283_v25  ;;  %v6928_v5 = vld [vmem:[#allocation13 + $0x50] sm:$0xff]  ;;  %v6930_v18 = vld [vmem:[#allocation13 + $0x60] sm:$0xff] }
 0xc88   :  { %8368 = vmatprep.subr.bf16.mxu1 %v6026_v42  ;;  %v6027_v28 = vpack.c.bf16 %v6018_v21, %v6017_v4  ;;  %v6377_v3 = vadd.f32 %v7740_v55, %v6265_v41  ;;  %v7711_v54 = vsel %vm6108_vm3, 1.0, %v15283_v25  ;;  %v7726_v6 = vsel %vm6219_vm12, 1.0, %v15283_v25  ;;  %v6931_v41 = vld [vmem:[#allocation13 + $0x68] sm:$0xff] }
 0xc89   :  { %v14235_v9 = vpop.permute.xlu0 %6315  ;;  %v7727_v34 = vsel %vm6220_vm15, 1.0, %v15283_v25  ;;  %vm6331_vm11 = vcmp.eq.s32.totalorder %v15280_v35, %v14218_v53  ;;  %v15341_v2 = vpack.c.bf16 %v14054_v14, %v14056_v24  ;;  %v15342_v56 = vpack.c.bf16 %v14084_v1, %v14082_v0  ;;  %v8569_v24 = vld [vmem:[#allocation22 + $0x60] sm:$0xff]  }
 0xc8a   :  { %vm6332_vm5 = vcmp.eq.s32.totalorder %v15280_v35, %v14235_v9  ;;  %v6487_v63 = vadd.f32 %v7754_v31, %v6375_v20  ;;  %v6267_v51 = vadd.f32 %v7726_v6, %v7710_v17  ;;  %v6268_v14 = vadd.f32 %v7727_v34, %v7711_v54  ;;  %v8570_v0 = vld [vmem:[#allocation22 + $0x20] sm:$0xff]  }
 0xc8b   :  { %8369 = vmatpush3.bf16.msra.mxu1 %v6026_v42  ;;  %v6419_v27 = vpop.permute.xlu1 %6418  ;;  %v6264_v42 = vadd.f32 %v7723_v48, %v7707_v46  ;;  %v7743_v44 = vsel %vm6332_vm5, 1.0, %v15283_v25  ;;  %v7742_v29 = vsel %vm6331_vm11, 1.0, %v15283_v25  ;;  %v6918_v46 = vld [vmem:[#allocation13] sm:$0xff]  ;;  %v6919_v48 = vld [vmem:[#allocation13 + $0x8] sm:$0xff]  ;;  %vm10087_vm8 = vmmov 0  }
 0xc8c   :  { %8370 = vmatprep.subr.bf16.mxu1 %v6027_v28  ;;  %vm6441_vm6 = vcmp.eq.s32.totalorder %v15280_v35, %v6419_v27  ;;  %v6380_v47 = vadd.f32 %v7743_v44, %v6268_v14  ;;  %v6379_v21 = vadd.f32 %v7742_v29, %v6267_v51  ;;  %6936 = vperm.xlu0 %8495, %v6918_v46   ;;  %v6924_v27 = vld [vmem:[#allocation13 + $0x30] sm:$0xff]  ;;  %v8578_v17 = vld [vmem:[#allocation5 + $0x8] sm:$0xff]   ;;  %v8581_v29 = vld [vmem:[#allocation5 + $0x20] sm:$0xff]  }
 0xc8d   :  { %v6376_v26 = vadd.f32 %v7739_v40, %v6264_v42  ;;  %v7756_v16 = vsel %vm6441_vm6, 1.0, %v15283_v25  ;;  %6941 = vperm.xlu1 %8496, %v6919_v48   ;;  %v6927_v40 = vld [vmem:[#allocation13 + $0x48] sm:$0xff]  ;;  %v6926_v42 = vld [vmem:[#allocation13 + $0x40] sm:$0xff]  ;;  %v8580_v51 = vld [vmem:[#allocation5 + $0x18] sm:$0xff]  }
 0xc8e   :  { %v6489_v4 = vadd.f32 %v7756_v16, %v6377_v3 }
 0xc8f   :  { %8371 = vmatpush3.bf16.msra.mxu1 %v6027_v28  ;;  %v6488_v30 = vadd.f32 %v7755_v61, %v6376_v26  ;;  %v8577_v26 = vld [vmem:[#allocation5] sm:$0xff]  }
 0xc90   :  { %8372 = vmatprep.subr.bf16.mxu1 %v6028_v62 }
 0xc91   :  { %v6498_v1 = vpack.c.bf16 %v6488_v30, %v6487_v63  ;;  %6946 = vperm.xlu1 %8496, %v6920_v38  }
 0xc93   :  { %8373 = vmatpush3.bf16.msra.mxu1 %v6028_v62 }
 0xc94   :  { %7965 = vmatprep.subr.bf16.mxu1 %v8561_v33 }
 0xc95   :  { %6956 = vperm.xlu1 %8496, %v6922_v10  }
 0xc96   :  { %8375 = vmatmul.mubr.bf16.vlgmr.msra.gmra.mrb[4].mxu1 %v6494_v15  ;;  %v6422_v15 = vpop.permute.xlu0 %6421 }
 0xc97   :  { %8378 = vmatprep.mubr.bf16.mxu1 %v6495_v8  ;;  %7966 = vmatpush3.bf16.msra.mxu1 %v8562_v32  ;;  %v6425_v8 = vpop.permute.xlu1 %6424  ;;  %vm6442_vm13 = vcmp.eq.s32.totalorder %v15280_v35, %v6422_v15  ;;  %v8574_v32 = vld [vmem:[#allocation22 + $0x30] sm:$0xff]  }
 0xc98   :  { %7967 = vmatprep.subr.bf16.mxu1 %v8563_v19  ;;  %v7757_v12 = vsel %vm6442_vm13, 1.0, %v15283_v25  ;;  %vm6443_vm14 = vcmp.eq.s32.totalorder %v15280_v35, %v6425_v8  ;;  %v6921_v19 = vld [vmem:[#allocation13 + $0x18] sm:$0xff] }
 0xc99   :  { %v6490_v52 = vadd.f32 %v7757_v12, %v6378_v22  ;;  %v7758_v28 = vsel %vm6443_vm14, 1.0, %v15283_v25  ;;  %6951 = vperm.xlu0 %8495, %v6921_v19   ;;  %6966 = vperm.xlu1 %8496, %v6924_v27   ;;  %v6933_v15 = vld [vmem:[#allocation13 + $0x78] sm:$0xff] }
 0xc9a   :  { %v6491_v53 = vadd.f32 %v7758_v28, %v6379_v21 }
 0xc9b   :  { %7968 = vmatpush3.bf16.msra.mxu1 %v8564_v23  ;;  %v6428_v11 = vpop.permute.xlu1 %6427  ;;  %v6499_v62 = vpack.c.bf16 %v6490_v52, %v6489_v4  ;;  %v6929_v23 = vld [vmem:[#allocation13 + $0x58] sm:$0xff]  ;;  %v8582_v52 = vld [vmem:[#allocation5 + $0x28] sm:$0xff]   ;;  %v8583_v4 = vld [vmem:[#allocation5 + $0x30] sm:$0xff]  }
 0xc9c   :  { %7969 = vmatprep.subr.bf16.mxu1 %v8565_v58  ;;  %vm6444_vm0 = vcmp.eq.s32.totalorder %v15280_v35, %v6428_v11  ;;  %v8573_v35 = vld [vmem:[#allocation22 + $0x70] sm:$0xff]  }
 0xc9d   :  { %v7759_v13 = vsel %vm6444_vm0, 1.0, %v15283_v25  ;;  %6961 = vperm.xlu0 %8495, %v6923_v50   ;;  %6976 = vperm.xlu1 %8496, %v6926_v42   ;;  %v6932_v58 = vld [vmem:[#allocation13 + $0x70] sm:$0xff] }
 0xc9e   :  { %8379 = vmatmul.mubr.bf16.gmra.mrb[8].mxu1 %v15341_v2  ;;  %v6492_v33 = vadd.f32 %v7759_v13, %v6380_v47  ;;  %v14327_v47 = vld [vmem:[#allocation23] ss:$0 sm:$0xff] }
 0xc9f   :  { %8382 = vmatprep.mubr.bf16.mxu1 %v15342_v56  ;;  %7970 = vmatpush3.bf16.msra.mxu1 %v8566_v39  ;;  %v8579_v56 = vld [vmem:[#allocation5 + $0x10] sm:$0xff]  }
 0xca0   :  { %7971 = vmatprep.subr.bf16.mxu1 %v8567_v59  ;;  %v6500_v9 = vpack.c.bf16 %v6492_v33, %v6491_v53 }
 0xca1   :  { %6971 = vperm.xlu0 %8495, %v6925_v36   ;;  %6986 = vperm.xlu1 %8496, %v6928_v5  }
 0xca3   :  { %7972 = vmatpush3.bf16.msra.mxu1 %v8568_v43 }
 0xca4   :  { %7973 = vmatprep.subr.bf16.mxu1 %v8569_v24 }
 0xca5   :  { %6981 = vperm.xlu0 %8495, %v6927_v40   ;;  %6996 = vperm.xlu1 %8496, %v6930_v18  }
 0xca6   :  { %8383 = vmatmul.mubr.bf16.gmra.mrb[12].mxu1 %v6498_v1 }
 0xca7   :  { %8386 = vmatprep.mubr.bf16.mxu1 %v6499_v62  ;;  %7974 = vmatpush3.bf16.msra.mxu1 %v8570_v0  ;;  %v8584_v0 = vld [vmem:[#allocation5 + $0x38] sm:$0xff]  }
 0xca8   :  { %7975 = vmatprep.subr.bf16.mxu1 %v8571_v57 }
 0xca9   :  { %6991 = vperm.xlu0 %8495, %v6929_v23   ;;  %7006 = vperm.xlu1 %8496, %v6932_v58  }
 0xcab   :  { %7976 = vmatpush3.bf16.msra.mxu1 %v8572_v60 }
 0xcac   :  { %7977 = vmatprep.subr.bf16.mxu1 %v8573_v35 }
 0xcad   :  { %7001 = vperm.xlu0 %8495, %v6931_v41  }
 0xcae   :  { %8387 = vmatmul.mubr.bf16.gmra.mrb[16].mxu1 %v6500_v9 }
 0xcaf   :  { %7978 = vmatpush3.bf16.msra.mxu1 %v8574_v32 }
 0xcb0   :  { %7979 = vmatprep.subr.bf16.mxu1 %v8575_v7 }
 0xcb1   :  { %7011 = vperm.xlu0 %8495, %v6933_v15  }
 0xcb3   :  { %7980 = vmatpush3.bf16.msra.mxu1 %v8576_v37 }
 0xcb4   :  { %8390 = vmatprep.subr.bf16.mxu1 %v15283_v25 }
 0xd0b   :  { %v6937_v53 = vpop.permute.xlu0 %6936 }
 0xd0c   :  { %v6942_v9 = vpop.permute.xlu1 %6941 }
 0xd10   :  { %v6947_v23 = vpop.permute.xlu1 %6946 }
 0xd18   :  { %v6952_v15 = vpop.permute.xlu0 %6951 }
 0xd69   :  { %v8376_v49 = vpop.f32.mrb[4].mxu1 }
 0xd6a   :  { %v6535_v55 = vpop.f32.mrb[5].mxu1 }
 0xd6b   :  { %v8377_v45 = vpop.f32.mrb[6].mxu1 }
 0xd6c   :  { %v6615_v8 = vpack.c.bf16 %v8377_v45, %v8376_v49  ;;  %v6538_v31 = vpop.f32.mrb[7].mxu1 }
 0xd6d   :  { %v6614_v39 = vpack.c.bf16 %v6538_v31, %v6535_v55 }
 0xd6f   :  { %6837 = vmatprep.mubr.bf16.mxu1 %v6614_v39 }
 0xd70   :  { %6838 = vmatmul.mubr.bf16.vlgmr.msra.gmra.mrb[20].mxu1 %v8577_v26 }
 0xd71   :  { %v8380_v20 = vpop.f32.mrb[8].mxu1  ;;  %6845 = vmatprep.mubr.bf16.mxu1 %v6615_v8 }
 0xd72   :  { %v6551_v61 = vpop.f32.mrb[9].mxu1 }
 0xd73   :  { %v8381_v3 = vpop.f32.mrb[10].mxu1 }
 0xd74   :  { %v6617_v22 = vpack.c.bf16 %v8381_v3, %v8380_v20  ;;  %v6554_v59 = vpop.f32.mrb[11].mxu1  ;;  %v6957_v3 = vpop.permute.xlu1 %6956 }
 0xd75   :  { %v6616_v54 = vpack.c.bf16 %v6554_v59, %v6551_v61 }
 0xd78   :  { %6846 = vmatmul.mubr.bf16.gmra.mrb[24].mxu1 %v8578_v17 }
 0xd79   :  { %v8384_v6 = vpop.f32.mrb[12].mxu1  ;;  %6853 = vmatprep.mubr.bf16.mxu1 %v6616_v54  ;;  %v6962_v54 = vpop.permute.xlu0 %6961 }
 0xd7a   :  { %v6567_v34 = vpop.f32.mrb[13].mxu1 }
 0xd7b   :  { %v8385_v2 = vpop.f32.mrb[14].mxu1 }
 0xd7c   :  { %v6619_v12 = vpack.c.bf16 %v8385_v2, %v8384_v6  ;;  %v6570_v16 = vpop.f32.mrb[15].mxu1 }
 0xd7d   :  { %v6618_v11 = vpack.c.bf16 %v6570_v16, %v6567_v34 }
 0xd80   :  { %6854 = vmatmul.mubr.bf16.gmra.mrb[28].mxu1 %v8579_v56 }
 0xd81   :  { %6861 = vmatprep.mubr.bf16.mxu1 %v6617_v22  ;;  %v8388_v43 = vpop.f32.mrb[16].mxu1 }
 0xd82   :  { %v6583_v63 = vpop.f32.mrb[17].mxu1 }
 0xd83   :  { %v8389_v30 = vpop.f32.mrb[18].mxu1 }
 0xd84   :  { %v6621_v14 = vpack.c.bf16 %v8389_v30, %v8388_v43  ;;  %v6586_v24 = vpop.f32.mrb[19].mxu1 }
 0xd85   :  { %v6620_v44 = vpack.c.bf16 %v6586_v24, %v6583_v63 }
 0xd88   :  { %6862 = vmatmul.mubr.bf16.gmra.mrb[32].mxu1 %v8580_v51  ;;  %v6967_v51 = vpop.permute.xlu1 %6966 }
 0xd89   :  { %6869 = vmatprep.mubr.bf16.mxu1 %v6618_v11 }
 0xd90   :  { %6870 = vmatmul.mubr.bf16.gmra.mrb[36].mxu1 %v8581_v29  ;;  %v6972_v29 = vpop.permute.xlu0 %6971 }
 0xd91   :  { %6877 = vmatprep.mubr.bf16.mxu1 %v6619_v12 }
 0xd98   :  { %6878 = vmatmul.mubr.bf16.gmra.mrb[40].mxu1 %v8582_v52 }
 0xd99   :  { %6885 = vmatprep.mubr.bf16.mxu1 %v6620_v44 }
 0xda0   :  { %6886 = vmatmul.mubr.bf16.gmra.mrb[44].mxu1 %v8583_v4 }
 0xda1   :  { %6893 = vmatprep.mubr.bf16.mxu1 %v6621_v14 }
 0xda8   :  { %6894 = vmatmul.mubr.bf16.gmra.mrb[48].mxu1 %v8584_v0 }
 0xda9   :  { %8406 = vmatprep.mubr.msk.bf16.mxu1 %vm10087_vm8, %v15283_v25 }
 0xe43   :  { %v7981_v1 = vpop.f32.mrb[20].mxu1 }
 0xe44   :  { %v7982_v21 = vpop.f32.mrb[21].mxu1 }
 0xe45   :  { %v7983_v57 = vadd.f32 %v7982_v21, %v7981_v1  ;;  %v7984_v62 = vpop.f32.mrb[22].mxu1 }
 0xe46   :  { %v7985_v28 = vpop.f32.mrb[23].mxu1 }
 0xe47   :  { %v6840_v13 = vadd.f32 %v7983_v57, %v14327_v47  ;;  %v7986_v60 = vadd.f32 %v7985_v28, %v7984_v62 }
 0xe49   :  { %v6902_v33 = vmax.f32 %v6840_v13, 0.0  ;;  %v6843_v35 = vadd.f32 %v7986_v60, %v14327_v47 }
 0xe4b   :  { %v7014_v32 = vmul.f32 %v6937_v53, %v6902_v33  ;;  %v6903_v7 = vmax.f32 %v6843_v35, 0.0  ;;  %v7987_v37 = vpop.f32.mrb[24].mxu1  ;;  %v6977_v53 = vpop.permute.xlu1 %6976 }
 0xe4c   :  { %v7988_v46 = vpop.f32.mrb[25].mxu1 }
 0xe4d   :  { %7030 = vst [vmem:[#allocation25] sm:$0xff] %v7014_v32  ;;  %v7015_v48 = vmul.f32 %v6942_v9, %v6903_v7  ;;  %v7989_v19 = vadd.f32 %v7988_v46, %v7987_v37  ;;  %v7990_v38 = vpop.f32.mrb[26].mxu1 }
 0xe4e   :  { %v7991_v50 = vpop.f32.mrb[27].mxu1 }
 0xe4f   :  { %7031 = vst [vmem:[#allocation25 + $0x8] sm:$0xff] %v7015_v48  ;;  %v7057_v10 = vpack.c.bf16 %v7015_v48, %v7014_v32  ;;  %v6848_v36 = vadd.f32 %v7989_v19, %v14327_v47  ;;  %v7992_v27 = vadd.f32 %v7991_v50, %v7990_v38  ;;  %v6982_v32 = vpop.permute.xlu0 %6981 }
 0xe51   :  { %v6904_v40 = vmax.f32 %v6848_v36, 0.0  ;;  %v6851_v42 = vadd.f32 %v7992_v27, %v14327_v47  ;;  %8391 = vmatpush3.bf16.msra.mxu1 %v7057_v10 }
 0xe52   :  { %8392 = vmatprep.subr.bf16.mxu1 %v15283_v25 }
 0xe53   :  { %v7016_v5 = vmul.f32 %v6947_v23, %v6904_v40  ;;  %v6905_v41 = vmax.f32 %v6851_v42, 0.0  ;;  %v7993_v18 = vpop.f32.mrb[28].mxu1  ;;  %v6987_v40 = vpop.permute.xlu1 %6986 }
 0xe54   :  { %v7994_v58 = vpop.f32.mrb[29].mxu1 }
 0xe55   :  { %7032 = vst [vmem:[#allocation25 + $0x10] sm:$0xff] %v7016_v5  ;;  %v7017_v49 = vmul.f32 %v6952_v15, %v6905_v41  ;;  %v7995_v55 = vadd.f32 %v7994_v58, %v7993_v18  ;;  %v7996_v45 = vpop.f32.mrb[30].mxu1  ;;  %v6992_v41 = vpop.permute.xlu0 %6991 }
 0xe56   :  { %v7997_v8 = vpop.f32.mrb[31].mxu1 }
 0xe57   :  { %7033 = vst [vmem:[#allocation25 + $0x18] sm:$0xff] %v7017_v49  ;;  %v7058_v31 = vpack.c.bf16 %v7017_v49, %v7016_v5  ;;  %v6856_v26 = vadd.f32 %v7995_v55, %v14327_v47  ;;  %v7998_v39 = vadd.f32 %v7997_v8, %v7996_v45 }
 0xe59   :  { %v6906_v20 = vmax.f32 %v6856_v26, 0.0  ;;  %v6859_v61 = vadd.f32 %v7998_v39, %v14327_v47  ;;  %8393 = vmatpush3.bf16.msra.mxu1 %v7058_v31 }
 0xe5a   :  { %8394 = vmatprep.subr.bf16.mxu1 %v15283_v25 }
 0xe5b   :  { %v7018_v22 = vmul.f32 %v6957_v3, %v6906_v20  ;;  %v6907_v59 = vmax.f32 %v6859_v61, 0.0  ;;  %v7999_v17 = vpop.f32.mrb[32].mxu1  ;;  %v6997_v20 = vpop.permute.xlu1 %6996 }
 0xe5c   :  { %v8000_v6 = vpop.f32.mrb[33].mxu1 }
 0xe5d   :  { %7034 = vst [vmem:[#allocation25 + $0x20] sm:$0xff] %v7018_v22  ;;  %v7019_v34 = vmul.f32 %v6962_v54, %v6907_v59  ;;  %v8001_v2 = vadd.f32 %v8000_v6, %v7999_v17  ;;  %v8002_v12 = vpop.f32.mrb[34].mxu1  ;;  %v7002_v59 = vpop.permute.xlu0 %7001 }
 0xe5e   :  { %v8003_v16 = vpop.f32.mrb[35].mxu1 }
 0xe5f   :  { %7035 = vst [vmem:[#allocation25 + $0x28] sm:$0xff] %v7019_v34  ;;  %v7059_v56 = vpack.c.bf16 %v7019_v34, %v7018_v22  ;;  %v6864_v11 = vadd.f32 %v8001_v2, %v14327_v47  ;;  %v8004_v43 = vadd.f32 %v8003_v16, %v8002_v12 }
 0xe61   :  { %v6908_v63 = vmax.f32 %v6864_v11, 0.0  ;;  %v6867_v30 = vadd.f32 %v8004_v43, %v14327_v47  ;;  %8395 = vmatpush3.bf16.msra.mxu1 %v7059_v56 }
 0xe62   :  { %8396 = vmatprep.subr.bf16.mxu1 %v15283_v25 }
 0xe63   :  { %v7020_v14 = vmul.f32 %v6967_v51, %v6908_v63  ;;  %v6909_v24 = vmax.f32 %v6867_v30, 0.0  ;;  %v8005_v44 = vpop.f32.mrb[36].mxu1  ;;  %v7007_v63 = vpop.permute.xlu1 %7006 }
 0xe64   :  { %v8006_v52 = vpop.f32.mrb[37].mxu1 }
 0xe65   :  { %7036 = vst [vmem:[#allocation25 + $0x30] sm:$0xff] %v7020_v14  ;;  %v7021_v4 = vmul.f32 %v6972_v29, %v6909_v24  ;;  %v8007_v0 = vadd.f32 %v8006_v52, %v8005_v44  ;;  %v8008_v1 = vpop.f32.mrb[38].mxu1  ;;  %v7012_v24 = vpop.permute.xlu0 %7011  ;;  %v15343_v29 = vld [vmem:[#allocation117_spill] sm:$0xff] }
 0xe66   :  { %v8009_v21 = vpop.f32.mrb[39].mxu1 }
 0xe67   :  { %7037 = vst [vmem:[#allocation25 + $0x38] sm:$0xff] %v7021_v4  ;;  %v7060_v57 = vpack.c.bf16 %v7021_v4, %v7020_v14  ;;  %v6872_v62 = vadd.f32 %v8007_v0, %v14327_v47  ;;  %v8010_v28 = vadd.f32 %v8009_v21, %v8008_v1  ;;  %v7785_v14 = vld [vmem:[#allocation10] ss:$0 sm:$0xff]  ;;  %v15344_v4 = vmov 1.0|1.0  }
 0xe68   :  { %vm7053_vm4 = vcmp.eq.s32.totalorder %v15343_v29, %v7785_v14 }
 0xe69   :  { %v6910_v13 = vmax.f32 %v6872_v62, 0.0  ;;  %v6875_v60 = vadd.f32 %v8010_v28, %v14327_v47  ;;  %8397 = vmatpush3.bf16.msra.mxu1 %v7060_v57  ;;  %vm7787_vm2 = vmpackc.low %vm7053_vm4, %vm7053_vm4 }
 0xe6a   :  { %8398 = vmatprep.subr.bf16.mxu1 %v15283_v25 }
 0xe6b   :  { %v7022_v33 = vmul.f32 %v6977_v53, %v6910_v13  ;;  %v6911_v35 = vmax.f32 %v6875_v60, 0.0  ;;  %v8011_v9 = vpop.f32.mrb[40].mxu1 }
 0xe6c   :  { %v8012_v7 = vpop.f32.mrb[41].mxu1 }
 0xe6d   :  { %7038 = vst [vmem:[#allocation25 + $0x40] sm:$0xff] %v7022_v33  ;;  %v7023_v37 = vmul.f32 %v6982_v32, %v6911_v35  ;;  %v8013_v46 = vadd.f32 %v8012_v7, %v8011_v9  ;;  %v8014_v48 = vpop.f32.mrb[42].mxu1 }
 0xe6e   :  { %v8015_v19 = vpop.f32.mrb[43].mxu1 }
 0xe6f   :  { %7039 = vst [vmem:[#allocation25 + $0x48] sm:$0xff] %v7023_v37  ;;  %v7061_v38 = vpack.c.bf16 %v7023_v37, %v7022_v33  ;;  %v6880_v50 = vadd.f32 %v8013_v46, %v14327_v47  ;;  %v8016_v10 = vadd.f32 %v8015_v19, %v8014_v48 }
 0xe71   :  { %v6912_v36 = vmax.f32 %v6880_v50, 0.0  ;;  %v6883_v27 = vadd.f32 %v8016_v10, %v14327_v47  ;;  %8399 = vmatpush3.bf16.msra.mxu1 %v7061_v38 }
 0xe72   :  { %8400 = vmatprep.subr.bf16.mxu1 %v15283_v25 }
 0xe73   :  { %v7024_v42 = vmul.f32 %v6987_v40, %v6912_v36  ;;  %v6913_v23 = vmax.f32 %v6883_v27, 0.0  ;;  %v8017_v5 = vpop.f32.mrb[44].mxu1 }
 0xe74   :  { %v8018_v18 = vpop.f32.mrb[45].mxu1 }
 0xe75   :  { %7040 = vst [vmem:[#allocation25 + $0x50] sm:$0xff] %v7024_v42  ;;  %v7025_v15 = vmul.f32 %v6992_v41, %v6913_v23  ;;  %v8019_v58 = vadd.f32 %v8018_v18, %v8017_v5  ;;  %v8020_v49 = vpop.f32.mrb[46].mxu1 }
 0xe76   :  { %v8021_v55 = vpop.f32.mrb[47].mxu1 }
 0xe77   :  { %7041 = vst [vmem:[#allocation25 + $0x58] sm:$0xff] %v7025_v15  ;;  %v7062_v45 = vpack.c.bf16 %v7025_v15, %v7024_v42  ;;  %v6888_v8 = vadd.f32 %v8019_v58, %v14327_v47  ;;  %v8022_v31 = vadd.f32 %v8021_v55, %v8020_v49 }
 0xe79   :  { %v6914_v26 = vmax.f32 %v6888_v8, 0.0  ;;  %v6891_v39 = vadd.f32 %v8022_v31, %v14327_v47  ;;  %8401 = vmatpush3.bf16.msra.mxu1 %v7062_v45 }
 0xe7a   :  { %8402 = vmatprep.subr.bf16.mxu1 %v15283_v25 }
 0xe7b   :  { %v7026_v61 = vmul.f32 %v6997_v20, %v6914_v26  ;;  %v6915_v3 = vmax.f32 %v6891_v39, 0.0  ;;  %v8023_v22 = vpop.f32.mrb[48].mxu1 }
 0xe7c   :  { %v8024_v17 = vpop.f32.mrb[49].mxu1 }
 0xe7d   :  { %7042 = vst [vmem:[#allocation25 + $0x60] sm:$0xff] %v7026_v61  ;;  %v7027_v54 = vmul.f32 %v7002_v59, %v6915_v3  ;;  %v8025_v6 = vadd.f32 %v8024_v17, %v8023_v22  ;;  %v8026_v34 = vpop.f32.mrb[50].mxu1 }
 0xe7e   :  { %v8027_v2 = vpop.f32.mrb[51].mxu1 }
 0xe7f   :  { %7043 = vst [vmem:[#allocation25 + $0x68] sm:$0xff] %v7027_v54  ;;  %v7063_v12 = vpack.c.bf16 %v7027_v54, %v7026_v61  ;;  %v6896_v16 = vadd.f32 %v8025_v6, %v14327_v47  ;;  %v8028_v56 = vadd.f32 %v8027_v2, %v8026_v34 }
 0xe81   :  { %v6916_v11 = vmax.f32 %v6896_v16, 0.0  ;;  %v6899_v43 = vadd.f32 %v8028_v56, %v14327_v47  ;;  %8403 = vmatpush3.bf16.msra.mxu1 %v7063_v12 }
 0xe82   :  { %8404 = vmatprep.subr.bf16.mxu1 %v15283_v25 }
 0xe83   :  { %v7028_v30 = vmul.f32 %v7007_v63, %v6916_v11  ;;  %v6917_v51 = vmax.f32 %v6899_v43, 0.0 }
 0xe85   :  { %7044 = vst [vmem:[#allocation25 + $0x70] sm:$0xff] %v7028_v30  ;;  %v7029_v44 = vmul.f32 %v7012_v24, %v6917_v51 }
 0xe87   :  { %7045 = vst [vmem:[#allocation25 + $0x78] sm:$0xff] %v7029_v44  ;;  %v7064_v52 = vpack.c.bf16 %v7029_v44, %v7028_v30 }
 0xe89   :  { %8405 = vmatpush3.bf16.msra.mxu1 %v7064_v52 }
 0xe8c   :  { %8407 = vmatmul.mubr.msk.bf16.vlgmr.msra.gmra.mrb[52].mxu1 %vm7787_vm2, %v15344_v4 }
 0xe8d   :  { %10008 = shalt.err (!%p10005_p4)
}
 0xe8e   :  { %s10009_s22 = scalar_lea.hbm %s14395_s14, 2048 }
 0xe8f   :  { %p10010_p5 = scmp.ne.s32.totalorder %s14395_s14, %s10009_s22  ;;  %p10013_p6 = scmp.lt.u32.totalorder %s10009_s22, %s14395_s14 }
 0xe91   :  { %p10015_p7 = pnand %p10013_p6, %p10010_p5 }
 0xe93   :  { %10018 = shalt.err (!%p10015_p7)
}
 0xe94   :  { %7117 = dma.vmem_to_hbm [thread:$0]  %s7112_s29, 2048, %s14395_s14, [#allocation4], %s14694_s0, %s14694_s0, %s10067_s30  }
 0xe95   :  { %s10089_s19 = smov [#allocation26]  }
 0xe96   :  { %s7124_s25 = sshll.u32 %s10089_s19, 4  ;;  %s7125_s25 = int_to_ptr.vmem [resolvable:$true] %s7124_s25 }
 0xe97   :  { %s10019_s10 = scalar_lea.vmem %s7125_s25, 128  ;;  %p10024_p9 = scmp.lt.s32.totalorder %s7125_s25, %s7125_s25 }
 0xe98   :  { %p10020_p8 = scmp.ne.s32.totalorder %s7125_s25, %s10019_s10  ;;  %p10025_p10 = scmp.lt.s32.totalorder %s10019_s10, %s10019_s10 }
 0xe9a   :  { %p10026_p11 = por %p10025_p10, %p10024_p9 }
 0xe9c   :  { %p10027_p12 = pnand %p10026_p11, %p10020_p8 }
 0xf5f   :  { %v7099_v25 = vpop.f32.mrb[52].mxu1 }
 0xf60   :  { %7105 = vst [vmem:[#allocation26] sm:$0xff] %v7099_v25  ;;  %v8408_v47 = vpop.f32.mrb[53].mxu1 }
 0xf61   :  { %v7102_v0 = vpop.f32.mrb[54].mxu1 }
 0xf62   :  { %10030 = shalt.err (!%p10027_p12)
}
 0xf63   :  { %s15345_s24 = sld [smem:[#allocation149_spill]] }
 0xf69   :  { %s10031_s16 = scalar_lea.hbm %s15345_s24, 128 }
 0xf6a   :  { %p10032_p13 = scmp.ne.s32.totalorder %s15345_s24, %s10031_s16  ;;  %p10035_p0 = scmp.lt.u32.totalorder %s10031_s16, %s15345_s24 }
 0xf6c   :  { %p10037_p1 = pnand %p10035_p0, %p10032_p13 }
 0xf6e   :  { %10040 = shalt.err (!%p10037_p1)
}
 0xf6f   :  { %7127 = dma.vmem_to_hbm [thread:$0]  %s7125_s25, 128, %s15345_s24, [#allocation27]   ;;  %v8409_v1 = vpop.f32.mrb[55].mxu1 }
 0xf70   :  { %10057 = dma.done.wait [#allocation4], 2048  }
 0xf71   :  { %10058 = vsyncadd [#allocation4], 4294965248 }
 0xf72   :  { %10059 = dma.done.wait [#allocation27], 128  }
 0xf73   :  { %10060 = vsyncadd [#allocation27], 4294967168 }
 0xf74   :  { %7134 = vsyncpa [#allocation3], 1 }
 0xf75   :  { %7135 = vsyncpa [#allocation6], 1 }
 0xf76   :  { %7136 = vsyncpa [#allocation9], 1 }
 0xf77   :  { %7137 = vsyncpa [#allocation12], 1 }
 0xf78   :  { %7138 = vsyncpa [#allocation15], 1 }
 0xf79   :  { %7139 = vsyncpa [#allocation18], 1 }
 0xf7a   :  { %7140 = vsyncpa [#allocation21], 1 }
 0xf7b   :  { %7141 = vsyncpa [#allocation24], 1 }
 0xf7c   :  { %7142 = vsyncpa [#allocation4], 1 }
 0xf7d   :  { %7143 = vsyncpa [#allocation27], 1 }

</bundles_post_ra>
